<compile_context>
chip_gen: v7x
topology: tpu7x:2x2x1
jax: 0.10.0
libtpu: 0.0.40
codegen_flags: <defaults>
</compile_context>

<pallas_src>
import functools

import jax
import jax.numpy as jnp
from jax import lax
from jax.experimental import pallas as pl
from jax.experimental.pallas import tpu as pltpu

# ---- scaled-down synthetic sizes (module hardcodes 2048 / 256) ----
C_BACK = 32            # stand-in for backbone_output_channels = 2048
C_HEAD = 32            # stand-in for DeepLabHead / ASPP hidden channels = 256
NUM_CLASSES = 40       # module default
ATROUS_RATES = (12, 24, 36)
MAX_RATE = max(ATROUS_RATES)
BN_EPS = 1e-5
LANE = 128


def _round_up(x, m):
    return ((x + m - 1) // m) * m


def _default_vmem_limit():
    """Generation-dependent scoped VMEM limit: ~80% of capacity, clamped, safe fallback."""
    try:
        info = pltpu.get_tpu_info()
        cap = int(getattr(info, "vmem_capacity_bytes", 0) or 0)
    except Exception:
        cap = 0
    if cap <= 0:
        return 32 * 1024 * 1024
    return max(32 * 1024 * 1024, min(int(cap * 0.8), 112 * 1024 * 1024))


VMEM_LIMIT = _default_vmem_limit()

# ---------------------------------------------------------------------------
# Single-buffering (Buffered(1)) support probe for grid-invariant weight blocks.
# ---------------------------------------------------------------------------
_PIPELINE_ONE = None


def _probe_buffered_one():
    """Set _PIPELINE_ONE iff pipeline_mode=pl.Buffered(1) lowers & runs on this jax/libtpu."""
    global _PIPELINE_ONE
    try:
        try:
            pm = pl.Buffered(buffer_count=1)
        except Exception:
            pm = pl.Buffered(1)

        def k(x_ref, w_ref, o_ref):
            o_ref[...] = x_ref[...] + w_ref[...]

        f = pl.pallas_call(
            k,
            out_shape=jax.ShapeDtypeStruct((16, 128), jnp.float32),
            grid_spec=pltpu.PrefetchScalarGridSpec(
                num_scalar_prefetch=0,
                grid=(2,),
                in_specs=[pl.BlockSpec((8, 128), lambda i: (i, 0)),
                          pl.BlockSpec((8, 128), lambda i: (0, 0), pipeline_mode=pm)],
                out_specs=pl.BlockSpec((8, 128), lambda i: (i, 0))))
        jax.block_until_ready(f(jnp.ones((16, 128), jnp.float32),
                                jnp.ones((8, 128), jnp.float32)))
        _PIPELINE_ONE = pm
    except Exception:
        _PIPELINE_ONE = None


_probe_buffered_one()


def _const_spec(shape, index_map):
    """BlockSpec for grid-invariant operands; single-buffered when supported."""
    if _PIPELINE_ONE is not None:
        return pl.BlockSpec(shape, index_map, pipeline_mode=_PIPELINE_ONE)
    return pl.BlockSpec(shape, index_map)


def _choose_row_tile(M):
    """Row tile for the (M, C) matmul kernels: large (up to 1024) but >=2 tiles when possible."""
    Mp = _round_up(M, 8)
    TM = min(1024, Mp)
    if Mp // TM < 2 and Mp >= 16:
        TM = _round_up(Mp // 2, 8)
    Mp = _round_up(Mp, TM)
    return TM, Mp


def _choose_col_tile(Np):
    for cand in (512, 256, 128):
        if Np % cand == 0:
            return cand
    return Np


# ---------------------------------------------------------------------------
# Pallas kernels
# ---------------------------------------------------------------------------
def _fused_matmul_kernel(*refs, n_in, relu):
    """out = act(sum_i x_i @ w_i + bias); bf16 MXU operands, f32 accumulation."""
    x_refs = refs[:n_in]
    w_refs = refs[n_in:2 * n_in]
    b_ref = refs[2 * n_in]
    o_ref = refs[2 * n_in + 1]
    acc = None
    for i in range(n_in):
        contrib = jnp.dot(x_refs[i][...].astype(jnp.bfloat16), w_refs[i][...],
                          preferred_element_type=jnp.float32)
        acc = contrib if acc is None else acc + contrib
    y = acc + b_ref[...]
    if relu:
        y = jnp.maximum(y, 0.0)
    o_ref[...] = y.astype(o_ref.dtype)


def fused_matmul(xs, ws, bias, *, relu, out_dtype=jnp.bfloat16):
    """y = act(sum_i xs[i] @ ws[i] + bias); M-tiled and N-tiled, both axes parallel."""
    n_in = len(xs)
    M = xs[0].shape[0]
    Np = ws[0].shape[1]
    TM, Mp = _choose_row_tile(M)
    TN = _choose_col_tile(Np)
    xs_p = [x if x.shape[0] == Mp else jnp.pad(x, ((0, Mp - x.shape[0]), (0, 0)))
            for x in xs]
    # weights/bias are grid-invariant only when there is a single N tile
    wspec = _const_spec if Np == TN else pl.BlockSpec
    in_specs = ([pl.BlockSpec((TM, x.shape[1]), lambda i, j: (i, 0)) for x in xs_p] +
                [wspec((w.shape[0], TN), lambda i, j: (0, j)) for w in ws] +
                [wspec((1, TN), lambda i, j: (0, j))])
    out = pl.pallas_call(
        functools.partial(_fused_matmul_kernel, n_in=n_in, relu=relu),
        out_shape=jax.ShapeDtypeStruct((Mp, Np), out_dtype),
        grid_spec=pltpu.PrefetchScalarGridSpec(
            num_scalar_prefetch=0,
            grid=(Mp // TM, Np // TN),
            in_specs=in_specs,
            out_specs=pl.BlockSpec((TM, TN), lambda i, j: (i, j))),
        compiler_params=pltpu.CompilerParams(
            dimension_semantics=("parallel", "parallel"),
            vmem_limit_bytes=VMEM_LIMIT),
    )(*xs_p, *ws, bias)
    return out if Mp == M else out[:M]


def _aspp_fused_kernel(xpad_ref, w0_ref, b0_ref, w27_ref, b3_ref, wp_ref, pt_ref, o_ref,
                       *, rates, maxrate, hf, wf):
    """Fused ASPP for one batch element: b0(1x1) + 3 atrous 3x3 + projection (+pooled term).

    xpad_ref: (1, hf+2*maxrate, wf+2*maxrate, CP) bf16 (padded once at max rate).
    w27_ref:  (27, CP, CPH) bf16 -- branch-major, tap-major, BN folded.
    wp_ref:   (4, CPH, CPH) bf16 -- projection chunks for [b0, b1, b2, b3].
    pt_ref:   (1, 1, CPH) f32    -- pooled branch @ proj chunk + proj bias (per batch).
    """
    cp = xpad_ref.shape[-1]
    cph = o_ref.shape[-1]

    # 1x1 branch reads the unpadded center of the shared padded map
    xc = xpad_ref[0, maxrate:maxrate + hf, maxrate:maxrate + wf, :].reshape(hf * wf, cp)
    b0 = jnp.maximum(
        jnp.dot(xc, w0_ref[...], preferred_element_type=jnp.float32) + b0_ref[...], 0.0)
    acc = jnp.dot(b0.astype(jnp.bfloat16), wp_ref[0], preferred_element_type=jnp.float32)

    for i, rate in enumerate(rates):
        off = maxrate - rate
        # TODO(synk): per-tap W slices at non-8-aligned offsets cause sublane relayouts; at
        #             real sizes restage W-aligned row tiles in VMEM reused by all 9 taps.
        bacc = None
        for dy in range(3):
            for dx in range(3):
                hh = off + dy * rate
                ww = off + dx * rate
                win = xpad_ref[0, hh:hh + hf, ww:ww + wf, :].reshape(hf * wf, cp)
                c = jnp.dot(win, w27_ref[9 * i + 3 * dy + dx],
                            preferred_element_type=jnp.float32)
                bacc = c if bacc is None else bacc + c
        bi = jnp.maximum(bacc + b3_ref[i], 0.0)
        acc = acc + jnp.dot(bi.astype(jnp.bfloat16), wp_ref[i + 1],
                            preferred_element_type=jnp.float32)

    y = jnp.maximum(acc + pt_ref[0], 0.0)                 # projection bias folded into pt
    o_ref[...] = y.reshape(1, hf, wf, cph).astype(o_ref.dtype)


def aspp_fused(xpad, pooled_term, prep, *, hf, wf, out_dtype=jnp.bfloat16):
    n, hp, wp_, cp = xpad.shape
    cph = prep["b0"]["w"].shape[1]
    pt = pooled_term.reshape(n, 1, cph)
    return pl.pallas_call(
        functools.partial(_aspp_fused_kernel, rates=ATROUS_RATES, maxrate=MAX_RATE,
                          hf=hf, wf=wf),
        out_shape=jax.ShapeDtypeStruct((n, hf, wf, cph), out_dtype),
        grid_spec=pltpu.PrefetchScalarGridSpec(
            num_scalar_prefetch=0,
            grid=(n,),
            in_specs=[pl.BlockSpec((1, hp, wp_, cp), lambda b: (b, 0, 0, 0)),
                      _const_spec((cp, cph), lambda b: (0, 0)),
                      _const_spec((1, cph), lambda b: (0, 0)),
                      _const_spec((27, cp, cph), lambda b: (0, 0, 0)),
                      _const_spec((3, 1, cph), lambda b: (0, 0, 0)),
                      _const_spec((4, cph, cph), lambda b: (0, 0, 0)),
                      pl.BlockSpec((1, 1, cph), lambda b: (b, 0, 0))],
            out_specs=pl.BlockSpec((1, hf, wf, cph), lambda b: (b, 0, 0, 0))),
        compiler_params=pltpu.CompilerParams(
            dimension_semantics=("parallel",),
            vmem_limit_bytes=VMEM_LIMIT),
    )(xpad, prep["b0"]["w"], prep["b0"]["b"], prep["atrous"]["w27"], prep["atrous"]["b3"],
      prep["proj"]["w_main"], pt)


def _head_fused_kernel(ypad_ref, w9_ref, b_ref, wc_ref, bc_ref, o_ref, *, hf, wf):
    """Head: 3x3 conv (pad=1, BN folded) + ReLU, then 1x1 classifier (+bias), per batch."""
    cin = ypad_ref.shape[-1]
    ncp = o_ref.shape[-1]
    acc = None
    for dy in range(3):
        for dx in range(3):
            win = ypad_ref[0, dy:dy + hf, dx:dx + wf, :].reshape(hf * wf, cin)
            c = jnp.dot(win, w9_ref[3 * dy + dx], preferred_element_type=jnp.float32)
            acc = c if acc is None else acc + c
    h = jnp.maximum(acc + b_ref[...], 0.0).astype(jnp.bfloat16)
    logits = jnp.dot(h, wc_ref[...], preferred_element_type=jnp.float32) + bc_ref[...]
    o_ref[...] = logits.reshape(1, hf, wf, ncp).astype(o_ref.dtype)


def head_conv_cls(ypad, conv3, cls, *, hf, wf):
    n, hp, wp_, cph = ypad.shape
    ncp = cls["w"].shape[1]
    return pl.pallas_call(
        functools.partial(_head_fused_kernel, hf=hf, wf=wf),
        out_shape=jax.ShapeDtypeStruct((n, hf, wf, ncp), jnp.float32),
        grid_spec=pltpu.PrefetchScalarGridSpec(
            num_scalar_prefetch=0,
            grid=(n,),
            in_specs=[pl.BlockSpec((1, hp, wp_, cph), lambda b: (b, 0, 0, 0)),
                      _const_spec((9, cph, cph), lambda b: (0, 0, 0)),
                      _const_spec((1, cph), lambda b: (0, 0)),
                      _const_spec((cph, ncp), lambda b: (0, 0)),
                      _const_spec((1, ncp), lambda b: (0, 0))],
            out_specs=pl.BlockSpec((1, hf, wf, ncp), lambda b: (b, 0, 0, 0))),
        compiler_params=pltpu.CompilerParams(
            dimension_semantics=("parallel",),
            vmem_limit_bytes=VMEM_LIMIT),
    )(ypad, conv3["w9"], conv3["b"], cls["w"], cls["b"])


def _gap_kernel(x_ref, o_ref, acc_ref, *, inv_hw):
    s = pl.program_id(0)

    @pl.when(s == 0)
    def _():
        acc_ref[...] = jnp.zeros_like(acc_ref)

    acc_ref[...] += jnp.sum(x_ref[...].astype(jnp.float32), axis=1)

    @pl.when(s == pl.num_programs(0) - 1)
    def _():
        o_ref[...] = (acc_ref[...] * inv_hw).astype(o_ref.dtype)


def global_avg_pool(x_map, out_dtype=jnp.bfloat16):
    """AdaptiveAvgPool2d(1): (n, H, W, C) bf16 -> (n, C); f32 scratch, store on last step."""
    n, H, W, C = x_map.shape
    HW = H * W
    x = x_map.reshape(n, HW, C)
    TS = min(512, _round_up(HW, 8))
    HWp = _round_up(HW, TS)
    if HWp != HW:
        x = jnp.pad(x, ((0, 0), (0, HWp - HW), (0, 0)))
    return pl.pallas_call(
        functools.partial(_gap_kernel, inv_hw=1.0 / HW),
        out_shape=jax.ShapeDtypeStruct((n, C), out_dtype),
        grid_spec=pltpu.PrefetchScalarGridSpec(
            num_scalar_prefetch=0,
            grid=(HWp // TS,),
            in_specs=[pl.BlockSpec((n, TS, C), lambda s: (0, s, 0))],
            out_specs=pl.BlockSpec((n, C), lambda s: (0, 0)),
            scratch_shapes=[pltpu.VMEM((n, C), jnp.float32)]),
        compiler_params=pltpu.CompilerParams(
            dimension_semantics=("arbitrary",),
            vmem_limit_bytes=VMEM_LIMIT),
    )(x)


def _argmax_kernel(x_ref, o_ref):
    x = x_ref[...]
    m = jnp.max(x, axis=0, keepdims=True)
    idx = lax.broadcasted_iota(jnp.int32, x.shape, 0)
    cand = jnp.where(x == m, idx, x.shape[0])            # first-max tie break
    o_ref[...] = jnp.min(cand, axis=0, keepdims=True)


def argmax_over_classes(logits_cs):
    """logits_cs: (NUM_CLASSES, S) -> (S,) int32, lane-dense (1, TS) output blocks."""
    C, S = logits_cs.shape
    TS = min(1024, _round_up(S, 128))
    if _round_up(S, 128) // TS < 2 and S >= 256:
        TS = _round_up((S + 1) // 2, 128)
    Sp = _round_up(S, TS)
    x = logits_cs if Sp == S else jnp.pad(logits_cs, ((0, 0), (0, Sp - S)))
    out = pl.pallas_call(
        _argmax_kernel,
        out_shape=jax.ShapeDtypeStruct((1, Sp), jnp.int32),
        grid_spec=pltpu.PrefetchScalarGridSpec(
            num_scalar_prefetch=0,
            grid=(Sp // TS,),
            in_specs=[pl.BlockSpec((C, TS), lambda s: (0, s))],
            out_specs=pl.BlockSpec((1, TS), lambda s: (0, s))),
        compiler_params=pltpu.CompilerParams(
            dimension_semantics=("parallel",),
            vmem_limit_bytes=VMEM_LIMIT),
    )(x)
    return out[0, :S]


# ---------------------------------------------------------------------------
# Glue: strided patches (backbone), BN folding / weight prep, parameter init
# ---------------------------------------------------------------------------
def _im2col_3x3_strided(x_nhwc, stride):
    """3x3, pad=1 patches subsampled before concatenation (no 4x waste at stride 2)."""
    N, H, W, C = x_nhwc.shape
    Ho, Wo = H // stride, W // stride
    xp = jnp.pad(x_nhwc, ((0, 0), (1, 1), (1, 1), (0, 0)))
    cols = []
    for dy in range(3):
        for dx in range(3):
            cols.append(xp[:, dy:dy + stride * Ho:stride, dx:dx + stride * Wo:stride, :])
    return jnp.concatenate(cols, axis=-1)                 # (N, Ho, Wo, 9*C)


def fold_bn(bn):
    scale = bn["gamma"] / jnp.sqrt(bn["running_var"] + BN_EPS)
    bias = bn["beta"] - bn["running_mean"] * scale
    return scale, bias


def prepare_eval_params(params):
    """Fold BN into weights, pad channel dims to multiples of 128, cast weights to bf16."""
    CP = _round_up(C_BACK, LANE)
    CPH = _round_up(C_HEAD, LANE)

    def mk_w(w, k_pad):
        K, N = w.shape
        Np = _round_up(N, LANE)
        wp = jnp.zeros((k_pad, Np), jnp.float32).at[:K, :N].set(w.astype(jnp.float32))
        return wp.astype(jnp.bfloat16)

    def mk_b(b):
        N = b.shape[0]
        Np = _round_up(N, LANE)
        return jnp.zeros((1, Np), jnp.float32).at[0, :N].set(b.astype(jnp.float32))

    def mk_w9(w, cin, k_pad):
        N = w.shape[1]
        Np = _round_up(N, LANE)
        w9 = w.reshape(9, cin, N).astype(jnp.float32)
        out = jnp.zeros((9, k_pad, Np), jnp.float32).at[:, :cin, :N].set(w9)
        return out.astype(jnp.bfloat16)

    prep = {}
    prep["rgb_bb"] = dict(w=mk_w(params["rgb_backbone"]["w"],
                                 params["rgb_backbone"]["w"].shape[0]),
                          b=mk_b(params["rgb_backbone"]["b"]))
    prep["dep_bb"] = dict(w=mk_w(params["depth_backbone"]["w"],
                                 params["depth_backbone"]["w"].shape[0]),
                          b=mk_b(params["depth_backbone"]["b"]))

    # one_by_one (bias=False) + bn, split so the channel concat never materializes
    sc, bi = fold_bn(params["bn"])
    W = params["one_by_one_w"] * sc[None, :]
    prep["obo"] = dict(w_rgb=mk_w(W[:C_BACK], CP), w_dep=mk_w(W[C_BACK:], CP), b=mk_b(bi))

    aspp = params["head"]["aspp"]
    sc, bi = fold_bn(aspp["b0"]["bn"])
    prep["b0"] = dict(w=mk_w(aspp["b0"]["w"] * sc[None, :], CP), b=mk_b(bi))

    w27, b3 = [], []
    for name in ("b1", "b2", "b3"):
        sc, bi = fold_bn(aspp[name]["bn"])
        w27.append(mk_w9(aspp[name]["w"] * sc[None, :], C_BACK, CP))
        b3.append(mk_b(bi))
    prep["atrous"] = dict(w27=jnp.concatenate(w27, axis=0),        # (27, CP, CPH)
                          b3=jnp.stack(b3, axis=0))                # (3, 1, CPH)

    sc, bi = fold_bn(aspp["pool"]["bn"])
    prep["pool"] = dict(w=mk_w(aspp["pool"]["w"] * sc[None, :], CP), b=mk_b(bi))

    # projection of cat(b0..b3, pool): 4 per-branch chunks for the kernel + pooled chunk
    sc, bi = fold_bn(aspp["proj"]["bn"])
    Wp5 = (aspp["proj"]["w"] * sc[None, :]).reshape(5, C_HEAD, C_HEAD)
    prep["proj"] = dict(w_main=jnp.stack([mk_w(Wp5[i], CPH) for i in range(4)], axis=0),
                        w_pool=mk_w(Wp5[4], CPH),
                        b=mk_b(bi))

    sc, bi = fold_bn(params["head"]["conv3"]["bn"])
    prep["conv3"] = dict(w9=mk_w9(params["head"]["conv3"]["w"] * sc[None, :], C_HEAD, CPH),
                         b=mk_b(bi))
    prep["cls"] = dict(w=mk_w(params["head"]["cls"]["w"], CPH),
                       b=mk_b(params["head"]["cls"]["b"]))
    return prep


def _conv_w(key, kh, kw, cin, cout):
    fan_in = kh * kw * cin
    w = jax.random.normal(key, (kh, kw, cin, cout), jnp.float32) / jnp.sqrt(fan_in)
    return w.reshape(kh * kw * cin, cout)                 # tap-major, matches in-kernel order


def _bn_params(key, c):
    k1, k2 = jax.random.split(key)
    return dict(gamma=jax.random.uniform(k1, (c,), jnp.float32, 0.5, 1.5),
                beta=0.1 * jax.random.normal(k2, (c,), jnp.float32),
                running_mean=jnp.zeros((c,), jnp.float32),
                running_var=jnp.ones((c,), jnp.float32))


def init_params(key):
    ks = iter(jax.random.split(key, 24))
    nk = lambda: next(ks)
    params = {}
    # tiny injectable stand-in backbones (the PyTorch ctor accepts custom backbones)
    params["rgb_backbone"] = dict(w=_conv_w(nk(), 3, 3, 3, C_BACK),
                                  b=0.01 * jax.random.normal(nk(), (C_BACK,), jnp.float32))
    params["depth_backbone"] = dict(w=_conv_w(nk(), 3, 3, 3, C_BACK),
                                    b=0.01 * jax.random.normal(nk(), (C_BACK,), jnp.float32))
    params["one_by_one_w"] = _conv_w(nk(), 1, 1, 2 * C_BACK, C_BACK)        # bias=False
    params["bn"] = _bn_params(nk(), C_BACK)
    aspp = {"b0": dict(w=_conv_w(nk(), 1, 1, C_BACK, C_HEAD), bn=_bn_params(nk(), C_HEAD))}
    for name in ("b1", "b2", "b3"):
        aspp[name] = dict(w=_conv_w(nk(), 3, 3, C_BACK, C_HEAD), bn=_bn_params(nk(), C_HEAD))
    aspp["pool"] = dict(w=_conv_w(nk(), 1, 1, C_BACK, C_HEAD), bn=_bn_params(nk(), C_HEAD))
    aspp["proj"] = dict(w=_conv_w(nk(), 1, 1, 5 * C_HEAD, C_HEAD), bn=_bn_params(nk(), C_HEAD))
    head = dict(aspp=aspp,
                conv3=dict(w=_conv_w(nk(), 3, 3, C_HEAD, C_HEAD), bn=_bn_params(nk(), C_HEAD)),
                cls=dict(w=_conv_w(nk(), 1, 1, C_HEAD, NUM_CLASSES),
                         b=0.01 * jax.random.normal(nk(), (NUM_CLASSES,), jnp.float32)))
    params["head"] = head
    return params


# ---------------------------------------------------------------------------
# Forward (eval mode: self.training == False)
# ---------------------------------------------------------------------------
def da_concat_deeplabv3_forward(prep, rgb_ims, depth_ims, seg_masks=None, hw_tuple=None):
    if hw_tuple is None:
        hw_tuple = (rgb_ims.shape[-2], rgb_ims.shape[-1])
    rgb = jnp.transpose(rgb_ims, (0, 2, 3, 1)).astype(jnp.float32)   # NCHW -> NHWC
    dep = jnp.transpose(depth_ims, (0, 2, 3, 1)).astype(jnp.float32)
    n = rgb.shape[0]

    def tiny_backbone(x_nhwc, bp):
        # stand-in backbone: 3x3 conv, stride 2, pad 1, ReLU
        cols = _im2col_3x3_strided(x_nhwc, stride=2)
        nb, ho, wo, kc = cols.shape
        flat = cols.reshape(nb * ho * wo, kc)
        y = fused_matmul([flat], [bp["w"]], bp["b"], relu=True, out_dtype=jnp.bfloat16)
        return y, ho, wo

    rgb_flat, hf, wf = tiny_backbone(rgb, prep["rgb_bb"])
    dep_flat, _, _ = tiny_backbone(dep, prep["dep_bb"])

    # one_by_one(cat(rgb, depth)) + BN  ==  rgb @ W_rgb + depth @ W_dep + bn_bias  (bf16 out)
    x = fused_matmul([rgb_flat, dep_flat],
                     [prep["obo"]["w_rgb"], prep["obo"]["w_dep"]],
                     prep["obo"]["b"], relu=False, out_dtype=jnp.bfloat16)
    CP = x.shape[1]
    x_map = x.reshape(n, hf, wf, CP)

    # ASPP pooled branch: GAP (bf16 x) -> 1x1+BN+ReLU; its projection chunk + proj bias is
    # folded into a tiny per-batch bias term (no (M, C) broadcast, one fewer matmul chunk).
    pooled = global_avg_pool(x_map)                                            # (n, CP)
    pb = fused_matmul([pooled], [prep["pool"]["w"]], prep["pool"]["b"], relu=True)
    pooled_term = (jnp.dot(pb, prep["proj"]["w_pool"],
                           preferred_element_type=jnp.float32) + prep["proj"]["b"])

    # single max-rate pad shared by all atrous branches; whole ASPP fused per batch element
    xpad = jnp.pad(x_map, ((0, 0), (MAX_RATE, MAX_RATE), (MAX_RATE, MAX_RATE), (0, 0)))
    y_map = aspp_fused(xpad, pooled_term, prep, hf=hf, wf=wf)    # (n, hf, wf, CPH) bf16
    # Dropout(0.5) is identity in eval mode.

    # head 3x3 conv + BN + ReLU fused with the 1x1 classifier
    ypad = jnp.pad(y_map, ((0, 0), (1, 1), (1, 1), (0, 0)))
    logits = head_conv_cls(ypad, prep["conv3"], prep["cls"], hf=hf, wf=wf)
    logits = logits[..., :NUM_CLASSES]                                         # (n,hf,wf,40)

    # class-major transpose on the SMALL pre-upsample tensor, then half-pixel bilinear resize
    Ho, Wo = hw_tuple
    logits_c = jnp.transpose(logits, (3, 0, 1, 2))                             # (C,n,hf,wf)
    # TODO(synk): bilinear resize stays in XLA (jax.image.resize); no Pallas equivalent used.
    up = jax.image.resize(logits_c, (NUM_CLASSES, n, Ho, Wo), method="bilinear")

    pred = argmax_over_classes(up.reshape(NUM_CLASSES, n * Ho * Wo)).reshape(n, Ho, Wo)
    return pred, None


if __name__ == "__main__":
    key = jax.random.PRNGKey(0)
    k_rgb, k_dep, k_seg, k_par = jax.random.split(key, 4)
    N, H, W = 2, 16, 16
    rgb_ims = jax.random.normal(k_rgb, (N, 3, H, W), jnp.float32)
    depth_ims = jax.random.normal(k_dep, (N, 3, H, W), jnp.float32)
    seg_masks = jax.random.randint(k_seg, (N, H, W), 0, NUM_CLASSES)   # unused in eval path
    params = init_params(k_par)
    prep = prepare_eval_params(params)        # fold BN + pad + cast to bf16, once

    fwd = jax.jit(functools.partial(da_concat_deeplabv3_forward, hw_tuple=(H, W)))
    pred, loss = fwd(prep, rgb_ims, depth_ims, seg_masks)
    pred = jax.block_until_ready(pred)
    assert pred.shape == (N, H, W) and pred.dtype == jnp.int32
    assert loss is None
    print("KERNEL_OK")
</pallas_src>

<mosaic_0001>
module attributes {stable_mosaic.version = 11 : i64} {
  func.func @k(%arg0: i32, %arg1: memref<8x128xf32, #tpu.memory_space<vmem>>, %arg2: memref<8x128xf32, #tpu.memory_space<vmem>>, %arg3: memref<8x128xf32, #tpu.memory_space<vmem>>) attributes {dimension_semantics = [#tpu.dimension_semantics<arbitrary>], iteration_bounds = array<i64: 2>, scalar_prefetch = 0 : i64, scratch_operands = 0 : i64, tpu.core_type = #tpu.core_type<tc>, window_params = [{transform_indices = @transform_0, window_bounds = array<i64: 8, 128>}, {pipeline_mode = #tpu.pipeline_mode<synchronous>, transform_indices = @transform_1, window_bounds = array<i64: 8, 128>}, {transform_indices = @transform_2, window_bounds = array<i64: 8, 128>}]} {
    %c0 = arith.constant 0 : index
    %c0_0 = arith.constant 0 : index
    %0 = vector.load %arg1[%c0, %c0_0] : memref<8x128xf32, #tpu.memory_space<vmem>>, vector<8x128xf32>
    %c0_1 = arith.constant 0 : index
    %c0_2 = arith.constant 0 : index
    %1 = vector.load %arg2[%c0_1, %c0_2] : memref<8x128xf32, #tpu.memory_space<vmem>>, vector<8x128xf32>
    %2 = arith.addf %0, %1 : vector<8x128xf32>
    %c0_3 = arith.constant 0 : index
    %c0_4 = arith.constant 0 : index
    %3 = vector.load %arg3[%c0_3, %c0_4] : memref<8x128xf32, #tpu.memory_space<vmem>>, vector<8x128xf32>
    tpu.vector_store %arg3[%c0_3, %c0_4], %2 {strides = array<i32>} : memref<8x128xf32, #tpu.memory_space<vmem>>, vector<8x128xf32>,
    return
  }
  func.func @transform_0(%arg0: i32) -> (i32, i32) {
    %c0_i32 = arith.constant 0 : i32
    %c0_i32_0 = arith.constant 0 : i32
    return %arg0, %c0_i32 : i32, i32
  }
  func.func @transform_1(%arg0: i32) -> (i32, i32) {
    %c0_i32 = arith.constant 0 : i32
    %c0_i32_0 = arith.constant 0 : i32
    %c0_i32_1 = arith.constant 0 : i32
    return %c0_i32, %c0_i32_0 : i32, i32
  }
  func.func @transform_2(%arg0: i32) -> (i32, i32) {
    %c0_i32 = arith.constant 0 : i32
    %c0_i32_0 = arith.constant 0 : i32
    return %arg0, %c0_i32 : i32, i32
  }
}

module attributes {stable_mosaic.version = 11 : i64} {
  func.func @_fused_matmul_kernel(%arg0: i32, %arg1: i32, %arg2: memref<64x128xbf16, #tpu.memory_space<vmem>>, %arg3: memref<64x128xbf16, #tpu.memory_space<vmem>>, %arg4: memref<128x128xbf16, #tpu.memory_space<vmem>>, %arg5: memref<128x128xbf16, #tpu.memory_space<vmem>>, %arg6: memref<1x128xf32, #tpu.memory_space<vmem>>, %arg7: memref<64x128xbf16, #tpu.memory_space<vmem>>) attributes {dimension_semantics = [#tpu.dimension_semantics<parallel>, #tpu.dimension_semantics<parallel>], iteration_bounds = array<i64: 2, 1>, scalar_prefetch = 0 : i64, scratch_operands = 0 : i64, tpu.core_type = #tpu.core_type<tc>, window_params = [{transform_indices = @transform_0, window_bounds = array<i64: 64, 128>}, {transform_indices = @transform_1, window_bounds = array<i64: 64, 128>}, {transform_indices = @transform_2, window_bounds = array<i64: 128, 128>}, {transform_indices = @transform_3, window_bounds = array<i64: 128, 128>}, {transform_indices = @transform_4, window_bounds = array<i64: 1, 128>}, {transform_indices = @transform_5, window_bounds = array<i64: 64, 128>}]} {
    %c0 = arith.constant 0 : index
    %c0_0 = arith.constant 0 : index
    %0 = vector.load %arg2[%c0, %c0_0] : memref<64x128xbf16, #tpu.memory_space<vmem>>, vector<64x128xbf16>
    %c0_1 = arith.constant 0 : index
    %c0_2 = arith.constant 0 : index
    %1 = vector.load %arg4[%c0_1, %c0_2] : memref<128x128xbf16, #tpu.memory_space<vmem>>, vector<128x128xbf16>
    %cst = arith.constant dense<0.000000e+00> : vector<64x128xf32>
    %2 = tpu.matmul %0, %1, %cst {dimension_numbers = #tpu.dot_dimension_numbers<[1], [0], [0], [1], [0, 0, 1, 1], [], []>} : vector<64x128xbf16>, vector<128x128xbf16>, vector<64x128xf32> -> vector<64x128xf32>
    %c0_3 = arith.constant 0 : index
    %c0_4 = arith.constant 0 : index
    %3 = vector.load %arg3[%c0_3, %c0_4] : memref<64x128xbf16, #tpu.memory_space<vmem>>, vector<64x128xbf16>
    %c0_5 = arith.constant 0 : index
    %c0_6 = arith.constant 0 : index
    %4 = vector.load %arg5[%c0_5, %c0_6] : memref<128x128xbf16, #tpu.memory_space<vmem>>, vector<128x128xbf16>
    %cst_7 = arith.constant dense<0.000000e+00> : vector<64x128xf32>
    %5 = tpu.matmul %3, %4, %cst_7 {dimension_numbers = #tpu.dot_dimension_numbers<[1], [0], [0], [1], [0, 0, 1, 1], [], []>} : vector<64x128xbf16>, vector<128x128xbf16>, vector<64x128xf32> -> vector<64x128xf32>
    %6 = arith.addf %2, %5 : vector<64x128xf32>
    %c0_8 = arith.constant 0 : index
    %c0_9 = arith.constant 0 : index
    %7 = vector.load %arg6[%c0_8, %c0_9] : memref<1x128xf32, #tpu.memory_space<vmem>>, vector<1x128xf32>
    %8 = vector.broadcast %7 : vector<1x128xf32> to vector<64x128xf32>
    %9 = arith.addf %6, %8 : vector<64x128xf32>
    %10 = arith.truncf %9 : vector<64x128xf32> to vector<64x128xbf16>
    %c0_10 = arith.constant 0 : index
    %c0_11 = arith.constant 0 : index
    %11 = vector.load %arg7[%c0_10, %c0_11] : memref<64x128xbf16, #tpu.memory_space<vmem>>, vector<64x128xbf16>
    tpu.vector_store %arg7[%c0_10, %c0_11], %10 {strides = array<i32>} : memref<64x128xbf16, #tpu.memory_space<vmem>>, vector<64x128xbf16>,
    return
  }
  func.func @transform_0(%arg0: i32, %arg1: i32) -> (i32, i32) {
    %c0_i32 = arith.constant 0 : i32
    %c0_i32_0 = arith.constant 0 : i32
    return %arg0, %c0_i32 : i32, i32
  }
  func.func @transform_1(%arg0: i32, %arg1: i32) -> (i32, i32) {
    %c0_i32 = arith.constant 0 : i32
    %c0_i32_0 = arith.constant 0 : i32
    return %arg0, %c0_i32 : i32, i32
  }
  func.func @transform_2(%arg0: i32, %arg1: i32) -> (i32, i32) {
    %c0_i32 = arith.constant 0 : i32
    %c0_i32_0 = arith.constant 0 : i32
    return %c0_i32, %arg1 : i32, i32
  }
  func.func @transform_3(%arg0: i32, %arg1: i32) -> (i32, i32) {
    %c0_i32 = arith.constant 0 : i32
    %c0_i32_0 = arith.constant 0 : i32
    return %c0_i32, %arg1 : i32, i32
  }
  func.func @transform_4(%arg0: i32, %arg1: i32) -> (i32, i32) {
    %c0_i32 = arith.constant 0 : i32
    %c0_i32_0 = arith.constant 0 : i32
    return %c0_i32, %arg1 : i32, i32
  }
  func.func @transform_5(%arg0: i32, %arg1: i32) -> (i32, i32) {
    %c0_i32 = arith.constant 0 : i32
    return %arg0, %arg1 : i32, i32
  }
}

module attributes {stable_mosaic.version = 11 : i64} {
  func.func @_fused_matmul_kernel(%arg0: i32, %arg1: i32, %arg2: memref<64x27xf32, #tpu.memory_space<vmem>>, %arg3: memref<27x128xbf16, #tpu.memory_space<vmem>>, %arg4: memref<1x128xf32, #tpu.memory_space<vmem>>, %arg5: memref<64x128xbf16, #tpu.memory_space<vmem>>) attributes {dimension_semantics = [#tpu.dimension_semantics<parallel>, #tpu.dimension_semantics<parallel>], iteration_bounds = array<i64: 2, 1>, scalar_prefetch = 0 : i64, scratch_operands = 0 : i64, tpu.core_type = #tpu.core_type<tc>, window_params = [{transform_indices = @transform_0, window_bounds = array<i64: 64, 27>}, {transform_indices = @transform_1, window_bounds = array<i64: 27, 128>}, {transform_indices = @transform_2, window_bounds = array<i64: 1, 128>}, {transform_indices = @transform_3, window_bounds = array<i64: 64, 128>}]} {
    %c0 = arith.constant 0 : index
    %c0_0 = arith.constant 0 : index
    %0 = vector.load %arg2[%c0, %c0_0] : memref<64x27xf32, #tpu.memory_space<vmem>>, vector<64x27xf32>
    %1 = arith.truncf %0 : vector<64x27xf32> to vector<64x27xbf16>
    %c0_1 = arith.constant 0 : index
    %c0_2 = arith.constant 0 : index
    %2 = vector.load %arg3[%c0_1, %c0_2] : memref<27x128xbf16, #tpu.memory_space<vmem>>, vector<27x128xbf16>
    %cst = arith.constant dense<0.000000e+00> : vector<64x128xf32>
    %3 = tpu.matmul %1, %2, %cst {dimension_numbers = #tpu.dot_dimension_numbers<[1], [0], [0], [1], [0, 0, 1, 1], [], []>} : vector<64x27xbf16>, vector<27x128xbf16>, vector<64x128xf32> -> vector<64x128xf32>
    %c0_3 = arith.constant 0 : index
    %c0_4 = arith.constant 0 : index
    %4 = vector.load %arg4[%c0_3, %c0_4] : memref<1x128xf32, #tpu.memory_space<vmem>>, vector<1x128xf32>
    %5 = vector.broadcast %4 : vector<1x128xf32> to vector<64x128xf32>
    %6 = arith.addf %3, %5 : vector<64x128xf32>
    %cst_5 = arith.constant 0.000000e+00 : f32
    %7 = vector.broadcast %cst_5 : f32 to vector<64x128xf32>
    %8 = arith.maximumf %6, %7 : vector<64x128xf32>
    %9 = arith.truncf %8 : vector<64x128xf32> to vector<64x128xbf16>
    %c0_6 = arith.constant 0 : index
    %c0_7 = arith.constant 0 : index
    %10 = vector.load %arg5[%c0_6, %c0_7] : memref<64x128xbf16, #tpu.memory_space<vmem>>, vector<64x128xbf16>
    tpu.vector_store %arg5[%c0_6, %c0_7], %9 {strides = array<i32>} : memref<64x128xbf16, #tpu.memory_space<vmem>>, vector<64x128xbf16>,
    return
  }
  func.func @transform_0(%arg0: i32, %arg1: i32) -> (i32, i32) {
    %c0_i32 = arith.constant 0 : i32
    %c0_i32_0 = arith.constant 0 : i32
    return %arg0, %c0_i32 : i32, i32
  }
  func.func @transform_1(%arg0: i32, %arg1: i32) -> (i32, i32) {
    %c0_i32 = arith.constant 0 : i32
    %c0_i32_0 = arith.constant 0 : i32
    return %c0_i32, %arg1 : i32, i32
  }
  func.func @transform_2(%arg0: i32, %arg1: i32) -> (i32, i32) {
    %c0_i32 = arith.constant 0 : i32
    %c0_i32_0 = arith.constant 0 : i32
    return %c0_i32, %arg1 : i32, i32
  }
  func.func @transform_3(%arg0: i32, %arg1: i32) -> (i32, i32) {
    %c0_i32 = arith.constant 0 : i32
    return %arg0, %arg1 : i32, i32
  }
}

module attributes {stable_mosaic.version = 11 : i64} {
  func.func @_fused_matmul_kernel(%arg0: i32, %arg1: i32, %arg2: memref<64x27xf32, #tpu.memory_space<vmem>>, %arg3: memref<27x128xbf16, #tpu.memory_space<vmem>>, %arg4: memref<1x128xf32, #tpu.memory_space<vmem>>, %arg5: memref<64x128xbf16, #tpu.memory_space<vmem>>) attributes {dimension_semantics = [#tpu.dimension_semantics<parallel>, #tpu.dimension_semantics<parallel>], iteration_bounds = array<i64: 2, 1>, scalar_prefetch = 0 : i64, scratch_operands = 0 : i64, tpu.core_type = #tpu.core_type<tc>, window_params = [{transform_indices = @transform_0, window_bounds = array<i64: 64, 27>}, {transform_indices = @transform_1, window_bounds = array<i64: 27, 128>}, {transform_indices = @transform_2, window_bounds = array<i64: 1, 128>}, {transform_indices = @transform_3, window_bounds = array<i64: 64, 128>}]} {
    %c0 = arith.constant 0 : index
    %c0_0 = arith.constant 0 : index
    %0 = vector.load %arg2[%c0, %c0_0] : memref<64x27xf32, #tpu.memory_space<vmem>>, vector<64x27xf32>
    %1 = arith.truncf %0 : vector<64x27xf32> to vector<64x27xbf16>
    %c0_1 = arith.constant 0 : index
    %c0_2 = arith.constant 0 : index
    %2 = vector.load %arg3[%c0_1, %c0_2] : memref<27x128xbf16, #tpu.memory_space<vmem>>, vector<27x128xbf16>
    %cst = arith.constant dense<0.000000e+00> : vector<64x128xf32>
    %3 = tpu.matmul %1, %2, %cst {dimension_numbers = #tpu.dot_dimension_numbers<[1], [0], [0], [1], [0, 0, 1, 1], [], []>} : vector<64x27xbf16>, vector<27x128xbf16>, vector<64x128xf32> -> vector<64x128xf32>
    %c0_3 = arith.constant 0 : index
    %c0_4 = arith.constant 0 : index
    %4 = vector.load %arg4[%c0_3, %c0_4] : memref<1x128xf32, #tpu.memory_space<vmem>>, vector<1x128xf32>
    %5 = vector.broadcast %4 : vector<1x128xf32> to vector<64x128xf32>
    %6 = arith.addf %3, %5 : vector<64x128xf32>
    %cst_5 = arith.constant 0.000000e+00 : f32
    %7 = vector.broadcast %cst_5 : f32 to vector<64x128xf32>
    %8 = arith.maximumf %6, %7 : vector<64x128xf32>
    %9 = arith.truncf %8 : vector<64x128xf32> to vector<64x128xbf16>
    %c0_6 = arith.constant 0 : index
    %c0_7 = arith.constant 0 : index
    %10 = vector.load %arg5[%c0_6, %c0_7] : memref<64x128xbf16, #tpu.memory_space<vmem>>, vector<64x128xbf16>
    tpu.vector_store %arg5[%c0_6, %c0_7], %9 {strides = array<i32>} : memref<64x128xbf16, #tpu.memory_space<vmem>>, vector<64x128xbf16>,
    return
  }
  func.func @transform_0(%arg0: i32, %arg1: i32) -> (i32, i32) {
    %c0_i32 = arith.constant 0 : i32
    %c0_i32_0 = arith.constant 0 : i32
    return %arg0, %c0_i32 : i32, i32
  }
  func.func @transform_1(%arg0: i32, %arg1: i32) -> (i32, i32) {
    %c0_i32 = arith.constant 0 : i32
    %c0_i32_0 = arith.constant 0 : i32
    return %c0_i32, %arg1 : i32, i32
  }
  func.func @transform_2(%arg0: i32, %arg1: i32) -> (i32, i32) {
    %c0_i32 = arith.constant 0 : i32
    %c0_i32_0 = arith.constant 0 : i32
    return %c0_i32, %arg1 : i32, i32
  }
  func.func @transform_3(%arg0: i32, %arg1: i32) -> (i32, i32) {
    %c0_i32 = arith.constant 0 : i32
    return %arg0, %arg1 : i32, i32
  }
}

module attributes {stable_mosaic.version = 11 : i64} {
  func.func @_gap_kernel(%arg0: i32, %arg1: memref<2x64x128xbf16, #tpu.memory_space<vmem>>, %arg2: memref<2x128xbf16, #tpu.memory_space<vmem>>, %arg3: memref<2x128xf32, #tpu.memory_space<vmem>>) attributes {dimension_semantics = [#tpu.dimension_semantics<arbitrary>], iteration_bounds = array<i64: 1>, scalar_prefetch = 0 : i64, scratch_operands = 1 : i64, tpu.core_type = #tpu.core_type<tc>, window_params = [{transform_indices = @transform_0, window_bounds = array<i64: 2, 64, 128>}, {pipeline_mode = #tpu.pipeline_mode<synchronous>, transform_indices = @transform_1, window_bounds = array<i64: 2, 128>}]} {
    %c0_i32 = arith.constant 0 : i32
    %0 = arith.cmpi eq, %arg0, %c0_i32 : i32
    %1 = arith.extui %0 : i1 to i32
    %c0_i32_0 = arith.constant 0 : i32
    %2 = arith.cmpi ne, %1, %c0_i32_0 : i32
    scf.if %2 {
      %cst_9 = arith.constant 0.000000e+00 : f32
      %12 = vector.broadcast %cst_9 : f32 to vector<2x128xf32>
      %c0_10 = arith.constant 0 : index
      %c0_11 = arith.constant 0 : index
      %13 = vector.load %arg3[%c0_10, %c0_11] : memref<2x128xf32, #tpu.memory_space<vmem>>, vector<2x128xf32>
      tpu.vector_store %arg3[%c0_10, %c0_11], %12 {strides = array<i32>} : memref<2x128xf32, #tpu.memory_space<vmem>>, vector<2x128xf32>,
    } else {
    }
    %c0 = arith.constant 0 : index
    %c0_1 = arith.constant 0 : index
    %3 = vector.load %arg3[%c0, %c0_1] : memref<2x128xf32, #tpu.memory_space<vmem>>, vector<2x128xf32>
    %c0_2 = arith.constant 0 : index
    %c0_3 = arith.constant 0 : index
    %c0_4 = arith.constant 0 : index
    %4 = vector.load %arg1[%c0_2, %c0_3, %c0_4] : memref<2x64x128xbf16, #tpu.memory_space<vmem>>, vector<2x64x128xbf16>
    %5 = arith.extf %4 : vector<2x64x128xbf16> to vector<2x64x128xf32>
    %cst = arith.constant dense<0.000000e+00> : vector<2x128xf32>
    %6 = vector.multi_reduction <add>, %5, %cst [1] : vector<2x64x128xf32> to vector<2x128xf32>
    %7 = arith.addf %3, %6 : vector<2x128xf32>
    %c0_5 = arith.constant 0 : index
    %c0_6 = arith.constant 0 : index
    %8 = vector.load %arg3[%c0_5, %c0_6] : memref<2x128xf32, #tpu.memory_space<vmem>>, vector<2x128xf32>
    tpu.vector_store %arg3[%c0_5, %c0_6], %7 {strides = array<i32>} : memref<2x128xf32, #tpu.memory_space<vmem>>, vector<2x128xf32>,
    %c0_i32_7 = arith.constant 0 : i32
    %9 = arith.cmpi eq, %arg0, %c0_i32_7 : i32
    %10 = arith.extui %9 : i1 to i32
    %c0_i32_8 = arith.constant 0 : i32
    %11 = arith.cmpi ne, %10, %c0_i32_8 : i32
    scf.if %11 {
      %c0_9 = arith.constant 0 : index
      %c0_10 = arith.constant 0 : index
      %12 = vector.load %arg3[%c0_9, %c0_10] : memref<2x128xf32, #tpu.memory_space<vmem>>, vector<2x128xf32>
      %cst_11 = arith.constant 1.562500e-02 : f32
      %13 = vector.broadcast %cst_11 : f32 to vector<2x128xf32>
      %14 = arith.mulf %12, %13 : vector<2x128xf32>
      %15 = arith.truncf %14 : vector<2x128xf32> to vector<2x128xbf16>
      %c0_12 = arith.constant 0 : index
      %c0_13 = arith.constant 0 : index
      %16 = vector.load %arg2[%c0_12, %c0_13] : memref<2x128xbf16, #tpu.memory_space<vmem>>, vector<2x128xbf16>
      tpu.vector_store %arg2[%c0_12, %c0_13], %15 {strides = array<i32>} : memref<2x128xbf16, #tpu.memory_space<vmem>>, vector<2x128xbf16>,
    } else {
    }
    return
  }
  func.func @transform_0(%arg0: i32) -> (i32, i32, i32) {
    %c0_i32 = arith.constant 0 : i32
    %c0_i32_0 = arith.constant 0 : i32
    %c0_i32_1 = arith.constant 0 : i32
    return %c0_i32, %arg0, %c0_i32_0 : i32, i32, i32
  }
  func.func @transform_1(%arg0: i32) -> (i32, i32) {
    %c0_i32 = arith.constant 0 : i32
    %c0_i32_0 = arith.constant 0 : i32
    %c0_i32_1 = arith.constant 0 : i32
    return %c0_i32, %c0_i32_0 : i32, i32
  }
}

module attributes {stable_mosaic.version = 11 : i64} {
  func.func @_fused_matmul_kernel(%arg0: i32, %arg1: i32, %arg2: memref<8x128xbf16, #tpu.memory_space<vmem>>, %arg3: memref<128x128xbf16, #tpu.memory_space<vmem>>, %arg4: memref<1x128xf32, #tpu.memory_space<vmem>>, %arg5: memref<8x128xbf16, #tpu.memory_space<vmem>>) attributes {dimension_semantics = [#tpu.dimension_semantics<parallel>, #tpu.dimension_semantics<parallel>], iteration_bounds = array<i64: 1, 1>, scalar_prefetch = 0 : i64, scratch_operands = 0 : i64, tpu.core_type = #tpu.core_type<tc>, window_params = [{transform_indices = @transform_0, window_bounds = array<i64: 8, 128>}, {transform_indices = @transform_1, window_bounds = array<i64: 128, 128>}, {transform_indices = @transform_2, window_bounds = array<i64: 1, 128>}, {transform_indices = @transform_3, window_bounds = array<i64: 8, 128>}]} {
    %c0 = arith.constant 0 : index
    %c0_0 = arith.constant 0 : index
    %0 = vector.load %arg2[%c0, %c0_0] : memref<8x128xbf16, #tpu.memory_space<vmem>>, vector<8x128xbf16>
    %c0_1 = arith.constant 0 : index
    %c0_2 = arith.constant 0 : index
    %1 = vector.load %arg3[%c0_1, %c0_2] : memref<128x128xbf16, #tpu.memory_space<vmem>>, vector<128x128xbf16>
    %cst = arith.constant dense<0.000000e+00> : vector<8x128xf32>
    %2 = tpu.matmul %0, %1, %cst {dimension_numbers = #tpu.dot_dimension_numbers<[1], [0], [0], [1], [0, 0, 1, 1], [], []>} : vector<8x128xbf16>, vector<128x128xbf16>, vector<8x128xf32> -> vector<8x128xf32>
    %c0_3 = arith.constant 0 : index
    %c0_4 = arith.constant 0 : index
    %3 = vector.load %arg4[%c0_3, %c0_4] : memref<1x128xf32, #tpu.memory_space<vmem>>, vector<1x128xf32>
    %4 = vector.broadcast %3 : vector<1x128xf32> to vector<8x128xf32>
    %5 = arith.addf %2, %4 : vector<8x128xf32>
    %cst_5 = arith.constant 0.000000e+00 : f32
    %6 = vector.broadcast %cst_5 : f32 to vector<8x128xf32>
    %7 = arith.maximumf %5, %6 : vector<8x128xf32>
    %8 = arith.truncf %7 : vector<8x128xf32> to vector<8x128xbf16>
    %c0_6 = arith.constant 0 : index
    %c0_7 = arith.constant 0 : index
    %9 = vector.load %arg5[%c0_6, %c0_7] : memref<8x128xbf16, #tpu.memory_space<vmem>>, vector<8x128xbf16>
    tpu.vector_store %arg5[%c0_6, %c0_7], %8 {strides = array<i32>} : memref<8x128xbf16, #tpu.memory_space<vmem>>, vector<8x128xbf16>,
    return
  }
  func.func @transform_0(%arg0: i32, %arg1: i32) -> (i32, i32) {
    %c0_i32 = arith.constant 0 : i32
    %c0_i32_0 = arith.constant 0 : i32
    return %arg0, %c0_i32 : i32, i32
  }
  func.func @transform_1(%arg0: i32, %arg1: i32) -> (i32, i32) {
    %c0_i32 = arith.constant 0 : i32
    %c0_i32_0 = arith.constant 0 : i32
    return %c0_i32, %arg1 : i32, i32
  }
  func.func @transform_2(%arg0: i32, %arg1: i32) -> (i32, i32) {
    %c0_i32 = arith.constant 0 : i32
    %c0_i32_0 = arith.constant 0 : i32
    return %c0_i32, %arg1 : i32, i32
  }
  func.func @transform_3(%arg0: i32, %arg1: i32) -> (i32, i32) {
    %c0_i32 = arith.constant 0 : i32
    return %arg0, %arg1 : i32, i32
  }
}

module attributes {stable_mosaic.version = 11 : i64} {
  func.func @_aspp_fused_kernel(%arg0: i32, %arg1: memref<1x80x80x128xbf16, #tpu.memory_space<vmem>>, %arg2: memref<128x128xbf16, #tpu.memory_space<vmem>>, %arg3: memref<1x128xf32, #tpu.memory_space<vmem>>, %arg4: memref<27x128x128xbf16, #tpu.memory_space<vmem>>, %arg5: memref<3x1x128xf32, #tpu.memory_space<vmem>>, %arg6: memref<4x128x128xbf16, #tpu.memory_space<vmem>>, %arg7: memref<1x1x128xf32, #tpu.memory_space<vmem>>, %arg8: memref<1x8x8x128xbf16, #tpu.memory_space<vmem>>) attributes {dimension_semantics = [#tpu.dimension_semantics<parallel>], iteration_bounds = array<i64: 2>, scalar_prefetch = 0 : i64, scratch_operands = 0 : i64, tpu.core_type = #tpu.core_type<tc>, window_params = [{transform_indices = @transform_0, window_bounds = array<i64: 1, 80, 80, 128>}, {pipeline_mode = #tpu.pipeline_mode<synchronous>, transform_indices = @transform_1, window_bounds = array<i64: 128, 128>}, {pipeline_mode = #tpu.pipeline_mode<synchronous>, transform_indices = @transform_2, window_bounds = array<i64: 1, 128>}, {pipeline_mode = #tpu.pipeline_mode<synchronous>, transform_indices = @transform_3, window_bounds = array<i64: 27, 128, 128>}, {pipeline_mode = #tpu.pipeline_mode<synchronous>, transform_indices = @transform_4, window_bounds = array<i64: 3, 1, 128>}, {pipeline_mode = #tpu.pipeline_mode<synchronous>, transform_indices = @transform_5, window_bounds = array<i64: 4, 128, 128>}, {transform_indices = @transform_6, window_bounds = array<i64: 1, 1, 128>}, {transform_indices = @transform_7, window_bounds = array<i64: 1, 8, 8, 128>}]} {
    %c0 = arith.constant 0 : index
    %c36 = arith.constant 36 : index
    %c36_0 = arith.constant 36 : index
    %c0_1 = arith.constant 0 : index
    %0 = vector.load %arg1[%c0, %c36, %c36_0, %c0_1] : memref<1x80x80x128xbf16, #tpu.memory_space<vmem>>, vector<1x8x8x128xbf16>
    %1 = vector.shape_cast %0 : vector<1x8x8x128xbf16> to vector<8x8x128xbf16>
    %2 = vector.shape_cast %1 : vector<8x8x128xbf16> to vector<64x128xbf16>
    %c0_2 = arith.constant 0 : index
    %c0_3 = arith.constant 0 : index
    %3 = vector.load %arg2[%c0_2, %c0_3] : memref<128x128xbf16, #tpu.memory_space<vmem>>, vector<128x128xbf16>
    %cst = arith.constant dense<0.000000e+00> : vector<64x128xf32>
    %4 = tpu.matmul %2, %3, %cst {dimension_numbers = #tpu.dot_dimension_numbers<[1], [0], [0], [1], [0, 0, 1, 1], [], []>} : vector<64x128xbf16>, vector<128x128xbf16>, vector<64x128xf32> -> vector<64x128xf32>
    %c0_4 = arith.constant 0 : index
    %c0_5 = arith.constant 0 : index
    %5 = vector.load %arg3[%c0_4, %c0_5] : memref<1x128xf32, #tpu.memory_space<vmem>>, vector<1x128xf32>
    %6 = vector.broadcast %5 : vector<1x128xf32> to vector<64x128xf32>
    %7 = arith.addf %4, %6 : vector<64x128xf32>
    %cst_6 = arith.constant 0.000000e+00 : f32
    %8 = vector.broadcast %cst_6 : f32 to vector<64x128xf32>
    %9 = arith.maximumf %7, %8 : vector<64x128xf32>
    %10 = arith.truncf %9 : vector<64x128xf32> to vector<64x128xbf16>
    %c0_7 = arith.constant 0 : index
    %c0_8 = arith.constant 0 : index
    %c0_9 = arith.constant 0 : index
    %11 = vector.load %arg6[%c0_7, %c0_8, %c0_9] : memref<4x128x128xbf16, #tpu.memory_space<vmem>>, vector<1x128x128xbf16>
    %12 = vector.shape_cast %11 : vector<1x128x128xbf16> to vector<128x128xbf16>
    %cst_10 = arith.constant dense<0.000000e+00> : vector<64x128xf32>
    %13 = tpu.matmul %10, %12, %cst_10 {dimension_numbers = #tpu.dot_dimension_numbers<[1], [0], [0], [1], [0, 0, 1, 1], [], []>} : vector<64x128xbf16>, vector<128x128xbf16>, vector<64x128xf32> -> vector<64x128xf32>
    %c0_11 = arith.constant 0 : index
    %c24 = arith.constant 24 : index
    %c24_12 = arith.constant 24 : index
    %c0_13 = arith.constant 0 : index
    %14 = vector.load %arg1[%c0_11, %c24, %c24_12, %c0_13] : memref<1x80x80x128xbf16, #tpu.memory_space<vmem>>, vector<1x8x8x128xbf16>
    %15 = vector.shape_cast %14 : vector<1x8x8x128xbf16> to vector<8x8x128xbf16>
    %16 = vector.shape_cast %15 : vector<8x8x128xbf16> to vector<64x128xbf16>
    %c0_14 = arith.constant 0 : index
    %c0_15 = arith.constant 0 : index
    %c0_16 = arith.constant 0 : index
    %17 = vector.load %arg4[%c0_14, %c0_15, %c0_16] : memref<27x128x128xbf16, #tpu.memory_space<vmem>>, vector<1x128x128xbf16>
    %18 = vector.shape_cast %17 : vector<1x128x128xbf16> to vector<128x128xbf16>
    %cst_17 = arith.constant dense<0.000000e+00> : vector<64x128xf32>
    %19 = tpu.matmul %16, %18, %cst_17 {dimension_numbers = #tpu.dot_dimension_numbers<[1], [0], [0], [1], [0, 0, 1, 1], [], []>} : vector<64x128xbf16>, vector<128x128xbf16>, vector<64x128xf32> -> vector<64x128xf32>
    %c0_18 = arith.constant 0 : index
    %c24_19 = arith.constant 24 : index
    %c36_20 = arith.constant 36 : index
    %c0_21 = arith.constant 0 : index
    %20 = vector.load %arg1[%c0_18, %c24_19, %c36_20, %c0_21] : memref<1x80x80x128xbf16, #tpu.memory_space<vmem>>, vector<1x8x8x128xbf16>
    %21 = vector.shape_cast %20 : vector<1x8x8x128xbf16> to vector<8x8x128xbf16>
    %22 = vector.shape_cast %21 : vector<8x8x128xbf16> to vector<64x128xbf16>
    %c1 = arith.constant 1 : index
    %c0_22 = arith.constant 0 : index
    %c0_23 = arith.constant 0 : index
    %23 = vector.load %arg4[%c1, %c0_22, %c0_23] : memref<27x128x128xbf16, #tpu.memory_space<vmem>>, vector<1x128x128xbf16>
    %24 = vector.shape_cast %23 : vector<1x128x128xbf16> to vector<128x128xbf16>
    %cst_24 = arith.constant dense<0.000000e+00> : vector<64x128xf32>
    %25 = tpu.matmul %22, %24, %cst_24 {dimension_numbers = #tpu.dot_dimension_numbers<[1], [0], [0], [1], [0, 0, 1, 1], [], []>} : vector<64x128xbf16>, vector<128x128xbf16>, vector<64x128xf32> -> vector<64x128xf32>
    %26 = arith.addf %19, %25 : vector<64x128xf32>
    %c0_25 = arith.constant 0 : index
    %c24_26 = arith.constant 24 : index
    %c48 = arith.constant 48 : index
    %c0_27 = arith.constant 0 : index
    %27 = vector.load %arg1[%c0_25, %c24_26, %c48, %c0_27] : memref<1x80x80x128xbf16, #tpu.memory_space<vmem>>, vector<1x8x8x128xbf16>
    %28 = vector.shape_cast %27 : vector<1x8x8x128xbf16> to vector<8x8x128xbf16>
    %29 = vector.shape_cast %28 : vector<8x8x128xbf16> to vector<64x128xbf16>
    %c2 = arith.constant 2 : index
    %c0_28 = arith.constant 0 : index
    %c0_29 = arith.constant 0 : index
    %30 = vector.load %arg4[%c2, %c0_28, %c0_29] : memref<27x128x128xbf16, #tpu.memory_space<vmem>>, vector<1x128x128xbf16>
    %31 = vector.shape_cast %30 : vector<1x128x128xbf16> to vector<128x128xbf16>
    %cst_30 = arith.constant dense<0.000000e+00> : vector<64x128xf32>
    %32 = tpu.matmul %29, %31, %cst_30 {dimension_numbers = #tpu.dot_dimension_numbers<[1], [0], [0], [1], [0, 0, 1, 1], [], []>} : vector<64x128xbf16>, vector<128x128xbf16>, vector<64x128xf32> -> vector<64x128xf32>
    %33 = arith.addf %26, %32 : vector<64x128xf32>
    %c0_31 = arith.constant 0 : index
    %c36_32 = arith.constant 36 : index
    %c24_33 = arith.constant 24 : index
    %c0_34 = arith.constant 0 : index
    %34 = vector.load %arg1[%c0_31, %c36_32, %c24_33, %c0_34] : memref<1x80x80x128xbf16, #tpu.memory_space<vmem>>, vector<1x8x8x128xbf16>
    %35 = vector.shape_cast %34 : vector<1x8x8x128xbf16> to vector<8x8x128xbf16>
    %36 = vector.shape_cast %35 : vector<8x8x128xbf16> to vector<64x128xbf16>
    %c3 = arith.constant 3 : index
    %c0_35 = arith.constant 0 : index
    %c0_36 = arith.constant 0 : index
    %37 = vector.load %arg4[%c3, %c0_35, %c0_36] : memref<27x128x128xbf16, #tpu.memory_space<vmem>>, vector<1x128x128xbf16>
    %38 = vector.shape_cast %37 : vector<1x128x128xbf16> to vector<128x128xbf16>
    %cst_37 = arith.constant dense<0.000000e+00> : vector<64x128xf32>
    %39 = tpu.matmul %36, %38, %cst_37 {dimension_numbers = #tpu.dot_dimension_numbers<[1], [0], [0], [1], [0, 0, 1, 1], [], []>} : vector<64x128xbf16>, vector<128x128xbf16>, vector<64x128xf32> -> vector<64x128xf32>
    %40 = arith.addf %33, %39 : vector<64x128xf32>
    %c0_38 = arith.constant 0 : index
    %c36_39 = arith.constant 36 : index
    %c36_40 = arith.constant 36 : index
    %c0_41 = arith.constant 0 : index
    %41 = vector.load %arg1[%c0_38, %c36_39, %c36_40, %c0_41] : memref<1x80x80x128xbf16, #tpu.memory_space<vmem>>, vector<1x8x8x128xbf16>
    %42 = vector.shape_cast %41 : vector<1x8x8x128xbf16> to vector<8x8x128xbf16>
    %43 = vector.shape_cast %42 : vector<8x8x128xbf16> to vector<64x128xbf16>
    %c4 = arith.constant 4 : index
    %c0_42 = arith.constant 0 : index
    %c0_43 = arith.constant 0 : index
    %44 = vector.load %arg4[%c4, %c0_42, %c0_43] : memref<27x128x128xbf16, #tpu.memory_space<vmem>>, vector<1x128x128xbf16>
    %45 = vector.shape_cast %44 : vector<1x128x128xbf16> to vector<128x128xbf16>
    %cst_44 = arith.constant dense<0.000000e+00> : vector<64x128xf32>
    %46 = tpu.matmul %43, %45, %cst_44 {dimension_numbers = #tpu.dot_dimension_numbers<[1], [0], [0], [1], [0, 0, 1, 1], [], []>} : vector<64x128xbf16>, vector<128x128xbf16>, vector<64x128xf32> -> vector<64x128xf32>
    %47 = arith.addf %40, %46 : vector<64x128xf32>
    %c0_45 = arith.constant 0 : index
    %c36_46 = arith.constant 36 : index
    %c48_47 = arith.constant 48 : index
    %c0_48 = arith.constant 0 : index
    %48 = vector.load %arg1[%c0_45, %c36_46, %c48_47, %c0_48] : memref<1x80x80x128xbf16, #tpu.memory_space<vmem>>, vector<1x8x8x128xbf16>
    %49 = vector.shape_cast %48 : vector<1x8x8x128xbf16> to vector<8x8x128xbf16>
    %50 = vector.shape_cast %49 : vector<8x8x128xbf16> to vector<64x128xbf16>
    %c5 = arith.constant 5 : index
    %c0_49 = arith.constant 0 : index
    %c0_50 = arith.constant 0 : index
    %51 = vector.load %arg4[%c5, %c0_49, %c0_50] : memref<27x128x128xbf16, #tpu.memory_space<vmem>>, vector<1x128x128xbf16>
    %52 = vector.shape_cast %51 : vector<1x128x128xbf16> to vector<128x128xbf16>
    %cst_51 = arith.constant dense<0.000000e+00> : vector<64x128xf32>
    %53 = tpu.matmul %50, %52, %cst_51 {dimension_numbers = #tpu.dot_dimension_numbers<[1], [0], [0], [1], [0, 0, 1, 1], [], []>} : vector<64x128xbf16>, vector<128x128xbf16>, vector<64x128xf32> -> vector<64x128xf32>
    %54 = arith.addf %47, %53 : vector<64x128xf32>
    %c0_52 = arith.constant 0 : index
    %c48_53 = arith.constant 48 : index
    %c24_54 = arith.constant 24 : index
    %c0_55 = arith.constant 0 : index
    %55 = vector.load %arg1[%c0_52, %c48_53, %c24_54, %c0_55] : memref<1x80x80x128xbf16, #tpu.memory_space<vmem>>, vector<1x8x8x128xbf16>
    %56 = vector.shape_cast %55 : vector<1x8x8x128xbf16> to vector<8x8x128xbf16>
    %57 = vector.shape_cast %56 : vector<8x8x128xbf16> to vector<64x128xbf16>
    %c6 = arith.constant 6 : index
    %c0_56 = arith.constant 0 : index
    %c0_57 = arith.constant 0 : index
    %58 = vector.load %arg4[%c6, %c0_56, %c0_57] : memref<27x128x128xbf16, #tpu.memory_space<vmem>>, vector<1x128x128xbf16>
    %59 = vector.shape_cast %58 : vector<1x128x128xbf16> to vector<128x128xbf16>
    %cst_58 = arith.constant dense<0.000000e+00> : vector<64x128xf32>
    %60 = tpu.matmul %57, %59, %cst_58 {dimension_numbers = #tpu.dot_dimension_numbers<[1], [0], [0], [1], [0, 0, 1, 1], [], []>} : vector<64x128xbf16>, vector<128x128xbf16>, vector<64x128xf32> -> vector<64x128xf32>
    %61 = arith.addf %54, %60 : vector<64x128xf32>
    %c0_59 = arith.constant 0 : index
    %c48_60 = arith.constant 48 : index
    %c36_61 = arith.constant 36 : index
    %c0_62 = arith.constant 0 : index
    %62 = vector.load %arg1[%c0_59, %c48_60, %c36_61, %c0_62] : memref<1x80x80x128xbf16, #tpu.memory_space<vmem>>, vector<1x8x8x128xbf16>
    %63 = vector.shape_cast %62 : vector<1x8x8x128xbf16> to vector<8x8x128xbf16>
    %64 = vector.shape_cast %63 : vector<8x8x128xbf16> to vector<64x128xbf16>
    %c7 = arith.constant 7 : index
    %c0_63 = arith.constant 0 : index
    %c0_64 = arith.constant 0 : index
    %65 = vector.load %arg4[%c7, %c0_63, %c0_64] : memref<27x128x128xbf16, #tpu.memory_space<vmem>>, vector<1x128x128xbf16>
    %66 = vector.shape_cast %65 : vector<1x128x128xbf16> to vector<128x128xbf16>
    %cst_65 = arith.constant dense<0.000000e+00> : vector<64x128xf32>
    %67 = tpu.matmul %64, %66, %cst_65 {dimension_numbers = #tpu.dot_dimension_numbers<[1], [0], [0], [1], [0, 0, 1, 1], [], []>} : vector<64x128xbf16>, vector<128x128xbf16>, vector<64x128xf32> -> vector<64x128xf32>
    %68 = arith.addf %61, %67 : vector<64x128xf32>
    %c0_66 = arith.constant 0 : index
    %c48_67 = arith.constant 48 : index
    %c48_68 = arith.constant 48 : index
    %c0_69 = arith.constant 0 : index
    %69 = vector.load %arg1[%c0_66, %c48_67, %c48_68, %c0_69] : memref<1x80x80x128xbf16, #tpu.memory_space<vmem>>, vector<1x8x8x128xbf16>
    %70 = vector.shape_cast %69 : vector<1x8x8x128xbf16> to vector<8x8x128xbf16>
    %71 = vector.shape_cast %70 : vector<8x8x128xbf16> to vector<64x128xbf16>
    %c8 = arith.constant 8 : index
    %c0_70 = arith.constant 0 : index
    %c0_71 = arith.constant 0 : index
    %72 = vector.load %arg4[%c8, %c0_70, %c0_71] : memref<27x128x128xbf16, #tpu.memory_space<vmem>>, vector<1x128x128xbf16>
    %73 = vector.shape_cast %72 : vector<1x128x128xbf16> to vector<128x128xbf16>
    %cst_72 = arith.constant dense<0.000000e+00> : vector<64x128xf32>
    %74 = tpu.matmul %71, %73, %cst_72 {dimension_numbers = #tpu.dot_dimension_numbers<[1], [0], [0], [1], [0, 0, 1, 1], [], []>} : vector<64x128xbf16>, vector<128x128xbf16>, vector<64x128xf32> -> vector<64x128xf32>
    %75 = arith.addf %68, %74 : vector<64x128xf32>
    %c0_73 = arith.constant 0 : index
    %c0_74 = arith.constant 0 : index
    %c0_75 = arith.constant 0 : index
    %76 = vector.load %arg5[%c0_73, %c0_74, %c0_75] : memref<3x1x128xf32, #tpu.memory_space<vmem>>, vector<1x1x128xf32>
    %77 = vector.shape_cast %76 : vector<1x1x128xf32> to vector<1x128xf32>
    %78 = vector.broadcast %77 : vector<1x128xf32> to vector<64x128xf32>
    %79 = arith.addf %75, %78 : vector<64x128xf32>
    %cst_76 = arith.constant 0.000000e+00 : f32
    %80 = vector.broadcast %cst_76 : f32 to vector<64x128xf32>
    %81 = arith.maximumf %79, %80 : vector<64x128xf32>
    %82 = arith.truncf %81 : vector<64x128xf32> to vector<64x128xbf16>
    %c1_77 = arith.constant 1 : index
    %c0_78 = arith.constant 0 : index
    %c0_79 = arith.constant 0 : index
    %83 = vector.load %arg6[%c1_77, %c0_78, %c0_79] : memref<4x128x128xbf16, #tpu.memory_space<vmem>>, vector<1x128x128xbf16>
    %84 = vector.shape_cast %83 : vector<1x128x128xbf16> to vector<128x128xbf16>
    %cst_80 = arith.constant dense<0.000000e+00> : vector<64x128xf32>
    %85 = tpu.matmul %82, %84, %cst_80 {dimension_numbers = #tpu.dot_dimension_numbers<[1], [0], [0], [1], [0, 0, 1, 1], [], []>} : vector<64x128xbf16>, vector<128x128xbf16>, vector<64x128xf32> -> vector<64x128xf32>
    %86 = arith.addf %13, %85 : vector<64x128xf32>
    %c0_81 = arith.constant 0 : index
    %c12 = arith.constant 12 : index
    %c12_82 = arith.constant 12 : index
    %c0_83 = arith.constant 0 : index
    %87 = vector.load %arg1[%c0_81, %c12, %c12_82, %c0_83] : memref<1x80x80x128xbf16, #tpu.memory_space<vmem>>, vector<1x8x8x128xbf16>
    %88 = vector.shape_cast %87 : vector<1x8x8x128xbf16> to vector<8x8x128xbf16>
    %89 = vector.shape_cast %88 : vector<8x8x128xbf16> to vector<64x128xbf16>
    %c9 = arith.constant 9 : index
    %c0_84 = arith.constant 0 : index
    %c0_85 = arith.constant 0 : index
    %90 = vector.load %arg4[%c9, %c0_84, %c0_85] : memref<27x128x128xbf16, #tpu.memory_space<vmem>>, vector<1x128x128xbf16>
    %91 = vector.shape_cast %90 : vector<1x128x128xbf16> to vector<128x128xbf16>
    %cst_86 = arith.constant dense<0.000000e+00> : vector<64x128xf32>
    %92 = tpu.matmul %89, %91, %cst_86 {dimension_numbers = #tpu.dot_dimension_numbers<[1], [0], [0], [1], [0, 0, 1, 1], [], []>} : vector<64x128xbf16>, vector<128x128xbf16>, vector<64x128xf32> -> vector<64x128xf32>
    %c0_87 = arith.constant 0 : index
    %c12_88 = arith.constant 12 : index
    %c36_89 = arith.constant 36 : index
    %c0_90 = arith.constant 0 : index
    %93 = vector.load %arg1[%c0_87, %c12_88, %c36_89, %c0_90] : memref<1x80x80x128xbf16, #tpu.memory_space<vmem>>, vector<1x8x8x128xbf16>
    %94 = vector.shape_cast %93 : vector<1x8x8x128xbf16> to vector<8x8x128xbf16>
    %95 = vector.shape_cast %94 : vector<8x8x128xbf16> to vector<64x128xbf16>
    %c10 = arith.constant 10 : index
    %c0_91 = arith.constant 0 : index
    %c0_92 = arith.constant 0 : index
    %96 = vector.load %arg4[%c10, %c0_91, %c0_92] : memref<27x128x128xbf16, #tpu.memory_space<vmem>>, vector<1x128x128xbf16>
    %97 = vector.shape_cast %96 : vector<1x128x128xbf16> to vector<128x128xbf16>
    %cst_93 = arith.constant dense<0.000000e+00> : vector<64x128xf32>
    %98 = tpu.matmul %95, %97, %cst_93 {dimension_numbers = #tpu.dot_dimension_numbers<[1], [0], [0], [1], [0, 0, 1, 1], [], []>} : vector<64x128xbf16>, vector<128x128xbf16>, vector<64x128xf32> -> vector<64x128xf32>
    %99 = arith.addf %92, %98 : vector<64x128xf32>
    %c0_94 = arith.constant 0 : index
    %c12_95 = arith.constant 12 : index
    %c60 = arith.constant 60 : index
    %c0_96 = arith.constant 0 : index
    %100 = vector.load %arg1[%c0_94, %c12_95, %c60, %c0_96] : memref<1x80x80x128xbf16, #tpu.memory_space<vmem>>, vector<1x8x8x128xbf16>
    %101 = vector.shape_cast %100 : vector<1x8x8x128xbf16> to vector<8x8x128xbf16>
    %102 = vector.shape_cast %101 : vector<8x8x128xbf16> to vector<64x128xbf16>
    %c11 = arith.constant 11 : index
    %c0_97 = arith.constant 0 : index
    %c0_98 = arith.constant 0 : index
    %103 = vector.load %arg4[%c11, %c0_97, %c0_98] : memref<27x128x128xbf16, #tpu.memory_space<vmem>>, vector<1x128x128xbf16>
    %104 = vector.shape_cast %103 : vector<1x128x128xbf16> to vector<128x128xbf16>
    %cst_99 = arith.constant dense<0.000000e+00> : vector<64x128xf32>
    %105 = tpu.matmul %102, %104, %cst_99 {dimension_numbers = #tpu.dot_dimension_numbers<[1], [0], [0], [1], [0, 0, 1, 1], [], []>} : vector<64x128xbf16>, vector<128x128xbf16>, vector<64x128xf32> -> vector<64x128xf32>
    %106 = arith.addf %99, %105 : vector<64x128xf32>
    %c0_100 = arith.constant 0 : index
    %c36_101 = arith.constant 36 : index
    %c12_102 = arith.constant 12 : index
    %c0_103 = arith.constant 0 : index
    %107 = vector.load %arg1[%c0_100, %c36_101, %c12_102, %c0_103] : memref<1x80x80x128xbf16, #tpu.memory_space<vmem>>, vector<1x8x8x128xbf16>
    %108 = vector.shape_cast %107 : vector<1x8x8x128xbf16> to vector<8x8x128xbf16>
    %109 = vector.shape_cast %108 : vector<8x8x128xbf16> to vector<64x128xbf16>
    %c12_104 = arith.constant 12 : index
    %c0_105 = arith.constant 0 : index
    %c0_106 = arith.constant 0 : index
    %110 = vector.load %arg4[%c12_104, %c0_105, %c0_106] : memref<27x128x128xbf16, #tpu.memory_space<vmem>>, vector<1x128x128xbf16>
    %111 = vector.shape_cast %110 : vector<1x128x128xbf16> to vector<128x128xbf16>
    %cst_107 = arith.constant dense<0.000000e+00> : vector<64x128xf32>
    %112 = tpu.matmul %109, %111, %cst_107 {dimension_numbers = #tpu.dot_dimension_numbers<[1], [0], [0], [1], [0, 0, 1, 1], [], []>} : vector<64x128xbf16>, vector<128x128xbf16>, vector<64x128xf32> -> vector<64x128xf32>
    %113 = arith.addf %106, %112 : vector<64x128xf32>
    %c0_108 = arith.constant 0 : index
    %c36_109 = arith.constant 36 : index
    %c36_110 = arith.constant 36 : index
    %c0_111 = arith.constant 0 : index
    %114 = vector.load %arg1[%c0_108, %c36_109, %c36_110, %c0_111] : memref<1x80x80x128xbf16, #tpu.memory_space<vmem>>, vector<1x8x8x128xbf16>
    %115 = vector.shape_cast %114 : vector<1x8x8x128xbf16> to vector<8x8x128xbf16>
    %116 = vector.shape_cast %115 : vector<8x8x128xbf16> to vector<64x128xbf16>
    %c13 = arith.constant 13 : index
    %c0_112 = arith.constant 0 : index
    %c0_113 = arith.constant 0 : index
    %117 = vector.load %arg4[%c13, %c0_112, %c0_113] : memref<27x128x128xbf16, #tpu.memory_space<vmem>>, vector<1x128x128xbf16>
    %118 = vector.shape_cast %117 : vector<1x128x128xbf16> to vector<128x128xbf16>
    %cst_114 = arith.constant dense<0.000000e+00> : vector<64x128xf32>
    %119 = tpu.matmul %116, %118, %cst_114 {dimension_numbers = #tpu.dot_dimension_numbers<[1], [0], [0], [1], [0, 0, 1, 1], [], []>} : vector<64x128xbf16>, vector<128x128xbf16>, vector<64x128xf32> -> vector<64x128xf32>
    %120 = arith.addf %113, %119 : vector<64x128xf32>
    %c0_115 = arith.constant 0 : index
    %c36_116 = arith.constant 36 : index
    %c60_117 = arith.constant 60 : index
    %c0_118 = arith.constant 0 : index
    %121 = vector.load %arg1[%c0_115, %c36_116, %c60_117, %c0_118] : memref<1x80x80x128xbf16, #tpu.memory_space<vmem>>, vector<1x8x8x128xbf16>
    %122 = vector.shape_cast %121 : vector<1x8x8x128xbf16> to vector<8x8x128xbf16>
    %123 = vector.shape_cast %122 : vector<8x8x128xbf16> to vector<64x128xbf16>
    %c14 = arith.constant 14 : index
    %c0_119 = arith.constant 0 : index
    %c0_120 = arith.constant 0 : index
    %124 = vector.load %arg4[%c14, %c0_119, %c0_120] : memref<27x128x128xbf16, #tpu.memory_space<vmem>>, vector<1x128x128xbf16>
    %125 = vector.shape_cast %124 : vector<1x128x128xbf16> to vector<128x128xbf16>
    %cst_121 = arith.constant dense<0.000000e+00> : vector<64x128xf32>
    %126 = tpu.matmul %123, %125, %cst_121 {dimension_numbers = #tpu.dot_dimension_numbers<[1], [0], [0], [1], [0, 0, 1, 1], [], []>} : vector<64x128xbf16>, vector<128x128xbf16>, vector<64x128xf32> -> vector<64x128xf32>
    %127 = arith.addf %120, %126 : vector<64x128xf32>
    %c0_122 = arith.constant 0 : index
    %c60_123 = arith.constant 60 : index
    %c12_124 = arith.constant 12 : index
    %c0_125 = arith.constant 0 : index
    %128 = vector.load %arg1[%c0_122, %c60_123, %c12_124, %c0_125] : memref<1x80x80x128xbf16, #tpu.memory_space<vmem>>, vector<1x8x8x128xbf16>
    %129 = vector.shape_cast %128 : vector<1x8x8x128xbf16> to vector<8x8x128xbf16>
    %130 = vector.shape_cast %129 : vector<8x8x128xbf16> to vector<64x128xbf16>
    %c15 = arith.constant 15 : index
    %c0_126 = arith.constant 0 : index
    %c0_127 = arith.constant 0 : index
    %131 = vector.load %arg4[%c15, %c0_126, %c0_127] : memref<27x128x128xbf16, #tpu.memory_space<vmem>>, vector<1x128x128xbf16>
    %132 = vector.shape_cast %131 : vector<1x128x128xbf16> to vector<128x128xbf16>
    %cst_128 = arith.constant dense<0.000000e+00> : vector<64x128xf32>
    %133 = tpu.matmul %130, %132, %cst_128 {dimension_numbers = #tpu.dot_dimension_numbers<[1], [0], [0], [1], [0, 0, 1, 1], [], []>} : vector<64x128xbf16>, vector<128x128xbf16>, vector<64x128xf32> -> vector<64x128xf32>
    %134 = arith.addf %127, %133 : vector<64x128xf32>
    %c0_129 = arith.constant 0 : index
    %c60_130 = arith.constant 60 : index
    %c36_131 = arith.constant 36 : index
    %c0_132 = arith.constant 0 : index
    %135 = vector.load %arg1[%c0_129, %c60_130, %c36_131, %c0_132] : memref<1x80x80x128xbf16, #tpu.memory_space<vmem>>, vector<1x8x8x128xbf16>
    %136 = vector.shape_cast %135 : vector<1x8x8x128xbf16> to vector<8x8x128xbf16>
    %137 = vector.shape_cast %136 : vector<8x8x128xbf16> to vector<64x128xbf16>
    %c16 = arith.constant 16 : index
    %c0_133 = arith.constant 0 : index
    %c0_134 = arith.constant 0 : index
    %138 = vector.load %arg4[%c16, %c0_133, %c0_134] : memref<27x128x128xbf16, #tpu.memory_space<vmem>>, vector<1x128x128xbf16>
    %139 = vector.shape_cast %138 : vector<1x128x128xbf16> to vector<128x128xbf16>
    %cst_135 = arith.constant dense<0.000000e+00> : vector<64x128xf32>
    %140 = tpu.matmul %137, %139, %cst_135 {dimension_numbers = #tpu.dot_dimension_numbers<[1], [0], [0], [1], [0, 0, 1, 1], [], []>} : vector<64x128xbf16>, vector<128x128xbf16>, vector<64x128xf32> -> vector<64x128xf32>
    %141 = arith.addf %134, %140 : vector<64x128xf32>
    %c0_136 = arith.constant 0 : index
    %c60_137 = arith.constant 60 : index
    %c60_138 = arith.constant 60 : index
    %c0_139 = arith.constant 0 : index
    %142 = vector.load %arg1[%c0_136, %c60_137, %c60_138, %c0_139] : memref<1x80x80x128xbf16, #tpu.memory_space<vmem>>, vector<1x8x8x128xbf16>
    %143 = vector.shape_cast %142 : vector<1x8x8x128xbf16> to vector<8x8x128xbf16>
    %144 = vector.shape_cast %143 : vector<8x8x128xbf16> to vector<64x128xbf16>
    %c17 = arith.constant 17 : index
    %c0_140 = arith.constant 0 : index
    %c0_141 = arith.constant 0 : index
    %145 = vector.load %arg4[%c17, %c0_140, %c0_141] : memref<27x128x128xbf16, #tpu.memory_space<vmem>>, vector<1x128x128xbf16>
    %146 = vector.shape_cast %145 : vector<1x128x128xbf16> to vector<128x128xbf16>
    %cst_142 = arith.constant dense<0.000000e+00> : vector<64x128xf32>
    %147 = tpu.matmul %144, %146, %cst_142 {dimension_numbers = #tpu.dot_dimension_numbers<[1], [0], [0], [1], [0, 0, 1, 1], [], []>} : vector<64x128xbf16>, vector<128x128xbf16>, vector<64x128xf32> -> vector<64x128xf32>
    %148 = arith.addf %141, %147 : vector<64x128xf32>
    %c1_143 = arith.constant 1 : index
    %c0_144 = arith.constant 0 : index
    %c0_145 = arith.constant 0 : index
    %149 = vector.load %arg5[%c1_143, %c0_144, %c0_145] : memref<3x1x128xf32, #tpu.memory_space<vmem>>, vector<1x1x128xf32>
    %150 = vector.shape_cast %149 : vector<1x1x128xf32> to vector<1x128xf32>
    %151 = vector.broadcast %150 : vector<1x128xf32> to vector<64x128xf32>
    %152 = arith.addf %148, %151 : vector<64x128xf32>
    %cst_146 = arith.constant 0.000000e+00 : f32
    %153 = vector.broadcast %cst_146 : f32 to vector<64x128xf32>
    %154 = arith.maximumf %152, %153 : vector<64x128xf32>
    %155 = arith.truncf %154 : vector<64x128xf32> to vector<64x128xbf16>
    %c2_147 = arith.constant 2 : index
    %c0_148 = arith.constant 0 : index
    %c0_149 = arith.constant 0 : index
    %156 = vector.load %arg6[%c2_147, %c0_148, %c0_149] : memref<4x128x128xbf16, #tpu.memory_space<vmem>>, vector<1x128x128xbf16>
    %157 = vector.shape_cast %156 : vector<1x128x128xbf16> to vector<128x128xbf16>
    %cst_150 = arith.constant dense<0.000000e+00> : vector<64x128xf32>
    %158 = tpu.matmul %155, %157, %cst_150 {dimension_numbers = #tpu.dot_dimension_numbers<[1], [0], [0], [1], [0, 0, 1, 1], [], []>} : vector<64x128xbf16>, vector<128x128xbf16>, vector<64x128xf32> -> vector<64x128xf32>
    %159 = arith.addf %86, %158 : vector<64x128xf32>
    %c0_151 = arith.constant 0 : index
    %c0_152 = arith.constant 0 : index
    %c0_153 = arith.constant 0 : index
    %c0_154 = arith.constant 0 : index
    %160 = vector.load %arg1[%c0_151, %c0_152, %c0_153, %c0_154] : memref<1x80x80x128xbf16, #tpu.memory_space<vmem>>, vector<1x8x8x128xbf16>
    %161 = vector.shape_cast %160 : vector<1x8x8x128xbf16> to vector<8x8x128xbf16>
    %162 = vector.shape_cast %161 : vector<8x8x128xbf16> to vector<64x128xbf16>
    %c18 = arith.constant 18 : index
    %c0_155 = arith.constant 0 : index
    %c0_156 = arith.constant 0 : index
    %163 = vector.load %arg4[%c18, %c0_155, %c0_156] : memref<27x128x128xbf16, #tpu.memory_space<vmem>>, vector<1x128x128xbf16>
    %164 = vector.shape_cast %163 : vector<1x128x128xbf16> to vector<128x128xbf16>
    %cst_157 = arith.constant dense<0.000000e+00> : vector<64x128xf32>
    %165 = tpu.matmul %162, %164, %cst_157 {dimension_numbers = #tpu.dot_dimension_numbers<[1], [0], [0], [1], [0, 0, 1, 1], [], []>} : vector<64x128xbf16>, vector<128x128xbf16>, vector<64x128xf32> -> vector<64x128xf32>
    %c0_158 = arith.constant 0 : index
    %c0_159 = arith.constant 0 : index
    %c36_160 = arith.constant 36 : index
    %c0_161 = arith.constant 0 : index
    %166 = vector.load %arg1[%c0_158, %c0_159, %c36_160, %c0_161] : memref<1x80x80x128xbf16, #tpu.memory_space<vmem>>, vector<1x8x8x128xbf16>
    %167 = vector.shape_cast %166 : vector<1x8x8x128xbf16> to vector<8x8x128xbf16>
    %168 = vector.shape_cast %167 : vector<8x8x128xbf16> to vector<64x128xbf16>
    %c19 = arith.constant 19 : index
    %c0_162 = arith.constant 0 : index
    %c0_163 = arith.constant 0 : index
    %169 = vector.load %arg4[%c19, %c0_162, %c0_163] : memref<27x128x128xbf16, #tpu.memory_space<vmem>>, vector<1x128x128xbf16>
    %170 = vector.shape_cast %169 : vector<1x128x128xbf16> to vector<128x128xbf16>
    %cst_164 = arith.constant dense<0.000000e+00> : vector<64x128xf32>
    %171 = tpu.matmul %168, %170, %cst_164 {dimension_numbers = #tpu.dot_dimension_numbers<[1], [0], [0], [1], [0, 0, 1, 1], [], []>} : vector<64x128xbf16>, vector<128x128xbf16>, vector<64x128xf32> -> vector<64x128xf32>
    %172 = arith.addf %165, %171 : vector<64x128xf32>
    %c0_165 = arith.constant 0 : index
    %c0_166 = arith.constant 0 : index
    %c72 = arith.constant 72 : index
    %c0_167 = arith.constant 0 : index
    %173 = vector.load %arg1[%c0_165, %c0_166, %c72, %c0_167] : memref<1x80x80x128xbf16, #tpu.memory_space<vmem>>, vector<1x8x8x128xbf16>
    %174 = vector.shape_cast %173 : vector<1x8x8x128xbf16> to vector<8x8x128xbf16>
    %175 = vector.shape_cast %174 : vector<8x8x128xbf16> to vector<64x128xbf16>
    %c20 = arith.constant 20 : index
    %c0_168 = arith.constant 0 : index
    %c0_169 = arith.constant 0 : index
    %176 = vector.load %arg4[%c20, %c0_168, %c0_169] : memref<27x128x128xbf16, #tpu.memory_space<vmem>>, vector<1x128x128xbf16>
    %177 = vector.shape_cast %176 : vector<1x128x128xbf16> to vector<128x128xbf16>
    %cst_170 = arith.constant dense<0.000000e+00> : vector<64x128xf32>
    %178 = tpu.matmul %175, %177, %cst_170 {dimension_numbers = #tpu.dot_dimension_numbers<[1], [0], [0], [1], [0, 0, 1, 1], [], []>} : vector<64x128xbf16>, vector<128x128xbf16>, vector<64x128xf32> -> vector<64x128xf32>
    %179 = arith.addf %172, %178 : vector<64x128xf32>
    %c0_171 = arith.constant 0 : index
    %c36_172 = arith.constant 36 : index
    %c0_173 = arith.constant 0 : index
    %c0_174 = arith.constant 0 : index
    %180 = vector.load %arg1[%c0_171, %c36_172, %c0_173, %c0_174] : memref<1x80x80x128xbf16, #tpu.memory_space<vmem>>, vector<1x8x8x128xbf16>
    %181 = vector.shape_cast %180 : vector<1x8x8x128xbf16> to vector<8x8x128xbf16>
    %182 = vector.shape_cast %181 : vector<8x8x128xbf16> to vector<64x128xbf16>
    %c21 = arith.constant 21 : index
    %c0_175 = arith.constant 0 : index
    %c0_176 = arith.constant 0 : index
    %183 = vector.load %arg4[%c21, %c0_175, %c0_176] : memref<27x128x128xbf16, #tpu.memory_space<vmem>>, vector<1x128x128xbf16>
    %184 = vector.shape_cast %183 : vector<1x128x128xbf16> to vector<128x128xbf16>
    %cst_177 = arith.constant dense<0.000000e+00> : vector<64x128xf32>
    %185 = tpu.matmul %182, %184, %cst_177 {dimension_numbers = #tpu.dot_dimension_numbers<[1], [0], [0], [1], [0, 0, 1, 1], [], []>} : vector<64x128xbf16>, vector<128x128xbf16>, vector<64x128xf32> -> vector<64x128xf32>
    %186 = arith.addf %179, %185 : vector<64x128xf32>
    %c0_178 = arith.constant 0 : index
    %c36_179 = arith.constant 36 : index
    %c36_180 = arith.constant 36 : index
    %c0_181 = arith.constant 0 : index
    %187 = vector.load %arg1[%c0_178, %c36_179, %c36_180, %c0_181] : memref<1x80x80x128xbf16, #tpu.memory_space<vmem>>, vector<1x8x8x128xbf16>
    %188 = vector.shape_cast %187 : vector<1x8x8x128xbf16> to vector<8x8x128xbf16>
    %189 = vector.shape_cast %188 : vector<8x8x128xbf16> to vector<64x128xbf16>
    %c22 = arith.constant 22 : index
    %c0_182 = arith.constant 0 : index
    %c0_183 = arith.constant 0 : index
    %190 = vector.load %arg4[%c22, %c0_182, %c0_183] : memref<27x128x128xbf16, #tpu.memory_space<vmem>>, vector<1x128x128xbf16>
    %191 = vector.shape_cast %190 : vector<1x128x128xbf16> to vector<128x128xbf16>
    %cst_184 = arith.constant dense<0.000000e+00> : vector<64x128xf32>
    %192 = tpu.matmul %189, %191, %cst_184 {dimension_numbers = #tpu.dot_dimension_numbers<[1], [0], [0], [1], [0, 0, 1, 1], [], []>} : vector<64x128xbf16>, vector<128x128xbf16>, vector<64x128xf32> -> vector<64x128xf32>
    %193 = arith.addf %186, %192 : vector<64x128xf32>
    %c0_185 = arith.constant 0 : index
    %c36_186 = arith.constant 36 : index
    %c72_187 = arith.constant 72 : index
    %c0_188 = arith.constant 0 : index
    %194 = vector.load %arg1[%c0_185, %c36_186, %c72_187, %c0_188] : memref<1x80x80x128xbf16, #tpu.memory_space<vmem>>, vector<1x8x8x128xbf16>
    %195 = vector.shape_cast %194 : vector<1x8x8x128xbf16> to vector<8x8x128xbf16>
    %196 = vector.shape_cast %195 : vector<8x8x128xbf16> to vector<64x128xbf16>
    %c23 = arith.constant 23 : index
    %c0_189 = arith.constant 0 : index
    %c0_190 = arith.constant 0 : index
    %197 = vector.load %arg4[%c23, %c0_189, %c0_190] : memref<27x128x128xbf16, #tpu.memory_space<vmem>>, vector<1x128x128xbf16>
    %198 = vector.shape_cast %197 : vector<1x128x128xbf16> to vector<128x128xbf16>
    %cst_191 = arith.constant dense<0.000000e+00> : vector<64x128xf32>
    %199 = tpu.matmul %196, %198, %cst_191 {dimension_numbers = #tpu.dot_dimension_numbers<[1], [0], [0], [1], [0, 0, 1, 1], [], []>} : vector<64x128xbf16>, vector<128x128xbf16>, vector<64x128xf32> -> vector<64x128xf32>
    %200 = arith.addf %193, %199 : vector<64x128xf32>
    %c0_192 = arith.constant 0 : index
    %c72_193 = arith.constant 72 : index
    %c0_194 = arith.constant 0 : index
    %c0_195 = arith.constant 0 : index
    %201 = vector.load %arg1[%c0_192, %c72_193, %c0_194, %c0_195] : memref<1x80x80x128xbf16, #tpu.memory_space<vmem>>, vector<1x8x8x128xbf16>
    %202 = vector.shape_cast %201 : vector<1x8x8x128xbf16> to vector<8x8x128xbf16>
    %203 = vector.shape_cast %202 : vector<8x8x128xbf16> to vector<64x128xbf16>
    %c24_196 = arith.constant 24 : index
    %c0_197 = arith.constant 0 : index
    %c0_198 = arith.constant 0 : index
    %204 = vector.load %arg4[%c24_196, %c0_197, %c0_198] : memref<27x128x128xbf16, #tpu.memory_space<vmem>>, vector<1x128x128xbf16>
    %205 = vector.shape_cast %204 : vector<1x128x128xbf16> to vector<128x128xbf16>
    %cst_199 = arith.constant dense<0.000000e+00> : vector<64x128xf32>
    %206 = tpu.matmul %203, %205, %cst_199 {dimension_numbers = #tpu.dot_dimension_numbers<[1], [0], [0], [1], [0, 0, 1, 1], [], []>} : vector<64x128xbf16>, vector<128x128xbf16>, vector<64x128xf32> -> vector<64x128xf32>
    %207 = arith.addf %200, %206 : vector<64x128xf32>
    %c0_200 = arith.constant 0 : index
    %c72_201 = arith.constant 72 : index
    %c36_202 = arith.constant 36 : index
    %c0_203 = arith.constant 0 : index
    %208 = vector.load %arg1[%c0_200, %c72_201, %c36_202, %c0_203] : memref<1x80x80x128xbf16, #tpu.memory_space<vmem>>, vector<1x8x8x128xbf16>
    %209 = vector.shape_cast %208 : vector<1x8x8x128xbf16> to vector<8x8x128xbf16>
    %210 = vector.shape_cast %209 : vector<8x8x128xbf16> to vector<64x128xbf16>
    %c25 = arith.constant 25 : index
    %c0_204 = arith.constant 0 : index
    %c0_205 = arith.constant 0 : index
    %211 = vector.load %arg4[%c25, %c0_204, %c0_205] : memref<27x128x128xbf16, #tpu.memory_space<vmem>>, vector<1x128x128xbf16>
    %212 = vector.shape_cast %211 : vector<1x128x128xbf16> to vector<128x128xbf16>
    %cst_206 = arith.constant dense<0.000000e+00> : vector<64x128xf32>
    %213 = tpu.matmul %210, %212, %cst_206 {dimension_numbers = #tpu.dot_dimension_numbers<[1], [0], [0], [1], [0, 0, 1, 1], [], []>} : vector<64x128xbf16>, vector<128x128xbf16>, vector<64x128xf32> -> vector<64x128xf32>
    %214 = arith.addf %207, %213 : vector<64x128xf32>
    %c0_207 = arith.constant 0 : index
    %c72_208 = arith.constant 72 : index
    %c72_209 = arith.constant 72 : index
    %c0_210 = arith.constant 0 : index
    %215 = vector.load %arg1[%c0_207, %c72_208, %c72_209, %c0_210] : memref<1x80x80x128xbf16, #tpu.memory_space<vmem>>, vector<1x8x8x128xbf16>
    %216 = vector.shape_cast %215 : vector<1x8x8x128xbf16> to vector<8x8x128xbf16>
    %217 = vector.shape_cast %216 : vector<8x8x128xbf16> to vector<64x128xbf16>
    %c26 = arith.constant 26 : index
    %c0_211 = arith.constant 0 : index
    %c0_212 = arith.constant 0 : index
    %218 = vector.load %arg4[%c26, %c0_211, %c0_212] : memref<27x128x128xbf16, #tpu.memory_space<vmem>>, vector<1x128x128xbf16>
    %219 = vector.shape_cast %218 : vector<1x128x128xbf16> to vector<128x128xbf16>
    %cst_213 = arith.constant dense<0.000000e+00> : vector<64x128xf32>
    %220 = tpu.matmul %217, %219, %cst_213 {dimension_numbers = #tpu.dot_dimension_numbers<[1], [0], [0], [1], [0, 0, 1, 1], [], []>} : vector<64x128xbf16>, vector<128x128xbf16>, vector<64x128xf32> -> vector<64x128xf32>
    %221 = arith.addf %214, %220 : vector<64x128xf32>
    %c2_214 = arith.constant 2 : index
    %c0_215 = arith.constant 0 : index
    %c0_216 = arith.constant 0 : index
    %222 = vector.load %arg5[%c2_214, %c0_215, %c0_216] : memref<3x1x128xf32, #tpu.memory_space<vmem>>, vector<1x1x128xf32>
    %223 = vector.shape_cast %222 : vector<1x1x128xf32> to vector<1x128xf32>
    %224 = vector.broadcast %223 : vector<1x128xf32> to vector<64x128xf32>
    %225 = arith.addf %221, %224 : vector<64x128xf32>
    %cst_217 = arith.constant 0.000000e+00 : f32
    %226 = vector.broadcast %cst_217 : f32 to vector<64x128xf32>
    %227 = arith.maximumf %225, %226 : vector<64x128xf32>
    %228 = arith.truncf %227 : vector<64x128xf32> to vector<64x128xbf16>
    %c3_218 = arith.constant 3 : index
    %c0_219 = arith.constant 0 : index
    %c0_220 = arith.constant 0 : index
    %229 = vector.load %arg6[%c3_218, %c0_219, %c0_220] : memref<4x128x128xbf16, #tpu.memory_space<vmem>>, vector<1x128x128xbf16>
    %230 = vector.shape_cast %229 : vector<1x128x128xbf16> to vector<128x128xbf16>
    %cst_221 = arith.constant dense<0.000000e+00> : vector<64x128xf32>
    %231 = tpu.matmul %228, %230, %cst_221 {dimension_numbers = #tpu.dot_dimension_numbers<[1], [0], [0], [1], [0, 0, 1, 1], [], []>} : vector<64x128xbf16>, vector<128x128xbf16>, vector<64x128xf32> -> vector<64x128xf32>
    %232 = arith.addf %159, %231 : vector<64x128xf32>
    %c0_222 = arith.constant 0 : index
    %c0_223 = arith.constant 0 : index
    %c0_224 = arith.constant 0 : index
    %233 = vector.load %arg7[%c0_222, %c0_223, %c0_224] : memref<1x1x128xf32, #tpu.memory_space<vmem>>, vector<1x1x128xf32>
    %234 = vector.shape_cast %233 : vector<1x1x128xf32> to vector<1x128xf32>
    %235 = vector.broadcast %234 : vector<1x128xf32> to vector<64x128xf32>
    %236 = arith.addf %232, %235 : vector<64x128xf32>
    %cst_225 = arith.constant 0.000000e+00 : f32
    %237 = vector.broadcast %cst_225 : f32 to vector<64x128xf32>
    %238 = arith.maximumf %236, %237 : vector<64x128xf32>
    %239 = vector.shape_cast %238 : vector<64x128xf32> to vector<1x8x8x128xf32>
    %240 = arith.truncf %239 : vector<1x8x8x128xf32> to vector<1x8x8x128xbf16>
    %c0_226 = arith.constant 0 : index
    %c0_227 = arith.constant 0 : index
    %c0_228 = arith.constant 0 : index
    %c0_229 = arith.constant 0 : index
    %241 = vector.load %arg8[%c0_226, %c0_227, %c0_228, %c0_229] : memref<1x8x8x128xbf16, #tpu.memory_space<vmem>>, vector<1x8x8x128xbf16>
    tpu.vector_store %arg8[%c0_226, %c0_227, %c0_228, %c0_229], %240 {strides = array<i32>} : memref<1x8x8x128xbf16, #tpu.memory_space<vmem>>, vector<1x8x8x128xbf16>,
    return
  }
  func.func @transform_0(%arg0: i32) -> (i32, i32, i32, i32) {
    %c0_i32 = arith.constant 0 : i32
    %c0_i32_0 = arith.constant 0 : i32
    %c0_i32_1 = arith.constant 0 : i32
    %c0_i32_2 = arith.constant 0 : i32
    return %arg0, %c0_i32, %c0_i32_0, %c0_i32_1 : i32, i32, i32, i32
  }
  func.func @transform_1(%arg0: i32) -> (i32, i32) {
    %c0_i32 = arith.constant 0 : i32
    %c0_i32_0 = arith.constant 0 : i32
    %c0_i32_1 = arith.constant 0 : i32
    return %c0_i32, %c0_i32_0 : i32, i32
  }
  func.func @transform_2(%arg0: i32) -> (i32, i32) {
    %c0_i32 = arith.constant 0 : i32
    %c0_i32_0 = arith.constant 0 : i32
    %c0_i32_1 = arith.constant 0 : i32
    return %c0_i32, %c0_i32_0 : i32, i32
  }
  func.func @transform_3(%arg0: i32) -> (i32, i32, i32) {
    %c0_i32 = arith.constant 0 : i32
    %c0_i32_0 = arith.constant 0 : i32
    %c0_i32_1 = arith.constant 0 : i32
    %c0_i32_2 = arith.constant 0 : i32
    return %c0_i32, %c0_i32_0, %c0_i32_1 : i32, i32, i32
  }
  func.func @transform_4(%arg0: i32) -> (i32, i32, i32) {
    %c0_i32 = arith.constant 0 : i32
    %c0_i32_0 = arith.constant 0 : i32
    %c0_i32_1 = arith.constant 0 : i32
    %c0_i32_2 = arith.constant 0 : i32
    return %c0_i32, %c0_i32_0, %c0_i32_1 : i32, i32, i32
  }
  func.func @transform_5(%arg0: i32) -> (i32, i32, i32) {
    %c0_i32 = arith.constant 0 : i32
    %c0_i32_0 = arith.constant 0 : i32
    %c0_i32_1 = arith.constant 0 : i32
    %c0_i32_2 = arith.constant 0 : i32
    return %c0_i32, %c0_i32_0, %c0_i32_1 : i32, i32, i32
  }
  func.func @transform_6(%arg0: i32) -> (i32, i32, i32) {
    %c0_i32 = arith.constant 0 : i32
    %c0_i32_0 = arith.constant 0 : i32
    %c0_i32_1 = arith.constant 0 : i32
    return %arg0, %c0_i32, %c0_i32_0 : i32, i32, i32
  }
  func.func @transform_7(%arg0: i32) -> (i32, i32, i32, i32) {
    %c0_i32 = arith.constant 0 : i32
    %c0_i32_0 = arith.constant 0 : i32
    %c0_i32_1 = arith.constant 0 : i32
    %c0_i32_2 = arith.constant 0 : i32
    return %arg0, %c0_i32, %c0_i32_0, %c0_i32_1 : i32, i32, i32, i32
  }
}

module attributes {stable_mosaic.version = 11 : i64} {
  func.func @_head_fused_kernel(%arg0: i32, %arg1: memref<1x10x10x128xbf16, #tpu.memory_space<vmem>>, %arg2: memref<9x128x128xbf16, #tpu.memory_space<vmem>>, %arg3: memref<1x128xf32, #tpu.memory_space<vmem>>, %arg4: memref<128x128xbf16, #tpu.memory_space<vmem>>, %arg5: memref<1x128xf32, #tpu.memory_space<vmem>>, %arg6: memref<1x8x8x128xf32, #tpu.memory_space<vmem>>) attributes {dimension_semantics = [#tpu.dimension_semantics<parallel>], iteration_bounds = array<i64: 2>, scalar_prefetch = 0 : i64, scratch_operands = 0 : i64, tpu.core_type = #tpu.core_type<tc>, window_params = [{transform_indices = @transform_0, window_bounds = array<i64: 1, 10, 10, 128>}, {pipeline_mode = #tpu.pipeline_mode<synchronous>, transform_indices = @transform_1, window_bounds = array<i64: 9, 128, 128>}, {pipeline_mode = #tpu.pipeline_mode<synchronous>, transform_indices = @transform_2, window_bounds = array<i64: 1, 128>}, {pipeline_mode = #tpu.pipeline_mode<synchronous>, transform_indices = @transform_3, window_bounds = array<i64: 128, 128>}, {pipeline_mode = #tpu.pipeline_mode<synchronous>, transform_indices = @transform_4, window_bounds = array<i64: 1, 128>}, {transform_indices = @transform_5, window_bounds = array<i64: 1, 8, 8, 128>}]} {
    %c0 = arith.constant 0 : index
    %c0_0 = arith.constant 0 : index
    %c0_1 = arith.constant 0 : index
    %c0_2 = arith.constant 0 : index
    %0 = vector.load %arg1[%c0, %c0_0, %c0_1, %c0_2] : memref<1x10x10x128xbf16, #tpu.memory_space<vmem>>, vector<1x8x8x128xbf16>
    %1 = vector.shape_cast %0 : vector<1x8x8x128xbf16> to vector<8x8x128xbf16>
    %2 = vector.shape_cast %1 : vector<8x8x128xbf16> to vector<64x128xbf16>
    %c0_3 = arith.constant 0 : index
    %c0_4 = arith.constant 0 : index
    %c0_5 = arith.constant 0 : index
    %3 = vector.load %arg2[%c0_3, %c0_4, %c0_5] : memref<9x128x128xbf16, #tpu.memory_space<vmem>>, vector<1x128x128xbf16>
    %4 = vector.shape_cast %3 : vector<1x128x128xbf16> to vector<128x128xbf16>
    %cst = arith.constant dense<0.000000e+00> : vector<64x128xf32>
    %5 = tpu.matmul %2, %4, %cst {dimension_numbers = #tpu.dot_dimension_numbers<[1], [0], [0], [1], [0, 0, 1, 1], [], []>} : vector<64x128xbf16>, vector<128x128xbf16>, vector<64x128xf32> -> vector<64x128xf32>
    %c0_6 = arith.constant 0 : index
    %c0_7 = arith.constant 0 : index
    %c1 = arith.constant 1 : index
    %c0_8 = arith.constant 0 : index
    %6 = vector.load %arg1[%c0_6, %c0_7, %c1, %c0_8] : memref<1x10x10x128xbf16, #tpu.memory_space<vmem>>, vector<1x8x8x128xbf16>
    %7 = vector.shape_cast %6 : vector<1x8x8x128xbf16> to vector<8x8x128xbf16>
    %8 = vector.shape_cast %7 : vector<8x8x128xbf16> to vector<64x128xbf16>
    %c1_9 = arith.constant 1 : index
    %c0_10 = arith.constant 0 : index
    %c0_11 = arith.constant 0 : index
    %9 = vector.load %arg2[%c1_9, %c0_10, %c0_11] : memref<9x128x128xbf16, #tpu.memory_space<vmem>>, vector<1x128x128xbf16>
    %10 = vector.shape_cast %9 : vector<1x128x128xbf16> to vector<128x128xbf16>
    %cst_12 = arith.constant dense<0.000000e+00> : vector<64x128xf32>
    %11 = tpu.matmul %8, %10, %cst_12 {dimension_numbers = #tpu.dot_dimension_numbers<[1], [0], [0], [1], [0, 0, 1, 1], [], []>} : vector<64x128xbf16>, vector<128x128xbf16>, vector<64x128xf32> -> vector<64x128xf32>
    %12 = arith.addf %5, %11 : vector<64x128xf32>
    %c0_13 = arith.constant 0 : index
    %c0_14 = arith.constant 0 : index
    %c2 = arith.constant 2 : index
    %c0_15 = arith.constant 0 : index
    %13 = vector.load %arg1[%c0_13, %c0_14, %c2, %c0_15] : memref<1x10x10x128xbf16, #tpu.memory_space<vmem>>, vector<1x8x8x128xbf16>
    %14 = vector.shape_cast %13 : vector<1x8x8x128xbf16> to vector<8x8x128xbf16>
    %15 = vector.shape_cast %14 : vector<8x8x128xbf16> to vector<64x128xbf16>
    %c2_16 = arith.constant 2 : index
    %c0_17 = arith.constant 0 : index
    %c0_18 = arith.constant 0 : index
    %16 = vector.load %arg2[%c2_16, %c0_17, %c0_18] : memref<9x128x128xbf16, #tpu.memory_space<vmem>>, vector<1x128x128xbf16>
    %17 = vector.shape_cast %16 : vector<1x128x128xbf16> to vector<128x128xbf16>
    %cst_19 = arith.constant dense<0.000000e+00> : vector<64x128xf32>
    %18 = tpu.matmul %15, %17, %cst_19 {dimension_numbers = #tpu.dot_dimension_numbers<[1], [0], [0], [1], [0, 0, 1, 1], [], []>} : vector<64x128xbf16>, vector<128x128xbf16>, vector<64x128xf32> -> vector<64x128xf32>
    %19 = arith.addf %12, %18 : vector<64x128xf32>
    %c0_20 = arith.constant 0 : index
    %c1_21 = arith.constant 1 : index
    %c0_22 = arith.constant 0 : index
    %c0_23 = arith.constant 0 : index
    %20 = vector.load %arg1[%c0_20, %c1_21, %c0_22, %c0_23] : memref<1x10x10x128xbf16, #tpu.memory_space<vmem>>, vector<1x8x8x128xbf16>
    %21 = vector.shape_cast %20 : vector<1x8x8x128xbf16> to vector<8x8x128xbf16>
    %22 = vector.shape_cast %21 : vector<8x8x128xbf16> to vector<64x128xbf16>
    %c3 = arith.constant 3 : index
    %c0_24 = arith.constant 0 : index
    %c0_25 = arith.constant 0 : index
    %23 = vector.load %arg2[%c3, %c0_24, %c0_25] : memref<9x128x128xbf16, #tpu.memory_space<vmem>>, vector<1x128x128xbf16>
    %24 = vector.shape_cast %23 : vector<1x128x128xbf16> to vector<128x128xbf16>
    %cst_26 = arith.constant dense<0.000000e+00> : vector<64x128xf32>
    %25 = tpu.matmul %22, %24, %cst_26 {dimension_numbers = #tpu.dot_dimension_numbers<[1], [0], [0], [1], [0, 0, 1, 1], [], []>} : vector<64x128xbf16>, vector<128x128xbf16>, vector<64x128xf32> -> vector<64x128xf32>
    %26 = arith.addf %19, %25 : vector<64x128xf32>
    %c0_27 = arith.constant 0 : index
    %c1_28 = arith.constant 1 : index
    %c1_29 = arith.constant 1 : index
    %c0_30 = arith.constant 0 : index
    %27 = vector.load %arg1[%c0_27, %c1_28, %c1_29, %c0_30] : memref<1x10x10x128xbf16, #tpu.memory_space<vmem>>, vector<1x8x8x128xbf16>
    %28 = vector.shape_cast %27 : vector<1x8x8x128xbf16> to vector<8x8x128xbf16>
    %29 = vector.shape_cast %28 : vector<8x8x128xbf16> to vector<64x128xbf16>
    %c4 = arith.constant 4 : index
    %c0_31 = arith.constant 0 : index
    %c0_32 = arith.constant 0 : index
    %30 = vector.load %arg2[%c4, %c0_31, %c0_32] : memref<9x128x128xbf16, #tpu.memory_space<vmem>>, vector<1x128x128xbf16>
    %31 = vector.shape_cast %30 : vector<1x128x128xbf16> to vector<128x128xbf16>
    %cst_33 = arith.constant dense<0.000000e+00> : vector<64x128xf32>
    %32 = tpu.matmul %29, %31, %cst_33 {dimension_numbers = #tpu.dot_dimension_numbers<[1], [0], [0], [1], [0, 0, 1, 1], [], []>} : vector<64x128xbf16>, vector<128x128xbf16>, vector<64x128xf32> -> vector<64x128xf32>
    %33 = arith.addf %26, %32 : vector<64x128xf32>
    %c0_34 = arith.constant 0 : index
    %c1_35 = arith.constant 1 : index
    %c2_36 = arith.constant 2 : index
    %c0_37 = arith.constant 0 : index
    %34 = vector.load %arg1[%c0_34, %c1_35, %c2_36, %c0_37] : memref<1x10x10x128xbf16, #tpu.memory_space<vmem>>, vector<1x8x8x128xbf16>
    %35 = vector.shape_cast %34 : vector<1x8x8x128xbf16> to vector<8x8x128xbf16>
    %36 = vector.shape_cast %35 : vector<8x8x128xbf16> to vector<64x128xbf16>
    %c5 = arith.constant 5 : index
    %c0_38 = arith.constant 0 : index
    %c0_39 = arith.constant 0 : index
    %37 = vector.load %arg2[%c5, %c0_38, %c0_39] : memref<9x128x128xbf16, #tpu.memory_space<vmem>>, vector<1x128x128xbf16>
    %38 = vector.shape_cast %37 : vector<1x128x128xbf16> to vector<128x128xbf16>
    %cst_40 = arith.constant dense<0.000000e+00> : vector<64x128xf32>
    %39 = tpu.matmul %36, %38, %cst_40 {dimension_numbers = #tpu.dot_dimension_numbers<[1], [0], [0], [1], [0, 0, 1, 1], [], []>} : vector<64x128xbf16>, vector<128x128xbf16>, vector<64x128xf32> -> vector<64x128xf32>
    %40 = arith.addf %33, %39 : vector<64x128xf32>
    %c0_41 = arith.constant 0 : index
    %c2_42 = arith.constant 2 : index
    %c0_43 = arith.constant 0 : index
    %c0_44 = arith.constant 0 : index
    %41 = vector.load %arg1[%c0_41, %c2_42, %c0_43, %c0_44] : memref<1x10x10x128xbf16, #tpu.memory_space<vmem>>, vector<1x8x8x128xbf16>
    %42 = vector.shape_cast %41 : vector<1x8x8x128xbf16> to vector<8x8x128xbf16>
    %43 = vector.shape_cast %42 : vector<8x8x128xbf16> to vector<64x128xbf16>
    %c6 = arith.constant 6 : index
    %c0_45 = arith.constant 0 : index
    %c0_46 = arith.constant 0 : index
    %44 = vector.load %arg2[%c6, %c0_45, %c0_46] : memref<9x128x128xbf16, #tpu.memory_space<vmem>>, vector<1x128x128xbf16>
    %45 = vector.shape_cast %44 : vector<1x128x128xbf16> to vector<128x128xbf16>
    %cst_47 = arith.constant dense<0.000000e+00> : vector<64x128xf32>
    %46 = tpu.matmul %43, %45, %cst_47 {dimension_numbers = #tpu.dot_dimension_numbers<[1], [0], [0], [1], [0, 0, 1, 1], [], []>} : vector<64x128xbf16>, vector<128x128xbf16>, vector<64x128xf32> -> vector<64x128xf32>
    %47 = arith.addf %40, %46 : vector<64x128xf32>
    %c0_48 = arith.constant 0 : index
    %c2_49 = arith.constant 2 : index
    %c1_50 = arith.constant 1 : index
    %c0_51 = arith.constant 0 : index
    %48 = vector.load %arg1[%c0_48, %c2_49, %c1_50, %c0_51] : memref<1x10x10x128xbf16, #tpu.memory_space<vmem>>, vector<1x8x8x128xbf16>
    %49 = vector.shape_cast %48 : vector<1x8x8x128xbf16> to vector<8x8x128xbf16>
    %50 = vector.shape_cast %49 : vector<8x8x128xbf16> to vector<64x128xbf16>
    %c7 = arith.constant 7 : index
    %c0_52 = arith.constant 0 : index
    %c0_53 = arith.constant 0 : index
    %51 = vector.load %arg2[%c7, %c0_52, %c0_53] : memref<9x128x128xbf16, #tpu.memory_space<vmem>>, vector<1x128x128xbf16>
    %52 = vector.shape_cast %51 : vector<1x128x128xbf16> to vector<128x128xbf16>
    %cst_54 = arith.constant dense<0.000000e+00> : vector<64x128xf32>
    %53 = tpu.matmul %50, %52, %cst_54 {dimension_numbers = #tpu.dot_dimension_numbers<[1], [0], [0], [1], [0, 0, 1, 1], [], []>} : vector<64x128xbf16>, vector<128x128xbf16>, vector<64x128xf32> -> vector<64x128xf32>
    %54 = arith.addf %47, %53 : vector<64x128xf32>
    %c0_55 = arith.constant 0 : index
    %c2_56 = arith.constant 2 : index
    %c2_57 = arith.constant 2 : index
    %c0_58 = arith.constant 0 : index
    %55 = vector.load %arg1[%c0_55, %c2_56, %c2_57, %c0_58] : memref<1x10x10x128xbf16, #tpu.memory_space<vmem>>, vector<1x8x8x128xbf16>
    %56 = vector.shape_cast %55 : vector<1x8x8x128xbf16> to vector<8x8x128xbf16>
    %57 = vector.shape_cast %56 : vector<8x8x128xbf16> to vector<64x128xbf16>
    %c8 = arith.constant 8 : index
    %c0_59 = arith.constant 0 : index
    %c0_60 = arith.constant 0 : index
    %58 = vector.load %arg2[%c8, %c0_59, %c0_60] : memref<9x128x128xbf16, #tpu.memory_space<vmem>>, vector<1x128x128xbf16>
    %59 = vector.shape_cast %58 : vector<1x128x128xbf16> to vector<128x128xbf16>
    %cst_61 = arith.constant dense<0.000000e+00> : vector<64x128xf32>
    %60 = tpu.matmul %57, %59, %cst_61 {dimension_numbers = #tpu.dot_dimension_numbers<[1], [0], [0], [1], [0, 0, 1, 1], [], []>} : vector<64x128xbf16>, vector<128x128xbf16>, vector<64x128xf32> -> vector<64x128xf32>
    %61 = arith.addf %54, %60 : vector<64x128xf32>
    %c0_62 = arith.constant 0 : index
    %c0_63 = arith.constant 0 : index
    %62 = vector.load %arg3[%c0_62, %c0_63] : memref<1x128xf32, #tpu.memory_space<vmem>>, vector<1x128xf32>
    %63 = vector.broadcast %62 : vector<1x128xf32> to vector<64x128xf32>
    %64 = arith.addf %61, %63 : vector<64x128xf32>
    %cst_64 = arith.constant 0.000000e+00 : f32
    %65 = vector.broadcast %cst_64 : f32 to vector<64x128xf32>
    %66 = arith.maximumf %64, %65 : vector<64x128xf32>
    %67 = arith.truncf %66 : vector<64x128xf32> to vector<64x128xbf16>
    %c0_65 = arith.constant 0 : index
    %c0_66 = arith.constant 0 : index
    %68 = vector.load %arg4[%c0_65, %c0_66] : memref<128x128xbf16, #tpu.memory_space<vmem>>, vector<128x128xbf16>
    %cst_67 = arith.constant dense<0.000000e+00> : vector<64x128xf32>
    %69 = tpu.matmul %67, %68, %cst_67 {dimension_numbers = #tpu.dot_dimension_numbers<[1], [0], [0], [1], [0, 0, 1, 1], [], []>} : vector<64x128xbf16>, vector<128x128xbf16>, vector<64x128xf32> -> vector<64x128xf32>
    %c0_68 = arith.constant 0 : index
    %c0_69 = arith.constant 0 : index
    %70 = vector.load %arg5[%c0_68, %c0_69] : memref<1x128xf32, #tpu.memory_space<vmem>>, vector<1x128xf32>
    %71 = vector.broadcast %70 : vector<1x128xf32> to vector<64x128xf32>
    %72 = arith.addf %69, %71 : vector<64x128xf32>
    %73 = vector.shape_cast %72 : vector<64x128xf32> to vector<1x8x8x128xf32>
    %c0_70 = arith.constant 0 : index
    %c0_71 = arith.constant 0 : index
    %c0_72 = arith.constant 0 : index
    %c0_73 = arith.constant 0 : index
    %74 = vector.load %arg6[%c0_70, %c0_71, %c0_72, %c0_73] : memref<1x8x8x128xf32, #tpu.memory_space<vmem>>, vector<1x8x8x128xf32>
    tpu.vector_store %arg6[%c0_70, %c0_71, %c0_72, %c0_73], %73 {strides = array<i32>} : memref<1x8x8x128xf32, #tpu.memory_space<vmem>>, vector<1x8x8x128xf32>,
    return
  }
  func.func @transform_0(%arg0: i32) -> (i32, i32, i32, i32) {
    %c0_i32 = arith.constant 0 : i32
    %c0_i32_0 = arith.constant 0 : i32
    %c0_i32_1 = arith.constant 0 : i32
    %c0_i32_2 = arith.constant 0 : i32
    return %arg0, %c0_i32, %c0_i32_0, %c0_i32_1 : i32, i32, i32, i32
  }
  func.func @transform_1(%arg0: i32) -> (i32, i32, i32) {
    %c0_i32 = arith.constant 0 : i32
    %c0_i32_0 = arith.constant 0 : i32
    %c0_i32_1 = arith.constant 0 : i32
    %c0_i32_2 = arith.constant 0 : i32
    return %c0_i32, %c0_i32_0, %c0_i32_1 : i32, i32, i32
  }
  func.func @transform_2(%arg0: i32) -> (i32, i32) {
    %c0_i32 = arith.constant 0 : i32
    %c0_i32_0 = arith.constant 0 : i32
    %c0_i32_1 = arith.constant 0 : i32
    return %c0_i32, %c0_i32_0 : i32, i32
  }
  func.func @transform_3(%arg0: i32) -> (i32, i32) {
    %c0_i32 = arith.constant 0 : i32
    %c0_i32_0 = arith.constant 0 : i32
    %c0_i32_1 = arith.constant 0 : i32
    return %c0_i32, %c0_i32_0 : i32, i32
  }
  func.func @transform_4(%arg0: i32) -> (i32, i32) {
    %c0_i32 = arith.constant 0 : i32
    %c0_i32_0 = arith.constant 0 : i32
    %c0_i32_1 = arith.constant 0 : i32
    return %c0_i32, %c0_i32_0 : i32, i32
  }
  func.func @transform_5(%arg0: i32) -> (i32, i32, i32, i32) {
    %c0_i32 = arith.constant 0 : i32
    %c0_i32_0 = arith.constant 0 : i32
    %c0_i32_1 = arith.constant 0 : i32
    %c0_i32_2 = arith.constant 0 : i32
    return %arg0, %c0_i32, %c0_i32_0, %c0_i32_1 : i32, i32, i32, i32
  }
}

module attributes {stable_mosaic.version = 11 : i64} {
  func.func @_argmax_kernel(%arg0: i32, %arg1: memref<40x256xf32, #tpu.memory_space<vmem>>, %arg2: memref<1x256xi32, #tpu.memory_space<vmem>>) attributes {dimension_semantics = [#tpu.dimension_semantics<parallel>], iteration_bounds = array<i64: 2>, scalar_prefetch = 0 : i64, scratch_operands = 0 : i64, tpu.core_type = #tpu.core_type<tc>, window_params = [{transform_indices = @transform_0, window_bounds = array<i64: 40, 256>}, {transform_indices = @transform_1, window_bounds = array<i64: 1, 256>}]} {
    %c0 = arith.constant 0 : index
    %c0_0 = arith.constant 0 : index
    %0 = vector.load %arg1[%c0, %c0_0] : memref<40x256xf32, #tpu.memory_space<vmem>>, vector<40x256xf32>
    %cst = arith.constant dense<0xFF800000> : vector<256xf32>
    %1 = vector.multi_reduction <maximumf>, %0, %cst [0] : vector<40x256xf32> to vector<256xf32>
    %2 = vector.shape_cast %1 : vector<256xf32> to vector<1x256xf32>
    %3 = tpu.iota {dimensions = array<i32: 0>} : vector<40x256xi32>
    %4 = vector.broadcast %2 : vector<1x256xf32> to vector<40x256xf32>
    %5 = arith.cmpf oeq, %0, %4 : vector<40x256xf32>
    %c40_i32 = arith.constant 40 : i32
    %6 = vector.broadcast %c40_i32 : i32 to vector<40x256xi32>
    %7 = arith.select %5, %3, %6 : vector<40x256xi1>, vector<40x256xi32>
    %cst_1 = arith.constant dense<2147483647> : vector<256xi32>
    %8 = vector.multi_reduction <minsi>, %7, %cst_1 [0] : vector<40x256xi32> to vector<256xi32>
    %9 = vector.shape_cast %8 : vector<256xi32> to vector<1x256xi32>
    %c0_2 = arith.constant 0 : index
    %c0_3 = arith.constant 0 : index
    %10 = vector.load %arg2[%c0_2, %c0_3] : memref<1x256xi32, #tpu.memory_space<vmem>>, vector<1x256xi32>
    tpu.vector_store %arg2[%c0_2, %c0_3], %9 {strides = array<i32>} : memref<1x256xi32, #tpu.memory_space<vmem>>, vector<1x256xi32>,
    return
  }
  func.func @transform_0(%arg0: i32) -> (i32, i32) {
    %c0_i32 = arith.constant 0 : i32
    %c0_i32_0 = arith.constant 0 : i32
    return %c0_i32, %arg0 : i32, i32
  }
  func.func @transform_1(%arg0: i32) -> (i32, i32) {
    %c0_i32 = arith.constant 0 : i32
    %c0_i32_0 = arith.constant 0 : i32
    return %c0_i32, %arg0 : i32, i32
  }
}

</mosaic_0001>

<bundles_post_ra>
// kernel: tpu_custom_call.1
= control target key start
LH: loop header
LB: loop body
LE: loop exit
PB: predicated region body
PF: predicated region fallthrough
CT: control target
= control target key end

     0   :  { %7 = vsyncpa [#allocation3], 0  ;;  %s690_s0 = inlined_call_operand.hbm [shape: f32[16,128], index: 0, kind: input, shape index: {}]   ;;  %s691_s1 = inlined_call_operand.hbm [shape: f32[8,128], index: 1, kind: input, shape index: {}]   ;;  %s692_s2 = inlined_call_operand.hbm [shape: f32[16,128], index: 2, kind: output, shape index: {}]  }
   0x1   :  { %9 = vsyncpa [#allocation3 + $0x1], 0 }
   0x2   :  { %10 = vsyncpa [#allocation6], 0 }
   0x3   :  { %11 = vsyncpa [#allocation4], 0 }
   0x4   :  { %13 = vsyncpa [#allocation4 + $0x1], 0  ;;  %s489_s9 = smov 0   ;;  %s491_s10 = smov 0  }
   0x5   :  { %s493_s11 = smov 0   ;;  %s495_s12 = smov 0  }
   0x6 LB: > { %s510_s13 = sadd.s32 4294967295, %s469_s12   ;;  %s270_s14 = sadd.s32 4294967294, %s469_s12   ;;  %s469_s12 = sphi %s495_s12, %s716_s12   ;;  %s465_s11 = sphi %s493_s11, %s715_s11   ;;  %s461_s10 = sphi %s491_s10, %s714_s10   ;;  %s457_s9 = sphi %s489_s9, %s713_s9  }
   0x7   : > { %p39_p0 = scmp.ne.s32.totalorder %s461_s10, %s457_s9  ;;  %p693_p1 = scmp.eq.s32.totalorder %s510_s13, 0 }
   0x8   : > { %p90_p3 = scmp.eq.s32.totalorder %s270_s14, 1  ;;  %p271_p5 = scmp.ge.s32.totalorder %s469_s12, 1 }
   0x9   : > { %p519_p4 = por %p693_p1, %p39_p0  ;;  %p97_p7 = scmp.lt.s32.totalorder %s469_s12, 3 }
   0xa   : > { %p524_p6 = por %p90_p3, %p39_p0  ;;  %s471_s18 = smov [#allocation5]  }
   0xb   : > { %s696_s15 = scalar_select %p519_p4, 1, 0 }
   0xc   : > { %s697_s16 = scalar_select %p524_p6, 1, 0 }
   0xd   : > { %p529_p8 = pnand %p271_p5, %p97_p7  ;;  %s110_s19 = sshll.u32 %s471_s18, 4  ;;  %s111_s19 = int_to_ptr.vmem [resolvable:$true] %s110_s19 }
   0xe   : > { %s537_s20 = sadd.s32 1, %s469_s12   ;;  %s26_s24 = sadd.s32 1, %s465_s11 }
   0xf   : > { %s698_s17 = scalar_select %p529_p8, 1, 0 }
  0x10   : > { %p292_p10 = pneg %p529_p8  ;;  %s23_s22 = ssub.s32 %s469_s12, %s537_s20 }
  0x11   : > { %p547_p12 = scmp.eq.s32.totalorder %s23_s22, 0  ;;  %s341_s27 = scalar_lea.hbm %s691_s1, 128 }
  0x12   : > { %p541_p11 = pnand %p292_p10, %p693_p1  ;;  %p342_p0 = scmp.ne.s32.totalorder %s691_s1, %s341_s27 }
  0x13   : > { %s700_s23 = scalar_select %p547_p12, 1, 0 }
  0x14   : > { %p343_p3 = pneg %p541_p11  ;;  %p348_p10 = scmp.lt.u32.totalorder %s341_s27, %s691_s1 }
  0x16   : > { %p344_p5 = pnand %p343_p3, %p342_p0 }
  0x18   : > { %p345_p7 = pneg %p344_p5 }
  0x1a   : > { %p350_p9 = pnand %p348_p10, %p345_p7 }
  0x1c   : > { %353 = shalt.err (!%p350_p9)
}
  0x1d   : > { %s354_s4 = scalar_lea.vmem %s111_s19, 128  ;;  %p362_p6 = scmp.lt.s32.totalorder %s111_s19, %s111_s19 }
  0x1e   : > { %p355_p1 = scmp.ne.s32.totalorder %s111_s19, %s354_s4  ;;  %p363_p4 = scmp.lt.s32.totalorder %s354_s4, %s354_s4 }
  0x20   : > { %p357_p2 = pnand %p355_p1, %p343_p3  ;;  %p364_p8 = por %p363_p4, %p362_p6 }
  0x22   : > { %p358_p13 = pneg %p357_p2 }
  0x24   : > { %p365_p12 = pnand %p364_p8, %p358_p13 }
  0x26   : > { %368 = shalt.err (!%p365_p12)
}
  0x27   : > { %295 = dma.hbm_to_vmem [thread:$0]  (!%p541_p11), %s691_s1, 128, %s111_s19, [#allocation6]  }
  0x28   : > { %p701_p1 = scmp.ne.s32.totalorder %s700_s23, 0  ;;  %p34_p2 = scmp.eq.s32.totalorder %s469_s12, 0 }
  0x29   : > { %p702_p4 = scmp.ne.s32.totalorder %s465_s11, %s461_s10  ;;  %p703_p6 = scmp.eq.s32.totalorder %s510_s13, 1 }
  0x2a   : > { %s573_s7 = scalar_select %p701_p1, %s465_s11, %s26_s24  }
  0x2b   : > { %p581_p8 = por %p703_p6, %p702_p4  ;;  %p305_p9 = scmp.lt.s32.totalorder %s469_s12, 2 }
  0x2c   : > { %s121_s14 = sand.u32 1, %s465_s11   ;;  %p705_p12 = pmov %p702_p4 }
  0x2d   : > { %s274_s18 = sshll.u32 %s121_s14, 3  ;;  %s275_s21 = sshll.u32 %s469_s12, 7 }
  0x2e   : > { %p35_p13 = por %p34_p2, %p705_p12  ;;  %s594_s19 = scalar_lea.hbm %s690_s0, %s275_s21 }
  0x2f   : > { %s125_s23 = scalar_lea.vmem [#allocation2], %s274_s18  ;;  %s122_s27 = scalar_lea.sflag [#allocation3], %s121_s14 }
  0x30   : > { %s132_s24 = sshll.u32 %s125_s23, 4  ;;  %p596_p11 = pnand %p305_p9, %p35_p13  ;;  %s600_s24 = int_to_ptr.vmem [resolvable:$true] %s132_s24 }
  0x31   : > { %s369_s28 = scalar_lea.hbm %s594_s19, 128  ;;  %s374_s3 = scalar_lea.hbm %s690_s0, 256 }
  0x32   : > { %p370_p0 = scmp.ne.s32.totalorder %s594_s19, %s369_s28  ;;  %p371_p3 = pneg %p596_p11 }
  0x33   : > { %p375_p10 = scmp.lt.u32.totalorder %s594_s19, %s690_s0  ;;  %p376_p1 = scmp.lt.u32.totalorder %s374_s3, %s369_s28 }
  0x34   : > { %p372_p5 = pnand %p371_p3, %p370_p0  ;;  %p378_p4 = scmp.lt.u32.totalorder %s369_s28, %s594_s19 }
  0x35   : > { %p377_p2 = por %p376_p1, %p375_p10 }
  0x36   : > { %p373_p7 = pneg %p372_p5 }
  0x37   : > { %p379_p6 = por %p378_p4, %p377_p2 }
  0x39   : > { %p380_p9 = pnand %p379_p6, %p373_p7 }
  0x3b   : > { %383 = shalt.err (!%p380_p9)
}
  0x3c   : > { %s384_s6 = scalar_lea.vmem %s600_s24, 128  ;;  %s472_s14 = smov [#allocation2]  }
  0x3d   : > { %p385_p12 = scmp.ne.s32.totalorder %s600_s24, %s384_s6  ;;  %s389_s18 = sshll.u32 %s472_s14, 4  ;;  %s390_s18 = int_to_ptr.vmem [resolvable:$false] %s389_s18 }
  0x3e   : > { %s391_s21 = scalar_lea.vmem %s390_s18, 256  ;;  %p392_p5 = scmp.lt.s32.totalorder %s600_s24, %s390_s18 }
  0x3f   : > { %p387_p13 = pnand %p385_p12, %p371_p3  ;;  %p393_p10 = scmp.lt.s32.totalorder %s391_s21, %s384_s6 }
  0x41   : > { %p388_p0 = pneg %p387_p13  ;;  %p394_p1 = por %p393_p10, %p392_p5 }
  0x43   : > { %p395_p2 = pnand %p394_p1, %p388_p0 }
  0x45   : > { %398 = shalt.err (!%p395_p2)
}
  0x46   : > { %299 = dma.hbm_to_vmem [thread:$0]  (!%p596_p11), %s594_s19, 128, %s600_s24, %s122_s27  }
  0x47   : > { %p707_p7 = scmp.ne.s32.totalorder %s698_s17, 0 }
  0x48   : > { %s630_s22 = sand.u32 (!%p707_p7), 1, %s461_s10   ;;  %p708_p3 = scmp.ne.s32.totalorder (!%p707_p7), %s696_s15, 0 }
  0x49   : > { %141 = sbr.rel (%p707_p7) target bundleno = 109 (0x6d), region = 28  ;;  %s277_s25 = sshll.u32 (!%p707_p7), %s630_s22, 3 }
  0x4a   : > { %s144_s23 = scalar_lea.sflag (!%p707_p7), [#allocation3], %s630_s22  ;;  %s147_s28 = scalar_lea.vmem (!%p707_p7), [#allocation2], %s277_s25 }
  0x50   : > { %444 = dma.done.wait (%p708_p3), %s144_s23, 128  }
  0x51   : > { %446 = vsyncadd (%p708_p3), %s144_s23, 4294967168  ;;  %p709_p4 = scmp.eq.s32.totalorder %s510_s13, 0 }
  0x53   : > { %448 = dma.done.wait (%p709_p4), [#allocation6], 128   ;;  %p710_p11 = pmov %p709_p4 }
  0x54   : > { %s171_s17 = scalar_lea.vmem [#allocation7], %s277_s25  ;;  %s281_s24 = sshll.u32 %s510_s13, 7  ;;  %v172_v0 = vld [vmem:[%s147_s28] sm:$0xff]  ;;  %v173_v1 = vld [vmem:[#allocation5] sm:$0xff] }
  0x55   : > { %450 = vsyncadd (%p710_p11), [#allocation6], 4294967168  ;;  %s190_s19 = sshll.u32 %s171_s17, 4  ;;  %v174_v2 = vadd.f32 %v173_v1, %v172_v0  ;;  %s648_s27 = scalar_lea.hbm %s692_s2, %s281_s24  ;;  %s643_s19 = int_to_ptr.vmem [resolvable:$true] %s190_s19 }
  0x56   : > { %s177_s29 = scalar_lea.sflag [#allocation4], %s630_s22  ;;  %s399_s30 = scalar_lea.vmem %s643_s19, 128 }
  0x57   : > { %175 = vst [vmem:[%s171_s17] sm:$0xff] %v174_v2  ;;  %p400_p6 = scmp.ne.s32.totalorder %s643_s19, %s399_s30  ;;  %s473_s13 = smov [#allocation7]  }
  0x58   : > { %s403_s3 = sshll.u32 %s473_s13, 4  ;;  %s404_s3 = int_to_ptr.vmem [resolvable:$false] %s403_s3 }
  0x59   : > { %p401_p9 = pnand %p400_p6, %p581_p8  ;;  %s405_s4 = scalar_lea.vmem %s404_s3, 256 }
  0x5a   : > { %p406_p13 = scmp.lt.s32.totalorder %s643_s19, %s404_s3  ;;  %p407_p0 = scmp.lt.s32.totalorder %s405_s4, %s399_s30 }
  0x5b   : > { %p402_p12 = pneg %p401_p9 }
  0x5c   : > { %p408_p5 = por %p407_p0, %p406_p13 }
  0x5e   : > { %p409_p10 = pnand %p408_p5, %p402_p12 }
  0x60   : > { %412 = shalt.err (!%p409_p10)
}
  0x61   : > { %s413_s5 = scalar_lea.hbm %s648_s27, 128  ;;  %s417_s18 = scalar_lea.hbm %s692_s2, 256 }
  0x62   : > { %p414_p1 = scmp.ne.s32.totalorder %s648_s27, %s413_s5  ;;  %p418_p3 = scmp.lt.u32.totalorder %s648_s27, %s692_s2 }
  0x63   : > { %p419_p4 = scmp.lt.u32.totalorder %s417_s18, %s413_s5  ;;  %p421_p6 = scmp.lt.u32.totalorder %s413_s5, %s648_s27 }
  0x64   : > { %p415_p2 = pnand %p414_p1, %p581_p8 }
  0x65   : > { %p420_p11 = por %p419_p4, %p418_p3 }
  0x66   : > { %p416_p7 = pneg %p415_p2 }
  0x67   : > { %p422_p9 = por %p421_p6, %p420_p11 }
  0x69   : > { %p423_p12 = pnand %p422_p9, %p416_p7 }
  0x6b   : > { %426 = shalt.err (!%p423_p12)
}
  0x6c   : > { %290 = dma.vmem_to_hbm [thread:$0]  (%p581_p8), %s643_s19, 128, %s648_s27, %s177_s29  }
  0x6d PF: > { %s202_s25 = sand.u32 1, %s457_s9   ;;  %p711_p13 = scmp.ne.s32.totalorder %s697_s16, 0 }
  0x6e   : > { %p712_p0 = scmp.ge.s32.totalorder %s469_s12, 2  ;;  %s203_s23 = scalar_lea.sflag [#allocation4], %s202_s25 }
  0x70   : > { %p301_p5 = pnand %p712_p0, %p711_p13 }
  0x72   : > { %452 = dma.done.wait (!%p301_p5), %s203_s23, 128  }
  0x73   : > { %454 = vsyncadd (!%p301_p5), %s203_s23, 4294967168  ;;  %p16_p10 = scmp.ge.s32.totalorder %s537_s20, 4   ;;  %s713_s9 = smov %s461_s10 }
  0x74   : > { %s714_s10 = smov %s465_s11  ;;  %s715_s11 = smov %s573_s7 }
  0x75   : > { %s716_s12 = smov %s537_s20  ;;  %18 = sbr.rel (!%p16_p10) target bundleno = 6 (0x6), region = 77 }
  0x7c   :  { %208 = vsyncpa [#allocation3], 1 }
  0x7d   :  { %210 = vsyncpa [#allocation3 + $0x1], 1 }
  0x7e   :  { %211 = vsyncpa [#allocation6], 1 }
  0x7f   :  { %212 = vsyncpa [#allocation4], 1 }
  0x80   :  { %214 = vsyncpa [#allocation4 + $0x1], 1 }

// kernel: da_concat_deeplabv3_forward.9
= control target key start
LH: loop header
LB: loop body
LE: loop exit
PB: predicated region body
PF: predicated region fallthrough
CT: control target
= control target key end

     0   :  { %8 = vsyncpa [#allocation3], 0  ;;  %s872_s0 = inlined_call_operand.vmem [shape: f32[128,27], index: 0, kind: input, shape index: {}]   ;;  %s873_s1 = inlined_call_operand.hbm [shape: bf16[27,128], index: 1, kind: input, shape index: {}]   ;;  %s874_s2 = inlined_call_operand.hbm [shape: f32[1,128], index: 2, kind: input, shape index: {}]   ;;  %s875_s3 = inlined_call_operand.vmem [shape: bf16[128,128], index: 3, kind: output, shape index: {}]  }
   0x1   :  { %9 = vsyncpa [#allocation5], 0  ;;  %s751_s12 = smov 0   ;;  %s753_s13 = smov 0  }
   0x2   :  { %s755_s14 = smov 0  }
   0x3 LB: > { %s505_s15 = sadd.s32 4294967295, %s724_s14   ;;  %s27_s16 = sadd.s32 1, %s720_s13  ;;  %s724_s14 = sphi %s755_s14, %s15_s14   ;;  %s720_s13 = sphi %s753_s13, %s885_s13   ;;  %s716_s12 = sphi %s751_s12, %s884_s12  }
   0x4   : > { %p29_p0 = scmp.ge.s32.totalorder %s27_s16, 2  ;;  %p507_p1 = scmp.ge.s32.totalorder %s724_s14, 1 }
   0x5   : > { %p138_p2 = scmp.lt.s32.totalorder %s724_s14, 3  ;;  %p776_p4 = scmp.eq.s32.totalorder %s505_s15, 0 }
   0x6   : > { %s887_s16 = smov (%p29_p0, %s27_s16), 0  ;;  %s726_s19 = smov [#allocation2]  }
   0x7   : > { %p772_p3 = pnand %p507_p1, %p138_p2  ;;  %s152_s20 = sshll.u32 %s726_s19, 4  ;;  %s153_s20 = int_to_ptr.vmem [resolvable:$true] %s152_s20 }
   0x8   : > { %s880_s18 = scalar_select %p776_p4, 1, 0 }
   0x9   : > { %s879_s17 = scalar_select %p772_p3, 1, 0 }
   0xa   : > { %p596_p5 = pneg %p772_p3  ;;  %s727_s22 = smov [#allocation4]  }
   0xb   : > { %s168_s23 = sshll.u32 %s727_s22, 4  ;;  %s638_s26 = scalar_lea.hbm %s873_s1, 256  ;;  %s788_s23 = int_to_ptr.vmem [resolvable:$true] %s168_s23 }
   0xc   : > { %p784_p6 = pnand %p776_p4, %p596_p5  ;;  %p639_p7 = scmp.ne.s32.totalorder %s873_s1, %s638_s26 }
   0xd   : > { %p645_p11 = scmp.lt.u32.totalorder %s638_s26, %s873_s1 }
   0xe   : > { %p640_p8 = pneg %p784_p6 }
  0x10   : > { %p641_p9 = pnand %p640_p8, %p639_p7 }
  0x12   : > { %p642_p10 = pneg %p641_p9 }
  0x14   : > { %p647_p12 = pnand %p645_p11, %p642_p10 }
  0x16   : > { %650 = shalt.err (!%p647_p12)
}
  0x17   : > { %s651_s4 = scalar_lea.vmem %s153_s20, 256  ;;  %p659_p2 = scmp.lt.s32.totalorder %s153_s20, %s153_s20 }
  0x18   : > { %p652_p13 = scmp.ne.s32.totalorder %s153_s20, %s651_s4  ;;  %p660_p5 = scmp.lt.s32.totalorder %s651_s4, %s651_s4 }
  0x1a   : > { %p654_p0 = pnand %p652_p13, %p640_p8  ;;  %p661_p4 = por %p660_p5, %p659_p2 }
  0x1c   : > { %p655_p1 = pneg %p654_p0 }
  0x1e   : > { %p662_p3 = pnand %p661_p4, %p655_p1 }
  0x20   : > { %665 = shalt.err (!%p662_p3)
}
  0x21   : > { %s728_s5 = smov 64   ;;  %s729_s6 = smov 4  }
  0x22   : > { %599 = dma.hbm_to_vmem [thread:$0]  (!%p784_p6), %s873_s1, 256, %s153_s20, [#allocation3], %s728_s5, %s728_s5, %s729_s6  }
  0x23   : > { %s666_s11 = scalar_lea.hbm %s874_s2, 16 }
  0x24   : > { %p667_p7 = scmp.ne.s32.totalorder %s874_s2, %s666_s11  ;;  %p673_p9 = scmp.lt.u32.totalorder %s666_s11, %s874_s2 }
  0x26   : > { %p669_p3 = pnand %p667_p7, %p640_p8 }
  0x28   : > { %p670_p4 = pneg %p669_p3 }
  0x2a   : > { %p675_p10 = pnand %p673_p9, %p670_p4 }
  0x2c   : > { %678 = shalt.err (!%p675_p10)
}
  0x2d   : > { %s679_s20 = scalar_lea.vmem %s788_s23, 16  ;;  %s686_s25 = scalar_lea.vmem %s788_s23, 32 }
  0x2e   : > { %p680_p11 = scmp.ne.s32.totalorder %s788_s23, %s679_s20  ;;  %p687_p0 = scmp.lt.s32.totalorder %s788_s23, %s788_s23 }
  0x2f   : > { %p688_p1 = scmp.lt.s32.totalorder %s686_s25, %s679_s20 }
  0x30   : > { %p682_p12 = pnand %p680_p11, %p640_p8 }
  0x31   : > { %p689_p2 = por %p688_p1, %p687_p0 }
  0x32   : > { %p683_p13 = pneg %p682_p12 }
  0x34   : > { %p690_p5 = pnand %p689_p2, %p683_p13 }
  0x36   : > { %693 = shalt.err (!%p690_p5)
}
  0x37   : > { %602 = dma.hbm_to_vmem [thread:$0]  (!%p784_p6), %s874_s2, 16, %s788_s23, [#allocation5]  }
  0x38   : > { %p882_p7 = scmp.ne.s32.totalorder %s879_s17, 0 }
  0x39   : > { %p883_p8 = scmp.ne.s32.totalorder (!%p882_p7), %s880_s18, 0 }
  0x3a   : > { %190 = sbr.rel (%p882_p7) target bundleno = 301 (0x12d), region = 32 }
  0x41   : > { %707 = dma.done.wait (%p883_p8), [#allocation3], 256  }
  0x42   : > { %709 = vsyncadd (%p883_p8), [#allocation3], 4294967040 }
  0x43   : > { %711 = dma.done.wait (%p883_p8), [#allocation5], 16  }
  0x44   : > { %713 = vsyncadd (%p883_p8), [#allocation5], 4294967280  ;;  %s514_s21 = sshll.u32 %s716_s12, 3  ;;  %vm284_vm0 = vcmask 1044480   ;;  %vm285_vm1 = vcmask 1045504   ;;  %v730_v0 = vmov 65535  }
  0x45   : > { %p222_p3 = scmp.lt.s32.totalorder %s514_s21, 15  ;;  %v286_v1 = vsel %vm284_vm0, 4294967295, %v730_v0  ;;  %v636_v2 = vld [vmem:[#allocation2] sm:$0xff]   ;;  %v637_v4 = vld [vmem:[#allocation2 + $0x8] sm:$0x3f]   ;;  %vm271_vm2 = vcmask 220160  }
  0x46   : > { %v287_v3 = vsel %vm285_vm1, %v286_v1, 0  ;;  %572 = vmatprep.subr.bf16.mxu0 %v636_v2  ;;  %584 = vmatprep.subr.bf16.mxu1 %v636_v2  ;;  %v518_v18 = vld [vmem:[#allocation4] ss:$0 sm:$0xff] }
  0x47   : > { %s889_s21 = smov (!%p222_p3, %s514_s21), 15  ;;  %573 = vmatpush3.bf16.msra.mxu0 %v636_v2  ;;  %586 = vmatpush3.bf16.msra.mxu1 %v636_v2  ;;  %v289_v8 = vand.u32 %v637_v4, %v287_v3 }
  0x48   : > { %s515_s17 = sshll.u32 %s889_s21, 3  ;;  %s517_s12 = sshll.u32 %s889_s21, 2 }
  0x49   : > { %s225_s29 = scalar_lea.vmem %s872_s0, %s515_s17  ;;  %574 = vmatprep.subr.bf16.mxu0 %v289_v8  ;;  %585 = vmatprep.subr.bf16.mxu1 %v289_v8  ;;  %s234_s4 = scalar_lea.vmem %s875_s3, %s517_s12 }
  0x4a   : > { %v237_v5 = vld [vmem:[%s225_s29] sm:$0xff]  ;;  %v238_v6 = vld [vmem:[%s225_s29 + $0x8] sm:$0xff]  ;;  %v239_v11 = vld [vmem:[%s225_s29 + $0x10] sm:$0xff] }
  0x4b   : > { %v241_v7 = vld [vmem:[%s225_s29 + $0x20] sm:$0xff]  ;;  %v245_v9 = vpack.c.bf16 %v238_v6, %v237_v5  ;;  %v242_v10 = vld [vmem:[%s225_s29 + $0x28] sm:$0xff]  ;;  %v240_v12 = vld [vmem:[%s225_s29 + $0x18] sm:$0xff]  ;;  %575 = vmatpush3.bf16.msra.mxu0 %v289_v8  ;;  %587 = vmatpush3.bf16.msra.mxu1 %v289_v8 }
  0x4c   : > { %v247_v13 = vpack.c.bf16 %v242_v10, %v241_v7  ;;  %v243_v14 = vld [vmem:[%s225_s29 + $0x30] sm:$0xff]  ;;  %v244_v15 = vld [vmem:[%s225_s29 + $0x38] sm:$0xff]  ;;  %v246_v16 = vpack.c.bf16 %v240_v12, %v239_v11 }
  0x4d   : > { %576 = vmatprep.mubr.msk.bf16.mxu0 %vm271_vm2, %v245_v9  ;;  %v248_v17 = vpack.c.bf16 %v244_v15, %v243_v14 }
  0x4e   : > { %580 = vmatprep.mubr.msk.bf16.mxu1 %vm271_vm2, %v247_v13  ;;  %577 = vmatmul.mubr.msk.bf16.vlgmr.msra.gmra.mrb[0].mxu0 %vm271_vm2, %v246_v16 }
  0x4f   : > { %581 = vmatmul.mubr.msk.bf16.vlgmr.msra.gmra.mrb[0].mxu1 %vm271_vm2, %v248_v17 }
 0x121   : > { %v578_v19 = vpop.f32.mrb[0].mxu0 }
 0x122   : > { %v582_v20 = vpop.f32.mrb[0].mxu1  ;;  %v334_v21 = vadd.f32 %v578_v19, %v518_v18  ;;  %v325_v23 = vpop.f32.mrb[1].mxu0 }
 0x123   : > { %v350_v22 = vadd.f32 %v582_v20, %v518_v18  ;;  %v341_v24 = vpop.f32.mrb[1].mxu1  ;;  %v326_v25 = vadd.f32 %v518_v18, %v325_v23  ;;  %v579_v27 = vpop.f32.mrb[2].mxu0 }
 0x124   : > { %v342_v26 = vadd.f32 %v518_v18, %v341_v24  ;;  %v583_v28 = vpop.f32.mrb[2].mxu1  ;;  %v337_v29 = vadd.f32 %v579_v27, %v518_v18  ;;  %v328_v31 = vpop.f32.mrb[3].mxu0  ;;  %v358_v35 = vmax.f32 %v334_v21, 0.0 }
 0x125   : > { %v353_v30 = vadd.f32 %v583_v28, %v518_v18  ;;  %v344_v32 = vpop.f32.mrb[3].mxu1  ;;  %v329_v33 = vadd.f32 %v518_v18, %v328_v31  ;;  %v362_v36 = vmax.f32 %v350_v22, 0.0  ;;  %v356_v39 = vmax.f32 %v326_v25, 0.0 }
 0x126   : > { %v345_v34 = vadd.f32 %v518_v18, %v344_v32  ;;  %v359_v37 = vmax.f32 %v337_v29, 0.0  ;;  %v360_v40 = vmax.f32 %v342_v26, 0.0 }
 0x127   : > { %v363_v38 = vmax.f32 %v353_v30, 0.0  ;;  %v357_v41 = vmax.f32 %v329_v33, 0.0 }
 0x128   : > { %v361_v42 = vmax.f32 %v345_v34, 0.0  ;;  %v551_v43 = vpack.c.bf16 %v359_v37, %v358_v35 }
 0x129   : > { %v561_v44 = vpack.c.bf16 %v363_v38, %v362_v36  ;;  %v546_v45 = vpack.c.bf16 %v357_v41, %v356_v39 }
 0x12a   : > { %v556_v46 = vpack.c.bf16 %v361_v42, %v360_v40  ;;  %563 = vst [vmem:[%s234_s4 + $0x8] sm:$0xff] %v551_v43  }
 0x12b   : > { %565 = vst [vmem:[%s234_s4 + $0x18] sm:$0xff] %v561_v44   ;;  %547 = vst [vmem:[%s234_s4] sm:$0xff] %v546_v45  }
 0x12c   : > { %564 = vst [vmem:[%s234_s4 + $0x10] sm:$0xff] %v556_v46  }
 0x12d PF: > { %s15_s14 = sadd.s32 1, %s724_s14   ;;  %s884_s12 = smov %s720_s13 }
 0x12e   : > { %p12_p6 = scmp.ge.s32.totalorder %s15_s14, 4   ;;  %s885_s13 = smov %s887_s16 }
 0x130   :  { %14 = sbr.rel (!%p12_p6) target bundleno = 3 (0x3), region = 73 }
 0x137   :  { %432 = vsyncpa [#allocation3], 1 }
 0x138   :  { %434 = vsyncpa [#allocation3 + $0x1], 1 }
 0x139   :  { %435 = vsyncpa [#allocation5], 1 }

// kernel: da_concat_deeplabv3_forward.8
= control target key start
LH: loop header
LB: loop body
LE: loop exit
PB: predicated region body
PF: predicated region fallthrough
CT: control target
= control target key end

     0   :  { %s648_s12 = smov 0   ;;  %s650_s13 = smov 0   ;;  %s694_s0 = inlined_call_operand.vmem [shape: f32[128,27], index: 0, kind: input, shape index: {}]   ;;  %s695_s1 = inlined_call_operand.vmem [shape: bf16[27,128], index: 1, kind: input, shape index: {}]   ;;  %s696_s2 = inlined_call_operand.vmem [shape: f32[1,128], index: 2, kind: input, shape index: {}]   ;;  %s697_s3 = inlined_call_operand.vmem [shape: bf16[128,128], index: 3, kind: output, shape index: {}]  }
   0x1   :  { %s652_s14 = smov 0  }
   0x2 LB: > { %s25_s15 = sadd.s32 1, %s621_s13  ;;  %p501_p0 = scmp.ge.s32.totalorder %s625_s14, 1  ;;  %s625_s14 = sphi %s652_s14, %s13_s14   ;;  %s621_s13 = sphi %s650_s13, %s699_s13   ;;  %s617_s12 = sphi %s648_s12, %s698_s12  }
   0x3   : > { %p27_p1 = scmp.ge.s32.totalorder %s25_s15, 2  ;;  %p169_p2 = scmp.lt.s32.totalorder %s625_s14, 3 }
   0x5   : > { %s701_s15 = smov (%p27_p1, %s25_s15), 0  ;;  %p170_p3 = pnand %p501_p0, %p169_p2 }
   0x6   : > { %v601_v0 = vld [vmem:[%s695_s1] sm:$0xff] (!%p170_p3)   ;;  %vm273_vm0 = vcmask (!%p170_p3), 1044480   ;;  %v602_v1 = vld [vmem:[%s695_s1 + $0x8] sm:$0x3f] (!%p170_p3)   ;;  %vm274_vm1 = vcmask (!%p170_p3), 1045504   ;;  %s502_s20 = sshll.u32 (!%p170_p3), %s617_s12, 3 }
   0x7   : > { %173 = sbr.rel (%p170_p3) target bundleno = 244 (0xf4), region = 32  ;;  %560 = vmatprep.subr.bf16.mxu0 (!%p170_p3), %v601_v0  ;;  %572 = vmatprep.subr.bf16.mxu1 (!%p170_p3), %v601_v0  ;;  %v627_v2 = vmov (!%p170_p3), 65535   ;;  %p204_p4 = scmp.lt.s32.totalorder (!%p170_p3), %s502_s20, 15  ;;  %vm260_vm2 = vcmask (!%p170_p3), 220160   ;;  %v506_v18 = vld [vmem:[%s696_s2] ss:$0 sm:$0xff] (!%p170_p3) }
   0x8   : > { %561 = vmatpush3.bf16.msra.mxu0 (!%p170_p3), %v601_v0  ;;  %574 = vmatpush3.bf16.msra.mxu1 (!%p170_p3), %v601_v0  ;;  %v275_v3 = vsel (!%p170_p3), %vm273_vm0, 4294967295, %v627_v2 }
   0x9   : > { %v276_v4 = vsel (!%p170_p3), %vm274_vm1, %v275_v3, 0 }
   0xa   : > { %v278_v5 = vand.u32 (!%p170_p3), %v602_v1, %v276_v4 }
   0xc   : > { %562 = vmatprep.subr.bf16.mxu0 (!%p170_p3), %v278_v5  ;;  %573 = vmatprep.subr.bf16.mxu1 (!%p170_p3), %v278_v5 }
   0xd   : > { %563 = vmatpush3.bf16.msra.mxu0 (!%p170_p3), %v278_v5  ;;  %575 = vmatpush3.bf16.msra.mxu1 (!%p170_p3), %v278_v5 }
   0xe   : > { %s703_s20 = smov (!%p204_p4, %s502_s20), 15 }
   0xf   : > { %s503_s21 = sshll.u32 %s703_s20, 3  ;;  %s505_s27 = sshll.u32 %s703_s20, 2 }
  0x10   : > { %s207_s24 = scalar_lea.vmem %s694_s0, %s503_s21  ;;  %s223_s30 = scalar_lea.vmem %s697_s3, %s505_s27 }
  0x11   : > { %v226_v6 = vld [vmem:[%s207_s24] sm:$0xff]  ;;  %v227_v7 = vld [vmem:[%s207_s24 + $0x8] sm:$0xff]  ;;  %v228_v11 = vld [vmem:[%s207_s24 + $0x10] sm:$0xff] }
  0x12   : > { %v230_v8 = vld [vmem:[%s207_s24 + $0x20] sm:$0xff]  ;;  %v234_v9 = vpack.c.bf16 %v227_v7, %v226_v6  ;;  %v231_v10 = vld [vmem:[%s207_s24 + $0x28] sm:$0xff]  ;;  %v229_v12 = vld [vmem:[%s207_s24 + $0x18] sm:$0xff] }
  0x13   : > { %v236_v13 = vpack.c.bf16 %v231_v10, %v230_v8  ;;  %v235_v14 = vpack.c.bf16 %v229_v12, %v228_v11  ;;  %v232_v15 = vld [vmem:[%s207_s24 + $0x30] sm:$0xff]  ;;  %v233_v16 = vld [vmem:[%s207_s24 + $0x38] sm:$0xff] }
  0x14   : > { %564 = vmatprep.mubr.msk.bf16.mxu0 %vm260_vm2, %v234_v9  ;;  %v237_v17 = vpack.c.bf16 %v233_v16, %v232_v15 }
  0x15   : > { %568 = vmatprep.mubr.msk.bf16.mxu1 %vm260_vm2, %v236_v13  ;;  %565 = vmatmul.mubr.msk.bf16.vlgmr.msra.gmra.mrb[0].mxu0 %vm260_vm2, %v235_v14 }
  0x16   : > { %569 = vmatmul.mubr.msk.bf16.vlgmr.msra.gmra.mrb[0].mxu1 %vm260_vm2, %v237_v17 }
  0xe8   : > { %v566_v19 = vpop.f32.mrb[0].mxu0 }
  0xe9   : > { %v323_v20 = vadd.f32 %v566_v19, %v506_v18  ;;  %v570_v21 = vpop.f32.mrb[0].mxu1  ;;  %v314_v22 = vpop.f32.mrb[1].mxu0 }
  0xea   : > { %v339_v23 = vadd.f32 %v570_v21, %v506_v18  ;;  %v315_v24 = vadd.f32 %v506_v18, %v314_v22  ;;  %v330_v25 = vpop.f32.mrb[1].mxu1  ;;  %v567_v26 = vpop.f32.mrb[2].mxu0 }
  0xeb   : > { %v331_v27 = vadd.f32 %v506_v18, %v330_v25  ;;  %v326_v28 = vadd.f32 %v567_v26, %v506_v18  ;;  %v571_v29 = vpop.f32.mrb[2].mxu1  ;;  %v317_v30 = vpop.f32.mrb[3].mxu0  ;;  %v347_v34 = vmax.f32 %v323_v20, 0.0 }
  0xec   : > { %v342_v31 = vadd.f32 %v571_v29, %v506_v18  ;;  %v318_v32 = vadd.f32 %v506_v18, %v317_v30  ;;  %v333_v33 = vpop.f32.mrb[3].mxu1  ;;  %v351_v37 = vmax.f32 %v339_v23, 0.0  ;;  %v345_v38 = vmax.f32 %v315_v24, 0.0 }
  0xed   : > { %v348_v35 = vmax.f32 %v326_v28, 0.0  ;;  %v334_v36 = vadd.f32 %v506_v18, %v333_v33  ;;  %v349_v41 = vmax.f32 %v331_v27, 0.0 }
  0xee   : > { %v352_v39 = vmax.f32 %v342_v31, 0.0  ;;  %v346_v40 = vmax.f32 %v318_v32, 0.0 }
  0xef   : > { %v539_v42 = vpack.c.bf16 %v348_v35, %v347_v34  ;;  %v350_v43 = vmax.f32 %v334_v36, 0.0 }
  0xf0   : > { %v549_v44 = vpack.c.bf16 %v352_v39, %v351_v37  ;;  %v534_v45 = vpack.c.bf16 %v346_v40, %v345_v38 }
  0xf1   : > { %551 = vst [vmem:[%s223_s30 + $0x8] sm:$0xff] %v539_v42   ;;  %v544_v46 = vpack.c.bf16 %v350_v43, %v349_v41 }
  0xf2   : > { %553 = vst [vmem:[%s223_s30 + $0x18] sm:$0xff] %v549_v44   ;;  %535 = vst [vmem:[%s223_s30] sm:$0xff] %v534_v45  }
  0xf3   : > { %552 = vst [vmem:[%s223_s30 + $0x10] sm:$0xff] %v544_v46  }
  0xf4 PF: > { %s13_s14 = sadd.s32 1, %s625_s14   ;;  %s698_s12 = smov %s621_s13 }
  0xf5   : > { %p10_p5 = scmp.ge.s32.totalorder %s13_s14, 4   ;;  %s699_s13 = smov %s701_s15 }
  0xf7   :  { %12 = sbr.rel (!%p10_p5) target bundleno = 2 (0x2), region = 68 }

// kernel: da_concat_deeplabv3_forward.10
= control target key start
LH: loop header
LB: loop body
LE: loop exit
PB: predicated region body
PF: predicated region fallthrough
CT: control target
= control target key end

     0   :  { %s1087_s18 = smov 0   ;;  %s1089_s19 = smov 0   ;;  %s1191_s0 = inlined_call_operand.vmem [shape: bf16[128,128], index: 0, kind: input, shape index: {}]   ;;  %s1192_s1 = inlined_call_operand.vmem [shape: bf16[128,128], index: 1, kind: input, shape index: {}]   ;;  %s1193_s2 = inlined_call_operand.vmem [shape: bf16[128,128], index: 2, kind: input, shape index: {}]   ;;  %s1194_s3 = inlined_call_operand.vmem [shape: bf16[128,128], index: 3, kind: input, shape index: {}]   ;;  %s1195_s4 = inlined_call_operand.vmem [shape: f32[1,128], index: 4, kind: input, shape index: {}]   ;;  %s1196_s5 = inlined_call_operand.vmem [shape: bf16[128,128], index: 5, kind: output, shape index: {}]  }
   0x1   :  { %s1091_s20 = smov 0  }
   0x2 LB: > { %s27_s21 = sadd.s32 1, %s1051_s19  ;;  %p832_p0 = scmp.ge.s32.totalorder %s1055_s20, 1  ;;  %s1055_s20 = sphi %s1091_s20, %s15_s20   ;;  %s1051_s19 = sphi %s1089_s19, %s1198_s19   ;;  %s1047_s18 = sphi %s1087_s18, %s1197_s18  }
   0x3   : > { %p29_p1 = scmp.ge.s32.totalorder %s27_s21, 2  ;;  %p239_p2 = scmp.lt.s32.totalorder %s1055_s20, 3 }
   0x5   : > { %s1200_s21 = smov (%p29_p1, %s27_s21), 0  ;;  %p240_p3 = pnand %p832_p0, %p239_p2 }
   0x6   : > { %v1009_v0 = vld [vmem:[%s1194_s3] sm:$0xff] (!%p240_p3)   ;;  %s833_s24 = sshll.u32 (!%p240_p3), %s1047_s18, 3  ;;  %v1011_v2 = vld [vmem:[%s1194_s3 + $0x8] sm:$0xff] (!%p240_p3)   ;;  %v1013_v4 = vld [vmem:[%s1194_s3 + $0x10] sm:$0xff] (!%p240_p3)  }
   0x7   : > { %243 = sbr.rel (%p240_p3) target bundleno = 270 (0x10e), region = 40  ;;  %v1010_v1 = vld [vmem:[%s1193_s2] sm:$0xff] (!%p240_p3)   ;;  %929 = vmatprep.subr.bf16.mxu1 (!%p240_p3), %v1009_v0  ;;  %p287_p4 = scmp.lt.s32.totalorder (!%p240_p3), %s833_s24, 15  ;;  %v1012_v3 = vld [vmem:[%s1193_s2 + $0x8] sm:$0xff] (!%p240_p3)   ;;  %v1014_v5 = vld [vmem:[%s1193_s2 + $0x10] sm:$0xff] (!%p240_p3)  }
   0x8   : > { %953 = vmatprep.subr.bf16.mxu0 (!%p240_p3), %v1010_v1  ;;  %930 = vmatpush3.bf16.msra.mxu1 (!%p240_p3), %v1009_v0  ;;  %v1015_v6 = vld [vmem:[%s1194_s3 + $0x18] sm:$0xff] (!%p240_p3)   ;;  %v1017_v8 = vld [vmem:[%s1194_s3 + $0x20] sm:$0xff] (!%p240_p3)   ;;  %v1019_v10 = vld [vmem:[%s1194_s3 + $0x28] sm:$0xff] (!%p240_p3)  }
   0x9   : > { %954 = vmatpush3.bf16.msra.mxu0 (!%p240_p3), %v1010_v1  ;;  %931 = vmatprep.subr.bf16.mxu1 (!%p240_p3), %v1011_v2  ;;  %v1016_v7 = vld [vmem:[%s1193_s2 + $0x18] sm:$0xff] (!%p240_p3)   ;;  %v1018_v9 = vld [vmem:[%s1193_s2 + $0x20] sm:$0xff] (!%p240_p3)   ;;  %v1020_v11 = vld [vmem:[%s1193_s2 + $0x28] sm:$0xff] (!%p240_p3)  }
   0xa   : > { %955 = vmatprep.subr.bf16.mxu0 (!%p240_p3), %v1012_v3  ;;  %v1021_v14 = vld [vmem:[%s1194_s3 + $0x30] sm:$0xff] (!%p240_p3)   ;;  %v1023_v16 = vld [vmem:[%s1194_s3 + $0x38] sm:$0xff] (!%p240_p3)   ;;  %v863_v30 = vld [vmem:[%s1195_s4] ss:$0 sm:$0xff] (!%p240_p3) }
   0xb   : > { %v1022_v15 = vld [vmem:[%s1193_s2 + $0x30] sm:$0xff] (!%p240_p3)   ;;  %v1024_v17 = vld [vmem:[%s1193_s2 + $0x38] sm:$0xff] (!%p240_p3)  }
   0xc   : > { %932 = vmatpush3.bf16.msra.mxu1 (!%p240_p3), %v1011_v2 }
   0xd   : > { %956 = vmatpush3.bf16.msra.mxu0 (!%p240_p3), %v1012_v3  ;;  %933 = vmatprep.subr.bf16.mxu1 (!%p240_p3), %v1013_v4 }
   0xe   : > { %s1202_s24 = smov (!%p287_p4, %s833_s24), 15  ;;  %957 = vmatprep.subr.bf16.mxu0 %v1014_v5 }
   0xf   : > { %s1129_s14 = sshll.u32 %s1202_s24, 2 }
  0x10   : > { %934 = vmatpush3.bf16.msra.mxu1 %v1013_v4  ;;  %s1141_s25 = scalar_lea.vmem %s1192_s1, %s1129_s14  ;;  %s1150_s29 = scalar_lea.vmem %s1191_s0, %s1129_s14 }
  0x11   : > { %958 = vmatpush3.bf16.msra.mxu0 %v1014_v5  ;;  %935 = vmatprep.subr.bf16.mxu1 %v1015_v6  ;;  %v1025_v12 = vld [vmem:[%s1141_s25] sm:$0xff]   ;;  %v1027_v18 = vld [vmem:[%s1141_s25 + $0x8] sm:$0xff]   ;;  %v1029_v20 = vld [vmem:[%s1141_s25 + $0x10] sm:$0xff]   ;;  %s316_s23 = scalar_lea.vmem %s1196_s5, %s1129_s14 }
  0x12   : > { %959 = vmatprep.subr.bf16.mxu0 %v1016_v7  ;;  %v1026_v13 = vld [vmem:[%s1150_s29] sm:$0xff]   ;;  %945 = vmatprep.mubr.bf16.mxu1 %v1025_v12  ;;  %v1028_v19 = vld [vmem:[%s1150_s29 + $0x8] sm:$0xff]   ;;  %v1030_v21 = vld [vmem:[%s1150_s29 + $0x10] sm:$0xff]  }
  0x13   : > { %969 = vmatprep.mubr.bf16.mxu0 %v1026_v13  ;;  %v1031_v22 = vld [vmem:[%s1141_s25 + $0x18] sm:$0xff]  }
  0x14   : > { %936 = vmatpush3.bf16.msra.mxu1 %v1015_v6  ;;  %v1032_v23 = vld [vmem:[%s1150_s29 + $0x18] sm:$0xff]  }
  0x15   : > { %960 = vmatpush3.bf16.msra.mxu0 %v1016_v7  ;;  %937 = vmatprep.subr.bf16.mxu1 %v1017_v8 }
  0x16   : > { %961 = vmatprep.subr.bf16.mxu0 %v1018_v9 }
  0x18   : > { %938 = vmatpush3.bf16.msra.mxu1 %v1017_v8 }
  0x19   : > { %962 = vmatpush3.bf16.msra.mxu0 %v1018_v9  ;;  %939 = vmatprep.subr.bf16.mxu1 %v1019_v10 }
  0x1a   : > { %963 = vmatprep.subr.bf16.mxu0 %v1020_v11 }
  0x1c   : > { %940 = vmatpush3.bf16.msra.mxu1 %v1019_v10 }
  0x1d   : > { %964 = vmatpush3.bf16.msra.mxu0 %v1020_v11  ;;  %941 = vmatprep.subr.bf16.mxu1 %v1021_v14 }
  0x1e   : > { %965 = vmatprep.subr.bf16.mxu0 %v1022_v15 }
  0x20   : > { %942 = vmatpush3.bf16.msra.mxu1 %v1021_v14 }
  0x21   : > { %966 = vmatpush3.bf16.msra.mxu0 %v1022_v15  ;;  %943 = vmatprep.subr.bf16.mxu1 %v1023_v16 }
  0x22   : > { %967 = vmatprep.subr.bf16.mxu0 %v1024_v17 }
  0x24   : > { %944 = vmatpush3.bf16.msra.mxu1 %v1023_v16 }
  0x25   : > { %968 = vmatpush3.bf16.msra.mxu0 %v1024_v17 }
  0x27   : > { %946 = vmatmul.mubr.bf16.vlgmr.msra.gmra.mrb[0].mxu1 %v1027_v18 }
  0x28   : > { %970 = vmatmul.mubr.bf16.vlgmr.msra.gmra.mrb[0].mxu0 %v1028_v19  ;;  %949 = vmatprep.mubr.bf16.mxu1 %v1029_v20 }
  0x29   : > { %973 = vmatprep.mubr.bf16.mxu0 %v1030_v21 }
  0x2f   : > { %950 = vmatmul.mubr.bf16.gmra.mrb[4].mxu1 %v1031_v22 }
  0x30   : > { %974 = vmatmul.mubr.bf16.gmra.mrb[4].mxu0 %v1032_v23 }
  0xfa   : > { %v947_v24 = vpop.f32.mrb[0].mxu1 }
  0xfb   : > { %v971_v25 = vpop.f32.mrb[0].mxu0  ;;  %v473_v26 = vpop.f32.mrb[1].mxu1 }
  0xfc   : > { %v619_v27 = vadd.f32 %v971_v25, %v947_v24  ;;  %v610_v28 = vpop.f32.mrb[1].mxu0  ;;  %v948_v29 = vpop.f32.mrb[2].mxu1 }
  0xfd   : > { %v611_v31 = vadd.f32 %v610_v28, %v473_v26  ;;  %v972_v32 = vpop.f32.mrb[2].mxu0  ;;  %v476_v33 = vpop.f32.mrb[3].mxu1 }
  0xfe   : > { %v622_v34 = vadd.f32 %v972_v32, %v948_v29  ;;  %v613_v35 = vpop.f32.mrb[3].mxu0  ;;  %v650_v37 = vadd.f32 %v863_v30, %v619_v27 }
  0xff   : > { %v614_v36 = vadd.f32 %v613_v35, %v476_v33  ;;  %v648_v39 = vadd.f32 %v863_v30, %v611_v31 }
 0x100   : > { %v651_v38 = vadd.f32 %v863_v30, %v622_v34 }
 0x101   : > { %v649_v40 = vadd.f32 %v863_v30, %v614_v36 }
 0x102   : > { %v890_v41 = vpack.c.bf16 %v651_v38, %v650_v37  ;;  %v951_v42 = vpop.f32.mrb[4].mxu1 }
 0x103   : > { %v885_v43 = vpack.c.bf16 %v649_v40, %v648_v39  ;;  %v975_v44 = vpop.f32.mrb[4].mxu0  ;;  %v489_v45 = vpop.f32.mrb[5].mxu1 }
 0x104   : > { %902 = vst [vmem:[%s316_s23 + $0x8] sm:$0xff] %v890_v41   ;;  %v635_v46 = vadd.f32 %v975_v44, %v951_v42  ;;  %v626_v47 = vpop.f32.mrb[5].mxu0  ;;  %v952_v48 = vpop.f32.mrb[6].mxu1 }
 0x105   : > { %886 = vst [vmem:[%s316_s23] sm:$0xff] %v885_v43   ;;  %v627_v49 = vadd.f32 %v626_v47, %v489_v45  ;;  %v976_v50 = vpop.f32.mrb[6].mxu0  ;;  %v492_v51 = vpop.f32.mrb[7].mxu1 }
 0x106   : > { %v638_v52 = vadd.f32 %v976_v50, %v952_v48  ;;  %v629_v53 = vpop.f32.mrb[7].mxu0  ;;  %v654_v55 = vadd.f32 %v863_v30, %v635_v46 }
 0x107   : > { %v630_v54 = vadd.f32 %v629_v53, %v492_v51  ;;  %v652_v57 = vadd.f32 %v863_v30, %v627_v49 }
 0x108   : > { %v655_v56 = vadd.f32 %v863_v30, %v638_v52 }
 0x109   : > { %v653_v58 = vadd.f32 %v863_v30, %v630_v54 }
 0x10a   : > { %v900_v59 = vpack.c.bf16 %v655_v56, %v654_v55 }
 0x10b   : > { %v895_v60 = vpack.c.bf16 %v653_v58, %v652_v57 }
 0x10c   : > { %904 = vst [vmem:[%s316_s23 + $0x18] sm:$0xff] %v900_v59  }
 0x10d   : > { %903 = vst [vmem:[%s316_s23 + $0x10] sm:$0xff] %v895_v60  }
 0x10e PF: > { %s15_s20 = sadd.s32 1, %s1055_s20   ;;  %s1197_s18 = smov %s1051_s19 }
 0x10f   : > { %p12_p5 = scmp.ge.s32.totalorder %s15_s20, 4   ;;  %s1198_s19 = smov %s1200_s21 }
 0x111   :  { %14 = sbr.rel (!%p12_p5) target bundleno = 2 (0x2), region = 82 }

// kernel: da_concat_deeplabv3_forward.11
= control target key start
LH: loop header
LB: loop body
LE: loop exit
PB: predicated region body
PF: predicated region fallthrough
CT: control target
= control target key end

     0   :  { %v130_v0 = vmov 0.0   ;;  %vm74_vm0 = vcmask 1041409   ;;  %s168_s0 = inlined_call_operand.vmem [shape: bf16[2,64,128], index: 0, kind: input, shape index: {}]   ;;  %s169_s1 = inlined_call_operand.vmem [shape: bf16[2,128], index: 1, kind: output, shape index: {}]  }
   0x1   :  { %12 = vst [vmem:[#allocation2] sm:$0x3] %v130_v0  ;;  %v91_v1 = vld [vmem:[%s168_s0] sm:$0xff]   ;;  %v122_v2 = vld [vmem:[%s168_s0 + $0x8] sm:$0xff]   ;;  %v123_v11 = vld [vmem:[%s168_s0 + $0x10] sm:$0xff]  }
   0x2   :  { %v92_v3 = vunpack.c.l.bf16 %v91_v1  ;;  %v93_v4 = vunpack.c.h.bf16 %v91_v1  ;;  %v125_v5 = vld [vmem:[%s168_s0 + $0x20] sm:$0xff]   ;;  %v126_v6 = vld [vmem:[%s168_s0 + $0x28] sm:$0xff]   ;;  %v96_v7 = vunpack.c.l.bf16 %v122_v2  ;;  %v127_v12 = vld [vmem:[%s168_s0 + $0x30] sm:$0xff]   ;;  %v97_v13 = vunpack.c.h.bf16 %v122_v2 }
   0x3   :  { %v108_v8 = vunpack.c.l.bf16 %v125_v5  ;;  %v109_v9 = vunpack.c.h.bf16 %v125_v5  ;;  %v112_v10 = vunpack.c.l.bf16 %v126_v6  ;;  %v113_v14 = vunpack.c.h.bf16 %v126_v6  ;;  %v124_v21 = vld [vmem:[%s168_s0 + $0x18] sm:$0xff]  }
   0x4   :  { %v46_v15 = vadd.f32 %v93_v4, %v92_v3  ;;  %v100_v17 = vunpack.c.l.bf16 %v123_v11  ;;  %v116_v18 = vunpack.c.l.bf16 %v127_v12  ;;  %v128_v22 = vld [vmem:[%s168_s0 + $0x38] sm:$0xff]   ;;  %v101_v23 = vunpack.c.h.bf16 %v123_v11 }
   0x5   :  { %v59_v16 = vadd.f32 %v109_v9, %v108_v8  ;;  %v117_v24 = vunpack.c.h.bf16 %v127_v12  ;;  %v104_v27 = vunpack.c.l.bf16 %v124_v21  ;;  %v120_v28 = vunpack.c.l.bf16 %v128_v22 }
   0x6   :  { %v47_v19 = vadd.f32 %v96_v7, %v46_v15  ;;  %v105_v31 = vunpack.c.h.bf16 %v124_v21  ;;  %v121_v32 = vunpack.c.h.bf16 %v128_v22 }
   0x7   :  { %v60_v20 = vadd.f32 %v112_v10, %v59_v16 }
   0x8   :  { %v48_v25 = vadd.f32 %v97_v13, %v47_v19  ;;  %v13_v49 = vld [vmem:[#allocation2] sm:$0x3] }
   0x9   :  { %v61_v26 = vadd.f32 %v113_v14, %v60_v20 }
   0xa   :  { %v49_v29 = vadd.f32 %v100_v17, %v48_v25 }
   0xb   :  { %v62_v30 = vadd.f32 %v116_v18, %v61_v26 }
   0xc   :  { %v50_v33 = vadd.f32 %v101_v23, %v49_v29 }
   0xd   :  { %v63_v34 = vadd.f32 %v117_v24, %v62_v30 }
   0xe   :  { %v51_v35 = vadd.f32 %v104_v27, %v50_v33 }
   0xf   :  { %v64_v36 = vadd.f32 %v120_v28, %v63_v34 }
  0x10   :  { %v52_v37 = vadd.f32 %v105_v31, %v51_v35 }
  0x11   :  { %v65_v38 = vadd.f32 %v121_v32, %v64_v36 }
  0x12   :  { %v53_v39 = vrot.slane %v52_v37, 4 }
  0x13   :  { %v66_v40 = vrot.slane %v65_v38, 4 }
  0x14   :  { %v54_v41 = vadd.f32 %v53_v39, %v52_v37 }
  0x15   :  { %v67_v42 = vadd.f32 %v66_v40, %v65_v38 }
  0x16   :  { %v55_v43 = vrot.slane %v54_v41, 2 }
  0x17   :  { %v68_v44 = vrot.slane %v67_v42, 2 }
  0x18   :  { %v56_v45 = vadd.f32 %v55_v43, %v54_v41 }
  0x19   :  { %v69_v46 = vadd.f32 %v68_v44, %v67_v42 }
  0x1a   :  { %v57_v47 = vrot.slane %v56_v45, 1 }
  0x1b   :  { %v70_v48 = vrot.slane %v69_v46, 1 }
  0x1c   :  { %v58_v50 = vadd.f32 %v57_v47, %v56_v45 }
  0x1d   :  { %v71_v51 = vadd.f32 %v70_v48, %v69_v46 }
  0x1f   :  { %v75_v52 = vsel %vm74_vm0, %v71_v51, %v58_v50 }
  0x20   :  { %v77_v53 = vadd.f32 %v75_v52, %v13_v49 }
  0x22   :  { %78 = vst [vmem:[#allocation2] sm:$0x3] %v77_v53 }
  0x29   :  { %v82_v54 = vld [vmem:[#allocation2] sm:$0x3] }
  0x2a   :  { %v83_v55 = vmul.f32 0.015625, %v82_v54 }
  0x2c   :  { %v84_v56 = vpack.c.bf16 %v83_v55, %v83_v55 }
  0x2e   :  { %85 = vst [vmem:[%s169_s1] sm:$0x1] %v84_v56 }

// kernel: da_concat_deeplabv3_forward.12
= control target key start
LH: loop header
LB: loop body
LE: loop exit
PB: predicated region body
PF: predicated region fallthrough
CT: control target
= control target key end

     0   :  { %v182_v0 = vmov 0.0   ;;  %vm183_vm0 = vmmov 0   ;;  %s237_s1 = inlined_call_operand.vmem [shape: bf16[128,128], index: 1, kind: input, shape index: {}]   ;;  %s238_s0 = inlined_call_operand.vmem [shape: bf16[8,128], index: 0, kind: input, shape index: {}]   ;;  %s239_s2 = inlined_call_operand.vmem [shape: f32[1,128], index: 2, kind: input, shape index: {}]   ;;  %s240_s3 = inlined_call_operand.vmem [shape: bf16[8,128], index: 3, kind: output, shape index: {}]  }
   0x1   :  { %152 = vmatprep.subr.bf16.mxu0 %v182_v0  ;;  %v174_v1 = vld [vmem:[%s237_s1] sm:$0xff]   ;;  %168 = vmatprep.mubr.msk.bf16.mxu0 %vm183_vm0, %v182_v0  ;;  %v175_v2 = vld [vmem:[%s237_s1 + $0x8] sm:$0xff]   ;;  %v176_v3 = vld [vmem:[%s237_s1 + $0x10] sm:$0xff]  }
   0x2   :  { %153 = vmatpush3.bf16.msra.mxu0 %v174_v1  ;;  %v177_v4 = vld [vmem:[%s237_s1 + $0x18] sm:$0xff]   ;;  %v178_v5 = vld [vmem:[%s237_s1 + $0x20] sm:$0xff]   ;;  %v179_v6 = vld [vmem:[%s237_s1 + $0x28] sm:$0xff]  }
   0x3   :  { %154 = vmatprep.subr.bf16.mxu0 %v182_v0  ;;  %v180_v7 = vld [vmem:[%s237_s1 + $0x30] sm:$0xff]   ;;  %v181_v8 = vld [vmem:[%s237_s1 + $0x38] sm:$0xff]   ;;  %v15_v9 = vld [vmem:[%s238_s0] sm:$0xf] }
   0x4   :  { %v134_v10 = vld [vmem:[%s239_s2] ss:$0 sm:$0xff] }
   0x6   :  { %155 = vmatpush3.bf16.msra.mxu0 %v175_v2 }
   0x7   :  { %156 = vmatprep.subr.bf16.mxu0 %v182_v0 }
   0xa   :  { %157 = vmatpush3.bf16.msra.mxu0 %v176_v3 }
   0xb   :  { %158 = vmatprep.subr.bf16.mxu0 %v182_v0 }
   0xe   :  { %159 = vmatpush3.bf16.msra.mxu0 %v177_v4 }
   0xf   :  { %160 = vmatprep.subr.bf16.mxu0 %v182_v0 }
  0x12   :  { %161 = vmatpush3.bf16.msra.mxu0 %v178_v5 }
  0x13   :  { %162 = vmatprep.subr.bf16.mxu0 %v182_v0 }
  0x16   :  { %163 = vmatpush3.bf16.msra.mxu0 %v179_v6 }
  0x17   :  { %164 = vmatprep.subr.bf16.mxu0 %v182_v0 }
  0x1a   :  { %165 = vmatpush3.bf16.msra.mxu0 %v180_v7 }
  0x1b   :  { %166 = vmatprep.subr.bf16.mxu0 %v182_v0 }
  0x1e   :  { %167 = vmatpush3.bf16.msra.mxu0 %v181_v8 }
  0x21   :  { %169 = vmatmul.mubr.bf16.vlgmr.msra.gmra.mrb[0].mxu0 %v15_v9 }
  0xf4   :  { %v121_v11 = vpop.f32.mrb[0].mxu0 }
  0xf5   :  { %v122_v12 = vadd.f32 %v134_v10, %v121_v11  ;;  %v170_v13 = vpop.f32.mrb[1].mxu0 }
  0xf6   :  { %v124_v14 = vpop.f32.mrb[2].mxu0 }
  0xf7   :  { %v127_v15 = vmax.f32 %v122_v12, 0.0  ;;  %v171_v16 = vpop.f32.mrb[3].mxu0 }
  0xf9   :  { %v128_v17 = vpack.c.bf16 %v127_v15, %v127_v15 }
  0xfb   :  { %129 = vst [vmem:[%s240_s3] sm:$0xf] %v128_v17 }

// kernel: da_concat_deeplabv3_forward.14
= control target key start
LH: loop header
LB: loop body
LE: loop exit
PB: predicated region body
PF: predicated region fallthrough
CT: control target
= control target key end

     0   :  { %s3329_s18 = smov 0   ;;  %s3928_s0 = inlined_call_operand.vmem [shape: bf16[2,10,10,128], index: 0, kind: input, shape index: {}]   ;;  %s3929_s1 = inlined_call_operand.vmem [shape: bf16[9,128,128], index: 1, kind: input, shape index: {}]   ;;  %s3930_s2 = inlined_call_operand.vmem [shape: f32[1,128], index: 2, kind: input, shape index: {}]   ;;  %s3931_s3 = inlined_call_operand.vmem [shape: bf16[128,128], index: 3, kind: input, shape index: {}]   ;;  %s3932_s4 = inlined_call_operand.vmem [shape: f32[1,128], index: 4, kind: input, shape index: {}]   ;;  %s3933_s5 = inlined_call_operand.vmem [shape: f32[2,8,8,128], index: 5, kind: output, shape index: {}]  }
   0x1 LB: > { %s2421_s19 = sadd.s32 4294967295, %s3297_s18   ;;  %p2425_p0 = scmp.ge.s32.totalorder %s3297_s18, 1  ;;  %s3297_s18 = sphi %s3329_s18, %s15_s18  }
   0x2   : > { %p187_p1 = scmp.lt.s32.totalorder %s3297_s18, 3 }
   0x4   : > { %p188_p2 = pnand %p2425_p0, %p187_p1 }
   0x5   : > { %v3199_v0 = vld [vmem:[%s3929_s1 + $0x40] sm:$0xff] (!%p188_p2)   ;;  %p215_p3 = scmp.lt.s32.totalorder (!%p188_p2), %s2421_s19, 1  ;;  %v3201_v2 = vld [vmem:[%s3929_s1 + $0x48] sm:$0xff] (!%p188_p2)   ;;  %v3203_v4 = vld [vmem:[%s3929_s1 + $0x50] sm:$0xff] (!%p188_p2)   ;;  %vm258_vm0 = vsmask.f32 (!%p188_p2), 3328 }
   0x6   : > { %191 = sbr.rel (%p188_p2) target bundleno = 622 (0x26e), region = 40  ;;  %v3200_v1 = vld [vmem:[%s3929_s1 + $0x100] sm:$0xff] (!%p188_p2)   ;;  %2886 = vmatprep.subr.bf16.mxu1 (!%p188_p2), %v3199_v0  ;;  %v3202_v3 = vld [vmem:[%s3929_s1 + $0x108] sm:$0xff] (!%p188_p2)   ;;  %v3204_v5 = vld [vmem:[%s3929_s1 + $0x110] sm:$0xff] (!%p188_p2)   ;;  %vm259_vm1 = vsmask.f32 (!%p188_p2), 7440 }
   0x7   : > { %2982 = vmatprep.subr.bf16.mxu0 (!%p188_p2), %v3200_v1  ;;  %2887 = vmatpush3.bf16.msra.mxu1 (!%p188_p2), %v3199_v0  ;;  %v3205_v6 = vld [vmem:[%s3929_s1 + $0x58] sm:$0xff] (!%p188_p2)   ;;  %v3207_v8 = vld [vmem:[%s3929_s1 + $0x60] sm:$0xff] (!%p188_p2)   ;;  %v3209_v10 = vld [vmem:[%s3929_s1 + $0x68] sm:$0xff] (!%p188_p2)   ;;  %vm680_vm3 = vcmask (!%p188_p2), 1042432   ;;  %vm681_vm4 = vcmask (!%p188_p2), 1046532  }
   0x8   : > { %2983 = vmatpush3.bf16.msra.mxu0 (!%p188_p2), %v3200_v1  ;;  %2888 = vmatprep.subr.bf16.mxu1 (!%p188_p2), %v3201_v2  ;;  %v3206_v7 = vld [vmem:[%s3929_s1 + $0x118] sm:$0xff] (!%p188_p2)   ;;  %v3208_v9 = vld [vmem:[%s3929_s1 + $0x120] sm:$0xff] (!%p188_p2)   ;;  %v3210_v14 = vld [vmem:[%s3929_s1 + $0x128] sm:$0xff] (!%p188_p2)  }
   0x9   : > { %2984 = vmatprep.subr.bf16.mxu0 (!%p188_p2), %v3202_v3  ;;  %v3211_v22 = vld [vmem:[%s3929_s1 + $0x70] sm:$0xff] (!%p188_p2)   ;;  %v3213_v37 = vld [vmem:[%s3929_s1 + $0x78] sm:$0xff] (!%p188_p2)   ;;  %vm3418_vm2 = vmor (!%p188_p2), %vm258_vm0, %vm259_vm1 }
   0xa   : > { %v3212_v23 = vld [vmem:[%s3929_s1 + $0x130] sm:$0xff] (!%p188_p2)   ;;  %v3214_v47 = vld [vmem:[%s3929_s1 + $0x138] sm:$0xff] (!%p188_p2)   ;;  %v3215_v63 = vld [vmem:[%s3929_s1] sm:$0xff] (!%p188_p2)  }
   0xb   : > { %2889 = vmatpush3.bf16.msra.mxu1 (!%p188_p2), %v3201_v2  ;;  %v3450_v1 = vld [vmem:[%s3929_s1 + $0x140] sm:$0xff] (!%p188_p2)   ;;  %vm3592_vm5 = vmor (!%p188_p2), %vm680_vm3, %vm681_vm4  ;;  %v3278_v38 = vld [vmem:[%s3929_s1 + $0x218] sm:$0xff] (!%p188_p2)  }
   0xc   : > { %2985 = vmatpush3.bf16.msra.mxu0 (!%p188_p2), %v3202_v3  ;;  %2890 = vmatprep.subr.bf16.mxu1 (!%p188_p2), %v3203_v4 }
   0xd   : > { %s3939_s19 = smov (!%p215_p3, %s2421_s19), 1  ;;  %2986 = vmatprep.subr.bf16.mxu0 %v3204_v5 }
   0xe   : > { %s3190_s11 = smul.u32 80, %s3939_s19  ;;  %s2765_s30 = sshll.u32 %s3939_s19, 6 }
   0xf   : > { %2891 = vmatpush3.bf16.msra.mxu1 %v3203_v4 }
  0x10   : > { %2987 = vmatpush3.bf16.msra.mxu0 %v3204_v5  ;;  %2892 = vmatprep.subr.bf16.mxu1 %v3205_v6  ;;  %s3373_s20 = scalar_lea.vmem %s3928_s0, %s3190_s11 }
  0x11   : > { %2988 = vmatprep.subr.bf16.mxu0 %v3206_v7  ;;  %v3379_v11 = vld [vmem:[%s3373_s20] sm:$0xf]  ;;  %v3382_v12 = vld [vmem:[%s3373_s20 + $0x8] sm:$0xf]  ;;  %v3385_v13 = vld [vmem:[%s3373_s20 + $0x4] sm:$0x1] }
  0x12   : > { %v3391_v15 = vld [vmem:[%s3373_s20 + $0xc] sm:$0x1]  ;;  %v262_v16 = vshrl.u32 %v3379_v11, 16  ;;  %v265_v17 = vshll.u32 %v3379_v11, 16  ;;  %v271_v18 = vshll.u32 %v3385_v13, 16  ;;  %v276_v19 = vshrl.u32 %v3382_v12, 16 }
  0x13   : > { %2893 = vmatpush3.bf16.msra.mxu1 %v3205_v6  ;;  %v279_v20 = vshll.u32 %v3382_v12, 16  ;;  %v285_v21 = vshll.u32 %v3391_v15, 16  ;;  %v2541_v30 = vld [vmem:[%s3373_s20 + $0x8] sm:$0xf]  ;;  %v3407_v31 = vld [vmem:[%s3373_s20 + $0xc] sm:$0x1] }
  0x14   : > { %2989 = vmatpush3.bf16.msra.mxu0 %v3206_v7  ;;  %2894 = vmatprep.subr.bf16.mxu1 %v3207_v8  ;;  %v264_v24 = vrot.slane %v262_v16, 4  ;;  %v267_v25 = vrot.slane %v265_v17, 5  ;;  %v273_v26 = vrot.slane %v271_v18, 5  ;;  %v278_v27 = vrot.slane %v276_v19, 4  ;;  %v2543_v33 = vld [vmem:[%s3373_s20 + $0x10] sm:$0xf] }
  0x15   : > { %2990 = vmatprep.subr.bf16.mxu0 %v3208_v9  ;;  %v281_v28 = vrot.slane %v279_v20, 5  ;;  %v287_v29 = vrot.slane %v285_v21, 5  ;;  %v3411_v34 = vld [vmem:[%s3373_s20 + $0x14] sm:$0x1]  ;;  %v1057_v35 = vshrl.u32 %v2541_v30, 16  ;;  %v1060_v36 = vshll.u32 %v2541_v30, 16 }
  0x16   : > { %v268_v32 = vor.u32 %v267_v25, %v264_v24  ;;  %v1066_v40 = vshll.u32 %v3407_v31, 16  ;;  %v1071_v41 = vshrl.u32 %v2543_v33, 16  ;;  %v1074_v42 = vshll.u32 %v2543_v33, 16  ;;  %v3428_v51 = vld [vmem:[%s3373_s20 + $0x10] sm:$0xf] }
  0x17   : > { %2895 = vmatpush3.bf16.msra.mxu1 %v3207_v8  ;;  %v282_v39 = vor.u32 %v281_v28, %v278_v27  ;;  %v1059_v44 = vrot.slane %v1057_v35, 4  ;;  %v1062_v45 = vrot.slane %v1060_v36, 5  ;;  %v1080_v46 = vshll.u32 %v3411_v34, 16  ;;  %v3433_v55 = vld [vmem:[%s3373_s20 + $0x18] sm:$0xf] }
  0x18   : > { %2991 = vmatpush3.bf16.msra.mxu0 %v3208_v9  ;;  %2896 = vmatprep.subr.bf16.mxu1 %v3209_v10  ;;  %v269_v43 = vrot.slane %v268_v32, 4  ;;  %v1073_v49 = vrot.slane %v1071_v41, 4  ;;  %v1076_v50 = vrot.slane %v1074_v42, 5  ;;  %v1068_v54 = vrot.slane %v1066_v40, 5  ;;  %v3436_v56 = vld [vmem:[%s3373_s20 + $0x14] sm:$0x1] }
  0x19   : > { %2992 = vmatprep.subr.bf16.mxu0 %v3210_v14  ;;  %v283_v48 = vrot.slane %v282_v39, 4  ;;  %v1063_v53 = vor.u32 %v1062_v45, %v1059_v44  ;;  %v1082_v59 = vrot.slane %v1080_v46, 5  ;;  %v3441_v60 = vld [vmem:[%s3373_s20 + $0x1c] sm:$0x1]  ;;  %v290_v61 = vshrl.u32 %v3428_v51, 16 }
  0x1a   : > { %v274_v52 = vsel %vm3418_vm2, %v269_v43, %v273_v26  ;;  %v1077_v58 = vor.u32 %v1076_v50, %v1073_v49  ;;  %v293_v2 = vshll.u32 %v3428_v51, 16  ;;  %v299_v3 = vshll.u32 %v3436_v56, 16  ;;  %v2545_v8 = vld [vmem:[%s3373_s20 + $0x18] sm:$0xf]  ;;  %v3461_v16 = vld [vmem:[%s3373_s20 + $0x1c] sm:$0x1] }
  0x1b   : > { %2897 = vmatpush3.bf16.msra.mxu1 %v3209_v10  ;;  %v288_v57 = vsel %vm3418_vm2, %v283_v48, %v287_v29  ;;  %v1064_v0 = vrot.slane %v1063_v53, 4  ;;  %v292_v5 = vrot.slane %v290_v61, 4  ;;  %v304_v6 = vshrl.u32 %v3433_v55, 16  ;;  %v2547_v17 = vld [vmem:[%s3373_s20 + $0x20] sm:$0xf]  ;;  %v3217_v43 = vld [vmem:[%s3929_s1 + $0x8] sm:$0xff]  }
  0x1c   : > { %2993 = vmatpush3.bf16.msra.mxu0 %v3210_v14  ;;  %2898 = vmatprep.subr.bf16.mxu1 %v3211_v22  ;;  %v2445_v62 = vcombine.low %v274_v52, %v288_v57  ;;  %v1078_v4 = vrot.slane %v1077_v58, 4  ;;  %v307_v7 = vshll.u32 %v3433_v55, 16  ;;  %v295_v10 = vrot.slane %v293_v2, 5  ;;  %v3467_v21 = vld [vmem:[%s3373_s20 + $0x24] sm:$0x1] }
  0x1d   : > { %2994 = vmatprep.subr.bf16.mxu0 %v3212_v23  ;;  %v1069_v9 = vsel %vm3418_vm2, %v1064_v0, %v1068_v54  ;;  %v313_v14 = vshll.u32 %v3441_v60, 16  ;;  %v306_v19 = vrot.slane %v304_v6, 4  ;;  %v301_v24 = vrot.slane %v299_v3, 5  ;;  %v3218_v54 = vld [vmem:[%s3929_s1 + $0x148] sm:$0xff]   ;;  %v3497_v0 = vld [vmem:[%s3373_s20 + $0x24] sm:$0x1] }
  0x1e   : > { %2902 = vmatprep.mubr.bf16.mxu1 %v2445_v62  ;;  %v1083_v18 = vsel %vm3418_vm2, %v1078_v4, %v1082_v59  ;;  %v309_v20 = vrot.slane %v307_v7, 5  ;;  %v1085_v27 = vshrl.u32 %v2545_v8, 16  ;;  %v1088_v28 = vshll.u32 %v2545_v8, 16  ;;  %v3219_v59 = vld [vmem:[%s3929_s1 + $0x10] sm:$0xff]   ;;  %v3491_v62 = vld [vmem:[%s3373_s20 + $0x20] sm:$0xf] }
  0x1f   : > { %2899 = vmatpush3.bf16.msra.mxu1 %v3211_v22  ;;  %v2573_v22 = vcombine.low %v1069_v9, %v1083_v18  ;;  %v315_v25 = vrot.slane %v313_v14, 5  ;;  %v1094_v29 = vshll.u32 %v3461_v16, 16  ;;  %v1099_v32 = vshrl.u32 %v2547_v17, 16  ;;  %v3500_v2 = vld [vmem:[%s3373_s20 + $0x2c] sm:$0x1]  ;;  %v3220_v9 = vld [vmem:[%s3929_s1 + $0x150] sm:$0xff]  }
  0x20   : > { %2995 = vmatpush3.bf16.msra.mxu0 %v3212_v23  ;;  %2900 = vmatprep.subr.bf16.mxu1 %v3213_v37  ;;  %v296_v23 = vor.u32 %v295_v10, %v292_v5  ;;  %v310_v26 = vor.u32 %v309_v20, %v306_v19  ;;  %v1102_v33 = vshll.u32 %v2547_v17, 16  ;;  %v1108_v35 = vshll.u32 %v3467_v21, 16  ;;  %v3221_v10 = vld [vmem:[%s3929_s1 + $0x18] sm:$0xff]  }
  0x21   : > { %2996 = vmatprep.subr.bf16.mxu0 %v3214_v47  ;;  %2998 = vmatprep.mubr.bf16.mxu0 %v2573_v22  ;;  %v1090_v39 = vrot.slane %v1088_v28, 5  ;;  %v1101_v41 = vrot.slane %v1099_v32, 4  ;;  %v1096_v46 = vrot.slane %v1094_v29, 5  ;;  %v1348_v57 = vrot.slane %v3407_v31, 5  ;;  %v3222_v29 = vld [vmem:[%s3929_s1 + $0x158] sm:$0xff]  }
  0x22   : > { %v297_v30 = vrot.slane %v296_v23, 4  ;;  %v311_v36 = vrot.slane %v310_v26, 4  ;;  %v1104_v42 = vrot.slane %v1102_v33, 5  ;;  %v318_v3 = vshrl.u32 %v3491_v62, 16  ;;  %v2549_v23 = vld [vmem:[%s3373_s20 + $0x28] sm:$0xf] }
  0x23   : > { %2901 = vmatpush3.bf16.msra.mxu1 %v3213_v37  ;;  %v1087_v37 = vrot.slane %v1085_v27, 4  ;;  %v321_v4 = vshll.u32 %v3491_v62, 16  ;;  %v327_v5 = vshll.u32 %v3497_v0, 16  ;;  %v341_v8 = vshll.u32 %v3500_v2, 16  ;;  %v3521_v26 = vld [vmem:[%s3373_s20 + $0x34] sm:$0x1] }
  0x24   : > { %2997 = vmatpush3.bf16.msra.mxu0 %v3214_v47  ;;  %2910 = vmatprep.subr.bf16.mxu1 %v3215_v63  ;;  %v302_v40 = vsel %vm3418_vm2, %v297_v30, %v301_v24  ;;  %v316_v44 = vsel %vm3418_vm2, %v311_v36, %v315_v25  ;;  %v1110_v47 = vrot.slane %v1108_v35, 5  ;;  %v1105_v49 = vor.u32 %v1104_v42, %v1101_v41  ;;  %v3517_v24 = vld [vmem:[%s3373_s20 + $0x2c] sm:$0x1]  ;;  %v2551_v25 = vld [vmem:[%s3373_s20 + $0x30] sm:$0xf]  ;;  %v3223_v30 = vld [vmem:[%s3929_s1 + $0x20] sm:$0xff]  }
  0x25   : > { %3006 = vmatprep.subr.bf16.mxu0 %v3450_v1  ;;  %v1091_v45 = vor.u32 %v1090_v39, %v1087_v37  ;;  %v2446_v48 = vcombine.low %v302_v40, %v316_v44  ;;  %v320_v14 = vrot.slane %v318_v3, 4  ;;  %v323_v17 = vrot.slane %v321_v4, 5 }
  0x26   : > { %v1106_v52 = vrot.slane %v1105_v49, 4  ;;  %v329_v18 = vrot.slane %v327_v5, 5  ;;  %v343_v22 = vrot.slane %v341_v8, 5  ;;  %v1113_v27 = vshrl.u32 %v2549_v23, 16  ;;  %v2553_v5 = vld [vmem:[%s3373_s20 + $0x38] sm:$0xf] }
  0x27   : > { %v1092_v50 = vrot.slane %v1091_v45, 4  ;;  %2903 = vmatmul.mubr.bf16.vlgmr.msra.gmra.mrb[0].mxu1 %v2446_v48  ;;  %v1116_v28 = vshll.u32 %v2549_v23, 16  ;;  %v1122_v33 = vshll.u32 %v3517_v24, 16  ;;  %v1127_v35 = vshrl.u32 %v2551_v25, 16 }
  0x28   : > { %2911 = vmatpush3.bf16.msra.mxu1 %v3215_v63  ;;  %v1111_v58 = vsel %vm3418_vm2, %v1106_v52, %v1110_v47  ;;  %v3494_v63 = vld [vmem:[%s3373_s20 + $0x28] sm:$0xf]  ;;  %v1130_v36 = vshll.u32 %v2551_v25, 16  ;;  %v1115_v39 = vrot.slane %v1113_v27, 4  ;;  %v1136_v41 = vshll.u32 %v3521_v26, 16 }
  0x29   : > { %v1097_v53 = vsel %vm3418_vm2, %v1092_v50, %v1096_v46  ;;  %2912 = vmatprep.subr.bf16.mxu1 %v3217_v43  ;;  %v332_v6 = vshrl.u32 %v3494_v63, 16  ;;  %v335_v7 = vshll.u32 %v3494_v63, 16  ;;  %v1118_v40 = vrot.slane %v1116_v28, 5  ;;  %v3532_v46 = vld [vmem:[%s3373_s20 + $0x30] sm:$0xf] }
  0x2a   : > { %v2574_v61 = vcombine.low %v1097_v53, %v1111_v58  ;;  %v1129_v44 = vrot.slane %v1127_v35, 4  ;;  %v1132_v45 = vrot.slane %v1130_v36, 5  ;;  %v1138_v49 = vrot.slane %v1136_v41, 5  ;;  %v3537_v50 = vld [vmem:[%s3373_s20 + $0x38] sm:$0xf] }
  0x2b   : > { %v334_v19 = vrot.slane %v332_v6, 4  ;;  %v337_v20 = vrot.slane %v335_v7, 5  ;;  %v1119_v48 = vor.u32 %v1118_v40, %v1115_v39  ;;  %v3540_v52 = vld [vmem:[%s3373_s20 + $0x34] sm:$0x1]  ;;  %v346_v53 = vshrl.u32 %v3532_v46, 16  ;;  %v3225_v6 = vld [vmem:[%s3929_s1 + $0x28] sm:$0xff]  }
  0x2c   : > { %2999 = vmatmul.mubr.bf16.vlgmr.msra.gmra.mrb[0].mxu0 %v2574_v61  ;;  %2913 = vmatpush3.bf16.msra.mxu1 %v3217_v43  ;;  %v1124_v43 = vrot.slane %v1122_v33, 5  ;;  %v3549_v61 = vld [vmem:[%s3373_s20 + $0x3c] sm:$0x1]  ;;  %v349_v3 = vshll.u32 %v3532_v46, 16  ;;  %v355_v4 = vshll.u32 %v3540_v52, 16  ;;  %v1141_v28 = vshrl.u32 %v2553_v5, 16 }
  0x2d   : > { %3007 = vmatpush3.bf16.msra.mxu0 %v3450_v1  ;;  %2914 = vmatprep.subr.bf16.mxu1 %v3219_v59  ;;  %v324_v1 = vor.u32 %v323_v17, %v320_v14  ;;  %v338_v32 = vor.u32 %v337_v20, %v334_v19  ;;  %v1120_v8 = vrot.slane %v1119_v48, 4  ;;  %v360_v14 = vshrl.u32 %v3537_v50, 16  ;;  %v3559_v17 = vld [vmem:[%s3373_s20 + $0x3c] sm:$0x1]  ;;  %v3567_v27 = vld [vmem:[%s3373_s20 + $0x44] sm:$0x1] }
  0x2e   : > { %3008 = vmatprep.subr.bf16.mxu0 %v3218_v54  ;;  %v351_v19 = vrot.slane %v349_v3, 5  ;;  %v357_v20 = vrot.slane %v355_v4, 5  ;;  %v369_v25 = vshll.u32 %v3549_v61, 16  ;;  %v1144_v36 = vshll.u32 %v2553_v5, 16 }
  0x2f   : > { %v325_v37 = vrot.slane %v324_v1, 4  ;;  %v339_v42 = vrot.slane %v338_v32, 4  ;;  %v1125_v23 = vsel %vm3418_vm2, %v1120_v8, %v1124_v43  ;;  %v362_v1 = vrot.slane %v360_v14, 4  ;;  %v3286_v8 = vld [vmem:[%s3931_s3 + $0x18] sm:$0xff]  }
  0x30   : > { %2915 = vmatpush3.bf16.msra.mxu1 %v3219_v59  ;;  %v1133_v59 = vor.u32 %v1132_v45, %v1129_v44  ;;  %v371_v40 = vrot.slane %v369_v25, 5  ;;  %v1143_v41 = vrot.slane %v1141_v28, 4  ;;  %v1146_v45 = vrot.slane %v1144_v36, 5  ;;  %v2587_v25 = vld [vmem:[%s3373_s20 + $0x18] sm:$0xe] }
  0x31   : > { %3009 = vmatpush3.bf16.msra.mxu0 %v3218_v54  ;;  %2916 = vmatprep.subr.bf16.mxu1 %v3221_v10  ;;  %v330_v47 = vsel %vm3418_vm2, %v325_v37, %v329_v18  ;;  %v3224_v54 = vld [vmem:[%s3929_s1 + $0x160] sm:$0xff]   ;;  %v344_v58 = vsel %vm3418_vm2, %v339_v42, %v343_v22  ;;  %v363_v22 = vshll.u32 %v3537_v50, 16  ;;  %v3227_v37 = vld [vmem:[%s3929_s1 + $0x30] sm:$0xff]   ;;  %v1150_v42 = vshll.u32 %v3559_v17, 16  ;;  %v3230_v28 = vld [vmem:[%s3929_s1 + $0x178] sm:$0xff]  }
  0x32   : > { %3010 = vmatprep.subr.bf16.mxu0 %v3220_v9  ;;  %v2447_v7 = vcombine.low %v330_v47, %v344_v58  ;;  %v1134_v18 = vrot.slane %v1133_v59, 4  ;;  %v1352_v47 = vrot.slane %v3411_v34, 5  ;;  %v1356_v48 = vrot.slane %v3461_v16, 5  ;;  %v3228_v58 = vld [vmem:[%s3929_s1 + $0x170] sm:$0xff]  }
  0x33   : > { %v365_v35 = vrot.slane %v363_v22, 5  ;;  %v1147_v4 = vor.u32 %v1146_v45, %v1143_v41  ;;  %v1152_v34 = vrot.slane %v1150_v42, 5  ;;  %v1360_v22 = vrot.slane %v3467_v21, 5  ;;  %v3233_v41 = vld [vmem:[%s3929_s1 + $0x180] sm:$0xff]  }
  0x34   : > { %2917 = vmatpush3.bf16.msra.mxu1 %v3221_v10  ;;  %v348_v10 = vrot.slane %v346_v53, 4  ;;  %2906 = vmatprep.mubr.bf16.mxu1 %v2447_v7  ;;  %v1139_v32 = vsel %vm3418_vm2, %v1134_v18, %v1138_v49  ;;  %v1164_v53 = vshll.u32 %v3567_v27, 16  ;;  %v2585_v7 = vld [vmem:[%s3373_s20 + $0x8] sm:$0xe]  ;;  %v2595_v36 = vrot.slane %v2587_v25, 9 }
  0x35   : > { %3011 = vmatpush3.bf16.msra.mxu0 %v3220_v9  ;;  %2918 = vmatprep.subr.bf16.mxu1 %v3223_v30  ;;  %v2555_v9 = vld [vmem:[%s3373_s20 + $0x40] sm:$0xf]  ;;  %v2575_v39 = vcombine.low %v1125_v23, %v1139_v32  ;;  %v366_v44 = vor.u32 %v365_v35, %v362_v1  ;;  %v2593_v14 = vrot.slane %v2585_v7, 9  ;;  %v1148_v18 = vrot.slane %v1147_v4, 4 }
  0x36   : > { %3012 = vmatprep.subr.bf16.mxu0 %v3222_v29  ;;  %v352_v33 = vor.u32 %v351_v19, %v348_v10  ;;  %v1158_v49 = vshll.u32 %v2555_v9, 16  ;;  %v2586_v10 = vld [vmem:[%s3373_s20 + $0x10] sm:$0xe]  ;;  %v2457_v19 = vcombine.low %v3379_v11, %v3382_v12  ;;  %v1166_v1 = vrot.slane %v1164_v53, 5  ;;  %v2588_v12 = vld [vmem:[%s3373_s20 + $0x20] sm:$0xe] }
  0x37   : > { %3002 = vmatprep.mubr.bf16.mxu0 %v2575_v39  ;;  %v367_v3 = vrot.slane %v366_v44, 4  ;;  %v1349_v32 = vsel %vm3592_vm5, %v2593_v14, %v1348_v57  ;;  %v1153_v21 = vsel %vm3418_vm2, %v1148_v18, %v1152_v34  ;;  %v3232_v35 = vld [vmem:[%s3929_s1 + $0x80] sm:$0xff]   ;;  %v1357_v42 = vsel %vm3592_vm5, %v2595_v36, %v1356_v48  ;;  %v3237_v44 = vld [vmem:[%s3929_s1 + $0x90] sm:$0xff]  }
  0x38   : > { %2919 = vmatpush3.bf16.msra.mxu1 %v3223_v30  ;;  %v3226_v30 = vld [vmem:[%s3929_s1 + $0x168] sm:$0xff]   ;;  %v353_v43 = vrot.slane %v352_v33, 4  ;;  %v1160_v16 = vrot.slane %v1158_v49, 5  ;;  %v1364_v45 = vrot.slane %v3517_v24, 5  ;;  %v1372_v53 = vrot.slane %v3559_v17, 5  ;;  %v3241_v18 = vld [vmem:[%s3929_s1 + $0xa0] sm:$0xff]  }
  0x39   : > { %3013 = vmatpush3.bf16.msra.mxu0 %v3222_v29  ;;  %2920 = vmatprep.subr.bf16.mxu1 %v3225_v6  ;;  %v1155_v29 = vshrl.u32 %v2555_v9, 16  ;;  %v1376_v24 = vrot.slane %v3567_v27, 5  ;;  %v689_v34 = vrot.slane %v3391_v15, 5  ;;  %v693_v17 = vrot.slane %v3436_v56, 5  ;;  %v657_v15 = vld [vmem:[%s3373_s20 + $0x8] sm:$0xe] }
  0x3a   : > { %3014 = vmatprep.subr.bf16.mxu0 %v3224_v54  ;;  %v358_v59 = vsel %vm3418_vm2, %v353_v43, %v357_v20  ;;  %v2594_v20 = vrot.slane %v2586_v10, 9  ;;  %v3235_v43 = vld [vmem:[%s3929_s1 + $0x88] sm:$0xff]   ;;  %v3238_v10 = vld [vmem:[%s3929_s1 + $0x190] sm:$0xff]   ;;  %v2470_v14 = vrot.slane %v657_v15, 9  ;;  %v660_v36 = vld [vmem:[%s3373_s20 + $0x20] sm:$0xe] }
  0x3b   : > { %v1157_v5 = vrot.slane %v1155_v29, 4  ;;  %v1368_v29 = vrot.slane %v3521_v26, 5  ;;  %v2460_v26 = vcombine.low %v3532_v46, %v3537_v50  ;;  %v3239_v46 = vld [vmem:[%s3929_s1 + $0x98] sm:$0xff]  }
  0x3c   : > { %2921 = vmatpush3.bf16.msra.mxu1 %v3225_v6  ;;  %v3229_v6 = vld [vmem:[%s3929_s1 + $0x38] sm:$0xff]   ;;  %v1353_v11 = vsel %vm3592_vm5, %v2594_v20, %v1352_v47 }
  0x3d   : > { %3015 = vmatpush3.bf16.msra.mxu0 %v3224_v54  ;;  %2922 = vmatprep.subr.bf16.mxu1 %v3227_v37  ;;  %v372_v54 = vsel %vm3418_vm2, %v367_v3, %v371_v40  ;;  %v1161_v23 = vor.u32 %v1160_v16, %v1157_v5  ;;  %v2617_v57 = vcombine.low %v1349_v32, %v1353_v11  ;;  %v656_v16 = vld [vmem:[%s3373_s20] sm:$0xe]  ;;  %v3240_v20 = vld [vmem:[%s3929_s1 + $0x198] sm:$0xff]  }
  0x3e   : > { %3016 = vmatprep.subr.bf16.mxu0 %v3226_v30  ;;  %v2448_v9 = vcombine.low %v358_v59, %v372_v54  ;;  %v2458_v40 = vcombine.low %v3428_v51, %v3433_v55  ;;  %v2459_v51 = vcombine.low %v3491_v62, %v3494_v63  ;;  %v685_v55 = vrot.slane %v3385_v13, 5  ;;  %v3236_v62 = vld [vmem:[%s3929_s1 + $0x188] sm:$0xff]   ;;  %v2590_v63 = vld [vmem:[%s3373_s20 + $0x30] sm:$0xe]  ;;  %v2592_v59 = vld [vmem:[%s3373_s20 + $0x40] sm:$0xe] }
  0x3f   : > { %v1162_v33 = vrot.slane %v1161_v23, 4  ;;  %v2589_v13 = vld [vmem:[%s3373_s20 + $0x28] sm:$0xe]  ;;  %v2598_v49 = vrot.slane %v2590_v63, 9  ;;  %v2600_v7 = vrot.slane %v2592_v59, 9  ;;  %v2469_v56 = vrot.slane %v656_v16, 9 }
  0x40   : > { %2923 = vmatpush3.bf16.msra.mxu1 %v3227_v37  ;;  %v2596_v37 = vrot.slane %v2588_v12, 9  ;;  %v2597_v48 = vrot.slane %v2589_v13, 9  ;;  %v697_v54 = vrot.slane %v3441_v60, 5  ;;  %v658_v23 = vld [vmem:[%s3373_s20 + $0x10] sm:$0xe]  ;;  %v3253_v63 = vld [vmem:[%s3929_s1 + $0x1c0] sm:$0xff]  }
  0x41   : > { %3017 = vmatpush3.bf16.msra.mxu0 %v3226_v30  ;;  %2907 = vmatmul.mubr.bf16.gmra.mrb[4].mxu1 %v2448_v9  ;;  %v1167_v31 = vsel %vm3418_vm2, %v1162_v33, %v1166_v1  ;;  %v1369_v4 = vsel %vm3592_vm5, %v2598_v49, %v1368_v29  ;;  %v690_v9 = vsel %vm3592_vm5, %v2470_v14, %v689_v34  ;;  %v659_v60 = vld [vmem:[%s3373_s20 + $0x18] sm:$0xe]  ;;  %v2471_v25 = vrot.slane %v658_v23, 9  ;;  %v3243_v33 = vld [vmem:[%s3929_s1 + $0xa8] sm:$0xff]   ;;  %v3740_v59 = vld [vmem:[%s3373_s20 + $0x1c] sm:$0x1] }
  0x42   : > { %3018 = vmatprep.subr.bf16.mxu0 %v3228_v58  ;;  %2924 = vmatprep.subr.bf16.mxu1 %v3229_v6  ;;  %v2576_v39 = vcombine.low %v1153_v21, %v1167_v31  ;;  %v1361_v30 = vsel %vm3592_vm5, %v2596_v37, %v1360_v22  ;;  %v1365_v3 = vsel %vm3592_vm5, %v2597_v48, %v1364_v45  ;;  %v3252_v32 = vld [vmem:[%s3373_s20 + $0x10] ss:$8 sps:$4 sm:$0xff]   ;;  %v661_v37 = vld [vmem:[%s3373_s20 + $0x28] sm:$0xe]  ;;  %v709_v45 = vrot.slane %v3540_v52, 5 }
  0x43   : > { %2926 = vmatprep.mubr.bf16.mxu1 %v2457_v19  ;;  %v2618_v47 = vcombine.low %v1357_v42, %v1361_v30  ;;  %v2619_v27 = vcombine.low %v1365_v3, %v1369_v4  ;;  %v686_v19 = vsel %vm3592_vm5, %v2469_v56, %v685_v55  ;;  %v694_v11 = vsel %vm3592_vm5, %v2471_v25, %v693_v17  ;;  %v3246_v31 = vld [vmem:[%s3929_s1 + $0xb0] sm:$0xff]   ;;  %v663_v55 = vld [vmem:[%s3373_s20 + $0x38] sm:$0xe]  ;;  %v3255_v52 = vld [vmem:[%s3929_s1 + $0xc8] sm:$0xff]  }
  0x44   : > { %2925 = vmatpush3.bf16.msra.mxu1 %v3229_v6  ;;  %3003 = vmatmul.mubr.bf16.gmra.mrb[4].mxu0 %v2576_v39  ;;  %v1377_v6 = vsel %vm3592_vm5, %v2600_v7, %v1376_v24  ;;  %v2493_v1 = vcombine.low %v686_v19, %v690_v9  ;;  %v3249_v39 = vld [vmem:[%s3929_s1 + $0xb8] sm:$0xff]   ;;  %v2474_v42 = vrot.slane %v661_v37, 9  ;;  %v705_v30 = vrot.slane %v3500_v2, 5  ;;  %v3254_v49 = vld [vmem:[%s3373_s20 + $0x20] ss:$8 sps:$4 sm:$0xff]   ;;  %v3258_v23 = vld [vmem:[%s3929_s1 + $0x1d0] sm:$0xff]  }
  0x45   : > { %3019 = vmatpush3.bf16.msra.mxu0 %v3228_v58  ;;  %2934 = vmatprep.subr.bf16.mxu1 %v3232_v35  ;;  %v2591_v58 = vld [vmem:[%s3373_s20 + $0x38] sm:$0xe]  ;;  %v2476_v13 = vrot.slane %v663_v55, 9  ;;  %v1743_v17 = vshll.u32 %v3740_v59, 16 }
  0x46   : > { %3020 = vmatprep.subr.bf16.mxu0 %v3230_v28  ;;  %3022 = vmatprep.mubr.bf16.mxu0 %v2617_v57  ;;  %v2599_v5 = vrot.slane %v2591_v58, 9  ;;  %v3244_v57 = vld [vmem:[%s3929_s1 + $0x1a8] sm:$0xff]   ;;  %v706_v2 = vsel %vm3592_vm5, %v2474_v42, %v705_v30  ;;  %v3250_v29 = vld [vmem:[%s3929_s1 + $0x1b8] sm:$0xff]   ;;  %v3262_v42 = vld [vmem:[%s3929_s1 + $0x1e0] sm:$0xff]  }
  0x47   : > { %v2667_v58 = vld [vmem:[%s3373_s20 + $0x18] sm:$0xf] }
  0x48   : > { %v1373_v50 = vsel %vm3592_vm5, %v2599_v5, %v1372_v53  ;;  %v2665_v53 = vld [vmem:[%s3373_s20 + $0x10] sm:$0xf]  ;;  %v1734_v7 = vshrl.u32 %v2667_v58, 16  ;;  %v1737_v34 = vshll.u32 %v2667_v58, 16  ;;  %v3798_v58 = vld [vmem:[%s3373_s20 + $0x3c] sm:$0x1] }
  0x49   : > { %3021 = vmatpush3.bf16.msra.mxu0 %v3230_v28  ;;  %2927 = vmatmul.mubr.bf16.vlgmr.msra.gmra.mrb[0].mxu1 %v2458_v40  ;;  %v2620_v22 = vcombine.low %v1373_v50, %v1377_v6  ;;  %v2472_v28 = vrot.slane %v659_v60, 9  ;;  %v2473_v40 = vrot.slane %v660_v36, 9  ;;  %v1720_v3 = vshrl.u32 %v2665_v53, 16  ;;  %v3256_v50 = vld [vmem:[%s3929_s1 + $0x1c8] sm:$0xff]   ;;  %v3266_v6 = vld [vmem:[%s3373_s20 + $0x30] ss:$8 sps:$4 sm:$0xff]  }
  0x4a   : > { %3030 = vmatprep.subr.bf16.mxu0 %v3233_v41  ;;  %2935 = vmatpush3.bf16.msra.mxu1 %v3232_v35  ;;  %v3242_v35 = vld [vmem:[%s3929_s1 + $0x1a0] sm:$0xff]   ;;  %v1723_v4 = vshll.u32 %v2665_v53, 16  ;;  %v1736_v15 = vrot.slane %v1734_v7, 4  ;;  %v1739_v56 = vrot.slane %v1737_v34, 5 }
  0x4b   : > { %2936 = vmatprep.subr.bf16.mxu1 %v3235_v43  ;;  %2930 = vmatprep.mubr.bf16.mxu1 %v2459_v51  ;;  %v698_v12 = vsel %vm3592_vm5, %v2472_v28, %v697_v54  ;;  %v662_v51 = vld [vmem:[%s3373_s20 + $0x30] sm:$0xe]  ;;  %v1722_v16 = vrot.slane %v1720_v3, 4  ;;  %v2669_v28 = vld [vmem:[%s3373_s20 + $0x20] sm:$0xf]  ;;  %v3269_v3 = vld [vmem:[%s3929_s1 + $0xf8] sm:$0xff]  }
  0x4c   : > { %3023 = vmatmul.mubr.bf16.vlgmr.msra.gmra.mrb[0].mxu0 %v2618_v47  ;;  %v2494_v21 = vcombine.low %v694_v11, %v698_v12  ;;  %v713_v47 = vrot.slane %v3549_v61, 5  ;;  %v3732_v61 = vld [vmem:[%s3373_s20 + $0x14] sm:$0x1]  ;;  %v1740_v19 = vor.u32 %v1739_v56, %v1736_v15  ;;  %v2671_v12 = vld [vmem:[%s3373_s20 + $0x28] sm:$0xf] }
  0x4d   : > { %3031 = vmatpush3.bf16.msra.mxu0 %v3233_v41  ;;  %3026 = vmatprep.mubr.bf16.mxu0 %v2619_v27  ;;  %v701_v41 = vrot.slane %v3497_v0, 5  ;;  %v1729_v5 = vshll.u32 %v3732_v61, 16  ;;  %v3257_v27 = vld [vmem:[%s3929_s1 + $0xd0] sm:$0xff]   ;;  %v1762_v36 = vshrl.u32 %v2671_v12, 16  ;;  %v1765_v37 = vshll.u32 %v2671_v12, 16 }
  0x4e   : > { %2937 = vmatpush3.bf16.msra.mxu1 %v3235_v43  ;;  %3032 = vmatprep.subr.bf16.mxu0 %v3236_v62  ;;  %v3247_v43 = vld [vmem:[%s3929_s1 + $0x1b0] sm:$0xff]   ;;  %v1741_v60 = vrot.slane %v1740_v19, 4  ;;  %v3805_v34 = vld [vmem:[%s3373_s20 + $0x44] sm:$0x1] }
  0x4f   : > { %2938 = vmatprep.subr.bf16.mxu1 %v3237_v44  ;;  %v702_v0 = vsel %vm3592_vm5, %v2473_v40, %v701_v41  ;;  %v1731_v54 = vrot.slane %v1729_v5, 5  ;;  %v3263_v40 = vld [vmem:[%s3929_s1 + $0xe8] sm:$0xff]   ;;  %v2675_v41 = vld [vmem:[%s3373_s20 + $0x38] sm:$0xf] }
  0x50   : > { %v2495_v48 = vcombine.low %v702_v0, %v706_v2  ;;  %v1793_v0 = vshll.u32 %v2675_v41, 16  ;;  %v3264_v2 = vld [vmem:[%s3929_s1 + $0x1e8] sm:$0xff]  }
  0x51   : > { %2931 = vmatmul.mubr.bf16.gmra.mrb[4].mxu1 %v2460_v26  ;;  %3033 = vmatpush3.bf16.msra.mxu0 %v3236_v62  ;;  %v2475_v62 = vrot.slane %v662_v51, 9  ;;  %v714_v26 = vsel %vm3592_vm5, %v2476_v13, %v713_v47  ;;  %v3265_v51 = vld [vmem:[%s3929_s1 + $0xf0] sm:$0xff]   ;;  %v1767_v13 = vrot.slane %v1765_v37, 5 }
  0x52   : > { %2939 = vmatpush3.bf16.msra.mxu1 %v3237_v44  ;;  %3034 = vmatprep.subr.bf16.mxu0 %v3238_v10  ;;  %v3251_v44 = vld [vmem:[%s3929_s1 + $0xc0] sm:$0xff]  }
  0x53   : > { %2940 = vmatprep.subr.bf16.mxu1 %v3239_v46  ;;  %2950 = vmatprep.mubr.bf16.mxu1 %v2493_v1  ;;  %v710_v24 = vsel %vm3592_vm5, %v2475_v62, %v709_v45  ;;  %v3268_v1 = vld [vmem:[%s3373_s20 + $0x40] ss:$8 sps:$4 sm:$0xff]   ;;  %v3790_v45 = vld [vmem:[%s3373_s20 + $0x2c] sm:$0x1]  ;;  %v1764_v62 = vrot.slane %v1762_v36, 4 }
  0x54   : > { %3027 = vmatmul.mubr.bf16.gmra.mrb[4].mxu0 %v2620_v22  ;;  %v3259_v22 = vld [vmem:[%s3929_s1 + $0xd8] sm:$0xff]   ;;  %v1771_v7 = vshll.u32 %v3790_v45, 16 }
  0x55   : > { %3035 = vmatpush3.bf16.msra.mxu0 %v3238_v10  ;;  %3046 = vmatprep.mubr.bf16.mxu0 %v3252_v32  ;;  %v2496_v10 = vcombine.low %v710_v24, %v714_v26  ;;  %v3260_v32 = vld [vmem:[%s3929_s1 + $0x1d8] sm:$0xff]   ;;  %v1795_v24 = vrot.slane %v1793_v0, 5  ;;  %v2679_v26 = vld [vmem:[%s3373_s20 + $0x48] sm:$0xf]  ;;  %v1768_v5 = vor.u32 %v1767_v13, %v1764_v62  ;;  %v2011_v13 = vrot.slane %v3732_v61, 5 }
  0x56   : > { %2941 = vmatpush3.bf16.msra.mxu1 %v3239_v46  ;;  %3036 = vmatprep.subr.bf16.mxu0 %v3240_v20  ;;  %v1725_v46 = vrot.slane %v1723_v4, 5 }
  0x57   : > { %2942 = vmatprep.subr.bf16.mxu1 %v3241_v18  ;;  %v1769_v19 = vrot.slane %v1768_v5, 4  ;;  %v3279_v5 = vld [vmem:[%s3929_s1 + $0x220] sm:$0xff]  }
  0x58   : > { %v1726_v14 = vor.u32 %v1725_v46, %v1722_v16  ;;  %v1818_v16 = vshrl.u32 %v2679_v26, 16  ;;  %v1821_v46 = vshll.u32 %v2679_v26, 16  ;;  %v3277_v26 = vld [vmem:[%s3929_s1 + $0x210] sm:$0xff]  }
  0x59   : > { %3037 = vmatpush3.bf16.msra.mxu0 %v3240_v20  ;;  %v1745_v20 = vrot.slane %v1743_v17, 5 }
  0x5a   : > { %2943 = vmatpush3.bf16.msra.mxu1 %v3241_v18  ;;  %3038 = vmatprep.subr.bf16.mxu0 %v3242_v35  ;;  %v3271_v18 = vld [vmem:[%s3373_s20 + $0x8] ss:$8 sps:$4 sm:$0xff]   ;;  %v1727_v9 = vrot.slane %v1726_v14, 4 }
  0x5b   : > { %2944 = vmatprep.subr.bf16.mxu1 %v3243_v33  ;;  %v1746_v11 = vsel %vm3418_vm2, %v1741_v60, %v1745_v20  ;;  %v1773_v20 = vrot.slane %v1771_v7, 5  ;;  %v3280_v7 = vld [vmem:[%s3929_s1 + $0x228] sm:$0xff]  }
  0x5c   : > { %v1732_v25 = vsel %vm3418_vm2, %v1727_v9, %v1731_v54  ;;  %v3270_v54 = vld [vmem:[%s3929_s1 + $0x1f8] sm:$0xff]  }
  0x5d   : > { %3039 = vmatpush3.bf16.msra.mxu0 %v3242_v35  ;;  %v3772_v35 = vld [vmem:[%s3373_s20 + $0x24] sm:$0x1]  ;;  %v3272_v9 = vld [vmem:[%s3373_s20 + $0x18] ss:$8 sps:$4 sm:$0xff]  }
  0x5e   : > { %2945 = vmatpush3.bf16.msra.mxu1 %v3243_v33  ;;  %3040 = vmatprep.subr.bf16.mxu0 %v3244_v57  ;;  %v2697_v33 = vcombine.low %v1732_v25, %v1746_v11  ;;  %v1757_v55 = vshll.u32 %v3772_v35, 16  ;;  %v1820_v25 = vrot.slane %v1818_v16, 4  ;;  %v2712_v16 = vld [vmem:[%s3373_s20 + $0x28] sm:$0xe] }
  0x5f   : > { %2946 = vmatprep.subr.bf16.mxu1 %v3246_v31 }
  0x60   : > { %v1759_v14 = vrot.slane %v1757_v55, 5 }
  0x61   : > { %3041 = vmatpush3.bf16.msra.mxu0 %v3244_v57  ;;  %v1751_v57 = vshll.u32 %v2669_v28, 16 }
  0x62   : > { %2947 = vmatpush3.bf16.msra.mxu1 %v3246_v31  ;;  %3042 = vmatprep.subr.bf16.mxu0 %v3247_v43  ;;  %v1748_v31 = vshrl.u32 %v2669_v28, 16  ;;  %v1823_v28 = vrot.slane %v1821_v46, 5  ;;  %v2713_v46 = vld [vmem:[%s3373_s20 + $0x30] sm:$0xe] }
  0x63   : > { %2948 = vmatprep.subr.bf16.mxu1 %v3249_v39  ;;  %v1753_v47 = vrot.slane %v1751_v57, 5 }
  0x65   : > { %3043 = vmatpush3.bf16.msra.mxu0 %v3247_v43 }
  0x66   : > { %2949 = vmatpush3.bf16.msra.mxu1 %v3249_v39  ;;  %3044 = vmatprep.subr.bf16.mxu0 %v3250_v29  ;;  %v2673_v39 = vld [vmem:[%s3373_s20 + $0x30] sm:$0xf] }
  0x67   : > { %2958 = vmatprep.subr.bf16.mxu1 %v3251_v44  ;;  %v1776_v30 = vshrl.u32 %v2673_v39, 16  ;;  %v1779_v43 = vshll.u32 %v2673_v39, 16  ;;  %v1774_v39 = vsel %vm3418_vm2, %v1769_v19, %v1773_v20  ;;  %v2031_v20 = vrot.slane %v3798_v58, 5 }
  0x69   : > { %2951 = vmatmul.mubr.bf16.vlgmr.msra.gmra.mrb[0].mxu1 %v2494_v21  ;;  %3045 = vmatpush3.bf16.msra.mxu0 %v3250_v29  ;;  %v3261_v21 = vld [vmem:[%s3929_s1 + $0xe0] sm:$0xff]   ;;  %v1750_v29 = vrot.slane %v1748_v31, 4 }
  0x6a   : > { %2959 = vmatpush3.bf16.msra.mxu1 %v3251_v44  ;;  %2954 = vmatprep.mubr.bf16.mxu1 %v2495_v48  ;;  %v1790_v44 = vshrl.u32 %v2675_v41, 16  ;;  %v1778_v48 = vrot.slane %v1776_v30, 4  ;;  %v3273_v31 = vld [vmem:[%s3929_s1 + $0x200] sm:$0xff]   ;;  %v1824_v41 = vor.u32 %v1823_v28, %v1820_v25  ;;  %v2710_v30 = vld [vmem:[%s3373_s20 + $0x18] sm:$0xe]  ;;  %v2035_v28 = vrot.slane %v3805_v34, 5 }
  0x6b   : > { %2960 = vmatprep.subr.bf16.mxu1 %v3255_v52  ;;  %3054 = vmatprep.subr.bf16.mxu0 %v3253_v63  ;;  %v1754_v4 = vor.u32 %v1753_v47, %v1750_v29  ;;  %v3274_v47 = vld [vmem:[%s3929_s1 + $0x208] sm:$0xff]  }
  0x6c   : > { %3047 = vmatmul.mubr.bf16.vlgmr.msra.gmra.mrb[0].mxu0 %v3254_v49  ;;  %v2677_v49 = vld [vmem:[%s3373_s20 + $0x40] sm:$0xf]  ;;  %v1792_v53 = vrot.slane %v1790_v44, 4 }
  0x6d   : > { %3055 = vmatpush3.bf16.msra.mxu0 %v3253_v63  ;;  %3050 = vmatprep.mubr.bf16.mxu0 %v3266_v6  ;;  %v3793_v63 = vld [vmem:[%s3373_s20 + $0x34] sm:$0x1]  ;;  %v1804_v17 = vshrl.u32 %v2677_v49, 16 }
  0x6e   : > { %2961 = vmatpush3.bf16.msra.mxu1 %v3255_v52  ;;  %3056 = vmatprep.subr.bf16.mxu0 %v3256_v50  ;;  %v1781_v52 = vrot.slane %v1779_v43, 5  ;;  %v1785_v15 = vshll.u32 %v3793_v63, 16  ;;  %v1796_v56 = vor.u32 %v1795_v24, %v1792_v53 }
  0x6f   : > { %2962 = vmatprep.subr.bf16.mxu1 %v3257_v27  ;;  %v1806_v60 = vrot.slane %v1804_v17, 4  ;;  %v3281_v17 = vld [vmem:[%s3929_s1 + $0x230] sm:$0xff]  }
  0x70   : > { %v1782_v6 = vor.u32 %v1781_v52, %v1778_v48  ;;  %v1787_v11 = vrot.slane %v1785_v15, 5  ;;  %v1797_v12 = vrot.slane %v1796_v56, 4  ;;  %v2718_v48 = vrot.slane %v2710_v30, 9 }
  0x71   : > { %2955 = vmatmul.mubr.bf16.gmra.mrb[4].mxu1 %v2496_v10  ;;  %3057 = vmatpush3.bf16.msra.mxu0 %v3256_v50  ;;  %v3267_v50 = vld [vmem:[%s3929_s1 + $0x1f0] sm:$0xff]   ;;  %v1799_v10 = vshll.u32 %v3798_v58, 16  ;;  %v2015_v52 = vrot.slane %v3740_v59, 5  ;;  %v2019_v15 = vrot.slane %v3772_v35, 5  ;;  %v2720_v56 = vrot.slane %v2712_v16, 9 }
  0x72   : > { %2963 = vmatpush3.bf16.msra.mxu1 %v3257_v27  ;;  %2974 = vmatprep.mubr.bf16.mxu1 %v3271_v18  ;;  %v1807_v27 = vshll.u32 %v2677_v49, 16  ;;  %v1755_v18 = vrot.slane %v1754_v4, 4  ;;  %v3276_v49 = vld [vmem:[%s3373_s20 + $0x38] ss:$8 sps:$4 sm:$0xff]  }
  0x73   : > { %2964 = vmatprep.subr.bf16.mxu1 %v3259_v22  ;;  %3058 = vmatprep.subr.bf16.mxu0 %v3258_v23  ;;  %v2016_v59 = vsel %vm3592_vm5, %v2718_v48, %v2015_v52 }
  0x74   : > { %3051 = vmatmul.mubr.bf16.gmra.mrb[4].mxu0 %v3268_v1  ;;  %v1809_v1 = vrot.slane %v1807_v27, 5  ;;  %v1760_v37 = vsel %vm3418_vm2, %v1755_v18, %v1759_v14  ;;  %v2711_v27 = vld [vmem:[%s3373_s20 + $0x20] sm:$0xe]  ;;  %v3282_v14 = vld [vmem:[%s3929_s1 + $0x238] sm:$0xff]   ;;  %v2027_v18 = vrot.slane %v3793_v63, 5 }
  0x75   : > { %3059 = vmatpush3.bf16.msra.mxu0 %v3258_v23  ;;  %3070 = vmatprep.mubr.bf16.mxu0 %v2697_v33  ;;  %v3818_v23 = vld [vmem:[%s3373_s20 + $0x4c] sm:$0x1]  ;;  %v3275_v33 = vld [vmem:[%s3373_s20 + $0x28] ss:$8 sps:$4 sm:$0xff]   ;;  %v2698_v55 = vcombine.low %v1760_v37, %v1774_v39  ;;  %v3290_v39 = vld [vmem:[%s3931_s3 + $0x38] sm:$0xff]  }
  0x76   : > { %2965 = vmatpush3.bf16.msra.mxu1 %v3259_v22  ;;  %3060 = vmatprep.subr.bf16.mxu0 %v3260_v32  ;;  %v1813_v22 = vshll.u32 %v3805_v34, 16  ;;  %v1827_v36 = vshll.u32 %v3818_v23, 16  ;;  %v3284_v34 = vld [vmem:[%s3931_s3 + $0x8] sm:$0xff]   ;;  %v3289_v37 = vld [vmem:[%s3931_s3 + $0x30] sm:$0xff]  }
  0x77   : > { %2966 = vmatprep.subr.bf16.mxu1 %v3261_v21 }
  0x78   : > { %v1815_v57 = vrot.slane %v1813_v22, 5  ;;  %v1829_v29 = vrot.slane %v1827_v36, 5  ;;  %v3288_v36 = vld [vmem:[%s3931_s3 + $0x28] sm:$0xff]  }
  0x79   : > { %3061 = vmatpush3.bf16.msra.mxu0 %v3260_v32  ;;  %v1783_v32 = vrot.slane %v1782_v6, 4  ;;  %v2719_v6 = vrot.slane %v2711_v27, 9 }
  0x7a   : > { %2967 = vmatpush3.bf16.msra.mxu1 %v3261_v21  ;;  %3062 = vmatprep.subr.bf16.mxu0 %v3262_v42  ;;  %v1801_v21 = vrot.slane %v1799_v10, 5  ;;  %v2023_v10 = vrot.slane %v3790_v45, 5 }
  0x7b   : > { %2968 = vmatprep.subr.bf16.mxu1 %v3263_v40  ;;  %v1788_v43 = vsel %vm3418_vm2, %v1783_v32, %v1787_v11  ;;  %v2020_v22 = vsel %vm3592_vm5, %v2719_v6, %v2019_v15  ;;  %v2039_v11 = vrot.slane %v3818_v23, 5  ;;  %v3285_v23 = vld [vmem:[%s3931_s3 + $0x10] sm:$0xff]  }
  0x7c   : > { %v2024_v35 = vsel %vm3592_vm5, %v2720_v56, %v2023_v10 }
  0x7d   : > { %3063 = vmatpush3.bf16.msra.mxu0 %v3262_v42  ;;  %v2709_v42 = vld [vmem:[%s3373_s20 + $0x10] sm:$0xe]  ;;  %v2742_v63 = vcombine.low %v2020_v22, %v2024_v35 }
  0x7e   : > { %2969 = vmatpush3.bf16.msra.mxu1 %v3263_v40  ;;  %3064 = vmatprep.subr.bf16.mxu0 %v3264_v2  ;;  %v1810_v40 = vor.u32 %v1809_v1, %v1806_v60  ;;  %v2717_v62 = vrot.slane %v2709_v42, 9  ;;  %v2716_v1 = vld [vmem:[%s3373_s20 + $0x48] sm:$0xe] }
  0x7f   : > { %2970 = vmatprep.subr.bf16.mxu1 %v3265_v51  ;;  %v2724_v32 = vrot.slane %v2716_v1, 9 }
  0x80   : > { %v1811_v0 = vrot.slane %v1810_v40, 4  ;;  %v2012_v61 = vsel %vm3592_vm5, %v2717_v62, %v2011_v13 }
  0x81   : > { %3065 = vmatpush3.bf16.msra.mxu0 %v3264_v2  ;;  %v1825_v2 = vrot.slane %v1824_v41, 4  ;;  %v2741_v4 = vcombine.low %v2012_v61, %v2016_v59 }
  0x82   : > { %2971 = vmatpush3.bf16.msra.mxu1 %v3265_v51  ;;  %3066 = vmatprep.subr.bf16.mxu0 %v3267_v50  ;;  %v1802_v51 = vsel %vm3418_vm2, %v1797_v12, %v1801_v21  ;;  %v1816_v53 = vsel %vm3418_vm2, %v1811_v0, %v1815_v57  ;;  %v2040_v21 = vsel %vm3592_vm5, %v2724_v32, %v2039_v11  ;;  %v3287_v57 = vld [vmem:[%s3931_s3 + $0x20] sm:$0xff]  }
  0x83   : > { %2972 = vmatprep.subr.bf16.mxu1 %v3269_v3  ;;  %v2699_v44 = vcombine.low %v1788_v43, %v1802_v51  ;;  %v1830_v24 = vsel %vm3418_vm2, %v1825_v2, %v1829_v29  ;;  %v2753_v2 = vld [vmem:[%s3930_s2] ss:$0 sm:$0xff] }
  0x85   : > { %3067 = vmatpush3.bf16.msra.mxu0 %v3267_v50  ;;  %v2714_v50 = vld [vmem:[%s3373_s20 + $0x38] sm:$0xe] }
  0x86   : > { %2973 = vmatpush3.bf16.msra.mxu1 %v3269_v3  ;;  %3068 = vmatprep.subr.bf16.mxu0 %v3270_v54  ;;  %v2700_v3 = vcombine.low %v1816_v53, %v1830_v24  ;;  %v2722_v19 = vrot.slane %v2714_v50, 9 }
  0x88   : > { %v2032_v60 = vsel %vm3592_vm5, %v2722_v19, %v2031_v20 }
  0x89   : > { %2975 = vmatmul.mubr.bf16.vlgmr.msra.gmra.mrb[0].mxu1 %v3272_v9  ;;  %3069 = vmatpush3.bf16.msra.mxu0 %v3270_v54  ;;  %v2721_v54 = vrot.slane %v2713_v46, 9  ;;  %v2715_v9 = vld [vmem:[%s3373_s20 + $0x40] sm:$0xe]  ;;  %s224_s20 = scalar_lea.vmem %s3933_s5, %s2765_s30 }
  0x8a   : > { %2978 = vmatprep.mubr.bf16.mxu1 %v3275_v33  ;;  %3078 = vmatprep.subr.bf16.mxu0 %v3273_v31  ;;  %v2723_v25 = vrot.slane %v2715_v9, 9 }
  0x8b   : > { %v2028_v45 = vsel %vm3592_vm5, %v2721_v54, %v2027_v18 }
  0x8c   : > { %3071 = vmatmul.mubr.bf16.vlgmr.msra.gmra.mrb[0].mxu0 %v2698_v55  ;;  %v2743_v58 = vcombine.low %v2028_v45, %v2032_v60  ;;  %v2036_v12 = vsel %vm3592_vm5, %v2723_v25, %v2035_v28  ;;  %v2754_v60 = vld [vmem:[%s3932_s4] ss:$0 sm:$0xff] }
  0x8d   : > { %3079 = vmatpush3.bf16.msra.mxu0 %v3273_v31  ;;  %3074 = vmatprep.mubr.bf16.mxu0 %v2699_v44  ;;  %v2744_v33 = vcombine.low %v2036_v12, %v2040_v21  ;;  %v3283_v31 = vld [vmem:[%s3931_s3] sm:$0xff]  }
  0x8e   : > { %3080 = vmatprep.subr.bf16.mxu0 %v3274_v47  ;;  %3102 = vmatprep.subr.bf16.mxu1 %v3283_v31 }
  0x8f   : > { %3103 = vmatpush3.bf16.msra.mxu1 %v3283_v31 }
  0x90   : > { %3104 = vmatprep.subr.bf16.mxu1 %v3284_v34 }
  0x91   : > { %2979 = vmatmul.mubr.bf16.gmra.mrb[4].mxu1 %v3276_v49  ;;  %3081 = vmatpush3.bf16.msra.mxu0 %v3274_v47 }
  0x92   : > { %3082 = vmatprep.subr.bf16.mxu0 %v3277_v26 }
  0x93   : > { %3105 = vmatpush3.bf16.msra.mxu1 %v3284_v34 }
  0x94   : > { %3075 = vmatmul.mubr.bf16.gmra.mrb[4].mxu0 %v2700_v3  ;;  %3106 = vmatprep.subr.bf16.mxu1 %v3285_v23 }
  0x95   : > { %3083 = vmatpush3.bf16.msra.mxu0 %v3277_v26  ;;  %3094 = vmatprep.mubr.bf16.mxu0 %v2741_v4 }
  0x96   : > { %3084 = vmatprep.subr.bf16.mxu0 %v3278_v38 }
  0x97   : > { %3107 = vmatpush3.bf16.msra.mxu1 %v3285_v23 }
  0x98   : > { %3108 = vmatprep.subr.bf16.mxu1 %v3286_v8 }
  0x99   : > { %3085 = vmatpush3.bf16.msra.mxu0 %v3278_v38 }
  0x9a   : > { %3086 = vmatprep.subr.bf16.mxu0 %v3279_v5 }
  0x9b   : > { %3109 = vmatpush3.bf16.msra.mxu1 %v3286_v8 }
  0x9c   : > { %3110 = vmatprep.subr.bf16.mxu1 %v3287_v57 }
  0x9d   : > { %3087 = vmatpush3.bf16.msra.mxu0 %v3279_v5 }
  0x9e   : > { %3088 = vmatprep.subr.bf16.mxu0 %v3280_v7 }
  0x9f   : > { %3111 = vmatpush3.bf16.msra.mxu1 %v3287_v57 }
  0xa0   : > { %3112 = vmatprep.subr.bf16.mxu1 %v3288_v36 }
  0xa1   : > { %3089 = vmatpush3.bf16.msra.mxu0 %v3280_v7 }
  0xa2   : > { %3090 = vmatprep.subr.bf16.mxu0 %v3281_v17 }
  0xa3   : > { %3113 = vmatpush3.bf16.msra.mxu1 %v3288_v36 }
  0xa4   : > { %3114 = vmatprep.subr.bf16.mxu1 %v3289_v37 }
  0xa5   : > { %3091 = vmatpush3.bf16.msra.mxu0 %v3281_v17 }
  0xa6   : > { %3092 = vmatprep.subr.bf16.mxu0 %v3282_v14 }
  0xa7   : > { %3115 = vmatpush3.bf16.msra.mxu1 %v3289_v37 }
  0xa8   : > { %3116 = vmatprep.subr.bf16.mxu1 %v3290_v39 }
  0xa9   : > { %3093 = vmatpush3.bf16.msra.mxu0 %v3282_v14 }
  0xab   : > { %3117 = vmatpush3.bf16.msra.mxu1 %v3290_v39 }
  0xac   : > { %3095 = vmatmul.mubr.bf16.vlgmr.msra.gmra.mrb[0].mxu0 %v2742_v63 }
  0xad   : > { %3098 = vmatprep.mubr.bf16.mxu0 %v2743_v58 }
  0xb4   : > { %3099 = vmatmul.mubr.bf16.gmra.mrb[4].mxu0 %v2744_v33 }
 0x15c   : > { %v2976_v40 = vpop.f32.mrb[0].mxu1 }
 0x15d   : > { %v1001_v41 = vpop.f32.mrb[1].mxu1 }
 0x15e   : > { %v2977_v42 = vpop.f32.mrb[2].mxu1 }
 0x15f   : > { %v1004_v30 = vpop.f32.mrb[3].mxu1 }
 0x164   : > { %v2980_v43 = vpop.f32.mrb[4].mxu1 }
 0x165   : > { %v1017_v51 = vpop.f32.mrb[5].mxu1 }
 0x166   : > { %v2981_v55 = vpop.f32.mrb[6].mxu1 }
 0x167   : > { %v1020_v44 = vpop.f32.mrb[7].mxu1 }
 0x17f   : > { %v3096_v0 = vpop.f32.mrb[0].mxu0 }
 0x180   : > { %v3126_v29 = vadd.f32 %v3096_v0, %v2976_v40  ;;  %v2156_v47 = vpop.f32.mrb[1].mxu0 }
 0x181   : > { %v3127_v62 = vadd.f32 %v2156_v47, %v1001_v41  ;;  %v3097_v13 = vpop.f32.mrb[2].mxu0 }
 0x182   : > { %v2204_v48 = vadd.f32 %v3126_v29, %v2753_v2  ;;  %v3128_v52 = vadd.f32 %v3097_v13, %v2977_v42  ;;  %v2159_v49 = vpop.f32.mrb[3].mxu0 }
 0x183   : > { %v2202_v53 = vadd.f32 %v3127_v62, %v2753_v2  ;;  %v3129_v24 = vadd.f32 %v2159_v49, %v1004_v30 }
 0x184   : > { %v2205_v26 = vadd.f32 %v3128_v52, %v2753_v2  ;;  %v2212_v59 = vmax.f32 %v2204_v48, 0.0 }
 0x185   : > { %v2203_v61 = vadd.f32 %v3129_v24, %v2753_v2  ;;  %v2210_v4 = vmax.f32 %v2202_v53, 0.0 }
 0x186   : > { %v2213_v3 = vmax.f32 %v2205_v26, 0.0 }
 0x187   : > { %v2211_v38 = vmax.f32 %v2203_v61, 0.0  ;;  %v3100_v5 = vpop.f32.mrb[4].mxu0 }
 0x188   : > { %v2219_v7 = vpack.c.bf16 %v2213_v3, %v2212_v59  ;;  %v3130_v17 = vadd.f32 %v3100_v5, %v2980_v43  ;;  %v2172_v27 = vpop.f32.mrb[5].mxu0 }
 0x189   : > { %v3131_v16 = vadd.f32 %v2172_v27, %v1017_v51  ;;  %v3101_v46 = vpop.f32.mrb[6].mxu0  ;;  %v2218_v50 = vpack.c.bf16 %v2211_v38, %v2210_v4 }
 0x18a   : > { %v2208_v6 = vadd.f32 %v3130_v17, %v2753_v2  ;;  %v3132_v15 = vadd.f32 %v3101_v46, %v2981_v55  ;;  %v2175_v56 = vpop.f32.mrb[7].mxu0 }
 0x18b   : > { %v2206_v10 = vadd.f32 %v3131_v16, %v2753_v2  ;;  %v3133_v14 = vadd.f32 %v2175_v56, %v1020_v44  ;;  %3118 = vmatprep.mubr.bf16.mxu1 %v2218_v50 }
 0x18c   : > { %v2209_v54 = vadd.f32 %v3132_v15, %v2753_v2  ;;  %3119 = vmatmul.mubr.bf16.vlgmr.msra.gmra.mrb[8].mxu1 %v2219_v7  ;;  %v2216_v19 = vmax.f32 %v2208_v6, 0.0 }
 0x18d   : > { %v2207_v18 = vadd.f32 %v3133_v14, %v2753_v2  ;;  %v2214_v22 = vmax.f32 %v2206_v10, 0.0 }
 0x18e   : > { %v2217_v20 = vmax.f32 %v2209_v54, 0.0 }
 0x18f   : > { %v2215_v35 = vmax.f32 %v2207_v18, 0.0 }
 0x190   : > { %v2221_v9 = vpack.c.bf16 %v2217_v20, %v2216_v19 }
 0x191   : > { %v2220_v45 = vpack.c.bf16 %v2215_v35, %v2214_v22 }
 0x193   : > { %3122 = vmatprep.mubr.bf16.mxu1 %v2220_v45 }
 0x194   : > { %3123 = vmatmul.mubr.bf16.gmra.mrb[12].mxu1 %v2221_v9 }
 0x25f   : > { %v3120_v1 = vpop.f32.mrb[8].mxu1 }
 0x260   : > { %v2336_v63 = vadd.f32 %v3120_v1, %v2754_v60  ;;  %v2327_v25 = vpop.f32.mrb[9].mxu1 }
 0x261   : > { %v2328_v58 = vadd.f32 %v2754_v60, %v2327_v25  ;;  %v3121_v28 = vpop.f32.mrb[10].mxu1 }
 0x262   : > { %2360 = vst [vmem:[%s224_s20 + $0x10] sm:$0xff] %v2336_v63  ;;  %v2339_v32 = vadd.f32 %v3121_v28, %v2754_v60  ;;  %v2330_v11 = vpop.f32.mrb[11].mxu1 }
 0x263   : > { %2358 = vst [vmem:[%s224_s20] sm:$0xff] %v2328_v58  ;;  %v2331_v12 = vadd.f32 %v2754_v60, %v2330_v11 }
 0x264   : > { %2361 = vst [vmem:[%s224_s20 + $0x18] sm:$0xff] %v2339_v32 }
 0x265   : > { %2359 = vst [vmem:[%s224_s20 + $0x8] sm:$0xff] %v2331_v12 }
 0x267   : > { %v3124_v21 = vpop.f32.mrb[12].mxu1 }
 0x268   : > { %v2352_v33 = vadd.f32 %v3124_v21, %v2754_v60  ;;  %v2343_v31 = vpop.f32.mrb[13].mxu1 }
 0x269   : > { %v2344_v34 = vadd.f32 %v2754_v60, %v2343_v31  ;;  %v3125_v23 = vpop.f32.mrb[14].mxu1 }
 0x26a   : > { %2364 = vst [vmem:[%s224_s20 + $0x30] sm:$0xff] %v2352_v33  ;;  %v2355_v8 = vadd.f32 %v3125_v23, %v2754_v60  ;;  %v2346_v57 = vpop.f32.mrb[15].mxu1 }
 0x26b   : > { %2362 = vst [vmem:[%s224_s20 + $0x20] sm:$0xff] %v2344_v34  ;;  %v2347_v36 = vadd.f32 %v2754_v60, %v2346_v57 }
 0x26c   : > { %2365 = vst [vmem:[%s224_s20 + $0x38] sm:$0xff] %v2355_v8 }
 0x26d   : > { %2363 = vst [vmem:[%s224_s20 + $0x28] sm:$0xff] %v2347_v36 }
 0x26e PF: > { %s15_s18 = sadd.s32 1, %s3297_s18  }
 0x26f   : > { %p12_p4 = scmp.ge.s32.totalorder %s15_s18, 4  }
 0x271   :  { %14 = sbr.rel (!%p12_p4) target bundleno = 1 (0x1), region = 80 }

// kernel: squeeze.1
= control target key start
LH: loop header
LB: loop body
LE: loop exit
PB: predicated region body
PF: predicated region fallthrough
CT: control target
= control target key end

     0   :  { %s135_s0 = inlined_call_operand.vmem [shape: s32[512], index: 0, kind: input, shape index: {}]   ;;  %s136_s1 = inlined_call_operand.hbm [shape: s32[2,16,16], index: 1, kind: output, shape index: {}]  }
   0x1   :  { %v5_v0 = vld [vmem:[%s135_s0] sm:$0xf] }
   0x2   :  { %6 = vst [vmem:[#allocation2] sm:$0xf] %v5_v0 }
   0x3   :  { %2 = vsyncpa [#allocation1], 0  ;;  %s94_s0 = smov 112   ;;  %s95_s8 = smov 80   ;;  %vm8_vm0 = vcmask 130048  }
   0x4   :  { %s96_s9 = smov 96   ;;  %s97_s10 = smov 64  }
   0x5   :  { %s98_s11 = smov 48   ;;  %s99_s12 = smov 32  }
   0x6   :  { %s100_s13 = smov 16   ;;  %s101_s14 = smov [#allocation0]  }
   0x7   :  { %s56_s15 = sshll.u32 %s101_s14, 4  ;;  %s57_s15 = int_to_ptr.vmem [resolvable:$true] %s56_s15 }
   0x8   :  { %s70_s16 = scalar_lea.vmem %s57_s15, 512  ;;  %p75_p1 = scmp.lt.s32.totalorder %s57_s15, %s57_s15 }
   0x9   :  { %v10_v1 = vld [vmem:[#allocation2] sm:$0xf]   ;;  %p71_p0 = scmp.ne.s32.totalorder %s57_s15, %s70_s16  ;;  %p76_p2 = scmp.lt.s32.totalorder %s70_s16, %s70_s16 }
   0xa   :  { %v22_v2 = vld [vmem:[#allocation2] sm:$0xf]   ;;  %11 = vrot.lane.b32.xlu0 %v10_v1, %s94_s0 }
   0xb   :  { %23 = vrot.lane.b32.xlu1 %v22_v2, %s95_s8  ;;  %v16_v3 = vld [vmem:[#allocation2] sm:$0xf]   ;;  %p77_p3 = por %p76_p2, %p75_p1 }
   0xc   :  { %v28_v4 = vld [vmem:[#allocation2] sm:$0xf]  }
   0xd   :  { %v7_v5 = vld [vmem:[#allocation2] sm:$0xf]   ;;  %p78_p4 = pnand %p77_p3, %p71_p0 }
   0xe   :  { %9 = vst.msk [vmem:[#allocation0] ss:$8 sm:$0xf] %vm8_vm0, %v7_v5   ;;  %17 = vrot.lane.b32.xlu0 %v16_v3, %s96_s9  ;;  %v34_v6 = vld [vmem:[#allocation2] sm:$0xf]  }
   0xf   :  { %29 = vrot.lane.b32.xlu1 %v28_v4, %s97_s10  ;;  %v40_v7 = vld [vmem:[#allocation2] sm:$0xf]  }
  0x10   :  { %v46_v8 = vld [vmem:[#allocation2] sm:$0xf]  }
  0x12   :  { %35 = vrot.lane.b32.xlu0 %v34_v6, %s98_s11 }
  0x13   :  { %41 = vrot.lane.b32.xlu1 %v40_v7, %s99_s12 }
  0x16   :  { %47 = vrot.lane.b32.xlu0 %v46_v8, %s100_s13 }
  0x7c   :  { %v12_v9 = vpop.permute.xlu0 %11  }
  0x7d   :  { %v24_v10 = vpop.permute.xlu1 %23   ;;  %15 = vst.msk [vmem:[#allocation0 + $0x1] ss:$8 sm:$0xf] %vm8_vm0, %v12_v9  }
  0x7e   :  { %27 = vst.msk [vmem:[#allocation0 + $0x3] ss:$8 sm:$0xf] %vm8_vm0, %v24_v10  }
  0x80   :  { %v18_v11 = vpop.permute.xlu0 %17  }
  0x81   :  { %v30_v12 = vpop.permute.xlu1 %29   ;;  %21 = vst.msk [vmem:[#allocation0 + $0x2] ss:$8 sm:$0xf] %vm8_vm0, %v18_v11  }
  0x82   :  { %33 = vst.msk [vmem:[#allocation0 + $0x4] ss:$8 sm:$0xf] %vm8_vm0, %v30_v12  }
  0x84   :  { %v36_v13 = vpop.permute.xlu0 %35  }
  0x85   :  { %v42_v14 = vpop.permute.xlu1 %41   ;;  %39 = vst.msk [vmem:[#allocation0 + $0x5] ss:$8 sm:$0xf] %vm8_vm0, %v36_v13  }
  0x86   :  { %45 = vst.msk [vmem:[#allocation0 + $0x6] ss:$8 sm:$0xf] %vm8_vm0, %v42_v14  }
  0x88   :  { %v48_v15 = vpop.permute.xlu0 %47  }
  0x89   :  { %51 = vst.msk [vmem:[#allocation0 + $0x7] ss:$8 sm:$0xf] %vm8_vm0, %v48_v15  }
  0x8a   :  { %81 = shalt.err (!%p78_p4)
}
  0x8b   :  { %s82_s19 = scalar_lea.hbm %s136_s1, 512 }
  0x8c   :  { %p83_p5 = scmp.ne.s32.totalorder %s136_s1, %s82_s19  ;;  %p86_p6 = scmp.lt.u32.totalorder %s82_s19, %s136_s1 }
  0x8e   :  { %p88_p7 = pnand %p86_p6, %p83_p5 }
  0x90   :  { %91 = shalt.err (!%p88_p7)
}
  0x91   :  { %59 = dma.vmem_to_hbm [thread:$0]  %s57_s15, 512, %s136_s1, [#allocation1]  }
  0x92   :  { %92 = dma.done.wait [#allocation1], 512  }
  0x93   :  { %93 = vsyncadd [#allocation1], 4294966784 }
  0x94   :  { %61 = vsyncpa [#allocation1], 1 }

// kernel: da_concat_deeplabv3_forward.15
= control target key start
LH: loop header
LB: loop body
LE: loop exit
PB: predicated region body
PF: predicated region fallthrough
CT: control target
= control target key end

     0   :  { %s394_s6 = smov 0   ;;  %s396_s7 = smov 0   ;;  %s457_s0 = inlined_call_operand.vmem [shape: f32[40,512], index: 0, kind: input, shape index: {}]   ;;  %s458_s1 = inlined_call_operand.vmem [shape: s32[1,512], index: 1, kind: output, shape index: {}]  }
   0x1   :  { %s398_s8 = smov 0  }
   0x2 LB: > { %s321_s9 = sadd.s32 4294967295, %s381_s8   ;;  %s411_s10 = sadd.s32 1, %s381_s8   ;;  %s381_s8 = sphi %s398_s8, %s461_s8   ;;  %s377_s7 = sphi %s396_s7, %s460_s7   ;;  %s373_s6 = sphi %s394_s6, %s459_s6  }
   0x3   : > { %s15_s11 = ssub.s32 %s381_s8, %s411_s10  ;;  %s18_s12 = sadd.s32 1, %s377_s7 }
   0x4   : > { %p16_p0 = scmp.eq.s32.totalorder %s15_s11, 0  ;;  %p25_p1 = scmp.ne.s32.totalorder %s377_s7, %s373_s6 }
   0x5   : > { %p26_p2 = scmp.eq.s32.totalorder %s381_s8, 0  ;;  %p324_p4 = scmp.ge.s32.totalorder %s381_s8, 2 }
   0x6   : > { %s420_s13 = scalar_select %p16_p0, %s377_s7, %s18_s12  }
   0x7   : > { %p27_p3 = por %p26_p2, %p25_p1  ;;  %77 = sbr.rel (%p324_p4) target bundleno = 23 (0x17), region = 16 }
   0xe   : > { %80 = sbr.rel (!%p27_p3) target bundleno = 23 (0x17), region = 20  ;;  %s82_s14 = sand.u32 (%p27_p3), 1, %s377_s7  }
   0xf   : > { %s331_s15 = sshll.u32 (%p27_p3), %s381_s8, 4  ;;  %s332_s16 = smul.u32 (%p27_p3), 80, %s82_s14 }
  0x10   : > { %s87_s19 = scalar_lea.vmem (%p27_p3), %s457_s0, %s331_s15 }
  0x11   : > { %v100_v0 = vld [vmem:[%s87_s19] sm:$0xff] (%p27_p3)  ;;  %v102_v1 = vld [vmem:[%s87_s19 + $0x8] sm:$0xff] (%p27_p3)  ;;  %s84_s20 = scalar_lea.vmem (%p27_p3), [#allocation2], %s332_s16 }
  0x12   : > { %v104_v2 = vld [vmem:[%s87_s19 + $0x20] sm:$0xff] (%p27_p3)  ;;  %v106_v3 = vld [vmem:[%s87_s19 + $0x28] sm:$0xff] (%p27_p3)  ;;  %101 = vst [vmem:[%s84_s20] sm:$0xff] (%p27_p3), %v100_v0  ;;  %103 = vst [vmem:[%s84_s20 + $0x8] sm:$0xff] (%p27_p3), %v102_v1 }
  0x13   : > { %v108_v4 = vld [vmem:[%s87_s19 + $0x40] sm:$0xff] (%p27_p3)  ;;  %v110_v5 = vld [vmem:[%s87_s19 + $0x48] sm:$0xff] (%p27_p3)  ;;  %105 = vst [vmem:[%s84_s20 + $0x10] sm:$0xff] (%p27_p3), %v104_v2  ;;  %107 = vst [vmem:[%s84_s20 + $0x18] sm:$0xff] (%p27_p3), %v106_v3 }
  0x14   : > { %109 = vst [vmem:[%s84_s20 + $0x20] sm:$0xff] (%p27_p3), %v108_v4  ;;  %111 = vst [vmem:[%s84_s20 + $0x28] sm:$0xff] (%p27_p3), %v110_v5  ;;  %v112_v6 = vld [vmem:[%s87_s19 + $0x60] sm:$0xff] (%p27_p3)  ;;  %v114_v7 = vld [vmem:[%s87_s19 + $0x68] sm:$0xff] (%p27_p3) }
  0x15   : > { %v116_v8 = vld [vmem:[%s87_s19 + $0x80] sm:$0xff]  ;;  %113 = vst [vmem:[%s84_s20 + $0x30] sm:$0xff] %v112_v6  ;;  %115 = vst [vmem:[%s84_s20 + $0x38] sm:$0xff] %v114_v7  ;;  %v118_v9 = vld [vmem:[%s87_s19 + $0x88] sm:$0xff] }
  0x16   : > { %117 = vst [vmem:[%s84_s20 + $0x40] sm:$0xff] %v116_v8  ;;  %119 = vst [vmem:[%s84_s20 + $0x48] sm:$0xff] %v118_v9 }
  0x17 PF: > { %p327_p5 = scmp.ge.s32.totalorder %s381_s8, 1  ;;  %p124_p6 = scmp.lt.s32.totalorder %s381_s8, 3 }
  0x19   : > { %p125_p7 = pnand %p327_p5, %p124_p6 }
  0x1a   : > { %s131_s21 = sand.u32 (!%p125_p7), 1, %s373_s6   ;;  %v185_v32 = vlaneseq (!%p125_p7)  ;;  %v383_v2 = vmov (!%p125_p7), 1966171168   ;;  %s328_s24 = sshll.u32 (!%p125_p7), %s321_s9, 1 }
  0x1b   : > { %128 = sbr.rel (%p125_p7) target bundleno = 81 (0x51), region = 43  ;;  %v247_v3 = vunpack.c.l.s4 (!%p125_p7), %v383_v2  ;;  %p151_p8 = scmp.lt.s32.totalorder (!%p125_p7), %s328_s24, 3 }
  0x1c   : > { %s333_s22 = smul.u32 (!%p125_p7), 80, %s131_s21  ;;  %v432_v37 = vshrl.u32 (!%p125_p7), %v185_v32, 7 }
  0x1d   : > { %v248_v8 = vunpack.c.0.s8 (!%p125_p7), %v247_v3 }
  0x1e   : > { %s133_s23 = scalar_lea.vmem (!%p125_p7), [#allocation2], %s333_s22  ;;  %v187_v42 = vadd.s32 (!%p125_p7), 8, %v432_v37  ;;  %v188_v43 = vadd.s32 (!%p125_p7), 16, %v432_v37  ;;  %v189_v44 = vadd.s32 (!%p125_p7), 24, %v432_v37  ;;  %v190_v45 = vadd.s32 (!%p125_p7), 32, %v432_v37 }
  0x1f   : > { %v155_v10 = vld [vmem:[%s133_s23] sm:$0xff] (!%p125_p7)  ;;  %v156_v11 = vld [vmem:[%s133_s23 + $0x8] sm:$0xff] (!%p125_p7)  ;;  %v157_v12 = vld [vmem:[%s133_s23 + $0x10] sm:$0xff] (!%p125_p7) }
  0x20   : > { %v158_v13 = vld [vmem:[%s133_s23 + $0x18] sm:$0xff] (!%p125_p7)  ;;  %v159_v14 = vld [vmem:[%s133_s23 + $0x20] sm:$0xff] (!%p125_p7)  ;;  %v160_v15 = vld [vmem:[%s133_s23 + $0x28] sm:$0xff] (!%p125_p7) }
  0x21   : > { %v161_v16 = vld [vmem:[%s133_s23 + $0x30] sm:$0xff] (!%p125_p7)  ;;  %v162_v17 = vld [vmem:[%s133_s23 + $0x38] sm:$0xff] (!%p125_p7)  ;;  %v163_v18 = vld [vmem:[%s133_s23 + $0x40] sm:$0xff] (!%p125_p7)  ;;  %v165_v19 = vmax.f32 (!%p125_p7), %v155_v10, %v159_v14  ;;  %v175_v20 = vmax.f32 (!%p125_p7), %v156_v11, %v160_v15 }
  0x22   : > { %v164_v21 = vld [vmem:[%s133_s23 + $0x48] sm:$0xff]  ;;  %v166_v22 = vmax.f32 %v157_v12, %v161_v16  ;;  %v176_v23 = vmax.f32 %v158_v13, %v162_v17  ;;  %s463_s24 = smov (!%p151_p8, %s328_s24), 3 }
  0x23   : > { %v167_v24 = vmax.f32 %v165_v19, %v163_v18  ;;  %v177_v25 = vmax.f32 %v175_v20, %v164_v21  ;;  %s153_s27 = scalar_lea.vmem %s458_s1, %s463_s24 }
  0x25   : > { %v168_v26 = vmax.f32 %v167_v24, %v166_v22  ;;  %v178_v27 = vmax.f32 %v177_v25, %v176_v23 }
  0x27   : > { %v169_v28 = vrot.slane %v168_v26, 4  ;;  %v179_v29 = vrot.slane %v178_v27, 4 }
  0x29   : > { %v170_v30 = vmax.f32 %v168_v26, %v169_v28  ;;  %v180_v31 = vmax.f32 %v178_v27, %v179_v29 }
  0x2b   : > { %v171_v33 = vrot.slane %v170_v30, 2  ;;  %v181_v34 = vrot.slane %v180_v31, 2 }
  0x2d   : > { %v172_v35 = vmax.f32 %v170_v30, %v171_v33  ;;  %v182_v36 = vmax.f32 %v180_v31, %v181_v34 }
  0x2f   : > { %v173_v38 = vrot.slane %v172_v35, 1  ;;  %v183_v39 = vrot.slane %v182_v36, 1 }
  0x31   : > { %v174_v40 = vmax.f32 %v172_v35, %v173_v38  ;;  %v184_v41 = vmax.f32 %v182_v36, %v183_v39 }
  0x33   : > { %vm191_vm0 = vcmp.eq.f32.partialorder %v155_v10, %v174_v40  ;;  %vm192_vm1 = vcmp.eq.f32.partialorder %v156_v11, %v184_v41  ;;  %vm193_vm2 = vcmp.eq.f32.partialorder %v157_v12, %v174_v40  ;;  %vm194_vm3 = vcmp.eq.f32.partialorder %v158_v13, %v184_v41 }
  0x34   : > { %vm195_vm4 = vcmp.eq.f32.partialorder %v159_v14, %v174_v40  ;;  %vm196_vm5 = vcmp.eq.f32.partialorder %v160_v15, %v184_v41  ;;  %vm197_vm6 = vcmp.eq.f32.partialorder %v161_v16, %v174_v40  ;;  %vm198_vm7 = vcmp.eq.f32.partialorder %v162_v17, %v184_v41 }
  0x35   : > { %vm199_vm8 = vcmp.eq.f32.partialorder %v163_v18, %v174_v40  ;;  %vm200_vm9 = vcmp.eq.f32.partialorder %v164_v21, %v184_v41  ;;  %v201_v46 = vsel %vm191_vm0, %v432_v37, 40  ;;  %v202_v47 = vsel %vm192_vm1, %v432_v37, 40 }
  0x36   : > { %v203_v48 = vsel %vm193_vm2, %v187_v42, 40  ;;  %v204_v49 = vsel %vm194_vm3, %v187_v42, 40  ;;  %v205_v50 = vsel %vm195_vm4, %v188_v43, 40  ;;  %v206_v51 = vsel %vm196_vm5, %v188_v43, 40 }
  0x37   : > { %v207_v52 = vsel %vm197_vm6, %v189_v44, 40  ;;  %v208_v53 = vsel %vm198_vm7, %v189_v44, 40  ;;  %v209_v54 = vsel %vm199_vm8, %v190_v45, 40  ;;  %v210_v55 = vsel %vm200_vm9, %v190_v45, 40 }
  0x38   : > { %vm211_vm10 = vcmp.lt.s32.totalorder %v201_v46, %v205_v50  ;;  %vm213_vm11 = vcmp.lt.s32.totalorder %v203_v48, %v207_v52  ;;  %vm228_vm12 = vcmp.lt.s32.totalorder %v202_v47, %v206_v51  ;;  %vm230_vm13 = vcmp.lt.s32.totalorder %v204_v49, %v208_v53 }
  0x39   : > { %v212_v56 = vsel %vm211_vm10, %v201_v46, %v205_v50  ;;  %v214_v57 = vsel %vm213_vm11, %v203_v48, %v207_v52  ;;  %v229_v58 = vsel %vm228_vm12, %v202_v47, %v206_v51  ;;  %v231_v59 = vsel %vm230_vm13, %v204_v49, %v208_v53 }
  0x3a   : > { %vm215_vm14 = vcmp.lt.s32.totalorder %v212_v56, %v209_v54  ;;  %vm232_vm15 = vcmp.lt.s32.totalorder %v229_v58, %v210_v55  ;;  %v251_v13 = vsub.s32 %v248_v8, %v432_v37  ;;  %vm262_vm8 = vcmp.lt.s32.totalorder %v185_v32, 256 }
  0x3b   : > { %v216_v60 = vsel %vm215_vm14, %v212_v56, %v209_v54  ;;  %v233_v61 = vsel %vm232_vm15, %v229_v58, %v210_v55 }
  0x3c   : > { %vm217_vm0 = vcmp.lt.s32.totalorder %v216_v60, %v214_v57  ;;  %vm234_vm1 = vcmp.lt.s32.totalorder %v233_v61, %v231_v59 }
  0x3d   : > { %v218_v62 = vsel %vm217_vm0, %v216_v60, %v214_v57  ;;  %v235_v63 = vsel %vm234_vm1, %v233_v61, %v231_v59 }
  0x3e   : > { %v219_v0 = vrot.slane %v218_v62, 4  ;;  %v236_v1 = vrot.slane %v235_v63, 4 }
  0x40   : > { %vm220_vm2 = vcmp.lt.s32.totalorder %v218_v62, %v219_v0  ;;  %vm237_vm3 = vcmp.lt.s32.totalorder %v235_v63, %v236_v1 }
  0x41   : > { %v221_v4 = vsel %vm220_vm2, %v218_v62, %v219_v0  ;;  %v238_v5 = vsel %vm237_vm3, %v235_v63, %v236_v1 }
  0x42   : > { %v222_v6 = vrot.slane %v221_v4, 2  ;;  %v239_v7 = vrot.slane %v238_v5, 2 }
  0x44   : > { %vm223_vm4 = vcmp.lt.s32.totalorder %v221_v4, %v222_v6  ;;  %vm240_vm5 = vcmp.lt.s32.totalorder %v238_v5, %v239_v7 }
  0x45   : > { %v224_v9 = vsel %vm223_vm4, %v221_v4, %v222_v6  ;;  %v241_v10 = vsel %vm240_vm5, %v238_v5, %v239_v7 }
  0x46   : > { %v225_v11 = vrot.slane %v224_v9, 1  ;;  %v242_v12 = vrot.slane %v241_v10, 1 }
  0x48   : > { %vm226_vm6 = vcmp.lt.s32.totalorder %v224_v9, %v225_v11  ;;  %vm243_vm7 = vcmp.lt.s32.totalorder %v241_v10, %v242_v12 }
  0x49   : > { %v227_v14 = vsel %vm226_vm6, %v224_v9, %v225_v11  ;;  %v244_v15 = vsel %vm243_vm7, %v241_v10, %v242_v12 }
  0x4a   : > { %v245_v16 = vcombine.low %v227_v14, %v244_v15 }
  0x4c   : > { %v252_v17 = vrot.slane %v245_v16, %v251_v13 }
  0x4e   : > { %v259_v18 = vrot.slane %v252_v17, %v251_v13 }
  0x50   : > { %264 = vst.msk [vmem:[%s153_s27] sm:$0x3] %vm262_vm8, %v259_v18 }
  0x51 PF: > { %p8_p9 = scmp.ge.s32.totalorder %s411_s10, 4   ;;  %s459_s6 = smov %s377_s7 }
  0x52   : > { %s460_s7 = smov %s420_s13  ;;  %s461_s8 = smov %s411_s10 }
  0x53   :  { %10 = sbr.rel (!%p8_p9) target bundleno = 2 (0x2), region = 82 }

// kernel: da_concat_deeplabv3_forward.13
= control target key start
LH: loop header
LB: loop body
LE: loop exit
PB: predicated region body
PF: predicated region fallthrough
CT: control target
= control target key end

     0   :  { %s9239_s24 = smov 0   ;;  %s10600_s0 = inlined_call_operand.vmem [shape: bf16[2,80,80,128], index: 0, kind: input, shape index: {}]   ;;  %s10601_s1 = inlined_call_operand.vmem [shape: bf16[128,128], index: 1, kind: input, shape index: {}]   ;;  %s10602_s2 = inlined_call_operand.vmem [shape: f32[1,128], index: 2, kind: input, shape index: {}]   ;;  %s10603_s3 = inlined_call_operand.vmem [shape: bf16[27,128,128], index: 3, kind: input, shape index: {}]   ;;  %s10604_s4 = inlined_call_operand.vmem [shape: f32[3,1,128], index: 4, kind: input, shape index: {}]   ;;  %s10605_s5 = inlined_call_operand.vmem [shape: bf16[4,128,128], index: 5, kind: input, shape index: {}]   ;;  %s10606_s6 = inlined_call_operand.vmem [shape: f32[2,1,128], index: 6, kind: input, shape index: {}]   ;;  %s10607_s7 = inlined_call_operand.vmem [shape: bf16[2,8,8,128], index: 7, kind: output, shape index: {}]  }
   0x1 LB: > { %s6273_s25 = sadd.s32 4294967295, %s9197_s24   ;;  %p6277_p0 = scmp.ge.s32.totalorder %s9197_s24, 1  ;;  %s9197_s24 = sphi %s9239_s24, %s17_s24  }
   0x2   : > { %p245_p1 = scmp.lt.s32.totalorder %s9197_s24, 3 }
   0x4   : > { %p246_p2 = pnand %p6277_p0, %p245_p1 }
   0x5   : > { %v8887_v0 = vld [vmem:[%s10603_s3 + $0x80] sm:$0xff] (!%p246_p2)   ;;  %p280_p3 = scmp.lt.s32.totalorder (!%p246_p2), %s6273_s25, 1  ;;  %v8888_v1 = vld [vmem:[%s10603_s3 + $0x88] sm:$0xff] (!%p246_p2)   ;;  %v8889_v2 = vld [vmem:[%s10603_s3 + $0x90] sm:$0xff] (!%p246_p2)   ;;  %vm327_vm0 = vcmask (!%p246_p2), 1041408   ;;  %vm328_vm1 = vcmask (!%p246_p2), 1045508  }
   0x6   : > { %249 = sbr.rel (%p246_p2) target bundleno = 1258 (0x4ea), region = 48  ;;  %7966 = vmatprep.subr.bf16.mxu1 (!%p246_p2), %v8887_v0  ;;  %v8890_v3 = vld [vmem:[%s10603_s3 + $0x98] sm:$0xff] (!%p246_p2)   ;;  %v8891_v5 = vld [vmem:[%s10603_s3 + $0xa0] sm:$0xff] (!%p246_p2)   ;;  %v8892_v6 = vld [vmem:[%s10603_s3 + $0xa8] sm:$0xff] (!%p246_p2)  }
   0x7   : > { %7967 = vmatpush3.bf16.msra.mxu1 (!%p246_p2), %v8887_v0  ;;  %v8893_v7 = vld [vmem:[%s10603_s3 + $0xb0] sm:$0xff] (!%p246_p2)   ;;  %v8894_v8 = vld [vmem:[%s10603_s3 + $0xb8] sm:$0xff] (!%p246_p2)   ;;  %v8896_v9 = vld [vmem:[%s10603_s3 + $0xc0] sm:$0xff] (!%p246_p2)  }
   0x8   : > { %7968 = vmatprep.subr.bf16.mxu1 (!%p246_p2), %v8888_v1  ;;  %v8898_v11 = vld [vmem:[%s10603_s3 + $0xc8] sm:$0xff] (!%p246_p2)   ;;  %v8919_v13 = vld [vmem:[%s10601_s1] sm:$0xff] (!%p246_p2)   ;;  %vm9295_vm2 = vmor (!%p246_p2), %vm327_vm0, %vm328_vm1 }
   0x9   : > { %7894 = vmatprep.subr.bf16.mxu0 (!%p246_p2), %v8919_v13  ;;  %v8921_v23 = vld [vmem:[%s10601_s1 + $0x8] sm:$0xff] (!%p246_p2)   ;;  %v8899_v24 = vld [vmem:[%s10603_s3 + $0xd0] sm:$0xff] (!%p246_p2)   ;;  %v8900_v29 = vld [vmem:[%s10603_s3 + $0xd8] sm:$0xff] (!%p246_p2)  }
   0xa   : > { %7895 = vmatpush3.bf16.msra.mxu0 (!%p246_p2), %v8919_v13  ;;  %v8923_v30 = vld [vmem:[%s10601_s1 + $0x10] sm:$0xff] (!%p246_p2)   ;;  %v8925_v32 = vld [vmem:[%s10601_s1 + $0x18] sm:$0xff] (!%p246_p2)   ;;  %v8901_v33 = vld [vmem:[%s10603_s3 + $0xe0] sm:$0xff] (!%p246_p2)  }
   0xb   : > { %7969 = vmatpush3.bf16.msra.mxu1 (!%p246_p2), %v8888_v1  ;;  %7896 = vmatprep.subr.bf16.mxu0 (!%p246_p2), %v8921_v23  ;;  %v8927_v34 = vld [vmem:[%s10601_s1 + $0x20] sm:$0xff] (!%p246_p2)   ;;  %v8902_v35 = vld [vmem:[%s10603_s3 + $0xe8] sm:$0xff] (!%p246_p2)   ;;  %v8904_v40 = vld [vmem:[%s10603_s3 + $0xf0] sm:$0xff] (!%p246_p2)  }
   0xc   : > { %7970 = vmatprep.subr.bf16.mxu1 (!%p246_p2), %v8889_v2  ;;  %v8929_v39 = vld [vmem:[%s10601_s1 + $0x28] sm:$0xff] (!%p246_p2)   ;;  %v8931_v45 = vld [vmem:[%s10601_s1 + $0x30] sm:$0xff] (!%p246_p2)   ;;  %v8906_v47 = vld [vmem:[%s10603_s3 + $0xf8] sm:$0xff] (!%p246_p2)  }
   0xd   : > { %s10611_s25 = smov (!%p280_p3, %s6273_s25), 1  ;;  %v8933_v52 = vld [vmem:[%s10601_s1 + $0x38] sm:$0xff]   ;;  %v8908_v53 = vld [vmem:[%s10603_s3 + $0x100] sm:$0xff]   ;;  %v8910_v62 = vld [vmem:[%s10603_s3 + $0x108] sm:$0xff]  }
   0xe   : > { %s8878_s9 = smul.u32 3200, %s10611_s25  ;;  %7897 = vmatpush3.bf16.msra.mxu0 %v8921_v23  ;;  %v8935_v61 = vld [vmem:[%s10603_s3 + $0x40] sm:$0xff]   ;;  %v8911_v13 = vld [vmem:[%s10603_s3 + $0x110] sm:$0xff]   ;;  %s287_s29 = scalar_lea.vmem %s10606_s6, %s10611_s25 }
   0xf   : > { %7971 = vmatpush3.bf16.msra.mxu1 %v8889_v2  ;;  %7898 = vmatprep.subr.bf16.mxu0 %v8923_v30  ;;  %v9179_v18 = vld [vmem:[%s10605_s5 + $0xa0] sm:$0xff]   ;;  %s7486_s30 = sshll.u32 %s10611_s25, 5 }
  0x10   : > { %s9262_s12 = scalar_lea.vmem %s10600_s0, %s8878_s9  ;;  %7972 = vmatprep.subr.bf16.mxu1 %v8890_v3  ;;  %s292_s10 = scalar_lea.vmem %s10607_s7, %s7486_s30 }
  0x11   : > { %v8895_v4 = vld [vmem:[%s9262_s12 + $0x3d8] ss:$40 sps:$4 sm:$0xff]   ;;  %v8897_v10 = vld [vmem:[%s9262_s12 + $0x428] ss:$40 sps:$4 sm:$0xff]   ;;  %v6282_v15 = vld [vmem:[%s9262_s12 + $0x5b4] sm:$0x3] }
  0x12   : > { %7982 = vmatprep.mubr.bf16.mxu1 %v8895_v4  ;;  %v8903_v12 = vld [vmem:[%s9262_s12 + $0x478] ss:$40 sps:$4 sm:$0xff]   ;;  %v6281_v14 = vld [vmem:[%s9262_s12 + $0x5b0] sm:$0xc]  ;;  %v6284_v17 = vld [vmem:[%s9262_s12 + $0x5dc] sm:$0x3]  ;;  %7899 = vmatpush3.bf16.msra.mxu0 %v8923_v30 }
  0x13   : > { %7973 = vmatpush3.bf16.msra.mxu1 %v8890_v3  ;;  %v6283_v16 = vld [vmem:[%s9262_s12 + $0x5d8] sm:$0xc]  ;;  %v6297_v19 = vrot.slane %v6281_v14, 10  ;;  %v332_v20 = vrot.slane %v6282_v15, 6  ;;  %v336_v22 = vrot.slane %v6284_v17, 6  ;;  %7900 = vmatprep.subr.bf16.mxu0 %v8925_v32  ;;  %v8941_v15 = vld [vmem:[%s10603_s3 + $0x50] sm:$0xff]  }
  0x14   : > { %7974 = vmatprep.subr.bf16.mxu1 %v8891_v5  ;;  %v6298_v21 = vrot.slane %v6283_v16, 10  ;;  %v8905_v26 = vld [vmem:[%s9262_s12 + $0x4c8] ss:$40 sps:$4 sm:$0xff]   ;;  %v8907_v27 = vld [vmem:[%s9262_s12 + $0x5ac] ss:$40 sps:$4 sm:$0xff]  }
  0x15   : > { %v333_v25 = vsel %vm9295_vm2, %v6297_v19, %v332_v20  ;;  %v6285_v36 = vld [vmem:[%s9262_s12 + $0x600] sm:$0xc]  ;;  %v6286_v37 = vld [vmem:[%s9262_s12 + $0x604] sm:$0x3]  ;;  %v6287_v38 = vld [vmem:[%s9262_s12 + $0x628] sm:$0xc] }
  0x16   : > { %v337_v28 = vsel %vm9295_vm2, %v6298_v21, %v336_v22  ;;  %7901 = vmatpush3.bf16.msra.mxu0 %v8925_v32  ;;  %v6288_v41 = vld [vmem:[%s9262_s12 + $0x62c] sm:$0x3]  ;;  %v6299_v42 = vrot.slane %v6285_v36, 10  ;;  %v340_v43 = vrot.slane %v6286_v37, 6  ;;  %v6300_v44 = vrot.slane %v6287_v38, 10  ;;  %v8912_v19 = vld [vmem:[%s10603_s3 + $0x118] sm:$0xff]  }
  0x17   : > { %7975 = vmatpush3.bf16.msra.mxu1 %v8891_v5  ;;  %v9317_v31 = vcombine.low %v333_v25, %v337_v28  ;;  %7902 = vmatprep.subr.bf16.mxu0 %v8927_v34  ;;  %v6289_v46 = vld [vmem:[%s9262_s12 + $0x650] sm:$0xc]  ;;  %v6290_v48 = vld [vmem:[%s9262_s12 + $0x654] sm:$0x3]  ;;  %v6291_v49 = vld [vmem:[%s9262_s12 + $0x678] sm:$0xc] }
  0x18   : > { %7976 = vmatprep.subr.bf16.mxu1 %v8892_v6  ;;  %v6292_v50 = vld [vmem:[%s9262_s12 + $0x67c] sm:$0x3]  ;;  %v344_v51 = vrot.slane %v6288_v41, 6  ;;  %v6301_v54 = vrot.slane %v6289_v46, 10  ;;  %v348_v55 = vrot.slane %v6290_v48, 6  ;;  %v6302_v56 = vrot.slane %v6291_v49, 10 }
  0x19   : > { %7910 = vmatprep.mubr.bf16.mxu0 %v9317_v31  ;;  %v352_v57 = vrot.slane %v6292_v50, 6  ;;  %v8909_v58 = vld [vmem:[%s9262_s12 + $0x5fc] ss:$40 sps:$4 sm:$0xff]   ;;  %v6293_v59 = vld [vmem:[%s9262_s12 + $0x6a0] sm:$0xc]  ;;  %v341_v0 = vsel %vm9295_vm2, %v6299_v42, %v340_v43  ;;  %v8916_v37 = vld [vmem:[%s10603_s3 + $0x130] sm:$0xff]  }
  0x1a   : > { %7903 = vmatpush3.bf16.msra.mxu0 %v8927_v34  ;;  %v8915_v60 = vld [vmem:[%s9262_s12 + $0x64c] ss:$40 sps:$4 sm:$0xff]   ;;  %v6294_v63 = vld [vmem:[%s9262_s12 + $0x6a4] sm:$0x3]  ;;  %v345_v1 = vsel %vm9295_vm2, %v6300_v44, %v344_v51  ;;  %v6295_v2 = vld [vmem:[%s9262_s12 + $0x6c8] sm:$0xc]  ;;  %v349_v3 = vsel %vm9295_vm2, %v6301_v54, %v348_v55 }
  0x1b   : > { %7977 = vmatpush3.bf16.msra.mxu1 %v8892_v6  ;;  %7904 = vmatprep.subr.bf16.mxu0 %v8929_v39  ;;  %v353_v4 = vsel %vm9295_vm2, %v6302_v56, %v352_v57  ;;  %v6296_v5 = vld [vmem:[%s9262_s12 + $0x6cc] sm:$0x3]  ;;  %v6303_v6 = vrot.slane %v6293_v59, 10  ;;  %v8917_v14 = vld [vmem:[%s9262_s12 + $0x69c] ss:$40 sps:$4 sm:$0xff]  }
  0x1c   : > { %7978 = vmatprep.subr.bf16.mxu1 %v8893_v7  ;;  %v8943_v21 = vld [vmem:[%s10603_s3 + $0x58] sm:$0xff]   ;;  %v8913_v22 = vld [vmem:[%s10603_s3 + $0x120] sm:$0xff]   ;;  %v6326_v23 = vld [vmem:[%s9262_s12 + $0x3d0] sm:$0xc] }
  0x1d   : > { %v6328_v25 = vld [vmem:[%s9262_s12 + $0x3f8] sm:$0xc]  ;;  %v8945_v32 = vld [vmem:[%s10603_s3 + $0x60] sm:$0xff]   ;;  %v8947_v38 = vld [vmem:[%s10603_s3 + $0x68] sm:$0xff]  }
  0x1e   : > { %7905 = vmatpush3.bf16.msra.mxu0 %v8929_v39  ;;  %v6330_v39 = vld [vmem:[%s9262_s12 + $0x420] sm:$0xc]  ;;  %v6331_v41 = vld [vmem:[%s9262_s12 + $0x424] sm:$0x3]  ;;  %v6332_v42 = vld [vmem:[%s9262_s12 + $0x448] sm:$0xc] }
  0x1f   : > { %7979 = vmatpush3.bf16.msra.mxu1 %v8893_v7  ;;  %7906 = vmatprep.subr.bf16.mxu0 %v8931_v45  ;;  %v9378_v7 = vcombine.low %v341_v0, %v345_v1  ;;  %v6333_v43 = vld [vmem:[%s9262_s12 + $0x44c] sm:$0x3]  ;;  %v8918_v44 = vld [vmem:[%s10603_s3 + $0x138] sm:$0xff]   ;;  %v609_v46 = vrot.slane %v6331_v41, 6  ;;  %v8920_v50 = vld [vmem:[%s10603_s3 + $0x140] sm:$0xff]  }
  0x20   : > { %7980 = vmatprep.subr.bf16.mxu1 %v8894_v8  ;;  %v613_v48 = vrot.slane %v6333_v43, 6  ;;  %v8953_v49 = vld [vmem:[%s10603_s3 + $0x78] sm:$0xff]   ;;  %v8955_v51 = vld [vmem:[%s10603_s3] sm:$0xff]   ;;  %v6334_v54 = vld [vmem:[%s9262_s12 + $0x470] sm:$0xc] }
  0x21   : > { %v6335_v55 = vld [vmem:[%s9262_s12 + $0x474] sm:$0x3]  ;;  %v8922_v56 = vld [vmem:[%s10603_s3 + $0x148] sm:$0xff]   ;;  %v6336_v57 = vld [vmem:[%s9262_s12 + $0x498] sm:$0xc]  ;;  %v6346_v59 = vrot.slane %v6334_v54, 10 }
  0x22   : > { %7907 = vmatpush3.bf16.msra.mxu0 %v8931_v45  ;;  %v6344_v45 = vrot.slane %v6330_v39, 10  ;;  %v6339_v0 = vld [vmem:[%s9262_s12 + $0x4c4] sm:$0x3]  ;;  %v8982_v39 = vld [vmem:[%s9262_s12 + $0x46c] ss:$40 sps:$4 sm:$0xff]   ;;  %v8944_v43 = vld [vmem:[%s10603_s3 + $0x198] sm:$0xff]  }
  0x23   : > { %7981 = vmatpush3.bf16.msra.mxu1 %v8894_v8  ;;  %7908 = vmatprep.subr.bf16.mxu0 %v8933_v52  ;;  %v356_v8 = vrot.slane %v6294_v63, 6  ;;  %v6338_v63 = vld [vmem:[%s9262_s12 + $0x4c0] sm:$0xc]  ;;  %v8952_v41 = vld [vmem:[%s9262_s12 + $0x6a8] ss:$40 sps:$4 sm:$0xff]  }
  0x24   : > { %7990 = vmatprep.subr.bf16.mxu1 %v8896_v9  ;;  %v8958_v54 = vld [vmem:[%s9262_s12 + $0x7dc] ss:$40 sps:$4 sm:$0xff]  }
  0x25   : > { %v357_v16 = vsel %vm9295_vm2, %v6303_v6, %v356_v8  ;;  %v625_v6 = vrot.slane %v6339_v0, 6 }
  0x26   : > { %7983 = vmatmul.mubr.bf16.vlgmr.msra.gmra.mrb[0].mxu1 %v8897_v10  ;;  %7909 = vmatpush3.bf16.msra.mxu0 %v8933_v52  ;;  %v9383_v10 = vcombine.low %v349_v3, %v353_v4  ;;  %v610_v52 = vsel %vm9295_vm2, %v6344_v45, %v609_v46  ;;  %v6340_v3 = vld [vmem:[%s9262_s12 + $0x4e8] sm:$0xc]  ;;  %v6341_v4 = vld [vmem:[%s9262_s12 + $0x4ec] sm:$0x3]  ;;  %v8946_v45 = vld [vmem:[%s10603_s3 + $0x1a0] sm:$0xff]  }
  0x27   : > { %7991 = vmatpush3.bf16.msra.mxu1 %v8896_v9  ;;  %7986 = vmatprep.mubr.bf16.mxu1 %v8903_v12  ;;  %v8939_v9 = vld [vmem:[%s10603_s3 + $0x48] sm:$0xff]   ;;  %v360_v12 = vrot.slane %v6296_v5, 6  ;;  %v6348_v5 = vrot.slane %v6338_v63, 10 }
  0x28   : > { %7992 = vmatprep.subr.bf16.mxu1 %v8898_v11  ;;  %7918 = vmatprep.subr.bf16.mxu0 %v8935_v61  ;;  %v8948_v46 = vld [vmem:[%s10603_s3 + $0x1a8] sm:$0xff]  }
  0x29   : > { %7911 = vmatmul.mubr.bf16.vlgmr.msra.gmra.mrb[0].mxu0 %v9378_v7 }
  0x2a   : > { %7919 = vmatpush3.bf16.msra.mxu0 %v8935_v61  ;;  %7914 = vmatprep.mubr.bf16.mxu0 %v9383_v10  ;;  %v6347_v61 = vrot.slane %v6336_v57, 10 }
  0x2b   : > { %7993 = vmatpush3.bf16.msra.mxu1 %v8898_v11  ;;  %v6304_v11 = vrot.slane %v6295_v2, 10  ;;  %7920 = vmatprep.subr.bf16.mxu0 %v8939_v9 }
  0x2c   : > { %7994 = vmatprep.subr.bf16.mxu1 %v8899_v24 }
  0x2d   : > { %v361_v17 = vsel %vm9295_vm2, %v6304_v11, %v360_v12  ;;  %v629_v11 = vrot.slane %v6341_v4, 6  ;;  %v8959_v12 = vld [vmem:[%s10603_s3 + $0x8] sm:$0xff]   ;;  %v6563_v4 = vld [vmem:[%s9262_s12 + $0x7e4] sm:$0x3] }
  0x2e   : > { %7987 = vmatmul.mubr.bf16.gmra.mrb[4].mxu1 %v8905_v26  ;;  %7921 = vmatpush3.bf16.msra.mxu0 %v8939_v9  ;;  %v9401_v20 = vcombine.low %v357_v16, %v361_v17  ;;  %v6329_v26 = vld [vmem:[%s9262_s12 + $0x3fc] sm:$0x3]  ;;  %v6349_v9 = vrot.slane %v6340_v3, 10  ;;  %v8961_v17 = vld [vmem:[%s10603_s3 + $0x10] sm:$0xff]  }
  0x2f   : > { %7995 = vmatpush3.bf16.msra.mxu1 %v8899_v24  ;;  %8006 = vmatprep.mubr.bf16.mxu1 %v8907_v27  ;;  %v6327_v24 = vld [vmem:[%s9262_s12 + $0x3d4] sm:$0x3]  ;;  %v6342_v27 = vrot.slane %v6326_v23, 10  ;;  %v605_v30 = vrot.slane %v6329_v26, 6  ;;  %v8965_v26 = vld [vmem:[%s10603_s3 + $0x20] sm:$0xff]  }
  0x30   : > { %7996 = vmatprep.subr.bf16.mxu1 %v8900_v29  ;;  %7922 = vmatprep.subr.bf16.mxu0 %v8941_v15  ;;  %v601_v28 = vrot.slane %v6327_v24, 6  ;;  %v630_v16 = vsel %vm9295_vm2, %v6349_v9, %v629_v11  ;;  %v8975_v23 = vld [vmem:[%s9262_s12 + $0x3cc] ss:$40 sps:$4 sm:$0xff]   ;;  %v8963_v24 = vld [vmem:[%s10603_s3 + $0x18] sm:$0xff]   ;;  %v1775_v11 = vrot.slane %v6563_v4, 6 }
  0x31   : > { %7915 = vmatmul.mubr.bf16.gmra.mrb[4].mxu0 %v9401_v20  ;;  %v4455_v4 = vld [vmem:[%s9262_s12 + $0x64] sm:$0x3] }
  0x32   : > { %7923 = vmatpush3.bf16.msra.mxu0 %v8941_v15  ;;  %v626_v15 = vsel %vm9295_vm2, %v6348_v5, %v625_v6  ;;  %v8966_v5 = vld [vmem:[%s10603_s3 + $0x1e0] sm:$0xff]   ;;  %v6564_v6 = vld [vmem:[%s9262_s12 + $0x808] sm:$0xc] }
  0x33   : > { %7997 = vmatpush3.bf16.msra.mxu1 %v8900_v29  ;;  %v6343_v29 = vrot.slane %v6328_v25, 10  ;;  %7924 = vmatprep.subr.bf16.mxu0 %v8943_v21  ;;  %v8928_v25 = vld [vmem:[%s10603_s3 + $0x160] sm:$0xff]  }
  0x34   : > { %7998 = vmatprep.subr.bf16.mxu1 %v8901_v33 }
  0x35   : > { %v606_v34 = vsel %vm9295_vm2, %v6343_v29, %v605_v30  ;;  %v8932_v29 = vld [vmem:[%s10603_s3 + $0x170] sm:$0xff]  }
  0x36   : > { %7925 = vmatpush3.bf16.msra.mxu0 %v8943_v21  ;;  %v8926_v21 = vld [vmem:[%s10603_s3 + $0x158] sm:$0xff]   ;;  %v8969_v30 = vld [vmem:[%s10603_s3 + $0x30] sm:$0xff]  }
  0x37   : > { %7999 = vmatpush3.bf16.msra.mxu1 %v8901_v33  ;;  %v602_v33 = vsel %vm9295_vm2, %v6342_v27, %v601_v28  ;;  %7926 = vmatprep.subr.bf16.mxu0 %v8945_v32  ;;  %v8930_v27 = vld [vmem:[%s10603_s3 + $0x168] sm:$0xff]  }
  0x38   : > { %8000 = vmatprep.subr.bf16.mxu1 %v8902_v35  ;;  %v6366_v36 = vcombine.low %v602_v33, %v606_v34  ;;  %v8967_v28 = vld [vmem:[%s10603_s3 + $0x28] sm:$0xff]   ;;  %v8973_v33 = vld [vmem:[%s10603_s3 + $0x38] sm:$0xff]   ;;  %v8937_v34 = vld [vmem:[%s10603_s3 + $0x180] sm:$0xff]  }
  0x3a   : > { %7934 = vmatprep.mubr.bf16.mxu0 %v6366_v36  ;;  %7927 = vmatpush3.bf16.msra.mxu0 %v8945_v32  ;;  %v8934_v32 = vld [vmem:[%s10603_s3 + $0x178] sm:$0xff]   ;;  %v8940_v36 = vld [vmem:[%s10603_s3 + $0x188] sm:$0xff]  }
  0x3b   : > { %8001 = vmatpush3.bf16.msra.mxu1 %v8902_v35  ;;  %v8914_v35 = vld [vmem:[%s10603_s3 + $0x128] sm:$0xff]   ;;  %7928 = vmatprep.subr.bf16.mxu0 %v8947_v38 }
  0x3c   : > { %8002 = vmatprep.subr.bf16.mxu1 %v8904_v40 }
  0x3e   : > { %7929 = vmatpush3.bf16.msra.mxu0 %v8947_v38  ;;  %v8976_v38 = vld [vmem:[%s9262_s12 + $0x41c] ss:$40 sps:$4 sm:$0xff]  }
  0x3f   : > { %8003 = vmatpush3.bf16.msra.mxu1 %v8904_v40  ;;  %v8949_v40 = vld [vmem:[%s10603_s3 + $0x70] sm:$0xff]  }
  0x40   : > { %8004 = vmatprep.subr.bf16.mxu1 %v8906_v47  ;;  %7930 = vmatprep.subr.bf16.mxu0 %v8949_v40 }
  0x42   : > { %7931 = vmatpush3.bf16.msra.mxu0 %v8949_v40  ;;  %v8942_v40 = vld [vmem:[%s10603_s3 + $0x190] sm:$0xff]  }
  0x43   : > { %8005 = vmatpush3.bf16.msra.mxu1 %v8906_v47  ;;  %v6345_v47 = vrot.slane %v6332_v42, 10  ;;  %7932 = vmatprep.subr.bf16.mxu0 %v8953_v49  ;;  %v8956_v42 = vld [vmem:[%s9262_s12 + $0x78c] ss:$40 sps:$4 sm:$0xff]  }
  0x44   : > { %8014 = vmatprep.subr.bf16.mxu1 %v8908_v53 }
  0x46   : > { %8007 = vmatmul.mubr.bf16.vlgmr.msra.gmra.mrb[0].mxu1 %v8909_v58  ;;  %v6337_v58 = vld [vmem:[%s9262_s12 + $0x49c] sm:$0x3]  ;;  %7933 = vmatpush3.bf16.msra.mxu0 %v8953_v49  ;;  %v8957_v49 = vld [vmem:[%s10603_s3 + $0x1c0] sm:$0xff]  }
  0x47   : > { %8015 = vmatpush3.bf16.msra.mxu1 %v8908_v53  ;;  %8010 = vmatprep.mubr.bf16.mxu1 %v8915_v60  ;;  %v614_v53 = vsel %vm9295_vm2, %v6345_v47, %v613_v48  ;;  %v617_v60 = vrot.slane %v6335_v55, 6  ;;  %v8951_v47 = vld [vmem:[%s10603_s3 + $0x1b0] sm:$0xff]   ;;  %v8954_v48 = vld [vmem:[%s10603_s3 + $0x1b8] sm:$0xff]   ;;  %v8960_v55 = vld [vmem:[%s10603_s3 + $0x1c8] sm:$0xff]  }
  0x48   : > { %8016 = vmatprep.subr.bf16.mxu1 %v8910_v62  ;;  %v6367_v1 = vcombine.low %v610_v52, %v614_v53  ;;  %7942 = vmatprep.subr.bf16.mxu0 %v8955_v51  ;;  %v6560_v52 = vld [vmem:[%s9262_s12 + $0x7b8] sm:$0xc]  ;;  %v6561_v53 = vld [vmem:[%s9262_s12 + $0x7bc] sm:$0x3] }
  0x49   : > { %v618_v2 = vsel %vm9295_vm2, %v6346_v59, %v617_v60  ;;  %v6575_v59 = vrot.slane %v6560_v52, 10  ;;  %v1771_v60 = vrot.slane %v6561_v53, 6  ;;  %v8985_v52 = vld [vmem:[%s10603_s3 + $0x230] sm:$0xff]   ;;  %v8986_v53 = vld [vmem:[%s10603_s3 + $0x238] sm:$0xff]  }
  0x4a   : > { %7935 = vmatmul.mubr.bf16.vlgmr.msra.gmra.mrb[8].mxu0 %v6367_v1  ;;  %v8964_v1 = vld [vmem:[%s10603_s3 + $0x1d8] sm:$0xff]  }
  0x4b   : > { %8017 = vmatpush3.bf16.msra.mxu1 %v8910_v62  ;;  %v621_v62 = vrot.slane %v6337_v58, 6  ;;  %7943 = vmatpush3.bf16.msra.mxu0 %v8955_v51  ;;  %v6559_v51 = vld [vmem:[%s9262_s12 + $0x794] sm:$0x3]  ;;  %v1772_v0 = vsel %vm9295_vm2, %v6575_v59, %v1771_v60  ;;  %v8988_v59 = vld [vmem:[%s9262_s12 + $0x7e8] ss:$40 sps:$4 sm:$0xff]  }
  0x4c   : > { %8018 = vmatprep.subr.bf16.mxu1 %v8911_v13  ;;  %7944 = vmatprep.subr.bf16.mxu0 %v8959_v12  ;;  %v1767_v58 = vrot.slane %v6559_v51, 6  ;;  %v8983_v51 = vld [vmem:[%s10603_s3 + $0x228] sm:$0xff]   ;;  %v8989_v60 = vld [vmem:[%s9262_s12 + $0x838] ss:$40 sps:$4 sm:$0xff]  }
  0x4d   : > { %v622_v8 = vsel %vm9295_vm2, %v6347_v61, %v621_v62  ;;  %v8962_v61 = vld [vmem:[%s10603_s3 + $0x1d0] sm:$0xff]   ;;  %v8972_v62 = vld [vmem:[%s9262_s12 + $0x87c] ss:$40 sps:$4 sm:$0xff]  }
  0x4e   : > { %8011 = vmatmul.mubr.bf16.gmra.mrb[4].mxu1 %v8917_v14  ;;  %v8924_v14 = vld [vmem:[%s10603_s3 + $0x150] sm:$0xff]  }
  0x4f   : > { %8019 = vmatpush3.bf16.msra.mxu1 %v8911_v13  ;;  %8030 = vmatprep.mubr.bf16.mxu1 %v9317_v31  ;;  %v6368_v13 = vcombine.low %v618_v2, %v622_v8  ;;  %v6562_v2 = vld [vmem:[%s9262_s12 + $0x7e0] sm:$0xc]  ;;  %v6565_v8 = vld [vmem:[%s9262_s12 + $0x80c] sm:$0x3] }
  0x50   : > { %8020 = vmatprep.subr.bf16.mxu1 %v8912_v19  ;;  %7945 = vmatpush3.bf16.msra.mxu0 %v8959_v12  ;;  %v6576_v9 = vrot.slane %v6562_v2, 10  ;;  %v8968_v12 = vld [vmem:[%s10603_s3 + $0x1e8] sm:$0xff]   ;;  %v8993_v2 = vld [vmem:[%s10603_s3 + $0x4d0] sm:$0xff]  }
  0x51   : > { %7938 = vmatprep.mubr.bf16.mxu0 %v6368_v13  ;;  %7946 = vmatprep.subr.bf16.mxu0 %v8961_v17  ;;  %v6577_v13 = vrot.slane %v6564_v6, 10 }
  0x53   : > { %8021 = vmatpush3.bf16.msra.mxu1 %v8912_v19  ;;  %v8936_v19 = vld [vmem:[%s9262_s12 + $0x5b8] ss:$40 sps:$4 sm:$0xff]  }
  0x54   : > { %8022 = vmatprep.subr.bf16.mxu1 %v8913_v22  ;;  %7947 = vmatpush3.bf16.msra.mxu0 %v8961_v17  ;;  %v6567_v17 = vld [vmem:[%s9262_s12 + $0x834] sm:$0x3] }
  0x55   : > { %7948 = vmatprep.subr.bf16.mxu0 %v8963_v24 }
  0x57   : > { %8023 = vmatpush3.bf16.msra.mxu1 %v8913_v22  ;;  %v6369_v22 = vcombine.low %v626_v15, %v630_v16  ;;  %v8971_v15 = vld [vmem:[%s10603_s3 + $0x1f0] sm:$0xff]  }
  0x58   : > { %8024 = vmatprep.subr.bf16.mxu1 %v8914_v35  ;;  %7949 = vmatpush3.bf16.msra.mxu0 %v8963_v24  ;;  %v6566_v16 = vld [vmem:[%s9262_s12 + $0x830] sm:$0xc]  ;;  %v1783_v24 = vrot.slane %v6567_v17, 6 }
  0x59   : > { %7939 = vmatmul.mubr.bf16.gmra.mrb[12].mxu0 %v6369_v22  ;;  %7950 = vmatprep.subr.bf16.mxu0 %v8965_v26  ;;  %v8974_v22 = vld [vmem:[%s10603_s3 + $0x1f8] sm:$0xff]  }
  0x5a   : > { %7958 = vmatprep.mubr.bf16.mxu0 %v8975_v23  ;;  %v6578_v23 = vrot.slane %v6566_v16, 10  ;;  %v8995_v16 = vld [vmem:[%s10603_s3 + $0x4e0] sm:$0xff]  }
  0x5b   : > { %8025 = vmatpush3.bf16.msra.mxu1 %v8914_v35  ;;  %v8938_v35 = vld [vmem:[%s9262_s12 + $0x608] ss:$40 sps:$4 sm:$0xff]  }
  0x5c   : > { %8026 = vmatprep.subr.bf16.mxu1 %v8916_v37  ;;  %7951 = vmatpush3.bf16.msra.mxu0 %v8965_v26 }
  0x5d   : > { %7952 = vmatprep.subr.bf16.mxu0 %v8967_v28 }
  0x5f   : > { %8027 = vmatpush3.bf16.msra.mxu1 %v8916_v37  ;;  %v8950_v37 = vld [vmem:[%s9262_s12 + $0x658] ss:$40 sps:$4 sm:$0xff]  }
  0x60   : > { %8028 = vmatprep.subr.bf16.mxu1 %v8918_v44  ;;  %7953 = vmatpush3.bf16.msra.mxu0 %v8967_v28  ;;  %v6571_v28 = vld [vmem:[%s9262_s12 + $0x884] sm:$0x3] }
  0x61   : > { %7954 = vmatprep.subr.bf16.mxu0 %v8969_v30 }
  0x63   : > { %8029 = vmatpush3.bf16.msra.mxu1 %v8918_v44  ;;  %v8984_v44 = vld [vmem:[%s9262_s12 + $0x4bc] ss:$40 sps:$4 sm:$0xff]  }
  0x64   : > { %8038 = vmatprep.subr.bf16.mxu1 %v8920_v50  ;;  %7955 = vmatpush3.bf16.msra.mxu0 %v8969_v30  ;;  %v6573_v30 = vld [vmem:[%s9262_s12 + $0x8ac] sm:$0x3] }
  0x65   : > { %7956 = vmatprep.subr.bf16.mxu0 %v8973_v33 }
  0x66   : > { %8031 = vmatmul.mubr.bf16.vlgmr.msra.gmra.mrb[0].mxu1 %v9378_v7 }
  0x67   : > { %8039 = vmatpush3.bf16.msra.mxu1 %v8920_v50  ;;  %8034 = vmatprep.mubr.bf16.mxu1 %v9383_v10  ;;  %v6558_v50 = vld [vmem:[%s9262_s12 + $0x790] sm:$0xc] }
  0x68   : > { %8040 = vmatprep.subr.bf16.mxu1 %v8922_v56  ;;  %7957 = vmatpush3.bf16.msra.mxu0 %v8973_v33  ;;  %v6574_v57 = vrot.slane %v6558_v50, 10  ;;  %v1776_v33 = vsel %vm9295_vm2, %v6576_v9, %v1775_v11  ;;  %v8981_v50 = vld [vmem:[%s10603_s3 + $0x220] sm:$0xff]   ;;  %v8994_v9 = vld [vmem:[%s10603_s3 + $0x4d8] sm:$0xff]   ;;  %v4456_v11 = vld [vmem:[%s9262_s12 + $0x88] sm:$0xc] }
  0x69   : > { %v7164_v17 = vrot.slane %v4456_v11, 10 }
  0x6a   : > { %v1768_v63 = vsel %vm9295_vm2, %v6574_v57, %v1767_v58  ;;  %v4452_v57 = vld [vmem:[%s9262_s12 + $0x38] sm:$0xc]  ;;  %v4453_v58 = vld [vmem:[%s9262_s12 + $0x3c] sm:$0x3] }
  0x6b   : > { %8041 = vmatpush3.bf16.msra.mxu1 %v8922_v56  ;;  %7959 = vmatmul.mubr.bf16.vlgmr.msra.gmra.mrb[8].mxu0 %v8976_v38  ;;  %v8970_v56 = vld [vmem:[%s9262_s12 + $0x82c] ss:$40 sps:$4 sm:$0xff]   ;;  %v6598_v3 = vcombine.low %v1768_v63, %v1772_v0  ;;  %v7162_v0 = vrot.slane %v4452_v57, 10  ;;  %v9003_v57 = vld [vmem:[%s10603_s3 + $0x4a0] sm:$0xff]  }
  0x6c   : > { %8042 = vmatprep.subr.bf16.mxu1 %v8924_v14  ;;  %7962 = vmatprep.mubr.bf16.mxu0 %v8982_v39 }
  0x6e   : > { %8035 = vmatmul.mubr.bf16.gmra.mrb[4].mxu1 %v9401_v20 }
  0x6f   : > { %8043 = vmatpush3.bf16.msra.mxu1 %v8924_v14  ;;  %8054 = vmatprep.mubr.bf16.mxu1 %v8936_v19  ;;  %v1779_v14 = vrot.slane %v6565_v8, 6  ;;  %v6568_v19 = vld [vmem:[%s9262_s12 + $0x858] sm:$0xc] }
  0x70   : > { %8044 = vmatprep.subr.bf16.mxu1 %v8926_v21 }
  0x73   : > { %8045 = vmatpush3.bf16.msra.mxu1 %v8926_v21  ;;  %7963 = vmatmul.mubr.bf16.gmra.mrb[12].mxu0 %v8984_v44  ;;  %v6569_v21 = vld [vmem:[%s9262_s12 + $0x85c] sm:$0x3]  ;;  %v8979_v44 = vld [vmem:[%s10603_s3 + $0x210] sm:$0xff]  }
  0x74   : > { %8046 = vmatprep.subr.bf16.mxu1 %v8928_v25  ;;  %v1787_v26 = vrot.slane %v6569_v21, 6  ;;  %v8996_v21 = vld [vmem:[%s10603_s3 + $0x4e8] sm:$0xff]  }
  0x77   : > { %8047 = vmatpush3.bf16.msra.mxu1 %v8928_v25  ;;  %v6579_v25 = vrot.slane %v6568_v19, 10 }
  0x78   : > { %8048 = vmatprep.subr.bf16.mxu1 %v8930_v27 }
  0x7b   : > { %8049 = vmatpush3.bf16.msra.mxu1 %v8930_v27  ;;  %v6570_v27 = vld [vmem:[%s9262_s12 + $0x880] sm:$0xc] }
  0x7c   : > { %8050 = vmatprep.subr.bf16.mxu1 %v8932_v29 }
  0x7f   : > { %8051 = vmatpush3.bf16.msra.mxu1 %v8932_v29  ;;  %v6572_v29 = vld [vmem:[%s9262_s12 + $0x8a8] sm:$0xc] }
  0x80   : > { %8052 = vmatprep.subr.bf16.mxu1 %v8934_v32 }
  0x83   : > { %8053 = vmatpush3.bf16.msra.mxu1 %v8934_v32  ;;  %v8977_v32 = vld [vmem:[%s10603_s3 + $0x200] sm:$0xff]  }
  0x84   : > { %8062 = vmatprep.subr.bf16.mxu1 %v8937_v34 }
  0x86   : > { %8055 = vmatmul.mubr.bf16.vlgmr.msra.gmra.mrb[0].mxu1 %v8938_v35  ;;  %v6580_v35 = vrot.slane %v6570_v27, 10 }
  0x87   : > { %8063 = vmatpush3.bf16.msra.mxu1 %v8937_v34  ;;  %8058 = vmatprep.mubr.bf16.mxu1 %v8950_v37  ;;  %v1780_v34 = vsel %vm9295_vm2, %v6577_v13, %v1779_v14  ;;  %v1788_v37 = vsel %vm9295_vm2, %v6579_v25, %v1787_v26  ;;  %v4460_v25 = vld [vmem:[%s9262_s12 + $0xd8] sm:$0xc]  ;;  %v4461_v26 = vld [vmem:[%s9262_s12 + $0xdc] sm:$0x3] }
  0x88   : > { %8064 = vmatprep.subr.bf16.mxu1 %v8940_v36  ;;  %v6599_v38 = vcombine.low %v1776_v33, %v1780_v34  ;;  %v4462_v33 = vld [vmem:[%s9262_s12 + $0x100] sm:$0xc]  ;;  %v4463_v34 = vld [vmem:[%s9262_s12 + $0x104] sm:$0x3] }
  0x8b   : > { %8065 = vmatpush3.bf16.msra.mxu1 %v8940_v36  ;;  %v1784_v36 = vsel %vm9295_vm2, %v6578_v23, %v1783_v24  ;;  %v4459_v23 = vld [vmem:[%s9262_s12 + $0xb4] sm:$0x3] }
  0x8c   : > { %8066 = vmatprep.subr.bf16.mxu1 %v8942_v40  ;;  %v6600_v39 = vcombine.low %v1784_v36, %v1788_v37  ;;  %v8997_v24 = vld [vmem:[%s10603_s3 + $0x4f0] sm:$0xff]   ;;  %v4464_v36 = vld [vmem:[%s9262_s12 + $0x128] sm:$0xc]  ;;  %v4465_v37 = vld [vmem:[%s9262_s12 + $0x12c] sm:$0x3] }
  0x8e   : > { %8059 = vmatmul.mubr.bf16.gmra.mrb[4].mxu1 %v8952_v41  ;;  %v6581_v41 = vrot.slane %v6572_v29, 10  ;;  %v8998_v29 = vld [vmem:[%s10603_s3 + $0x4f8] sm:$0xff]  }
  0x8f   : > { %8067 = vmatpush3.bf16.msra.mxu1 %v8942_v40  ;;  %8078 = vmatprep.mubr.bf16.mxu1 %v8956_v42  ;;  %v1791_v40 = vrot.slane %v6571_v28, 6  ;;  %v1795_v42 = vrot.slane %v6573_v30, 6  ;;  %v4500_v28 = vrot.slane %v4459_v23, 6  ;;  %v7166_v30 = vrot.slane %v4460_v25, 10  ;;  %v9010_v23 = vld [vmem:[%s10603_s3 + $0x508] sm:$0xff]  }
  0x90   : > { %8068 = vmatprep.subr.bf16.mxu1 %v8944_v43 }
  0x93   : > { %8069 = vmatpush3.bf16.msra.mxu1 %v8944_v43  ;;  %v8978_v43 = vld [vmem:[%s10603_s3 + $0x208] sm:$0xff]  }
  0x94   : > { %8070 = vmatprep.subr.bf16.mxu1 %v8946_v45 }
  0x97   : > { %8071 = vmatpush3.bf16.msra.mxu1 %v8946_v45  ;;  %v1792_v45 = vsel %vm9295_vm2, %v6580_v35, %v1791_v40  ;;  %v8999_v35 = vld [vmem:[%s10603_s3 + $0x480] sm:$0xff]   ;;  %v7167_v40 = vrot.slane %v4462_v33, 10 }
  0x98   : > { %8072 = vmatprep.subr.bf16.mxu1 %v8948_v46 }
  0x9b   : > { %8073 = vmatpush3.bf16.msra.mxu1 %v8948_v46  ;;  %v1796_v46 = vsel %vm9295_vm2, %v6581_v41, %v1795_v42  ;;  %v4508_v41 = vrot.slane %v4463_v34, 6  ;;  %v9011_v34 = vld [vmem:[%s10603_s3 + $0x510] sm:$0xff]  }
  0x9c   : > { %8074 = vmatprep.subr.bf16.mxu1 %v8951_v47 }
  0x9f   : > { %8075 = vmatpush3.bf16.msra.mxu1 %v8951_v47  ;;  %v8980_v47 = vld [vmem:[%s10603_s3 + $0x218] sm:$0xff]  }
  0xa0   : > { %8076 = vmatprep.subr.bf16.mxu1 %v8954_v48 }
  0xa3   : > { %8077 = vmatpush3.bf16.msra.mxu1 %v8954_v48  ;;  %v6601_v48 = vcombine.low %v1792_v45, %v1796_v46  ;;  %v9000_v45 = vld [vmem:[%s10603_s3 + $0x488] sm:$0xff]  }
  0xa4   : > { %8086 = vmatprep.subr.bf16.mxu1 %v8957_v49 }
  0xa6   : > { %8079 = vmatmul.mubr.bf16.vlgmr.msra.gmra.mrb[0].mxu1 %v8958_v54  ;;  %v8991_v54 = vld [vmem:[%s10603_s3 + $0x4c0] sm:$0xff]  }
  0xa7   : > { %8087 = vmatpush3.bf16.msra.mxu1 %v8957_v49  ;;  %8082 = vmatprep.mubr.bf16.mxu1 %v8970_v56  ;;  %v8987_v49 = vld [vmem:[%s9262_s12 + $0x798] ss:$40 sps:$4 sm:$0xff]   ;;  %v4451_v56 = vld [vmem:[%s9262_s12 + $0x14] sm:$0x3] }
  0xa8   : > { %8088 = vmatprep.subr.bf16.mxu1 %v8960_v55  ;;  %v4484_v63 = vrot.slane %v4451_v56, 6  ;;  %v9046_v56 = vld [vmem:[%s10605_s5 + $0x48] sm:$0xff]  }
  0xab   : > { %8089 = vmatpush3.bf16.msra.mxu1 %v8960_v55  ;;  %v4450_v55 = vld [vmem:[%s9262_s12 + $0x10] sm:$0xc] }
  0xac   : > { %8090 = vmatprep.subr.bf16.mxu1 %v8962_v61 }
  0xae   : > { %8083 = vmatmul.mubr.bf16.gmra.mrb[4].mxu1 %v8972_v62  ;;  %v7161_v62 = vrot.slane %v4450_v55, 10  ;;  %v9007_v55 = vld [vmem:[%s9262_s12] ss:$40 sps:$4 sm:$0xff]  }
  0xaf   : > { %8091 = vmatpush3.bf16.msra.mxu1 %v8962_v61  ;;  %8102 = vmatprep.mubr.bf16.mxu1 %v6598_v3  ;;  %v8992_v61 = vld [vmem:[%s10603_s3 + $0x4c8] sm:$0xff]   ;;  %v4454_v3 = vld [vmem:[%s9262_s12 + $0x60] sm:$0xc] }
  0xb0   : > { %8092 = vmatprep.subr.bf16.mxu1 %v8964_v1  ;;  %v4485_v6 = vsel %vm9295_vm2, %v7161_v62, %v4484_v63  ;;  %v7163_v14 = vrot.slane %v4454_v3, 10  ;;  %v6305_v62 = vld [vmem:[%s10602_s2] ss:$0 sm:$0xff] }
  0xb1   : > { %v9052_v63 = vld [vmem:[%s10605_s5 + $0x60] sm:$0xff]  }
  0xb3   : > { %8093 = vmatpush3.bf16.msra.mxu1 %v8964_v1  ;;  %v4488_v1 = vrot.slane %v4453_v58, 6  ;;  %v9048_v58 = vld [vmem:[%s10605_s5 + $0x50] sm:$0xff]  }
  0xb4   : > { %8094 = vmatprep.subr.bf16.mxu1 %v8966_v5 }
  0xb5   : > { %v4489_v8 = vsel %vm9295_vm2, %v7162_v0, %v4488_v1  ;;  %v9006_v1 = vld [vmem:[%s10603_s3 + $0x4b8] sm:$0xff]  }
  0xb6   : > { %v7185_v13 = vcombine.low %v4485_v6, %v4489_v8 }
  0xb7   : > { %8095 = vmatpush3.bf16.msra.mxu1 %v8966_v5  ;;  %v8990_v5 = vld [vmem:[%s9262_s12 + $0x888] ss:$40 sps:$4 sm:$0xff]  }
  0xb8   : > { %8096 = vmatprep.subr.bf16.mxu1 %v8968_v12 }
  0xbb   : > { %8097 = vmatpush3.bf16.msra.mxu1 %v8968_v12  ;;  %v4457_v12 = vld [vmem:[%s9262_s12 + $0x8c] sm:$0x3] }
  0xbc   : > { %8098 = vmatprep.subr.bf16.mxu1 %v8971_v15  ;;  %v4496_v19 = vrot.slane %v4457_v12, 6 }
  0xbf   : > { %8099 = vmatpush3.bf16.msra.mxu1 %v8971_v15  ;;  %v4492_v15 = vrot.slane %v4455_v4, 6 }
  0xc0   : > { %8100 = vmatprep.subr.bf16.mxu1 %v8974_v22 }
  0xc3   : > { %8101 = vmatpush3.bf16.msra.mxu1 %v8974_v22  ;;  %v4458_v22 = vld [vmem:[%s9262_s12 + $0xb0] sm:$0xc] }
  0xc4   : > { %8110 = vmatprep.subr.bf16.mxu1 %v8977_v32  ;;  %v7165_v27 = vrot.slane %v4458_v22, 10 }
  0xc6   : > { %8103 = vmatmul.mubr.bf16.vlgmr.msra.gmra.mrb[0].mxu1 %v6599_v38  ;;  %v4493_v38 = vsel %vm9295_vm2, %v7163_v14, %v4492_v15  ;;  %v4501_v42 = vsel %vm9295_vm2, %v7165_v27, %v4500_v28  ;;  %v9009_v14 = vld [vmem:[%s9262_s12 + $0x50] ss:$40 sps:$4 sm:$0xff]  }
  0xc7   : > { %8111 = vmatpush3.bf16.msra.mxu1 %v8977_v32  ;;  %8106 = vmatprep.mubr.bf16.mxu1 %v6600_v39  ;;  %v4504_v32 = vrot.slane %v4461_v26, 6  ;;  %v4497_v39 = vsel %vm9295_vm2, %v7164_v17, %v4496_v19 }
  0xc8   : > { %8112 = vmatprep.subr.bf16.mxu1 %v8978_v43 }
  0xcb   : > { %8113 = vmatpush3.bf16.msra.mxu1 %v8978_v43  ;;  %v4505_v43 = vsel %vm9295_vm2, %v7166_v30, %v4504_v32 }
  0xcc   : > { %8114 = vmatprep.subr.bf16.mxu1 %v8979_v44  ;;  %v7187_v46 = vcombine.low %v4501_v42, %v4505_v43  ;;  %v9013_v42 = vld [vmem:[%s10603_s3 + $0x520] sm:$0xff]   ;;  %v9014_v43 = vld [vmem:[%s10603_s3 + $0x528] sm:$0xff]  }
  0xce   : > { %8107 = vmatmul.mubr.bf16.gmra.mrb[4].mxu1 %v6601_v48  ;;  %v4512_v48 = vrot.slane %v4465_v37, 6  ;;  %v9017_v37 = vld [vmem:[%s9262_s12 + $0xf0] ss:$40 sps:$4 sm:$0xff]  }
  0xcf   : > { %8115 = vmatpush3.bf16.msra.mxu1 %v8979_v44  ;;  %8126 = vmatprep.mubr.bf16.mxu1 %v8987_v49  ;;  %v7186_v44 = vcombine.low %v4493_v38, %v4497_v39  ;;  %v9001_v49 = vld [vmem:[%s10603_s3 + $0x490] sm:$0xff]   ;;  %v9019_v39 = vld [vmem:[%s9262_s12 + $0x24] ss:$40 sps:$4 sm:$0xff]  }
  0xd0   : > { %8116 = vmatprep.subr.bf16.mxu1 %v8980_v47 }
  0xd3   : > { %8117 = vmatpush3.bf16.msra.mxu1 %v8980_v47  ;;  %v7168_v47 = vrot.slane %v4464_v36, 10 }
  0xd4   : > { %8118 = vmatprep.subr.bf16.mxu1 %v8981_v50 }
  0xd7   : > { %8119 = vmatpush3.bf16.msra.mxu1 %v8981_v50  ;;  %v4509_v50 = vsel %vm9295_vm2, %v7167_v40, %v4508_v41  ;;  %v9012_v41 = vld [vmem:[%s10603_s3 + $0x518] sm:$0xff]  }
  0xd8   : > { %8120 = vmatprep.subr.bf16.mxu1 %v8983_v51 }
  0xdb   : > { %8121 = vmatpush3.bf16.msra.mxu1 %v8983_v51  ;;  %v4513_v51 = vsel %vm9295_vm2, %v7168_v47, %v4512_v48  ;;  %v9018_v47 = vld [vmem:[%s10603_s3 + $0x538] sm:$0xff]  }
  0xdc   : > { %8122 = vmatprep.subr.bf16.mxu1 %v8985_v52  ;;  %v9058_v48 = vld [vmem:[%s10605_s5 + $0x78] sm:$0xff]  }
  0xdf   : > { %8123 = vmatpush3.bf16.msra.mxu1 %v8985_v52  ;;  %v9044_v52 = vld [vmem:[%s10605_s5 + $0x40] sm:$0xff]  }
  0xe0   : > { %8124 = vmatprep.subr.bf16.mxu1 %v8986_v53  ;;  %8134 = vmatprep.subr.bf16.mxu0 %v9044_v52 }
  0xe1   : > { %8135 = vmatpush3.bf16.msra.mxu0 %v9044_v52  ;;  %v9787_v52 = vld [vmem:[%s10605_s5] sm:$0xff]  }
  0xe2   : > { %8136 = vmatprep.subr.bf16.mxu0 %v9046_v56 }
  0xe3   : > { %8125 = vmatpush3.bf16.msra.mxu1 %v8986_v53  ;;  %v9002_v53 = vld [vmem:[%s10603_s3 + $0x498] sm:$0xff]  }
  0xe4   : > { %8422 = vmatprep.subr.bf16.mxu1 %v8991_v54 }
  0xe5   : > { %8137 = vmatpush3.bf16.msra.mxu0 %v9046_v56  ;;  %v9031_v56 = vld [vmem:[%s9262_s12 + $0x5a0] ss:$40 sps:$4 sm:$0xff]  }
  0xe6   : > { %8127 = vmatmul.mubr.bf16.vlgmr.msra.gmra.mrb[0].mxu1 %v8988_v59  ;;  %8138 = vmatprep.subr.bf16.mxu0 %v9048_v58  ;;  %v9004_v59 = vld [vmem:[%s10603_s3 + $0x4a8] sm:$0xff]  }
  0xe7   : > { %8130 = vmatprep.mubr.bf16.mxu1 %v8989_v60  ;;  %8423 = vmatpush3.bf16.msra.mxu1 %v8991_v54  ;;  %v7188_v54 = vcombine.low %v4509_v50, %v4513_v51  ;;  %v9050_v60 = vld [vmem:[%s10605_s5 + $0x58] sm:$0xff]   ;;  %v9027_v51 = vld [vmem:[%s9262_s12 + $0xc4] ss:$40 sps:$4 sm:$0xff]  }
  0xe8   : > { %8424 = vmatprep.subr.bf16.mxu1 %v8992_v61  ;;  %v9021_v50 = vld [vmem:[%s9262_s12 + $0x74] ss:$40 sps:$4 sm:$0xff]  }
  0xe9   : > { %8139 = vmatpush3.bf16.msra.mxu0 %v9048_v58  ;;  %v9025_v58 = vld [vmem:[%s10603_s3 + $0x560] sm:$0xff]  }
  0xea   : > { %8140 = vmatprep.subr.bf16.mxu0 %v9050_v60 }
  0xeb   : > { %8425 = vmatpush3.bf16.msra.mxu1 %v8992_v61  ;;  %v9005_v61 = vld [vmem:[%s10603_s3 + $0x4b0] sm:$0xff]  }
  0xec   : > { %8426 = vmatprep.subr.bf16.mxu1 %v8993_v2 }
  0xed   : > { %8141 = vmatpush3.bf16.msra.mxu0 %v9050_v60  ;;  %v9028_v60 = vld [vmem:[%s10603_s3 + $0x570] sm:$0xff]  }
  0xee   : > { %8131 = vmatmul.mubr.bf16.gmra.mrb[4].mxu1 %v8990_v5  ;;  %8142 = vmatprep.subr.bf16.mxu0 %v9052_v63 }
  0xef   : > { %8427 = vmatpush3.bf16.msra.mxu1 %v8993_v2  ;;  %8438 = vmatprep.mubr.bf16.mxu1 %v7185_v13  ;;  %v9008_v13 = vld [vmem:[%s10603_s3 + $0x500] sm:$0xff]  }
  0xf0   : > { %8428 = vmatprep.subr.bf16.mxu1 %v8994_v9 }
  0xf1   : > { %8143 = vmatpush3.bf16.msra.mxu0 %v9052_v63 }
  0xf3   : > { %8429 = vmatpush3.bf16.msra.mxu1 %v8994_v9 }
  0xf4   : > { %8430 = vmatprep.subr.bf16.mxu1 %v8995_v16 }
  0xf7   : > { %8431 = vmatpush3.bf16.msra.mxu1 %v8995_v16  ;;  %v9015_v16 = vld [vmem:[%s9262_s12 + $0xa0] ss:$40 sps:$4 sm:$0xff]  }
  0xf8   : > { %8432 = vmatprep.subr.bf16.mxu1 %v8996_v21 }
  0xfb   : > { %8433 = vmatpush3.bf16.msra.mxu1 %v8996_v21 }
  0xfc   : > { %8434 = vmatprep.subr.bf16.mxu1 %v8997_v24  ;;  %v7912_v0 = vpop.f32.mrb[0].mxu0 }
  0xfd   : > { %v492_v2 = vadd.f32 %v7912_v0, %v6305_v62  ;;  %v483_v3 = vpop.f32.mrb[1].mxu0 }
  0xfe   : > { %v484_v4 = vadd.f32 %v6305_v62, %v483_v3  ;;  %v7913_v5 = vpop.f32.mrb[2].mxu0  ;;  %v9033_v3 = vld [vmem:[%s9262_s12 + $0x5f0] ss:$40 sps:$4 sm:$0xff]  }
  0xff   : > { %8435 = vmatpush3.bf16.msra.mxu1 %v8997_v24  ;;  %v516_v6 = vmax.f32 %v492_v2, 0.0  ;;  %v495_v8 = vadd.f32 %v7913_v5, %v6305_v62  ;;  %v486_v9 = vpop.f32.mrb[3].mxu0  ;;  %v9032_v2 = vld [vmem:[%s10603_s3 + $0x580] sm:$0xff]  }
 0x100   : > { %8436 = vmatprep.subr.bf16.mxu1 %v8998_v29  ;;  %v514_v11 = vmax.f32 %v484_v4, 0.0  ;;  %v487_v12 = vadd.f32 %v6305_v62, %v486_v9  ;;  %v9039_v4 = vld [vmem:[%s9262_s12 + $0x640] ss:$40 sps:$4 sm:$0xff]  }
 0x101   : > { %v517_v15 = vmax.f32 %v495_v8, 0.0 }
 0x102   : > { %v515_v17 = vmax.f32 %v487_v12, 0.0  ;;  %v9035_v12 = vld [vmem:[%s10603_s3 + $0x590] sm:$0xff]  }
 0x103   : > { %8437 = vmatpush3.bf16.msra.mxu1 %v8998_v29  ;;  %v9739_v19 = vpack.c.bf16 %v517_v15, %v516_v6  ;;  %v9034_v6 = vld [vmem:[%s10603_s3 + $0x588] sm:$0xff]   ;;  %v9037_v15 = vld [vmem:[%s10603_s3 + $0x5a0] sm:$0xff]  }
 0x104   : > { %8446 = vmatprep.subr.bf16.mxu1 %v8999_v35  ;;  %v9741_v21 = vpack.c.bf16 %v515_v17, %v514_v11  ;;  %v7916_v22 = vpop.f32.mrb[4].mxu0  ;;  %v9040_v17 = vld [vmem:[%s10603_s3 + $0x5b0] sm:$0xff]  }
 0x105   : > { %v508_v24 = vadd.f32 %v7916_v22, %v6305_v62  ;;  %v499_v25 = vpop.f32.mrb[5].mxu0  ;;  %v9042_v22 = vld [vmem:[%s10603_s3 + $0x5b8] sm:$0xff]  }
 0x106   : > { %8439 = vmatmul.mubr.bf16.vlgmr.msra.gmra.mrb[8].mxu1 %v7186_v44  ;;  %v500_v26 = vadd.f32 %v6305_v62, %v499_v25  ;;  %v7917_v27 = vpop.f32.mrb[6].mxu0  ;;  %v9054_v44 = vld [vmem:[%s10605_s5 + $0x68] sm:$0xff]   ;;  %v9047_v25 = vld [vmem:[%s10603_s3 + $0x5d0] sm:$0xff]  }
 0x107   : > { %8447 = vmatpush3.bf16.msra.mxu1 %v8999_v35  ;;  %8442 = vmatprep.mubr.bf16.mxu1 %v7187_v46  ;;  %v520_v28 = vmax.f32 %v508_v24, 0.0  ;;  %v511_v29 = vadd.f32 %v7917_v27, %v6305_v62  ;;  %v502_v30 = vpop.f32.mrb[7].mxu0  ;;  %v9056_v46 = vld [vmem:[%s10605_s5 + $0x70] sm:$0xff]   ;;  %v9045_v24 = vld [vmem:[%s10603_s3 + $0x5c8] sm:$0xff]   ;;  %v9049_v27 = vld [vmem:[%s10603_s3 + $0x5d8] sm:$0xff]  }
 0x108   : > { %8448 = vmatprep.subr.bf16.mxu1 %v9000_v45  ;;  %v518_v32 = vmax.f32 %v500_v26, 0.0  ;;  %v503_v33 = vadd.f32 %v6305_v62, %v502_v30  ;;  %8144 = vmatprep.subr.bf16.mxu0 %v9054_v44  ;;  %v9030_v62 = vld [vmem:[%s10603_s3 + $0x578] sm:$0xff]   ;;  %v9059_v26 = vld [vmem:[%s9262_s12 + $0x5c4] ss:$40 sps:$4 sm:$0xff]   ;;  %v9055_v30 = vld [vmem:[%s10603_s3 + $0x5f0] sm:$0xff]  }
 0x109   : > { %v521_v35 = vmax.f32 %v511_v29, 0.0  ;;  %8145 = vmatpush3.bf16.msra.mxu0 %v9054_v44  ;;  %v9053_v29 = vld [vmem:[%s10603_s3 + $0x5e8] sm:$0xff]  }
 0x10a   : > { %v519_v36 = vmax.f32 %v503_v33, 0.0  ;;  %8146 = vmatprep.subr.bf16.mxu0 %v9056_v46  ;;  %v9060_v33 = vld [vmem:[%s10603_s3 + $0x600] sm:$0xff]   ;;  %v9071_v44 = vld [vmem:[%s10603_s3 + $0x628] sm:$0xff]  }
 0x10b   : > { %8449 = vmatpush3.bf16.msra.mxu1 %v9000_v45  ;;  %v9750_v38 = vpack.c.bf16 %v521_v35, %v520_v28  ;;  %v9016_v45 = vld [vmem:[%s10603_s3 + $0x530] sm:$0xff]   ;;  %v9051_v28 = vld [vmem:[%s10603_s3 + $0x5e0] sm:$0xff]  }
 0x10c   : > { %8450 = vmatprep.subr.bf16.mxu1 %v9001_v49  ;;  %v9753_v40 = vpack.c.bf16 %v519_v36, %v518_v32  ;;  %v9057_v32 = vld [vmem:[%s10603_s3 + $0x5f8] sm:$0xff]   ;;  %v9073_v35 = vld [vmem:[%s9262_s12 + $0x664] ss:$40 sps:$4 sm:$0xff]  }
 0x10d   : > { %8147 = vmatpush3.bf16.msra.mxu0 %v9056_v46  ;;  %v9063_v36 = vld [vmem:[%s10603_s3 + $0x608] sm:$0xff]  }
 0x10e   : > { %8443 = vmatmul.mubr.bf16.gmra.mrb[12].mxu1 %v7188_v54  ;;  %8148 = vmatprep.subr.bf16.mxu0 %v9058_v48  ;;  %v9023_v54 = vld [vmem:[%s10603_s3 + $0x550] sm:$0xff]  }
 0x10f   : > { %8451 = vmatpush3.bf16.msra.mxu1 %v9001_v49  ;;  %8462 = vmatprep.mubr.bf16.mxu1 %v9007_v55  ;;  %v9020_v49 = vld [vmem:[%s10603_s3 + $0x540] sm:$0xff]   ;;  %v9029_v55 = vld [vmem:[%s9262_s12 + $0x114] ss:$40 sps:$4 sm:$0xff]  }
 0x110   : > { %8452 = vmatprep.subr.bf16.mxu1 %v9002_v53 }
 0x111   : > { %8149 = vmatpush3.bf16.msra.mxu0 %v9058_v48 }
 0x112   : > { %8158 = vmatprep.subr.bf16.mxu0 %v9787_v52 }
 0x113   : > { %8453 = vmatpush3.bf16.msra.mxu1 %v9002_v53  ;;  %v9022_v53 = vld [vmem:[%s10603_s3 + $0x548] sm:$0xff]  }
 0x114   : > { %8454 = vmatprep.subr.bf16.mxu1 %v9003_v57 }
 0x117   : > { %8455 = vmatpush3.bf16.msra.mxu1 %v9003_v57  ;;  %v9024_v57 = vld [vmem:[%s10603_s3 + $0x558] sm:$0xff]  }
 0x118   : > { %8456 = vmatprep.subr.bf16.mxu1 %v9004_v59 }
 0x11b   : > { %8457 = vmatpush3.bf16.msra.mxu1 %v9004_v59  ;;  %v9026_v59 = vld [vmem:[%s10603_s3 + $0x568] sm:$0xff]  }
 0x11c   : > { %8458 = vmatprep.subr.bf16.mxu1 %v9005_v61 }
 0x11f   : > { %8459 = vmatpush3.bf16.msra.mxu1 %v9005_v61 }
 0x120   : > { %8460 = vmatprep.subr.bf16.mxu1 %v9006_v1 }
 0x123   : > { %8461 = vmatpush3.bf16.msra.mxu1 %v9006_v1 }
 0x124   : > { %8470 = vmatprep.subr.bf16.mxu1 %v9008_v13 }
 0x126   : > { %8463 = vmatmul.mubr.bf16.vlgmr.msra.gmra.mrb[8].mxu1 %v9009_v14  ;;  %v9036_v14 = vld [vmem:[%s10603_s3 + $0x598] sm:$0xff]  }
 0x127   : > { %8471 = vmatpush3.bf16.msra.mxu1 %v9008_v13  ;;  %8466 = vmatprep.mubr.bf16.mxu1 %v9015_v16  ;;  %v9041_v13 = vld [vmem:[%s9262_s12 + $0x690] ss:$40 sps:$4 sm:$0xff]   ;;  %v9038_v16 = vld [vmem:[%s10603_s3 + $0x5a8] sm:$0xff]  }
 0x128   : > { %8472 = vmatprep.subr.bf16.mxu1 %v9010_v23 }
 0x12b   : > { %8473 = vmatpush3.bf16.msra.mxu1 %v9010_v23  ;;  %v9043_v23 = vld [vmem:[%s10603_s3 + $0x5c0] sm:$0xff]  }
 0x12c   : > { %8474 = vmatprep.subr.bf16.mxu1 %v9011_v34 }
 0x12e   : > { %8467 = vmatmul.mubr.bf16.gmra.mrb[12].mxu1 %v9017_v37  ;;  %v9065_v37 = vld [vmem:[%s10603_s3 + $0x610] sm:$0xff]  }
 0x12f   : > { %8475 = vmatpush3.bf16.msra.mxu1 %v9011_v34  ;;  %8486 = vmatprep.mubr.bf16.mxu1 %v9019_v39  ;;  %v9061_v34 = vld [vmem:[%s9262_s12 + $0x614] ss:$40 sps:$4 sm:$0xff]  }
 0x130   : > { %8476 = vmatprep.subr.bf16.mxu1 %v9012_v41  ;;  %v9075_v39 = vld [vmem:[%s9262_s12 + $0x6b4] ss:$40 sps:$4 sm:$0xff]  }
 0x133   : > { %8477 = vmatpush3.bf16.msra.mxu1 %v9012_v41  ;;  %v9079_v41 = vld [vmem:[%s9262_s12 + $0xb40] ss:$40 sps:$4 sm:$0xff]  }
 0x134   : > { %8478 = vmatprep.subr.bf16.mxu1 %v9013_v42 }
 0x137   : > { %8479 = vmatpush3.bf16.msra.mxu1 %v9013_v42  ;;  %v9067_v42 = vld [vmem:[%s10603_s3 + $0x618] sm:$0xff]  }
 0x138   : > { %8480 = vmatprep.subr.bf16.mxu1 %v9014_v43 }
 0x13b   : > { %8481 = vmatpush3.bf16.msra.mxu1 %v9014_v43  ;;  %v9069_v43 = vld [vmem:[%s10603_s3 + $0x620] sm:$0xff]  }
 0x13c   : > { %8482 = vmatprep.subr.bf16.mxu1 %v9016_v45 }
 0x13e   : > { %v9810_v61 = vpop.f32.mrb[8].mxu0 }
 0x13f   : > { %8483 = vmatpush3.bf16.msra.mxu1 %v9016_v45  ;;  %v9815_v63 = vpop.f32.mrb[9].mxu0  ;;  %v9074_v45 = vld [vmem:[%s10603_s3 + $0x630] sm:$0xff]  }
 0x140   : > { %8484 = vmatprep.subr.bf16.mxu1 %v9018_v47  ;;  %v9817_v0 = vpop.f32.mrb[10].mxu0 }
 0x141   : > { %v9819_v1 = vpop.f32.mrb[11].mxu0 }
 0x143   : > { %8485 = vmatpush3.bf16.msra.mxu1 %v9018_v47  ;;  %v6646_v47 = vld [vmem:[%s10604_s4] ss:$0 sm:$0xff] }
 0x144   : > { %8494 = vmatprep.subr.bf16.mxu1 %v9020_v49 }
 0x146   : > { %8487 = vmatmul.mubr.bf16.vlgmr.msra.gmra.mrb[8].mxu1 %v9021_v50  ;;  %v9826_v5 = vpop.f32.mrb[12].mxu0 }
 0x147   : > { %8495 = vmatpush3.bf16.msra.mxu1 %v9020_v49  ;;  %8490 = vmatprep.mubr.bf16.mxu1 %v9027_v51  ;;  %v9831_v8 = vpop.f32.mrb[13].mxu0 }
 0x148   : > { %8496 = vmatprep.subr.bf16.mxu1 %v9022_v53  ;;  %v9833_v9 = vpop.f32.mrb[14].mxu0 }
 0x149   : > { %v9835_v11 = vpop.f32.mrb[15].mxu0 }
 0x14b   : > { %8497 = vmatpush3.bf16.msra.mxu1 %v9022_v53 }
 0x14c   : > { %8498 = vmatprep.subr.bf16.mxu1 %v9023_v54 }
 0x14e   : > { %8491 = vmatmul.mubr.bf16.gmra.mrb[12].mxu1 %v9029_v55 }
 0x14f   : > { %8499 = vmatpush3.bf16.msra.mxu1 %v9023_v54  ;;  %8510 = vmatprep.mubr.bf16.mxu1 %v9031_v56  ;;  %v9077_v56 = vld [vmem:[%s10603_s3 + $0x638] sm:$0xff]  }
 0x150   : > { %8500 = vmatprep.subr.bf16.mxu1 %v9024_v57 }
 0x153   : > { %8501 = vmatpush3.bf16.msra.mxu1 %v9024_v57 }
 0x154   : > { %8502 = vmatprep.subr.bf16.mxu1 %v9025_v58 }
 0x157   : > { %8503 = vmatpush3.bf16.msra.mxu1 %v9025_v58 }
 0x158   : > { %8504 = vmatprep.subr.bf16.mxu1 %v9026_v59 }
 0x15b   : > { %8505 = vmatpush3.bf16.msra.mxu1 %v9026_v59 }
 0x15c   : > { %8506 = vmatprep.subr.bf16.mxu1 %v9028_v60 }
 0x15f   : > { %8507 = vmatpush3.bf16.msra.mxu1 %v9028_v60 }
 0x160   : > { %8508 = vmatprep.subr.bf16.mxu1 %v9030_v62 }
 0x163   : > { %8509 = vmatpush3.bf16.msra.mxu1 %v9030_v62 }
 0x164   : > { %8518 = vmatprep.subr.bf16.mxu1 %v9032_v2 }
 0x166   : > { %8511 = vmatmul.mubr.bf16.vlgmr.msra.gmra.mrb[8].mxu1 %v9033_v3 }
 0x167   : > { %8519 = vmatpush3.bf16.msra.mxu1 %v9032_v2  ;;  %8514 = vmatprep.mubr.bf16.mxu1 %v9039_v4  ;;  %v9081_v4 = vld [vmem:[%s9262_s12 + $0xb90] ss:$40 sps:$4 sm:$0xff]  }
 0x168   : > { %8520 = vmatprep.subr.bf16.mxu1 %v9034_v6 }
 0x16b   : > { %8521 = vmatpush3.bf16.msra.mxu1 %v9034_v6 }
 0x16c   : > { %8522 = vmatprep.subr.bf16.mxu1 %v9035_v12 }
 0x16e   : > { %8515 = vmatmul.mubr.bf16.gmra.mrb[12].mxu1 %v9041_v13  ;;  %v7369_v13 = vld [vmem:[%s9262_s12 + $0xb50] sm:$0xc] }
 0x16f   : > { %8523 = vmatpush3.bf16.msra.mxu1 %v9035_v12  ;;  %8534 = vmatprep.mubr.bf16.mxu1 %v9317_v31 }
 0x170   : > { %8524 = vmatprep.subr.bf16.mxu1 %v9036_v14 }
 0x173   : > { %8525 = vmatpush3.bf16.msra.mxu1 %v9036_v14  ;;  %v7370_v14 = vld [vmem:[%s9262_s12 + $0xb54] sm:$0x3] }
 0x174   : > { %8526 = vmatprep.subr.bf16.mxu1 %v9037_v15 }
 0x177   : > { %8527 = vmatpush3.bf16.msra.mxu1 %v9037_v15 }
 0x178   : > { %8528 = vmatprep.subr.bf16.mxu1 %v9038_v16 }
 0x17b   : > { %8529 = vmatpush3.bf16.msra.mxu1 %v9038_v16 }
 0x17c   : > { %8530 = vmatprep.subr.bf16.mxu1 %v9040_v17 }
 0x17f   : > { %8531 = vmatpush3.bf16.msra.mxu1 %v9040_v17 }
 0x180   : > { %8532 = vmatprep.subr.bf16.mxu1 %v9042_v22 }
 0x183   : > { %8533 = vmatpush3.bf16.msra.mxu1 %v9042_v22  ;;  %v7371_v22 = vld [vmem:[%s9262_s12 + $0xb78] sm:$0xc] }
 0x184   : > { %8542 = vmatprep.subr.bf16.mxu1 %v9043_v23 }
 0x186   : > { %8535 = vmatmul.mubr.bf16.vlgmr.msra.gmra.mrb[8].mxu1 %v9378_v7 }
 0x187   : > { %8543 = vmatpush3.bf16.msra.mxu1 %v9043_v23  ;;  %8538 = vmatprep.mubr.bf16.mxu1 %v9383_v10  ;;  %v7372_v23 = vld [vmem:[%s9262_s12 + $0xb7c] sm:$0x3] }
 0x188   : > { %8544 = vmatprep.subr.bf16.mxu1 %v9045_v24 }
 0x18b   : > { %8545 = vmatpush3.bf16.msra.mxu1 %v9045_v24 }
 0x18c   : > { %8546 = vmatprep.subr.bf16.mxu1 %v9047_v25 }
 0x18e   : > { %8539 = vmatmul.mubr.bf16.gmra.mrb[12].mxu1 %v9401_v20 }
 0x18f   : > { %8547 = vmatpush3.bf16.msra.mxu1 %v9047_v25  ;;  %8558 = vmatprep.mubr.bf16.mxu1 %v9059_v26 }
 0x190   : > { %8548 = vmatprep.subr.bf16.mxu1 %v9049_v27 }
 0x193   : > { %8549 = vmatpush3.bf16.msra.mxu1 %v9049_v27  ;;  %v9064_v27 = vld [vmem:[%s10605_s5 + $0x8] sm:$0xff]  }
 0x194   : > { %8550 = vmatprep.subr.bf16.mxu1 %v9051_v28 }
 0x197   : > { %8551 = vmatpush3.bf16.msra.mxu1 %v9051_v28 }
 0x198   : > { %8552 = vmatprep.subr.bf16.mxu1 %v9053_v29 }
 0x19b   : > { %8553 = vmatpush3.bf16.msra.mxu1 %v9053_v29  ;;  %v9093_v29 = vld [vmem:[%s9262_s12 + $0xbe0] ss:$40 sps:$4 sm:$0xff]  }
 0x19c   : > { %8554 = vmatprep.subr.bf16.mxu1 %v9055_v30 }
 0x19f   : > { %8555 = vmatpush3.bf16.msra.mxu1 %v9055_v30  ;;  %v7385_v30 = vrot.slane %v7369_v13, 10 }
 0x1a0   : > { %8556 = vmatprep.subr.bf16.mxu1 %v9057_v32 }
 0x1a3   : > { %8557 = vmatpush3.bf16.msra.mxu1 %v9057_v32 }
 0x1a4   : > { %8566 = vmatprep.subr.bf16.mxu1 %v9060_v33 }
 0x1a6   : > { %8559 = vmatmul.mubr.bf16.vlgmr.msra.gmra.mrb[8].mxu1 %v9061_v34  ;;  %v5654_v34 = vrot.slane %v7372_v23, 6  ;;  %v6720_v23 = vld [vmem:[%s9262_s12 + $0x1f4] sm:$0x3] }
 0x1a7   : > { %8567 = vmatpush3.bf16.msra.mxu1 %v9060_v33  ;;  %8562 = vmatprep.mubr.bf16.mxu1 %v9073_v35  ;;  %v7386_v33 = vrot.slane %v7371_v22, 10  ;;  %v6719_v22 = vld [vmem:[%s9262_s12 + $0x1f0] sm:$0xc] }
 0x1a8   : > { %8568 = vmatprep.subr.bf16.mxu1 %v9063_v36 }
 0x1ab   : > { %8569 = vmatpush3.bf16.msra.mxu1 %v9063_v36 }
 0x1ac   : > { %8570 = vmatprep.subr.bf16.mxu1 %v9065_v37 }
 0x1ae   : > { %8563 = vmatmul.mubr.bf16.gmra.mrb[12].mxu1 %v9075_v39  ;;  %v9085_v39 = vld [vmem:[%s10603_s3 + $0x650] sm:$0xff]  }
 0x1af   : > { %8571 = vmatpush3.bf16.msra.mxu1 %v9065_v37  ;;  %8582 = vmatprep.mubr.bf16.mxu1 %v9079_v41 }
 0x1b0   : > { %8572 = vmatprep.subr.bf16.mxu1 %v9067_v42 }
 0x1b3   : > { %8573 = vmatpush3.bf16.msra.mxu1 %v9067_v42 }
 0x1b4   : > { %8574 = vmatprep.subr.bf16.mxu1 %v9069_v43 }
 0x1b7   : > { %8575 = vmatpush3.bf16.msra.mxu1 %v9069_v43 }
 0x1b8   : > { %8576 = vmatprep.subr.bf16.mxu1 %v9071_v44 }
 0x1b9   : > { %v8128_v46 = vpop.f32.mrb[0].mxu1 }
 0x1ba   : > { %v8662_v48 = vadd.f32 %v8128_v46, %v9810_v61  ;;  %v2082_v49 = vpop.f32.mrb[1].mxu1 }
 0x1bb   : > { %v8663_v50 = vadd.f32 %v2082_v49, %v9815_v63  ;;  %v8129_v51 = vpop.f32.mrb[2].mxu1  ;;  %8577 = vmatpush3.bf16.msra.mxu1 %v9071_v44  ;;  %v9080_v63 = vld [vmem:[%s10603_s3 + $0x640] sm:$0xff]   ;;  %v9095_v44 = vld [vmem:[%s9262_s12 + $0xc30] ss:$40 sps:$4 sm:$0xff]  }
 0x1bc   : > { %v2130_v53 = vadd.f32 %v8662_v48, %v6646_v47  ;;  %v8664_v54 = vadd.f32 %v8129_v51, %v9817_v0  ;;  %v2085_v55 = vpop.f32.mrb[3].mxu1  ;;  %8578 = vmatprep.subr.bf16.mxu1 %v9074_v45  ;;  %v9087_v48 = vld [vmem:[%s10603_s3 + $0x658] sm:$0xff]   ;;  %v9089_v51 = vld [vmem:[%s10603_s3 + $0x660] sm:$0xff]  }
 0x1bd   : > { %v2128_v57 = vadd.f32 %v8663_v50, %v6646_v47  ;;  %v8665_v58 = vadd.f32 %v2085_v55, %v9819_v1  ;;  %v9070_v50 = vld [vmem:[%s10605_s5 + $0x20] sm:$0xff]   ;;  %v9094_v55 = vld [vmem:[%s10603_s3 + $0x670] sm:$0xff]  }
 0x1be   : > { %v2131_v59 = vadd.f32 %v8664_v54, %v6646_v47  ;;  %v2138_v61 = vmax.f32 %v2130_v53, 0.0  ;;  %v9091_v53 = vld [vmem:[%s10603_s3 + $0x668] sm:$0xff]   ;;  %v9076_v54 = vld [vmem:[%s10605_s5 + $0x30] sm:$0xff]  }
 0x1bf   : > { %v2129_v60 = vadd.f32 %v8665_v58, %v6646_v47  ;;  %8579 = vmatpush3.bf16.msra.mxu1 %v9074_v45  ;;  %v2136_v0 = vmax.f32 %v2128_v57, 0.0  ;;  %v5655_v45 = vsel %vm9295_vm2, %v7386_v33, %v5654_v34  ;;  %v7374_v57 = vld [vmem:[%s9262_s12 + $0xba4] sm:$0x3]  ;;  %v7375_v58 = vld [vmem:[%s9262_s12 + $0xbc8] sm:$0xc]  ;;  %v2507_v33 = vrot.slane %v6720_v23, 6 }
 0x1c0   : > { %v2139_v62 = vmax.f32 %v2131_v59, 0.0  ;;  %8580 = vmatprep.subr.bf16.mxu1 %v9077_v56  ;;  %v7376_v59 = vld [vmem:[%s9262_s12 + $0xbcc] sm:$0x3] }
 0x1c1   : > { %v2137_v2 = vmax.f32 %v2129_v60, 0.0  ;;  %v8132_v3 = vpop.f32.mrb[4].mxu1  ;;  %v7377_v60 = vld [vmem:[%s9262_s12 + $0xbf0] sm:$0xc]  ;;  %v9084_v34 = vld [vmem:[%s10603_s3 + $0x288] sm:$0xff]  }
 0x1c2   : > { %v2145_v6 = vpack.c.bf16 %v2139_v62, %v2138_v61  ;;  %v8666_v1 = vadd.f32 %v8132_v3, %v9826_v5  ;;  %v2098_v12 = vpop.f32.mrb[5].mxu1  ;;  %v9083_v5 = vld [vmem:[%s10603_s3 + $0x648] sm:$0xff]   ;;  %v7378_v61 = vld [vmem:[%s9262_s12 + $0xbf4] sm:$0x3]  ;;  %v7379_v62 = vld [vmem:[%s9262_s12 + $0xc18] sm:$0xc] }
 0x1c3   : > { %v8667_v15 = vadd.f32 %v2098_v12, %v9831_v8  ;;  %v8133_v16 = vpop.f32.mrb[6].mxu1  ;;  %v2144_v17 = vpack.c.bf16 %v2137_v2, %v2136_v0  ;;  %8581 = vmatpush3.bf16.msra.mxu1 %v9077_v56  ;;  %v7373_v56 = vld [vmem:[%s9262_s12 + $0xba0] sm:$0xc]  ;;  %v9078_v0 = vld [vmem:[%s10605_s5 + $0x38] sm:$0xff]   ;;  %v7389_v12 = vrot.slane %v7377_v60, 10  ;;  %v5666_v13 = vrot.slane %v7378_v61, 6 }
 0x1c4   : > { %v2134_v24 = vadd.f32 %v8666_v1, %v6646_v47  ;;  %v8668_v25 = vadd.f32 %v8133_v16, %v9833_v9  ;;  %v2101_v26 = vpop.f32.mrb[7].mxu1  ;;  %8590 = vmatprep.subr.bf16.mxu1 %v9080_v63  ;;  %v5650_v9 = vrot.slane %v7370_v14, 6  ;;  %v9097_v2 = vld [vmem:[%s10603_s3 + $0x678] sm:$0xff]   ;;  %v7387_v3 = vrot.slane %v7373_v56, 10  ;;  %v9082_v16 = vld [vmem:[%s10603_s3 + $0x280] sm:$0xff]   ;;  %v9096_v56 = vld [vmem:[%s10603_s3 + $0x2b0] sm:$0xff]  }
 0x1c5   : > { %v2132_v28 = vadd.f32 %v8667_v15, %v6646_v47  ;;  %v8669_v8 = vadd.f32 %v2101_v26, %v9835_v11  ;;  %8150 = vmatprep.mubr.bf16.mxu0 %v2144_v17  ;;  %v9066_v11 = vld [vmem:[%s10605_s5 + $0x10] sm:$0xff]   ;;  %v5662_v1 = vrot.slane %v7376_v59, 6  ;;  %v7390_v14 = vrot.slane %v7379_v62, 10  ;;  %v9099_v17 = vld [vmem:[%s10603_s3 + $0x680] sm:$0xff]   ;;  %v6721_v26 = vld [vmem:[%s9262_s12 + $0x218] sm:$0xc] }
 0x1c6   : > { %v2135_v32 = vadd.f32 %v8668_v25, %v6646_v47  ;;  %8151 = vmatmul.mubr.bf16.vlgmr.msra.gmra.mrb[16].mxu0 %v2145_v6  ;;  %8583 = vmatmul.mubr.bf16.vlgmr.msra.gmra.mrb[8].mxu1 %v9081_v4  ;;  %v2142_v36 = vmax.f32 %v2134_v24, 0.0  ;;  %v5658_v4 = vrot.slane %v7374_v57, 6  ;;  %v7388_v6 = vrot.slane %v7375_v58, 10  ;;  %v6723_v57 = vld [vmem:[%s9262_s12 + $0x240] sm:$0xc] }
 0x1c7   : > { %v2133_v35 = vadd.f32 %v8669_v8, %v6646_v47  ;;  %8159 = vmatpush3.bf16.msra.mxu0 %v9787_v52  ;;  %8591 = vmatpush3.bf16.msra.mxu1 %v9080_v63  ;;  %v2140_v41 = vmax.f32 %v2132_v28, 0.0  ;;  %v5651_v52 = vsel %vm9295_vm2, %v7385_v30, %v5650_v9  ;;  %v9068_v47 = vld [vmem:[%s10605_s5 + $0x18] sm:$0xff]   ;;  %v5667_v28 = vsel %vm9295_vm2, %v7389_v12, %v5666_v13  ;;  %v7383_v30 = vld [vmem:[%s9262_s12 + $0xc68] sm:$0xc]  ;;  %v6724_v58 = vld [vmem:[%s9262_s12 + $0x244] sm:$0x3] }
 0x1c8   : > { %v2143_v37 = vmax.f32 %v2135_v32, 0.0  ;;  %8160 = vmatprep.subr.bf16.mxu0 %v9064_v27  ;;  %8592 = vmatprep.subr.bf16.mxu1 %v9083_v5  ;;  %v7409_v49 = vcombine.low %v5651_v52, %v5655_v45  ;;  %v7380_v63 = vld [vmem:[%s9262_s12 + $0xc1c] sm:$0x3]  ;;  %v5659_v24 = vsel %vm9295_vm2, %v7387_v3, %v5658_v4  ;;  %v5663_v25 = vsel %vm9295_vm2, %v7388_v6, %v5662_v1  ;;  %v7384_v32 = vld [vmem:[%s9262_s12 + $0xc6c] sm:$0x3]  ;;  %v9086_v52 = vld [vmem:[%s10603_s3 + $0x290] sm:$0xff]  }
 0x1c9   : > { %v2141_v42 = vmax.f32 %v2133_v35, 0.0  ;;  %8586 = vmatprep.mubr.bf16.mxu1 %v9093_v29  ;;  %v5670_v15 = vrot.slane %v7380_v63, 6  ;;  %v7382_v29 = vld [vmem:[%s9262_s12 + $0xc44] sm:$0x3]  ;;  %v6735_v9 = vrot.slane %v6719_v22, 10  ;;  %v7410_v35 = vcombine.low %v5659_v24, %v5663_v25  ;;  %v9098_v12 = vld [vmem:[%s10603_s3 + $0x2b8] sm:$0xff]  }
 0x1ca   : > { %v2147_v43 = vpack.c.bf16 %v2143_v37, %v2142_v36  ;;  %v6736_v36 = vrot.slane %v6721_v26, 10  ;;  %v6725_v59 = vld [vmem:[%s9262_s12 + $0x268] sm:$0xc]  ;;  %v6726_v60 = vld [vmem:[%s9262_s12 + $0x26c] sm:$0x3]  ;;  %v6737_v3 = vrot.slane %v6723_v57, 10 }
 0x1cb   : > { %8161 = vmatpush3.bf16.msra.mxu0 %v9064_v27  ;;  %v2146_v46 = vpack.c.bf16 %v2141_v42, %v2140_v41  ;;  %8593 = vmatpush3.bf16.msra.mxu1 %v9083_v5  ;;  %v6722_v27 = vld [vmem:[%s9262_s12 + $0x21c] sm:$0x3]  ;;  %v7381_v5 = vld [vmem:[%s9262_s12 + $0xc40] sm:$0xc]  ;;  %v5671_v8 = vsel %vm9295_vm2, %v7390_v14, %v5670_v15  ;;  %v5674_v41 = vrot.slane %v7382_v29, 6  ;;  %v7392_v42 = vrot.slane %v7383_v30, 10 }
 0x1cc   : > { %8162 = vmatprep.subr.bf16.mxu0 %v9066_v11  ;;  %8594 = vmatprep.subr.bf16.mxu1 %v9085_v39  ;;  %v2511_v37 = vrot.slane %v6722_v27, 6  ;;  %v2508_v45 = vsel %vm9295_vm2, %v6735_v9, %v2507_v33  ;;  %v6727_v61 = vld [vmem:[%s9262_s12 + $0x290] sm:$0xc]  ;;  %v6728_v62 = vld [vmem:[%s9262_s12 + $0x294] sm:$0x3]  ;;  %v2515_v4 = vrot.slane %v6724_v58, 6 }
 0x1cd   : > { %8154 = vmatprep.mubr.bf16.mxu0 %v2146_v46  ;;  %v6729_v63 = vld [vmem:[%s9262_s12 + $0x2b8] sm:$0xc]  ;;  %v6738_v6 = vrot.slane %v6725_v59, 10  ;;  %v2519_v1 = vrot.slane %v6726_v60, 6  ;;  %v6739_v13 = vrot.slane %v6727_v61, 10  ;;  %v2523_v14 = vrot.slane %v6728_v62, 6 }
 0x1ce   : > { %8155 = vmatmul.mubr.bf16.gmra.mrb[20].mxu0 %v2147_v43  ;;  %8587 = vmatmul.mubr.bf16.gmra.mrb[12].mxu1 %v9095_v44  ;;  %v5678_v43 = vrot.slane %v7384_v32, 6  ;;  %v9101_v44 = vld [vmem:[%s10603_s3 + $0x688] sm:$0xff]   ;;  %v6740_v15 = vrot.slane %v6729_v63, 10  ;;  %v9100_v22 = vld [vmem:[%s10603_s3 + $0x240] sm:$0xff]   ;;  %v2516_v23 = vsel %vm9295_vm2, %v6737_v3, %v2515_v4  ;;  %v6682_v9 = vld [vmem:[%s9262_s12 + $0x210] sm:$0x3] }
 0x1cf   : > { %8163 = vmatpush3.bf16.msra.mxu0 %v9066_v11  ;;  %8174 = vmatprep.mubr.bf16.mxu0 %v9741_v21  ;;  %v9072_v21 = vld [vmem:[%s10605_s5 + $0x28] sm:$0xff]   ;;  %v7391_v11 = vrot.slane %v7381_v5, 10  ;;  %v2520_v24 = vsel %vm9295_vm2, %v6738_v6, %v2519_v1  ;;  %v6731_v25 = vld [vmem:[%s9262_s12 + $0x2e0] sm:$0xc]  ;;  %v6732_v26 = vld [vmem:[%s9262_s12 + $0x2e4] sm:$0x3]  ;;  %v2524_v27 = vsel %vm9295_vm2, %v6739_v13, %v2523_v14 }
 0x1d0   : > { %8164 = vmatprep.subr.bf16.mxu0 %v9068_v47  ;;  %8595 = vmatpush3.bf16.msra.mxu1 %v9085_v39  ;;  %v7411_v39 = vcombine.low %v5667_v28, %v5671_v8  ;;  %v6733_v28 = vld [vmem:[%s9262_s12 + $0x308] sm:$0xc]  ;;  %v6734_v8 = vld [vmem:[%s9262_s12 + $0x30c] sm:$0x3]  ;;  %v6679_v29 = vld [vmem:[%s9262_s12 + $0x1e4] sm:$0xc]  ;;  %v6760_v33 = vcombine.low %v2516_v23, %v2520_v24 }
 0x1d1   : > { %8596 = vmatprep.subr.bf16.mxu1 %v9087_v48  ;;  %8606 = vmatprep.mubr.bf16.mxu1 %v7409_v49  ;;  %v5675_v46 = vsel %vm9295_vm2, %v7391_v11, %v5674_v41  ;;  %v9088_v49 = vld [vmem:[%s10603_s3 + $0x298] sm:$0xff]   ;;  %v6680_v30 = vld [vmem:[%s9262_s12 + $0x1e8] sm:$0x3]  ;;  %v6681_v32 = vld [vmem:[%s9262_s12 + $0x20c] sm:$0xc]  ;;  %v6742_v11 = vrot.slane %v6733_v28, 10 }
 0x1d2   : > { %v9116_v41 = vld [vmem:[%s9262_s12 + $0xbb4] ss:$40 sps:$4 sm:$0xff]   ;;  %v6686_v58 = vld [vmem:[%s9262_s12 + $0x260] sm:$0x3]  ;;  %v6687_v59 = vld [vmem:[%s9262_s12 + $0x284] sm:$0xc] }
 0x1d3   : > { %8165 = vmatpush3.bf16.msra.mxu0 %v9068_v47  ;;  %v9103_v47 = vld [vmem:[%s10603_s3 + $0x690] sm:$0xff]   ;;  %v6685_v57 = vld [vmem:[%s9262_s12 + $0x25c] sm:$0xc]  ;;  %v6688_v60 = vld [vmem:[%s9262_s12 + $0x288] sm:$0x3]  ;;  %v2438_v3 = vrot.slane %v6686_v58, 6 }
 0x1d4   : > { %8166 = vmatprep.subr.bf16.mxu0 %v9070_v50  ;;  %8597 = vmatpush3.bf16.msra.mxu1 %v9087_v48  ;;  %v6689_v61 = vld [vmem:[%s9262_s12 + $0x2ac] sm:$0xc]  ;;  %v6690_v62 = vld [vmem:[%s9262_s12 + $0x2b0] sm:$0x3]  ;;  %v9114_v4 = vld [vmem:[%s10603_s3 + $0x278] sm:$0xff]   ;;  %v6699_v6 = vrot.slane %v6687_v59, 10 }
 0x1d5   : > { %8598 = vmatprep.subr.bf16.mxu1 %v9089_v51  ;;  %v2442_v1 = vrot.slane %v6688_v60, 6  ;;  %v2446_v13 = vrot.slane %v6690_v62, 6  ;;  %v9117_v14 = vld [vmem:[%s10603_s3 + $0x2c0] sm:$0xff]   ;;  %v9126_v60 = vld [vmem:[%s10603_s3 + $0x2f8] sm:$0xff]  }
 0x1d6   : > { %v6785_v28 = vld [vmem:[%s9262_s12 + $0x224] sm:$0xc] }
 0x1d7   : > { %8167 = vmatpush3.bf16.msra.mxu0 %v9070_v50  ;;  %v2443_v23 = vsel %vm9295_vm2, %v6699_v6, %v2442_v1  ;;  %v6795_v6 = vld [vmem:[%s9262_s12 + $0x2ec] sm:$0xc]  ;;  %v6796_v1 = vld [vmem:[%s9262_s12 + $0x2f0] sm:$0x3] }
 0x1d8   : > { %8168 = vmatprep.subr.bf16.mxu0 %v9072_v21  ;;  %8599 = vmatpush3.bf16.msra.mxu1 %v9089_v51  ;;  %v9115_v51 = vld [vmem:[%s9262_s12 + $0xb64] ss:$40 sps:$4 sm:$0xff]  }
 0x1d9   : > { %8600 = vmatprep.subr.bf16.mxu1 %v9091_v53 }
 0x1db   : > { %8169 = vmatpush3.bf16.msra.mxu0 %v9072_v21  ;;  %v9105_v21 = vld [vmem:[%s10603_s3 + $0x698] sm:$0xff]  }
 0x1dc   : > { %8170 = vmatprep.subr.bf16.mxu0 %v9076_v54  ;;  %8601 = vmatpush3.bf16.msra.mxu1 %v9091_v53  ;;  %v9090_v53 = vld [vmem:[%s10603_s3 + $0x2a0] sm:$0xff]  }
 0x1dd   : > { %8602 = vmatprep.subr.bf16.mxu1 %v9094_v55 }
 0x1df   : > { %8171 = vmatpush3.bf16.msra.mxu0 %v9076_v54  ;;  %v9092_v54 = vld [vmem:[%s10603_s3 + $0x2a8] sm:$0xff]  }
 0x1e0   : > { %8172 = vmatprep.subr.bf16.mxu0 %v9078_v0  ;;  %8603 = vmatpush3.bf16.msra.mxu1 %v9094_v55  ;;  %v9109_v55 = vld [vmem:[%s10603_s3 + $0x6a8] sm:$0xff]  }
 0x1e1   : > { %8604 = vmatprep.subr.bf16.mxu1 %v9097_v2 }
 0x1e3   : > { %8173 = vmatpush3.bf16.msra.mxu0 %v9078_v0  ;;  %v6730_v0 = vld [vmem:[%s9262_s12 + $0x2bc] sm:$0x3] }
 0x1e4   : > { %8182 = vmatprep.subr.bf16.mxu0 %v9082_v16  ;;  %8605 = vmatpush3.bf16.msra.mxu1 %v9097_v2  ;;  %v9111_v2 = vld [vmem:[%s10603_s3 + $0x6b0] sm:$0xff]  }
 0x1e5   : > { %8614 = vmatprep.subr.bf16.mxu1 %v9099_v17 }
 0x1e6   : > { %8175 = vmatmul.mubr.bf16.vlgmr.msra.gmra.mrb[16].mxu0 %v9739_v19  ;;  %v2512_v19 = vsel %vm9295_vm2, %v6736_v36, %v2511_v37  ;;  %v2531_v37 = vrot.slane %v6732_v26, 6  ;;  %v6694_v26 = vld [vmem:[%s9262_s12 + $0x300] sm:$0x3] }
 0x1e7   : > { %8178 = vmatprep.mubr.bf16.mxu0 %v9753_v40  ;;  %8183 = vmatpush3.bf16.msra.mxu0 %v9082_v16  ;;  %v5679_v40 = vsel %vm9295_vm2, %v7392_v42, %v5678_v43  ;;  %v6759_v48 = vcombine.low %v2508_v45, %v2512_v19  ;;  %v2527_v16 = vrot.slane %v6730_v0, 6  ;;  %v6695_v42 = vrot.slane %v6679_v29, 10  ;;  %v9123_v45 = vld [vmem:[%s9262_s12 + $0xc04] ss:$40 sps:$4 sm:$0xff]  }
 0x1e8   : > { %8184 = vmatprep.subr.bf16.mxu0 %v9084_v34  ;;  %8607 = vmatmul.mubr.bf16.vlgmr.msra.gmra.mrb[8].mxu1 %v7410_v35  ;;  %v7412_v50 = vcombine.low %v5675_v46, %v5679_v40  ;;  %v9102_v35 = vld [vmem:[%s10603_s3 + $0x248] sm:$0xff]   ;;  %v2426_v43 = vrot.slane %v6680_v30, 6  ;;  %v9104_v40 = vld [vmem:[%s10603_s3 + $0x250] sm:$0xff]  }
 0x1e9   : > { %8615 = vmatpush3.bf16.msra.mxu1 %v9099_v17  ;;  %8610 = vmatprep.mubr.bf16.mxu1 %v7411_v39  ;;  %v9113_v17 = vld [vmem:[%s10603_s3 + $0x6b8] sm:$0xff]   ;;  %v2528_v5 = vsel %vm9295_vm2, %v6740_v15, %v2527_v16  ;;  %v2535_v39 = vrot.slane %v6734_v8, 6  ;;  %v6786_v8 = vld [vmem:[%s9262_s12 + $0x228] sm:$0x3] }
 0x1ea   : > { %8616 = vmatprep.subr.bf16.mxu1 %v9101_v44  ;;  %v6761_v36 = vcombine.low %v2524_v27, %v2528_v5  ;;  %v6783_v27 = vld [vmem:[%s9262_s12 + $0x1fc] sm:$0xc]  ;;  %v6784_v5 = vld [vmem:[%s9262_s12 + $0x200] sm:$0x3] }
 0x1eb   : > { %8185 = vmatpush3.bf16.msra.mxu0 %v9084_v34  ;;  %v6741_v34 = vrot.slane %v6731_v25, 10  ;;  %v2536_v46 = vsel %vm9295_vm2, %v6742_v11, %v2535_v39  ;;  %v6693_v25 = vld [vmem:[%s9262_s12 + $0x2fc] sm:$0xc]  ;;  %v6800_v11 = vrot.slane %v6785_v28, 10  ;;  %v2850_v39 = vrot.slane %v6786_v8, 6  ;;  %v9128_v8 = vld [vmem:[%s10603_s3 + $0x308] sm:$0xff]  }
 0x1ec   : > { %8186 = vmatprep.subr.bf16.mxu0 %v9086_v52 }
 0x1ed   : > { %8617 = vmatpush3.bf16.msra.mxu1 %v9101_v44  ;;  %v6696_v44 = vrot.slane %v6681_v32, 10  ;;  %v2532_v19 = vsel %vm9295_vm2, %v6741_v34, %v2531_v37  ;;  %v2454_v34 = vrot.slane %v6694_v26, 6  ;;  %v2846_v37 = vrot.slane %v6784_v5, 6 }
 0x1ee   : > { %8179 = vmatmul.mubr.bf16.gmra.mrb[20].mxu0 %v9750_v38  ;;  %8618 = vmatprep.subr.bf16.mxu1 %v9103_v47  ;;  %v9107_v38 = vld [vmem:[%s10603_s3 + $0x6a0] sm:$0xff]  }
 0x1ef   : > { %8187 = vmatpush3.bf16.msra.mxu0 %v9086_v52  ;;  %8198 = vmatprep.mubr.bf16.mxu0 %v6759_v48  ;;  %v2430_v52 = vrot.slane %v6682_v9, 6 }
 0x1f0   : > { %8188 = vmatprep.subr.bf16.mxu0 %v9088_v49  ;;  %8611 = vmatmul.mubr.bf16.gmra.mrb[12].mxu1 %v7412_v50 }
 0x1f1   : > { %8619 = vmatpush3.bf16.msra.mxu1 %v9103_v47  ;;  %8630 = vmatprep.mubr.bf16.mxu1 %v9115_v51  ;;  %v2427_v47 = vsel %vm9295_vm2, %v6695_v42, %v2426_v43  ;;  %v2431_v48 = vsel %vm9295_vm2, %v6696_v44, %v2430_v52  ;;  %v9106_v51 = vld [vmem:[%s10603_s3 + $0x258] sm:$0xff]   ;;  %v9119_v43 = vld [vmem:[%s10603_s3 + $0x2d0] sm:$0xff]   ;;  %v2851_v52 = vsel %vm9295_vm2, %v6800_v11, %v2850_v39 }
 0x1f2   : > { %8620 = vmatprep.subr.bf16.mxu1 %v9105_v21  ;;  %v6771_v50 = vcombine.low %v2427_v47, %v2431_v48  ;;  %v9122_v47 = vld [vmem:[%s10603_s3 + $0x2e8] sm:$0xff]   ;;  %v9125_v48 = vld [vmem:[%s10603_s3 + $0x2f0] sm:$0xff]  }
 0x1f3   : > { %8189 = vmatpush3.bf16.msra.mxu0 %v9088_v49  ;;  %v6762_v49 = vcombine.low %v2532_v19, %v2536_v46  ;;  %v9120_v46 = vld [vmem:[%s10603_s3 + $0x2d8] sm:$0xff]  }
 0x1f4   : > { %8190 = vmatprep.subr.bf16.mxu0 %v9090_v53 }
 0x1f5   : > { %8621 = vmatpush3.bf16.msra.mxu1 %v9105_v21  ;;  %v9124_v21 = vld [vmem:[%s9262_s12 + $0xc54] ss:$40 sps:$4 sm:$0xff]  }
 0x1f6   : > { %8622 = vmatprep.subr.bf16.mxu1 %v9107_v38 }
 0x1f7   : > { %8191 = vmatpush3.bf16.msra.mxu0 %v9090_v53  ;;  %v9108_v53 = vld [vmem:[%s10603_s3 + $0x260] sm:$0xff]  }
 0x1f8   : > { %8192 = vmatprep.subr.bf16.mxu0 %v9092_v54 }
 0x1f9   : > { %8623 = vmatpush3.bf16.msra.mxu1 %v9107_v38  ;;  %v9110_v38 = vld [vmem:[%s10603_s3 + $0x268] sm:$0xff]  }
 0x1fa   : > { %8624 = vmatprep.subr.bf16.mxu1 %v9109_v55 }
 0x1fb   : > { %8193 = vmatpush3.bf16.msra.mxu0 %v9092_v54  ;;  %v9112_v54 = vld [vmem:[%s10603_s3 + $0x270] sm:$0xff]  }
 0x1fc   : > { %8194 = vmatprep.subr.bf16.mxu0 %v9096_v56 }
 0x1fd   : > { %8625 = vmatpush3.bf16.msra.mxu1 %v9109_v55  ;;  %v6683_v55 = vld [vmem:[%s9262_s12 + $0x234] sm:$0xc] }
 0x1fe   : > { %8626 = vmatprep.subr.bf16.mxu1 %v9111_v2  ;;  %v6697_v63 = vrot.slane %v6683_v55, 10  ;;  %v6794_v55 = vld [vmem:[%s9262_s12 + $0x2c8] sm:$0x3] }
 0x1ff   : > { %8195 = vmatpush3.bf16.msra.mxu0 %v9096_v56  ;;  %v6684_v56 = vld [vmem:[%s9262_s12 + $0x238] sm:$0x3] }
 0x200   : > { %8196 = vmatprep.subr.bf16.mxu0 %v9098_v12  ;;  %v2434_v0 = vrot.slane %v6684_v56, 6 }
 0x201   : > { %8627 = vmatpush3.bf16.msra.mxu1 %v9111_v2  ;;  %v6698_v2 = vrot.slane %v6685_v57, 10 }
 0x202   : > { %8628 = vmatprep.subr.bf16.mxu1 %v9113_v17  ;;  %v2435_v15 = vsel %vm9295_vm2, %v6697_v63, %v2434_v0  ;;  %v2866_v0 = vrot.slane %v6794_v55, 6 }
 0x203   : > { %8197 = vmatpush3.bf16.msra.mxu0 %v9098_v12  ;;  %v6700_v12 = vrot.slane %v6689_v61, 10  ;;  %v2439_v16 = vsel %vm9295_vm2, %v6698_v2, %v2438_v3  ;;  %v9127_v2 = vld [vmem:[%s10603_s3 + $0x300] sm:$0xff]  }
 0x204   : > { %8206 = vmatprep.subr.bf16.mxu0 %v9100_v22  ;;  %v6772_v29 = vcombine.low %v2435_v15, %v2439_v16  ;;  %v6798_v15 = vld [vmem:[%s9262_s12 + $0x318] sm:$0x3]  ;;  %v6835_v16 = vld [vmem:[%s9262_s12 + $0x5a4] sm:$0xc] }
 0x205   : > { %8629 = vmatpush3.bf16.msra.mxu1 %v9113_v17  ;;  %v6691_v17 = vld [vmem:[%s9262_s12 + $0x2d4] sm:$0xc]  ;;  %v2447_v24 = vsel %vm9295_vm2, %v6700_v12, %v2446_v13  ;;  %v2874_v28 = vrot.slane %v6798_v15, 6  ;;  %v9136_v15 = vld [vmem:[%s10603_s3 + $0x348] sm:$0xff]  }
 0x206   : > { %8199 = vmatmul.mubr.bf16.vlgmr.msra.gmra.mrb[24].mxu0 %v6760_v33  ;;  %v6701_v30 = vrot.slane %v6691_v17, 10  ;;  %v6773_v32 = vcombine.low %v2443_v23, %v2447_v24  ;;  %v6702_v33 = vrot.slane %v6693_v25, 10  ;;  %v6836_v17 = vld [vmem:[%s9262_s12 + $0x5a8] sm:$0x3]  ;;  %v6838_v23 = vld [vmem:[%s9262_s12 + $0x5d0] sm:$0x3] }
 0x207   : > { %8207 = vmatpush3.bf16.msra.mxu0 %v9100_v22  ;;  %8202 = vmatprep.mubr.bf16.mxu0 %v6761_v36  ;;  %v6692_v22 = vld [vmem:[%s9262_s12 + $0x2d8] sm:$0x3]  ;;  %v6799_v36 = vrot.slane %v6783_v27, 10  ;;  %v6805_v25 = vrot.slane %v6795_v6, 10  ;;  %v2870_v27 = vrot.slane %v6796_v1, 6 }
 0x208   : > { %8208 = vmatprep.subr.bf16.mxu0 %v9102_v35  ;;  %8631 = vmatmul.mubr.bf16.vlgmr.msra.gmra.mrb[8].mxu1 %v9116_v41  ;;  %v2450_v9 = vrot.slane %v6692_v22, 6  ;;  %v2455_v42 = vsel %vm9295_vm2, %v6702_v33, %v2454_v34  ;;  %v6837_v22 = vld [vmem:[%s9262_s12 + $0x5cc] sm:$0xc] }
 0x209   : > { %8634 = vmatprep.mubr.bf16.mxu1 %v9123_v45  ;;  %v2847_v44 = vsel %vm9295_vm2, %v6799_v36, %v2846_v37  ;;  %v2871_v33 = vsel %vm9295_vm2, %v6805_v25, %v2870_v27  ;;  %v9139_v25 = vld [vmem:[%s10603_s3 + $0x360] sm:$0xff]   ;;  %v9142_v27 = vld [vmem:[%s10603_s3 + $0x378] sm:$0xff]  }
 0x20a   : > { %v2451_v41 = vsel %vm9295_vm2, %v6701_v30, %v2450_v9  ;;  %v6823_v19 = vcombine.low %v2847_v44, %v2851_v52  ;;  %v3064_v30 = vrot.slane %v6836_v17, 6  ;;  %v3068_v9 = vrot.slane %v6838_v23, 6  ;;  %v9133_v44 = vld [vmem:[%s10603_s3 + $0x330] sm:$0xff]  }
 0x20b   : > { %8209 = vmatpush3.bf16.msra.mxu0 %v9102_v35  ;;  %v9118_v35 = vld [vmem:[%s10603_s3 + $0x2c8] sm:$0xff]   ;;  %v6774_v45 = vcombine.low %v2451_v41, %v2455_v42  ;;  %v9130_v41 = vld [vmem:[%s10603_s3 + $0x318] sm:$0xff]   ;;  %v9131_v42 = vld [vmem:[%s10603_s3 + $0x320] sm:$0xff]  }
 0x20c   : > { %8210 = vmatprep.subr.bf16.mxu0 %v9104_v40  ;;  %v6839_v52 = vld [vmem:[%s9262_s12 + $0x5f4] sm:$0xc] }
 0x20e   : > { %8203 = vmatmul.mubr.bf16.gmra.mrb[28].mxu0 %v6762_v49  ;;  %v6787_v49 = vld [vmem:[%s9262_s12 + $0x24c] sm:$0xc] }
 0x20f   : > { %8211 = vmatpush3.bf16.msra.mxu0 %v9104_v40  ;;  %8222 = vmatprep.mubr.bf16.mxu0 %v6771_v50  ;;  %v9121_v40 = vld [vmem:[%s10603_s3 + $0x2e0] sm:$0xff]   ;;  %v6788_v50 = vld [vmem:[%s9262_s12 + $0x250] sm:$0x3]  ;;  %v6801_v56 = vrot.slane %v6787_v49, 10 }
 0x210   : > { %8212 = vmatprep.subr.bf16.mxu0 %v9106_v51  ;;  %8635 = vmatmul.mubr.bf16.gmra.mrb[12].mxu1 %v9124_v21  ;;  %v6790_v21 = vld [vmem:[%s9262_s12 + $0x278] sm:$0x3]  ;;  %v2854_v57 = vrot.slane %v6788_v50, 6  ;;  %v6846_v49 = vld [vmem:[%s9262_s12 + $0x670] sm:$0x3]  ;;  %v6853_v50 = vrot.slane %v6839_v52, 10 }
 0x211   : > { %v2858_v59 = vrot.slane %v6790_v21, 6  ;;  %v6918_v52 = vld [vmem:[%s9262_s12 + $0x638] sm:$0x3] }
 0x212   : > { %v2855_v3 = vsel %vm9295_vm2, %v6801_v56, %v2854_v57  ;;  %v3084_v57 = vrot.slane %v6846_v49, 6 }
 0x213   : > { %8213 = vmatpush3.bf16.msra.mxu0 %v9106_v51  ;;  %v6789_v51 = vld [vmem:[%s9262_s12 + $0x274] sm:$0xc] }
 0x214   : > { %8214 = vmatprep.subr.bf16.mxu0 %v9108_v53  ;;  %v6802_v58 = vrot.slane %v6789_v51, 10 }
 0x217   : > { %8215 = vmatpush3.bf16.msra.mxu0 %v9108_v53  ;;  %v6791_v53 = vld [vmem:[%s9262_s12 + $0x29c] sm:$0xc] }
 0x218   : > { %8216 = vmatprep.subr.bf16.mxu0 %v9110_v38  ;;  %v6803_v61 = vrot.slane %v6791_v53, 10 }
 0x21b   : > { %8217 = vmatpush3.bf16.msra.mxu0 %v9110_v38  ;;  %v6792_v38 = vld [vmem:[%s9262_s12 + $0x2a0] sm:$0x3] }
 0x21c   : > { %8218 = vmatprep.subr.bf16.mxu0 %v9112_v54  ;;  %v2862_v62 = vrot.slane %v6792_v38, 6  ;;  %v9134_v38 = vld [vmem:[%s10603_s3 + $0x338] sm:$0xff]  }
 0x21e   : > { %v2863_v12 = vsel %vm9295_vm2, %v6803_v61, %v2862_v62  ;;  %v6847_v61 = vld [vmem:[%s9262_s12 + $0x694] sm:$0xc] }
 0x21f   : > { %8219 = vmatpush3.bf16.msra.mxu0 %v9112_v54  ;;  %v6793_v54 = vld [vmem:[%s9262_s12 + $0x2c4] sm:$0xc]  ;;  %v6857_v6 = vrot.slane %v6847_v61, 10 }
 0x220   : > { %8220 = vmatprep.subr.bf16.mxu0 %v9114_v4  ;;  %v6804_v63 = vrot.slane %v6793_v54, 10 }
 0x222   : > { %v2867_v13 = vsel %vm9295_vm2, %v6804_v63, %v2866_v0  ;;  %v6848_v0 = vld [vmem:[%s9262_s12 + $0x698] sm:$0x3] }
 0x223   : > { %8221 = vmatpush3.bf16.msra.mxu0 %v9114_v4  ;;  %v2859_v4 = vsel %vm9295_vm2, %v6802_v58, %v2858_v59  ;;  %v6825_v26 = vcombine.low %v2863_v12, %v2867_v13  ;;  %v9135_v58 = vld [vmem:[%s10603_s3 + $0x340] sm:$0xff]   ;;  %v3088_v12 = vrot.slane %v6848_v0, 6 }
 0x224   : > { %8230 = vmatprep.subr.bf16.mxu0 %v9117_v14  ;;  %v6824_v24 = vcombine.low %v2855_v3, %v2859_v4  ;;  %v6850_v3 = vld [vmem:[%s9262_s12 + $0x6c0] sm:$0x3]  ;;  %v6963_v0 = vld [vmem:[%s9262_s12 + $0x964] sm:$0xc] }
 0x226   : > { %8223 = vmatmul.mubr.bf16.vlgmr.msra.gmra.mrb[24].mxu0 %v6772_v29  ;;  %v6851_v29 = vrot.slane %v6835_v16, 10  ;;  %v3089_v16 = vsel %vm9295_vm2, %v6857_v6, %v3088_v12 }
 0x227   : > { %8231 = vmatpush3.bf16.msra.mxu0 %v9117_v14  ;;  %8226 = vmatprep.mubr.bf16.mxu0 %v6773_v32  ;;  %v6797_v14 = vld [vmem:[%s9262_s12 + $0x314] sm:$0xc]  ;;  %v6852_v32 = vrot.slane %v6837_v22, 10 }
 0x228   : > { %8232 = vmatprep.subr.bf16.mxu0 %v9118_v35  ;;  %v6806_v5 = vrot.slane %v6797_v14, 10  ;;  %v3065_v36 = vsel %vm9295_vm2, %v6851_v29, %v3064_v30  ;;  %v3092_v14 = vrot.slane %v6850_v3, 6  ;;  %v9137_v22 = vld [vmem:[%s10603_s3 + $0x350] sm:$0xff]   ;;  %v6913_v29 = vld [vmem:[%s9262_s12 + $0x5e4] sm:$0xc] }
 0x229   : > { %v3069_v37 = vsel %vm9295_vm2, %v6852_v32, %v3068_v9  ;;  %v6914_v30 = vld [vmem:[%s9262_s12 + $0x5e8] sm:$0x3]  ;;  %v6965_v3 = vld [vmem:[%s9262_s12 + $0x98c] sm:$0xc] }
 0x22a   : > { %v2875_v34 = vsel %vm9295_vm2, %v6806_v5, %v2874_v28  ;;  %v6875_v39 = vcombine.low %v3065_v36, %v3069_v37  ;;  %v9143_v5 = vld [vmem:[%s10603_s3 + $0x380] sm:$0xff]   ;;  %v6911_v28 = vld [vmem:[%s9262_s12 + $0x5bc] sm:$0xc]  ;;  %v9144_v32 = vld [vmem:[%s10603_s3 + $0x388] sm:$0xff]  }
 0x22b   : > { %8233 = vmatpush3.bf16.msra.mxu0 %v9118_v35  ;;  %v9129_v35 = vld [vmem:[%s10603_s3 + $0x310] sm:$0xff]   ;;  %v6826_v11 = vcombine.low %v2871_v33, %v2875_v34  ;;  %v6927_v9 = vrot.slane %v6911_v28, 10  ;;  %v6928_v34 = vrot.slane %v6913_v29, 10  ;;  %v9154_v29 = vld [vmem:[%s10603_s3 + $0x3d8] sm:$0xff]  }
 0x22c   : > { %8234 = vmatprep.subr.bf16.mxu0 %v9119_v43  ;;  %v9145_v36 = vld [vmem:[%s10603_s3 + $0x390] sm:$0xff]  }
 0x22e   : > { %8227 = vmatmul.mubr.bf16.gmra.mrb[28].mxu0 %v6774_v45  ;;  %v6840_v45 = vld [vmem:[%s9262_s12 + $0x5f8] sm:$0x3] }
 0x22f   : > { %8235 = vmatpush3.bf16.msra.mxu0 %v9119_v43  ;;  %8246 = vmatprep.mubr.bf16.mxu0 %v6823_v19  ;;  %v9132_v43 = vld [vmem:[%s10603_s3 + $0x328] sm:$0xff]   ;;  %v6841_v19 = vld [vmem:[%s9262_s12 + $0x61c] sm:$0xc]  ;;  %v3072_v51 = vrot.slane %v6840_v45, 6 }
 0x230   : > { %8236 = vmatprep.subr.bf16.mxu0 %v9120_v46  ;;  %v6854_v21 = vrot.slane %v6841_v19, 10  ;;  %v6919_v45 = vld [vmem:[%s9262_s12 + $0x65c] sm:$0xc]  ;;  %v6920_v19 = vld [vmem:[%s9262_s12 + $0x660] sm:$0x3] }
 0x231   : > { %v3073_v59 = vsel %vm9295_vm2, %v6853_v50, %v3072_v51  ;;  %v3432_v50 = vrot.slane %v6918_v52, 6  ;;  %v9150_v51 = vld [vmem:[%s10603_s3 + $0x3b8] sm:$0xff]  }
 0x233   : > { %8237 = vmatpush3.bf16.msra.mxu0 %v9120_v46  ;;  %v6842_v46 = vld [vmem:[%s9262_s12 + $0x620] sm:$0x3] }
 0x234   : > { %8238 = vmatprep.subr.bf16.mxu0 %v9121_v40  ;;  %v3076_v53 = vrot.slane %v6842_v46, 6  ;;  %v6921_v46 = vld [vmem:[%s9262_s12 + $0x684] sm:$0xc] }
 0x237   : > { %8239 = vmatpush3.bf16.msra.mxu0 %v9121_v40  ;;  %v6843_v40 = vld [vmem:[%s9262_s12 + $0x644] sm:$0xc] }
 0x238   : > { %8240 = vmatprep.subr.bf16.mxu0 %v9122_v47  ;;  %v6855_v54 = vrot.slane %v6843_v40, 10  ;;  %v6922_v40 = vld [vmem:[%s9262_s12 + $0x688] sm:$0x3] }
 0x23b   : > { %8241 = vmatpush3.bf16.msra.mxu0 %v9122_v47  ;;  %v6844_v47 = vld [vmem:[%s9262_s12 + $0x648] sm:$0x3] }
 0x23c   : > { %8242 = vmatprep.subr.bf16.mxu0 %v9125_v48  ;;  %v3080_v55 = vrot.slane %v6844_v47, 6 }
 0x23e   : > { %v3081_v62 = vsel %vm9295_vm2, %v6855_v54, %v3080_v55  ;;  %v3440_v54 = vrot.slane %v6922_v40, 6  ;;  %v9151_v55 = vld [vmem:[%s10603_s3 + $0x3c0] sm:$0xff]  }
 0x23f   : > { %8243 = vmatpush3.bf16.msra.mxu0 %v9125_v48  ;;  %v6845_v48 = vld [vmem:[%s9262_s12 + $0x66c] sm:$0xc] }
 0x240   : > { %8244 = vmatprep.subr.bf16.mxu0 %v9126_v60  ;;  %v6856_v56 = vrot.slane %v6845_v48, 10 }
 0x242   : > { %v3085_v63 = vsel %vm9295_vm2, %v6856_v56, %v3084_v57 }
 0x243   : > { %8245 = vmatpush3.bf16.msra.mxu0 %v9126_v60  ;;  %v3077_v60 = vsel %vm9295_vm2, %v6854_v21, %v3076_v53  ;;  %v6877_v1 = vcombine.low %v3081_v62, %v3085_v63  ;;  %v6931_v21 = vrot.slane %v6919_v45, 10  ;;  %v3436_v53 = vrot.slane %v6920_v19, 6  ;;  %v6925_v62 = vld [vmem:[%s9262_s12 + $0x6d4] sm:$0xc]  ;;  %v6926_v63 = vld [vmem:[%s9262_s12 + $0x6d8] sm:$0x3] }
 0x244   : > { %8254 = vmatprep.subr.bf16.mxu0 %v9127_v2  ;;  %v6876_v4 = vcombine.low %v3073_v59, %v3077_v60  ;;  %v6924_v59 = vld [vmem:[%s9262_s12 + $0x6b0] sm:$0x3] }
 0x245   : > { %v3437_v60 = vsel %vm9295_vm2, %v6931_v21, %v3436_v53  ;;  %v6977_v21 = vld [vmem:[%s9262_s12 + $0xa7c] sm:$0xc]  ;;  %v6978_v53 = vld [vmem:[%s9262_s12 + $0xa80] sm:$0x3] }
 0x246   : > { %8247 = vmatmul.mubr.bf16.vlgmr.msra.gmra.mrb[24].mxu0 %v6824_v24  ;;  %v9138_v24 = vld [vmem:[%s10603_s3 + $0x358] sm:$0xff]  }
 0x247   : > { %8255 = vmatpush3.bf16.msra.mxu0 %v9127_v2  ;;  %8250 = vmatprep.mubr.bf16.mxu0 %v6825_v26  ;;  %v6849_v2 = vld [vmem:[%s9262_s12 + $0x6bc] sm:$0xc]  ;;  %v9140_v26 = vld [vmem:[%s10603_s3 + $0x368] sm:$0xff]  }
 0x248   : > { %8256 = vmatprep.subr.bf16.mxu0 %v9128_v8  ;;  %v6858_v13 = vrot.slane %v6849_v2, 10  ;;  %v6964_v2 = vld [vmem:[%s9262_s12 + $0x968] sm:$0x3] }
 0x24a   : > { %v3093_v17 = vsel %vm9295_vm2, %v6858_v13, %v3092_v14  ;;  %v3444_v13 = vrot.slane %v6924_v59, 6  ;;  %v6934_v14 = vrot.slane %v6925_v62, 10  ;;  %v3667_v62 = vrot.slane %v6978_v53, 6 }
 0x24b   : > { %8257 = vmatpush3.bf16.msra.mxu0 %v9128_v8  ;;  %v6878_v23 = vcombine.low %v3089_v16, %v3093_v17  ;;  %v6912_v8 = vld [vmem:[%s9262_s12 + $0x5c0] sm:$0x3]  ;;  %v9152_v16 = vld [vmem:[%s10603_s3 + $0x3c8] sm:$0xff]   ;;  %v6979_v17 = vrot.slane %v6963_v0, 10 }
 0x24c   : > { %8258 = vmatprep.subr.bf16.mxu0 %v9129_v35  ;;  %v3420_v33 = vrot.slane %v6912_v8, 6 }
 0x24e   : > { %8251 = vmatmul.mubr.bf16.gmra.mrb[28].mxu0 %v6826_v11  ;;  %v3421_v37 = vsel %vm9295_vm2, %v6927_v9, %v3420_v33  ;;  %v9157_v9 = vld [vmem:[%s10603_s3 + $0x3f0] sm:$0xff]  }
 0x24f   : > { %8259 = vmatpush3.bf16.msra.mxu0 %v9129_v35  ;;  %8270 = vmatprep.mubr.bf16.mxu0 %v6875_v39  ;;  %v3424_v35 = vrot.slane %v6914_v30, 6  ;;  %v9155_v30 = vld [vmem:[%s10603_s3 + $0x3e0] sm:$0xff]   ;;  %v6967_v33 = vld [vmem:[%s9262_s12 + $0x9b4] sm:$0xc] }
 0x250   : > { %8260 = vmatprep.subr.bf16.mxu0 %v9130_v41 }
 0x251   : > { %v3425_v11 = vsel %vm9295_vm2, %v6928_v34, %v3424_v35  ;;  %v6968_v34 = vld [vmem:[%s9262_s12 + $0x9b8] sm:$0x3]  ;;  %v6969_v35 = vld [vmem:[%s9262_s12 + $0x9dc] sm:$0xc] }
 0x252   : > { %v6951_v39 = vcombine.low %v3421_v37, %v3425_v11  ;;  %v6971_v37 = vld [vmem:[%s9262_s12 + $0xa04] sm:$0xc]  ;;  %v6972_v11 = vld [vmem:[%s9262_s12 + $0xa08] sm:$0x3] }
 0x253   : > { %8261 = vmatpush3.bf16.msra.mxu0 %v9130_v41  ;;  %v9148_v41 = vld [vmem:[%s10603_s3 + $0x3a8] sm:$0xff]   ;;  %v3655_v52 = vrot.slane %v6972_v11, 6 }
 0x254   : > { %8262 = vmatprep.subr.bf16.mxu0 %v9131_v42 }
 0x257   : > { %8263 = vmatpush3.bf16.msra.mxu0 %v9131_v42  ;;  %v6915_v42 = vld [vmem:[%s9262_s12 + $0x60c] sm:$0xc] }
 0x258   : > { %8264 = vmatprep.subr.bf16.mxu0 %v9132_v43  ;;  %v6929_v47 = vrot.slane %v6915_v42, 10 }
 0x25b   : > { %8265 = vmatpush3.bf16.msra.mxu0 %v9132_v43  ;;  %v6916_v43 = vld [vmem:[%s9262_s12 + $0x610] sm:$0x3] }
 0x25c   : > { %8266 = vmatprep.subr.bf16.mxu0 %v9133_v44  ;;  %v3428_v48 = vrot.slane %v6916_v43, 6  ;;  %v9158_v43 = vld [vmem:[%s10603_s3 + $0x3f8] sm:$0xff]  }
 0x25e   : > { %v3429_v56 = vsel %vm9295_vm2, %v6929_v47, %v3428_v48  ;;  %v6975_v48 = vld [vmem:[%s9262_s12 + $0xa54] sm:$0xc] }
 0x25f   : > { %8267 = vmatpush3.bf16.msra.mxu0 %v9133_v44  ;;  %v6917_v44 = vld [vmem:[%s9262_s12 + $0x634] sm:$0xc] }
 0x260   : > { %8268 = vmatprep.subr.bf16.mxu0 %v9134_v38  ;;  %v6930_v49 = vrot.slane %v6917_v44, 10  ;;  %v6983_v44 = vrot.slane %v6971_v37, 10  ;;  %v9166_v37 = vld [vmem:[%s10603_s3 + $0x438] sm:$0xff]  }
 0x262   : > { %v3433_v57 = vsel %vm9295_vm2, %v6930_v49, %v3432_v50  ;;  %v6976_v49 = vld [vmem:[%s9262_s12 + $0xa58] sm:$0x3]  ;;  %v3656_v50 = vsel %vm9295_vm2, %v6983_v44, %v3655_v52 }
 0x263   : > { %8269 = vmatpush3.bf16.msra.mxu0 %v9134_v38  ;;  %v6932_v38 = vrot.slane %v6921_v46, 10  ;;  %v6952_v6 = vcombine.low %v3429_v56, %v3433_v57  ;;  %v9159_v46 = vld [vmem:[%s10603_s3 + $0x400] sm:$0xff]   ;;  %v7018_v56 = vld [vmem:[%s9262_s12 + $0x99c] sm:$0x3] }
 0x264   : > { %8278 = vmatprep.subr.bf16.mxu0 %v9135_v58 }
 0x265   : > { %v3441_v61 = vsel %vm9295_vm2, %v6932_v38, %v3440_v54  ;;  %v7015_v38 = vld [vmem:[%s9262_s12 + $0x970] sm:$0xc]  ;;  %v7016_v54 = vld [vmem:[%s9262_s12 + $0x974] sm:$0x3] }
 0x266   : > { %8271 = vmatmul.mubr.bf16.vlgmr.msra.gmra.mrb[24].mxu0 %v6876_v4  ;;  %v6966_v4 = vld [vmem:[%s9262_s12 + $0x990] sm:$0x3]  ;;  %v6953_v12 = vcombine.low %v3437_v60, %v3441_v61  ;;  %v3663_v60 = vrot.slane %v6976_v49, 6  ;;  %v6986_v61 = vrot.slane %v6977_v21, 10  ;;  %v7031_v0 = vrot.slane %v7015_v38, 10 }
 0x267   : > { %8279 = vmatpush3.bf16.msra.mxu0 %v9135_v58  ;;  %8274 = vmatprep.mubr.bf16.mxu0 %v6877_v1  ;;  %v6923_v58 = vld [vmem:[%s9262_s12 + $0x6ac] sm:$0xc]  ;;  %v7029_v49 = vld [vmem:[%s9262_s12 + $0xa88] sm:$0xc] }
 0x268   : > { %8280 = vmatprep.subr.bf16.mxu0 %v9136_v15  ;;  %v6933_v1 = vrot.slane %v6923_v58, 10  ;;  %v6985_v58 = vrot.slane %v6975_v48, 10 }
 0x26b   : > { %8281 = vmatpush3.bf16.msra.mxu0 %v9136_v15  ;;  %v3448_v15 = vrot.slane %v6926_v63, 6  ;;  %v9160_v63 = vld [vmem:[%s10603_s3 + $0x408] sm:$0xff]  }
 0x26c   : > { %8282 = vmatprep.subr.bf16.mxu0 %v9137_v22 }
 0x26e   : > { %8275 = vmatmul.mubr.bf16.gmra.mrb[28].mxu0 %v6878_v23  ;;  %v6980_v23 = vrot.slane %v6965_v3, 10 }
 0x26f   : > { %8283 = vmatpush3.bf16.msra.mxu0 %v9137_v22  ;;  %8294 = vmatprep.mubr.bf16.mxu0 %v9317_v31  ;;  %v9141_v31 = vld [vmem:[%s10603_s3 + $0x370] sm:$0xff]   ;;  %v3639_v22 = vrot.slane %v6964_v2, 6  ;;  %v3857_v2 = vrot.slane %v7016_v54, 6  ;;  %v7067_v54 = vld [vmem:[%s9262_s12 + $0x97c] sm:$0xc] }
 0x270   : > { %8284 = vmatprep.subr.bf16.mxu0 %v9138_v24 }
 0x273   : > { %8285 = vmatpush3.bf16.msra.mxu0 %v9138_v24  ;;  %v3643_v24 = vrot.slane %v6966_v4, 6  ;;  %v3861_v4 = vrot.slane %v7018_v56, 6 }
 0x274   : > { %8286 = vmatprep.subr.bf16.mxu0 %v9139_v25 }
 0x277   : > { %8287 = vmatpush3.bf16.msra.mxu0 %v9139_v25  ;;  %v3445_v25 = vsel %vm9295_vm2, %v6933_v1, %v3444_v13  ;;  %v3668_v1 = vsel %vm9295_vm2, %v6986_v61, %v3667_v62  ;;  %v3858_v13 = vsel %vm9295_vm2, %v7031_v0, %v3857_v2 }
 0x278   : > { %8288 = vmatprep.subr.bf16.mxu0 %v9140_v26 }
 0x27b   : > { %8289 = vmatpush3.bf16.msra.mxu0 %v9140_v26  ;;  %v3449_v26 = vsel %vm9295_vm2, %v6934_v14, %v3448_v15 }
 0x27c   : > { %8290 = vmatprep.subr.bf16.mxu0 %v9141_v31  ;;  %v6954_v28 = vcombine.low %v3445_v25, %v3449_v26  ;;  %v7020_v25 = vld [vmem:[%s9262_s12 + $0x9c4] sm:$0x3]  ;;  %v7021_v26 = vld [vmem:[%s9262_s12 + $0x9e8] sm:$0xc] }
 0x27f   : > { %8291 = vmatpush3.bf16.msra.mxu0 %v9141_v31  ;;  %v9153_v31 = vld [vmem:[%s10603_s3 + $0x3d0] sm:$0xff]  }
 0x280   : > { %8292 = vmatprep.subr.bf16.mxu0 %v9142_v27 }
 0x283   : > { %8293 = vmatpush3.bf16.msra.mxu0 %v9142_v27  ;;  %v3640_v27 = vsel %vm9295_vm2, %v6979_v17, %v3639_v22  ;;  %v9162_v17 = vld [vmem:[%s10603_s3 + $0x418] sm:$0xff]   ;;  %v9163_v22 = vld [vmem:[%s10603_s3 + $0x420] sm:$0xff]  }
 0x284   : > { %8302 = vmatprep.subr.bf16.mxu0 %v9143_v5 }
 0x286   : > { %8295 = vmatmul.mubr.bf16.vlgmr.msra.gmra.mrb[24].mxu0 %v9378_v7  ;;  %v9146_v7 = vld [vmem:[%s10603_s3 + $0x398] sm:$0xff]  }
 0x287   : > { %8303 = vmatpush3.bf16.msra.mxu0 %v9143_v5  ;;  %8298 = vmatprep.mubr.bf16.mxu0 %v9383_v10  ;;  %v9147_v10 = vld [vmem:[%s10603_s3 + $0x3a0] sm:$0xff]   ;;  %v3644_v5 = vsel %vm9295_vm2, %v6980_v23, %v3643_v24  ;;  %v9164_v23 = vld [vmem:[%s10603_s3 + $0x428] sm:$0xff]  }
 0x288   : > { %8304 = vmatprep.subr.bf16.mxu0 %v9144_v32  ;;  %v7003_v8 = vcombine.low %v3640_v27, %v3644_v5  ;;  %v7019_v24 = vld [vmem:[%s9262_s12 + $0x9c0] sm:$0xc]  ;;  %v9165_v27 = vld [vmem:[%s10603_s3 + $0x430] sm:$0xff]  }
 0x289   : > { %v10437_v5 = vld [vmem:[%s10604_s4 + $0x2] ss:$0 sm:$0xff] }
 0x28b   : > { %8305 = vmatpush3.bf16.msra.mxu0 %v9144_v32  ;;  %v9156_v32 = vld [vmem:[%s10603_s3 + $0x3e8] sm:$0xff]  }
 0x28c   : > { %8306 = vmatprep.subr.bf16.mxu0 %v9145_v36 }
 0x28e   : > { %8299 = vmatmul.mubr.bf16.gmra.mrb[28].mxu0 %v9401_v20  ;;  %v9149_v20 = vld [vmem:[%s10603_s3 + $0x3b0] sm:$0xff]  }
 0x28f   : > { %8307 = vmatpush3.bf16.msra.mxu0 %v9145_v36  ;;  %8318 = vmatprep.mubr.bf16.mxu0 %v6951_v39  ;;  %v6970_v36 = vld [vmem:[%s9262_s12 + $0x9e0] sm:$0x3]  ;;  %v6973_v39 = vld [vmem:[%s9262_s12 + $0xa2c] sm:$0xc] }
 0x290   : > { %8308 = vmatprep.subr.bf16.mxu0 %v9146_v7  ;;  %v3651_v42 = vrot.slane %v6970_v36, 6  ;;  %v6984_v45 = vrot.slane %v6973_v39, 10 }
 0x293   : > { %8309 = vmatpush3.bf16.msra.mxu0 %v9146_v7  ;;  %v6974_v7 = vld [vmem:[%s9262_s12 + $0xa30] sm:$0x3] }
 0x294   : > { %8310 = vmatprep.subr.bf16.mxu0 %v9147_v10  ;;  %v3659_v19 = vrot.slane %v6974_v7, 6 }
 0x297   : > { %8311 = vmatpush3.bf16.msra.mxu0 %v9147_v10  ;;  %v6981_v10 = vrot.slane %v6967_v33, 10  ;;  %v7034_v33 = vrot.slane %v7021_v26, 10 }
 0x298   : > { %8312 = vmatprep.subr.bf16.mxu0 %v9148_v41 }
 0x29b   : > { %8313 = vmatpush3.bf16.msra.mxu0 %v9148_v41  ;;  %v3647_v41 = vrot.slane %v6968_v34, 6 }
 0x29c   : > { %8314 = vmatprep.subr.bf16.mxu0 %v9149_v20 }
 0x29d   : > { %v3648_v40 = vsel %vm9295_vm2, %v6981_v10, %v3647_v41 }
 0x29f   : > { %8315 = vmatpush3.bf16.msra.mxu0 %v9149_v20  ;;  %v6982_v20 = vrot.slane %v6969_v35, 10 }
 0x2a0   : > { %8316 = vmatprep.subr.bf16.mxu0 %v9150_v51 }
 0x2a1   : > { %v3652_v47 = vsel %vm9295_vm2, %v6982_v20, %v3651_v42 }
 0x2a2   : > { %v7004_v57 = vcombine.low %v3648_v40, %v3652_v47  ;;  %v7028_v40 = vld [vmem:[%s9262_s12 + $0xa64] sm:$0x3] }
 0x2a3   : > { %8317 = vmatpush3.bf16.msra.mxu0 %v9150_v51  ;;  %v3660_v51 = vsel %vm9295_vm2, %v6984_v45, %v3659_v19  ;;  %v3881_v62 = vrot.slane %v7028_v40, 6 }
 0x2a4   : > { %8326 = vmatprep.subr.bf16.mxu0 %v9151_v55  ;;  %v7005_v59 = vcombine.low %v3656_v50, %v3660_v51  ;;  %v7030_v50 = vld [vmem:[%s9262_s12 + $0xa8c] sm:$0x3]  ;;  %v9167_v51 = vld [vmem:[%s10603_s3 + $0x440] sm:$0xff]  }
 0x2a6   : > { %8319 = vmatmul.mubr.bf16.vlgmr.msra.gmra.mrb[24].mxu0 %v6952_v6  ;;  %v3664_v6 = vsel %vm9295_vm2, %v6985_v58, %v3663_v60  ;;  %v7069_v58 = vld [vmem:[%s9262_s12 + $0x9a4] sm:$0xc] }
 0x2a7   : > { %8327 = vmatpush3.bf16.msra.mxu0 %v9151_v55  ;;  %8322 = vmatprep.mubr.bf16.mxu0 %v6953_v12  ;;  %v7017_v55 = vld [vmem:[%s9262_s12 + $0x998] sm:$0xc]  ;;  %v9161_v12 = vld [vmem:[%s10603_s3 + $0x410] sm:$0xff]   ;;  %v7006_v15 = vcombine.low %v3664_v6, %v3668_v1  ;;  %v9168_v1 = vld [vmem:[%s10603_s3 + $0x448] sm:$0xff]  }
 0x2a8   : > { %8328 = vmatprep.subr.bf16.mxu0 %v9152_v16  ;;  %v7032_v3 = vrot.slane %v7017_v55, 10  ;;  %v7068_v55 = vld [vmem:[%s9262_s12 + $0x980] sm:$0x3] }
 0x2aa   : > { %v3862_v14 = vsel %vm9295_vm2, %v7032_v3, %v3861_v4  ;;  %v3885_v3 = vrot.slane %v7030_v50, 6  ;;  %v7083_v4 = vrot.slane %v7067_v54, 10  ;;  %v7080_v54 = vld [vmem:[%s9262_s12 + $0xa70] sm:$0x3] }
 0x2ab   : > { %8329 = vmatpush3.bf16.msra.mxu0 %v9152_v16  ;;  %v7055_v16 = vcombine.low %v3858_v13, %v3862_v14  ;;  %v7084_v13 = vrot.slane %v7069_v58, 10  ;;  %v7082_v58 = vld [vmem:[%s9262_s12 + $0xa98] sm:$0x3] }
 0x2ac   : > { %8330 = vmatprep.subr.bf16.mxu0 %v9153_v31 }
 0x2ae   : > { %8323 = vmatmul.mubr.bf16.gmra.mrb[28].mxu0 %v6954_v28  ;;  %v7023_v28 = vld [vmem:[%s9262_s12 + $0xa10] sm:$0xc] }
 0x2af   : > { %8331 = vmatpush3.bf16.msra.mxu0 %v9153_v31  ;;  %8342 = vmatprep.mubr.bf16.mxu0 %v7003_v8  ;;  %v7022_v31 = vld [vmem:[%s9262_s12 + $0x9ec] sm:$0x3]  ;;  %v7024_v8 = vld [vmem:[%s9262_s12 + $0xa14] sm:$0x3]  ;;  %v7035_v36 = vrot.slane %v7023_v28, 10 }
 0x2b0   : > { %8332 = vmatprep.subr.bf16.mxu0 %v9154_v29  ;;  %v3869_v34 = vrot.slane %v7022_v31, 6  ;;  %v3873_v7 = vrot.slane %v7024_v8, 6  ;;  %v9169_v8 = vld [vmem:[%s10603_s3 + $0x450] sm:$0xff]  }
 0x2b2   : > { %v3870_v44 = vsel %vm9295_vm2, %v7034_v33, %v3869_v34  ;;  %v3874_v53 = vsel %vm9295_vm2, %v7035_v36, %v3873_v7  ;;  %v9170_v36 = vld [vmem:[%s10603_s3 + $0x458] sm:$0xff]   ;;  %v7071_v7 = vld [vmem:[%s9262_s12 + $0x9cc] sm:$0xc] }
 0x2b3   : > { %8333 = vmatpush3.bf16.msra.mxu0 %v9154_v29  ;;  %v7025_v29 = vld [vmem:[%s9262_s12 + $0xa38] sm:$0xc] }
 0x2b4   : > { %8334 = vmatprep.subr.bf16.mxu0 %v9155_v30  ;;  %v7036_v10 = vrot.slane %v7025_v29, 10 }
 0x2b7   : > { %8335 = vmatpush3.bf16.msra.mxu0 %v9155_v30  ;;  %v7026_v30 = vld [vmem:[%s9262_s12 + $0xa3c] sm:$0x3] }
 0x2b8   : > { %8336 = vmatprep.subr.bf16.mxu0 %v9156_v32  ;;  %v3877_v41 = vrot.slane %v7026_v30, 6 }
 0x2ba   : > { %v3878_v38 = vsel %vm9295_vm2, %v7036_v10, %v3877_v41  ;;  %v7072_v10 = vld [vmem:[%s9262_s12 + $0x9d0] sm:$0x3]  ;;  %v7073_v41 = vld [vmem:[%s9262_s12 + $0x9f4] sm:$0xc] }
 0x2bb   : > { %8337 = vmatpush3.bf16.msra.mxu0 %v9156_v32  ;;  %v7033_v32 = vrot.slane %v7019_v24, 10  ;;  %v7057_v2 = vcombine.low %v3874_v53, %v3878_v38  ;;  %v7079_v38 = vld [vmem:[%s9262_s12 + $0xa6c] sm:$0xc] }
 0x2bc   : > { %8338 = vmatprep.subr.bf16.mxu0 %v9157_v9 }
 0x2bf   : > { %8339 = vmatpush3.bf16.msra.mxu0 %v9157_v9  ;;  %v3865_v9 = vrot.slane %v7020_v25, 6 }
 0x2c0   : > { %8340 = vmatprep.subr.bf16.mxu0 %v9158_v43 }
 0x2c3   : > { %8341 = vmatpush3.bf16.msra.mxu0 %v9158_v43  ;;  %v3866_v43 = vsel %vm9295_vm2, %v7033_v32, %v3865_v9 }
 0x2c4   : > { %8350 = vmatprep.subr.bf16.mxu0 %v9159_v46  ;;  %v7056_v56 = vcombine.low %v3866_v43, %v3870_v44  ;;  %v7076_v43 = vld [vmem:[%s9262_s12 + $0xa20] sm:$0x3]  ;;  %v7077_v44 = vld [vmem:[%s9262_s12 + $0xa44] sm:$0xc] }
 0x2c5   : > { %v7088_v50 = vrot.slane %v7077_v44, 10 }
 0x2c6   : > { %8343 = vmatmul.mubr.bf16.vlgmr.msra.gmra.mrb[24].mxu0 %v7004_v57 }
 0x2c7   : > { %8351 = vmatpush3.bf16.msra.mxu0 %v9159_v46  ;;  %8346 = vmatprep.mubr.bf16.mxu0 %v7005_v59  ;;  %v7027_v46 = vld [vmem:[%s9262_s12 + $0xa60] sm:$0xc]  ;;  %v7070_v59 = vld [vmem:[%s9262_s12 + $0x9a8] sm:$0x3] }
 0x2c8   : > { %8352 = vmatprep.subr.bf16.mxu0 %v9160_v63  ;;  %v7037_v61 = vrot.slane %v7027_v46, 10  ;;  %v4079_v14 = vrot.slane %v7070_v59, 6  ;;  %v7086_v46 = vrot.slane %v7073_v41, 10  ;;  %v9175_v59 = vld [vmem:[%s10605_s5 + $0x80] sm:$0xff]  }
 0x2ca   : > { %v3882_v26 = vsel %vm9295_vm2, %v7037_v61, %v3881_v62  ;;  %v4080_v30 = vsel %vm9295_vm2, %v7084_v13, %v4079_v14  ;;  %v7089_v62 = vrot.slane %v7079_v38, 10  ;;  %v9177_v13 = vld [vmem:[%s10605_s5 + $0x90] sm:$0xff]  }
 0x2cb   : > { %8353 = vmatpush3.bf16.msra.mxu0 %v9160_v63  ;;  %v7038_v63 = vrot.slane %v7029_v49, 10  ;;  %v4091_v49 = vrot.slane %v7076_v43, 6 }
 0x2cc   : > { %8354 = vmatprep.subr.bf16.mxu0 %v9161_v12 }
 0x2cd   : > { %v3886_v31 = vsel %vm9295_vm2, %v7038_v63, %v3885_v3 }
 0x2ce   : > { %8347 = vmatmul.mubr.bf16.gmra.mrb[28].mxu0 %v7006_v15  ;;  %v7058_v33 = vcombine.low %v3882_v26, %v3886_v31 }
 0x2cf   : > { %8355 = vmatpush3.bf16.msra.mxu0 %v9161_v12  ;;  %8366 = vmatprep.mubr.bf16.mxu0 %v7055_v16  ;;  %v4075_v12 = vrot.slane %v7068_v55, 6 }
 0x2d0   : > { %8356 = vmatprep.subr.bf16.mxu0 %v9162_v17 }
 0x2d1   : > { %v4076_v29 = vsel %vm9295_vm2, %v7083_v4, %v4075_v12  ;;  %v4103_v4 = vrot.slane %v7082_v58, 6 }
 0x2d3   : > { %8357 = vmatpush3.bf16.msra.mxu0 %v9162_v17 }
 0x2d4   : > { %8358 = vmatprep.subr.bf16.mxu0 %v9163_v22 }
 0x2d7   : > { %8359 = vmatpush3.bf16.msra.mxu0 %v9163_v22 }
 0x2d8   : > { %8360 = vmatprep.subr.bf16.mxu0 %v9164_v23 }
 0x2db   : > { %8361 = vmatpush3.bf16.msra.mxu0 %v9164_v23  ;;  %v8632_v35 = vpop.f32.mrb[8].mxu1 }
 0x2dc   : > { %8362 = vmatprep.subr.bf16.mxu0 %v9165_v27  ;;  %v6014_v11 = vadd.f32 %v8632_v35, %v10437_v5  ;;  %v5965_v39 = vpop.f32.mrb[9].mxu1 }
 0x2dd   : > { %v6012_v20 = vadd.f32 %v10437_v5, %v5965_v39  ;;  %v8633_v42 = vpop.f32.mrb[10].mxu1  ;;  %v9173_v39 = vld [vmem:[%s10603_s3 + $0x470] sm:$0xff]  }
 0x2de   : > { %v6022_v52 = vmax.f32 %v6014_v11, 0.0  ;;  %v6015_v45 = vadd.f32 %v8633_v42, %v10437_v5  ;;  %v5968_v19 = vpop.f32.mrb[11].mxu1  ;;  %v9172_v11 = vld [vmem:[%s10603_s3 + $0x468] sm:$0xff]   ;;  %v7075_v42 = vld [vmem:[%s9262_s12 + $0xa1c] sm:$0xc] }
 0x2df   : > { %8363 = vmatpush3.bf16.msra.mxu0 %v9165_v27  ;;  %v6020_v47 = vmax.f32 %v6012_v20, 0.0  ;;  %v6013_v48 = vadd.f32 %v10437_v5, %v5968_v19  ;;  %v7074_v20 = vld [vmem:[%s9262_s12 + $0x9f8] sm:$0x3]  ;;  %v4083_v19 = vrot.slane %v7072_v10, 6  ;;  %v9184_v10 = vld [vmem:[%s10605_s5 + $0xc8] sm:$0xff]  }
 0x2e0   : > { %8364 = vmatprep.subr.bf16.mxu0 %v9166_v37  ;;  %v6023_v21 = vmax.f32 %v6015_v45, 0.0  ;;  %v7085_v45 = vrot.slane %v7071_v7, 10  ;;  %v4087_v40 = vrot.slane %v7074_v20, 6 }
 0x2e1   : > { %v6021_v57 = vmax.f32 %v6013_v48, 0.0  ;;  %v7087_v48 = vrot.slane %v7075_v42, 10 }
 0x2e2   : > { %v10469_v60 = vpack.c.bf16 %v6023_v21, %v6022_v52  ;;  %v7078_v52 = vld [vmem:[%s9262_s12 + $0xa48] sm:$0x3]  ;;  %v4084_v21 = vsel %vm9295_vm2, %v7085_v45, %v4083_v19  ;;  %v4088_v53 = vsel %vm9295_vm2, %v7086_v46, %v4087_v40  ;;  %v9185_v19 = vld [vmem:[%s10605_s5 + $0xd0] sm:$0xff]  }
 0x2e3   : > { %8365 = vmatpush3.bf16.msra.mxu0 %v9166_v37  ;;  %v10471_v0 = vpack.c.bf16 %v6021_v57, %v6020_v47  ;;  %v8636_v6 = vpop.f32.mrb[12].mxu1  ;;  %v9171_v37 = vld [vmem:[%s10603_s3 + $0x460] sm:$0xff]   ;;  %v9174_v47 = vld [vmem:[%s10603_s3 + $0x478] sm:$0xff]   ;;  %v4092_v55 = vsel %vm9295_vm2, %v7087_v48, %v4091_v49  ;;  %v7081_v57 = vld [vmem:[%s9262_s12 + $0xa94] sm:$0xc]  ;;  %v7108_v61 = vcombine.low %v4084_v21, %v4088_v53 }
 0x2e4   : > { %8374 = vmatprep.subr.bf16.mxu0 %v9167_v51  ;;  %v6018_v15 = vadd.f32 %v8636_v6, %v10437_v5  ;;  %v5981_v16 = vpop.f32.mrb[13].mxu1  ;;  %v7090_v3 = vrot.slane %v7081_v57, 10  ;;  %v9176_v6 = vld [vmem:[%s10605_s5 + $0x88] sm:$0xff]   ;;  %v9186_v49 = vld [vmem:[%s10605_s5 + $0xd8] sm:$0xff]   ;;  %v9189_v21 = vld [vmem:[%s10605_s5 + $0xf0] sm:$0xff]  }
 0x2e5   : > { %v6016_v17 = vadd.f32 %v10437_v5, %v5981_v16  ;;  %v8637_v22 = vpop.f32.mrb[14].mxu1  ;;  %v9180_v16 = vld [vmem:[%s10605_s5 + $0xa8] sm:$0xff]   ;;  %v7483_v53 = vld [vmem:[%s287_s29] ss:$0 sm:$0xff] }
 0x2e6   : > { %8367 = vmatmul.mubr.bf16.vlgmr.msra.gmra.mrb[24].mxu0 %v7056_v56  ;;  %v6026_v23 = vmax.f32 %v6018_v15, 0.0  ;;  %v6019_v24 = vadd.f32 %v8637_v22, %v10437_v5  ;;  %v5984_v25 = vpop.f32.mrb[15].mxu1  ;;  %v4104_v12 = vsel %vm9295_vm2, %v7090_v3, %v4103_v4  ;;  %v9178_v15 = vld [vmem:[%s10605_s5 + $0x98] sm:$0xff]  }
 0x2e7   : > { %8375 = vmatpush3.bf16.msra.mxu0 %v9167_v51  ;;  %8370 = vmatprep.mubr.bf16.mxu0 %v7057_v2  ;;  %v6024_v27 = vmax.f32 %v6016_v17, 0.0  ;;  %v6017_v28 = vadd.f32 %v10437_v5, %v5984_v25  ;;  %v7107_v5 = vcombine.low %v4076_v29, %v4080_v30  ;;  %v4095_v51 = vrot.slane %v7078_v52, 6  ;;  %v9181_v17 = vld [vmem:[%s10605_s5 + $0xb0] sm:$0xff]   ;;  %v9182_v22 = vld [vmem:[%s10605_s5 + $0xb8] sm:$0xff]  }
 0x2e8   : > { %8376 = vmatprep.subr.bf16.mxu0 %v9168_v1  ;;  %v6027_v32 = vmax.f32 %v6019_v24, 0.0  ;;  %v4099_v2 = vrot.slane %v7080_v54, 6  ;;  %v7120_v24 = vld [vmem:[%s10604_s4 + $0x1] ss:$0 sm:$0xff] }
 0x2e9   : > { %v6025_v9 = vmax.f32 %v6017_v28, 0.0  ;;  %v4096_v56 = vsel %vm9295_vm2, %v7088_v50, %v4095_v51  ;;  %v9187_v50 = vld [vmem:[%s10605_s5 + $0xe0] sm:$0xff]   ;;  %v9188_v51 = vld [vmem:[%s10605_s5 + $0xe8] sm:$0xff]  }
 0x2ea   : > { %v10491_v34 = vpack.c.bf16 %v6027_v32, %v6026_v23  ;;  %v7109_v63 = vcombine.low %v4092_v55, %v4096_v56  ;;  %v9183_v23 = vld [vmem:[%s10605_s5 + $0xc0] sm:$0xff]  }
 0x2eb   : > { %8377 = vmatpush3.bf16.msra.mxu0 %v9168_v1  ;;  %v10493_v35 = vpack.c.bf16 %v6025_v9, %v6024_v27  ;;  %v4100_v1 = vsel %vm9295_vm2, %v7089_v62, %v4099_v2 }
 0x2ec   : > { %8378 = vmatprep.subr.bf16.mxu0 %v9169_v8  ;;  %v7110_v14 = vcombine.low %v4100_v1, %v4104_v12 }
 0x2ee   : > { %8371 = vmatmul.mubr.bf16.gmra.mrb[28].mxu0 %v7058_v33 }
 0x2ef   : > { %8379 = vmatpush3.bf16.msra.mxu0 %v9169_v8  ;;  %8390 = vmatprep.mubr.bf16.mxu0 %v7107_v5 }
 0x2f0   : > { %8380 = vmatprep.subr.bf16.mxu0 %v9170_v36 }
 0x2f3   : > { %8381 = vmatpush3.bf16.msra.mxu0 %v9170_v36 }
 0x2f4   : > { %8382 = vmatprep.subr.bf16.mxu0 %v9171_v37 }
 0x2f7   : > { %8383 = vmatpush3.bf16.msra.mxu0 %v9171_v37 }
 0x2f8   : > { %8384 = vmatprep.subr.bf16.mxu0 %v9172_v11 }
 0x2fb   : > { %8385 = vmatpush3.bf16.msra.mxu0 %v9172_v11 }
 0x2fc   : > { %8386 = vmatprep.subr.bf16.mxu0 %v9173_v39 }
 0x2ff   : > { %8387 = vmatpush3.bf16.msra.mxu0 %v9173_v39 }
 0x300   : > { %8388 = vmatprep.subr.bf16.mxu0 %v9174_v47 }
 0x303   : > { %8389 = vmatpush3.bf16.msra.mxu0 %v9174_v47 }
 0x304   : > { %8398 = vmatprep.subr.bf16.mxu0 %v9175_v59 }
 0x306   : > { %8391 = vmatmul.mubr.bf16.vlgmr.msra.gmra.mrb[24].mxu0 %v7108_v61 }
 0x307   : > { %8394 = vmatprep.mubr.bf16.mxu0 %v7109_v63  ;;  %8399 = vmatpush3.bf16.msra.mxu0 %v9175_v59 }
 0x308   : > { %8400 = vmatprep.subr.bf16.mxu0 %v9176_v6 }
 0x30b   : > { %8401 = vmatpush3.bf16.msra.mxu0 %v9176_v6 }
 0x30c   : > { %8402 = vmatprep.subr.bf16.mxu0 %v9177_v13 }
 0x30e   : > { %8395 = vmatmul.mubr.bf16.gmra.mrb[28].mxu0 %v7110_v14 }
 0x30f   : > { %8403 = vmatpush3.bf16.msra.mxu0 %v9177_v13 }
 0x310   : > { %8404 = vmatprep.subr.bf16.mxu0 %v9178_v15 }
 0x313   : > { %8405 = vmatpush3.bf16.msra.mxu0 %v9178_v15 }
 0x314   : > { %8406 = vmatprep.subr.bf16.mxu0 %v9179_v18 }
 0x317   : > { %8407 = vmatpush3.bf16.msra.mxu0 %v9179_v18 }
 0x318   : > { %8408 = vmatprep.subr.bf16.mxu0 %v9180_v16 }
 0x31b   : > { %8409 = vmatpush3.bf16.msra.mxu0 %v9180_v16 }
 0x31c   : > { %8410 = vmatprep.subr.bf16.mxu0 %v9181_v17 }
 0x31f   : > { %8411 = vmatpush3.bf16.msra.mxu0 %v9181_v17 }
 0x320   : > { %8412 = vmatprep.subr.bf16.mxu0 %v9182_v22 }
 0x323   : > { %8413 = vmatpush3.bf16.msra.mxu0 %v9182_v22 }
 0x324   : > { %8638 = vmatprep.subr.bf16.mxu0 %v9183_v23 }
 0x3d9   : > { %v8392_v25 = vpop.f32.mrb[24].mxu0 }
 0x3da   : > { %v4269_v26 = vadd.f32 %v8392_v25, %v7120_v24  ;;  %v4220_v31 = vpop.f32.mrb[25].mxu0 }
 0x3db   : > { %v4267_v27 = vadd.f32 %v7120_v24, %v4220_v31  ;;  %v8393_v28 = vpop.f32.mrb[26].mxu0 }
 0x3dc   : > { %v4270_v8 = vadd.f32 %v8393_v28, %v7120_v24  ;;  %v4223_v29 = vpop.f32.mrb[27].mxu0  ;;  %v4277_v32 = vmax.f32 %v4269_v26, 0.0 }
 0x3dd   : > { %v4268_v30 = vadd.f32 %v7120_v24, %v4223_v29  ;;  %v4275_v33 = vmax.f32 %v4267_v27, 0.0 }
 0x3de   : > { %v4278_v9 = vmax.f32 %v4270_v8, 0.0 }
 0x3df   : > { %v4276_v5 = vmax.f32 %v4268_v30, 0.0 }
 0x3e0   : > { %v4284_v36 = vpack.c.bf16 %v4278_v9, %v4277_v32 }
 0x3e1   : > { %v4283_v37 = vpack.c.bf16 %v4276_v5, %v4275_v33  ;;  %v8396_v11 = vpop.f32.mrb[28].mxu0 }
 0x3e2   : > { %v4273_v39 = vadd.f32 %v8396_v11, %v7120_v24  ;;  %v4236_v7 = vpop.f32.mrb[29].mxu0 }
 0x3e3   : > { %v4271_v41 = vadd.f32 %v7120_v24, %v4236_v7  ;;  %v8397_v20 = vpop.f32.mrb[30].mxu0  ;;  %8414 = vmatprep.mubr.bf16.mxu0 %v4283_v37 }
 0x3e4   : > { %v4274_v42 = vadd.f32 %v8397_v20, %v7120_v24  ;;  %v4239_v43 = vpop.f32.mrb[31].mxu0  ;;  %8415 = vmatmul.mubr.bf16.vlgmr.msra.gmra.mrb[16].mxu0 %v4284_v36  ;;  %v4281_v52 = vmax.f32 %v4273_v39, 0.0 }
 0x3e5   : > { %v4272_v44 = vadd.f32 %v7120_v24, %v4239_v43  ;;  %8639 = vmatpush3.bf16.msra.mxu0 %v9183_v23  ;;  %v4279_v46 = vmax.f32 %v4271_v41, 0.0 }
 0x3e6   : > { %v4282_v45 = vmax.f32 %v4274_v42, 0.0  ;;  %8640 = vmatprep.subr.bf16.mxu0 %v9184_v10 }
 0x3e7   : > { %v4280_v40 = vmax.f32 %v4272_v44, 0.0 }
 0x3e8   : > { %v4286_v47 = vpack.c.bf16 %v4282_v45, %v4281_v52 }
 0x3e9   : > { %v4285_v48 = vpack.c.bf16 %v4280_v40, %v4279_v46  ;;  %8641 = vmatpush3.bf16.msra.mxu0 %v9184_v10 }
 0x3ea   : > { %8642 = vmatprep.subr.bf16.mxu0 %v9185_v19 }
 0x3eb   : > { %8418 = vmatprep.mubr.bf16.mxu0 %v4285_v48 }
 0x3ec   : > { %8419 = vmatmul.mubr.bf16.gmra.mrb[20].mxu0 %v4286_v47 }
 0x3ed   : > { %8643 = vmatpush3.bf16.msra.mxu0 %v9185_v19  ;;  %8654 = vmatprep.mubr.bf16.mxu0 %v10471_v0  ;;  %v9190_v0 = vld [vmem:[%s10605_s5 + $0xf8] sm:$0xff]  }
 0x3ee   : > { %8644 = vmatprep.subr.bf16.mxu0 %v9186_v49 }
 0x3f1   : > { %8645 = vmatpush3.bf16.msra.mxu0 %v9186_v49 }
 0x3f2   : > { %8646 = vmatprep.subr.bf16.mxu0 %v9187_v50 }
 0x3f5   : > { %8647 = vmatpush3.bf16.msra.mxu0 %v9187_v50 }
 0x3f6   : > { %8648 = vmatprep.subr.bf16.mxu0 %v9188_v51 }
 0x3f9   : > { %8649 = vmatpush3.bf16.msra.mxu0 %v9188_v51 }
 0x3fa   : > { %8650 = vmatprep.subr.bf16.mxu0 %v9189_v21 }
 0x3fd   : > { %8651 = vmatpush3.bf16.msra.mxu0 %v9189_v21 }
 0x3fe   : > { %8652 = vmatprep.subr.bf16.mxu0 %v9190_v0 }
 0x401   : > { %8653 = vmatpush3.bf16.msra.mxu0 %v9190_v0 }
 0x404   : > { %8655 = vmatmul.mubr.bf16.vlgmr.msra.gmra.mrb[16].mxu0 %v10469_v60 }
 0x405   : > { %8658 = vmatprep.mubr.bf16.mxu0 %v10493_v35 }
 0x40c   : > { %8659 = vmatmul.mubr.bf16.gmra.mrb[20].mxu0 %v10491_v34 }
 0x4d7   : > { %v8656_v38 = vpop.f32.mrb[16].mxu0 }
 0x4d8   : > { %v6179_v54 = vadd.f32 %v8656_v38, %v7483_v53  ;;  %v6131_v55 = vpop.f32.mrb[17].mxu0 }
 0x4d9   : > { %v6177_v56 = vadd.f32 %v7483_v53, %v6131_v55  ;;  %v8657_v57 = vpop.f32.mrb[18].mxu0 }
 0x4da   : > { %v6180_v58 = vadd.f32 %v8657_v57, %v7483_v53  ;;  %v6134_v59 = vpop.f32.mrb[19].mxu0  ;;  %v6187_v62 = vmax.f32 %v6179_v54, 0.0 }
 0x4db   : > { %v6178_v61 = vadd.f32 %v7483_v53, %v6134_v59  ;;  %v6185_v63 = vmax.f32 %v6177_v56, 0.0 }
 0x4dc   : > { %v6188_v60 = vmax.f32 %v6180_v58, 0.0 }
 0x4dd   : > { %v6186_v34 = vmax.f32 %v6178_v61, 0.0 }
 0x4de   : > { %v7495_v35 = vpack.c.bf16 %v6188_v60, %v6187_v62 }
 0x4df   : > { %v7490_v2 = vpack.c.bf16 %v6186_v34, %v6185_v63  ;;  %v8660_v3 = vpop.f32.mrb[20].mxu0 }
 0x4e0   : > { %7507 = vst [vmem:[%s292_s10 + $0x8] sm:$0xff] %v7495_v35   ;;  %v6183_v4 = vadd.f32 %v8660_v3, %v7483_v53  ;;  %v6147_v6 = vpop.f32.mrb[21].mxu0 }
 0x4e1   : > { %7491 = vst [vmem:[%s292_s10] sm:$0xff] %v7490_v2   ;;  %v6181_v1 = vadd.f32 %v7483_v53, %v6147_v6  ;;  %v8661_v12 = vpop.f32.mrb[22].mxu0 }
 0x4e2   : > { %v6184_v13 = vadd.f32 %v8661_v12, %v7483_v53  ;;  %v6150_v14 = vpop.f32.mrb[23].mxu0  ;;  %v6191_v18 = vmax.f32 %v6183_v4, 0.0 }
 0x4e3   : > { %v6182_v15 = vadd.f32 %v7483_v53, %v6150_v14  ;;  %v6189_v17 = vmax.f32 %v6181_v1, 0.0 }
 0x4e4   : > { %v6192_v16 = vmax.f32 %v6184_v13, 0.0 }
 0x4e5   : > { %v6190_v22 = vmax.f32 %v6182_v15, 0.0 }
 0x4e6   : > { %v7505_v23 = vpack.c.bf16 %v6192_v16, %v6191_v18 }
 0x4e7   : > { %v7500_v24 = vpack.c.bf16 %v6190_v22, %v6189_v17 }
 0x4e8   : > { %7509 = vst [vmem:[%s292_s10 + $0x18] sm:$0xff] %v7505_v23  }
 0x4e9   : > { %7508 = vst [vmem:[%s292_s10 + $0x10] sm:$0xff] %v7500_v24  }
 0x4ea PF: > { %s17_s24 = sadd.s32 1, %s9197_s24  }
 0x4eb   : > { %p14_p4 = scmp.ge.s32.totalorder %s17_s24, 4  }
 0x4ed   :  { %16 = sbr.rel (!%p14_p4) target bundleno = 1 (0x1), region = 118 }

</bundles_post_ra>
